<compile_context>
chip_gen: v7x
topology: tpu7x:2x2x1
jax: 0.10.0
libtpu: 0.0.40
codegen_flags: <defaults>
</compile_context>

<pallas_src>
import math

import jax
import jax.numpy as jnp
from jax import lax
from jax.experimental import pallas as pl
from jax.experimental.pallas import tpu as pltpu

# ---- small, TPU-friendly hyperparameters consistent with the module ----
VOCAB_SIZE = 128
BLOCK_SIZE = 64          # max context (== T here)
N_EMBD     = 128
N_HEAD     = 4
N_LAYER    = 2
HEAD_DIM   = N_EMBD // N_HEAD
LN_EPS     = 1e-5


# ----------------------------- kernel -----------------------------------
def _layernorm(x, gamma, beta):
    mu = jnp.mean(x, axis=-1, keepdims=True)
    xc = x - mu
    var = jnp.mean(xc * xc, axis=-1, keepdims=True)
    return xc * lax.rsqrt(var + LN_EPS) * gamma + beta


def _mm(x_f32, w_bf16):
    """bf16 MXU matmul with f32 accumulation."""
    return jnp.dot(x_f32.astype(jnp.bfloat16), w_bf16,
                   preferred_element_type=jnp.float32)


def gpt_fused_kernel(x_ref, pos_ref,
                     ln1g_ref, ln1b_ref, wqkv_ref, wproj_ref,
                     ln2g_ref, ln2b_ref, w1_ref, b1_ref, w2_ref, b2_ref,
                     lnfg_ref, lnfb_ref, wlm_ref, blm_ref,
                     o_ref):
    T, C = x_ref.shape[1], x_ref.shape[2]
    nh, hd = N_HEAD, HEAD_DIM
    scale = 1.0 / math.sqrt(hd)

    # Residual stream kept on-chip for the whole forward pass.
    x = x_ref[0].astype(jnp.float32) + pos_ref[...]          # (T, C)

    # Causal mask: built once, reused by every layer/head.
    row = lax.broadcasted_iota(jnp.int32, (T, T), 0)
    col = lax.broadcasted_iota(jnp.int32, (T, T), 1)
    causal = col <= row
    neg = jnp.float32(-1e30)                                  # finite "−inf"

    for l in range(N_LAYER):                                  # static unroll
        # ---- ln1 + causal self attention ----
        xn = _layernorm(x, ln1g_ref[l], ln1b_ref[l])
        qkv = _mm(xn, wqkv_ref[l])                            # (T, 3C) f32

        head_outs = []
        for h in range(nh):                                   # static per-head loop
            q_h = qkv[:, h * hd:(h + 1) * hd].astype(jnp.bfloat16)               # (T, hd)
            k_h = qkv[:, C + h * hd:C + (h + 1) * hd].astype(jnp.bfloat16)
            v_h = qkv[:, 2 * C + h * hd:2 * C + (h + 1) * hd].astype(jnp.bfloat16)
            # q_h @ k_h^T without an explicit transpose.
            att = lax.dot_general(q_h, k_h, (((1,), (1,)), ((), ())),
                                  preferred_element_type=jnp.float32) * scale     # (T, T)
            att = jnp.where(causal, att, neg)
            m = jnp.max(att, axis=-1, keepdims=True)
            p = jnp.exp(att - m)
            p = p * pl.reciprocal(jnp.sum(p, axis=-1, keepdims=True), approx=True)
            # attn_dropout: identity (eval)
            head_outs.append(jnp.dot(p.astype(jnp.bfloat16), v_h,
                                     preferred_element_type=jnp.float32))          # (T, hd)
        y = jnp.concatenate(head_outs, axis=-1)               # (T, C)
        y = _mm(y, wproj_ref[l])
        # resid_dropout: identity (eval)
        x = x + y

        # ---- ln2 + MLP ----
        xn2 = _layernorm(x, ln2g_ref[l], ln2b_ref[l])
        h1 = _mm(xn2, w1_ref[l]) + b1_ref[l]
        h1 = jnp.maximum(h1, 0.0)
        ff = _mm(h1, w2_ref[l]) + b2_ref[l]
        # mlp dropout: identity (eval)
        x = x + ff

    # ---- final layernorm + LM head ----
    xn = _layernorm(x, lnfg_ref[...], lnfb_ref[...])
    logits = _mm(xn, wlm_ref[...]) + blm_ref[...]             # (T, V)
    o_ref[0] = logits.astype(o_ref.dtype)


# ----------------------------- wrapper -----------------------------------
def _rep_spec(shape):
    """Full-array block, replicated across the batch grid axis."""
    nd = len(shape)
    return pl.BlockSpec(shape, lambda b, _nd=nd: (0,) * _nd)


def gpt_pallas_forward(tok_emb, pos_emb, p):
    B, T, C = tok_emb.shape
    L = N_LAYER
    V = p["w_lm"].shape[-1]
    in_specs = [
        pl.BlockSpec((1, T, C), lambda b: (b, 0, 0)),         # tok_emb slab
        _rep_spec((T, C)),                                    # pos_emb
        _rep_spec((L, 1, C)), _rep_spec((L, 1, C)),           # ln1 gamma/beta
        _rep_spec((L, C, 3 * C)), _rep_spec((L, C, C)),       # w_qkv, w_proj
        _rep_spec((L, 1, C)), _rep_spec((L, 1, C)),           # ln2 gamma/beta
        _rep_spec((L, C, 4 * C)), _rep_spec((L, 1, 4 * C)),   # fc1 w/b
        _rep_spec((L, 4 * C, C)), _rep_spec((L, 1, C)),       # fc2 w/b
        _rep_spec((1, C)), _rep_spec((1, C)),                 # lnf gamma/beta
        _rep_spec((C, V)), _rep_spec((1, V)),                 # lm head w/b
    ]
    return pl.pallas_call(
        gpt_fused_kernel,
        out_shape=jax.ShapeDtypeStruct((B, T, V), jnp.float32),
        grid=(B,),
        in_specs=in_specs,
        out_specs=pl.BlockSpec((1, T, V), lambda b: (b, 0, 0)),
        compiler_params=pltpu.CompilerParams(
            dimension_semantics=("parallel",)),
    )(tok_emb, pos_emb,
      p["ln1_g"], p["ln1_b"], p["w_qkv"], p["w_proj"],
      p["ln2_g"], p["ln2_b"], p["w_fc1"], p["b_fc1"], p["w_fc2"], p["b_fc2"],
      p["lnf_g"], p["lnf_b"], p["w_lm"], p["b_lm"])


@jax.jit
def gpt_forward(idx, params):
    """GPTLanguageModel.forward(idx, targets=None) -> logits of shape (B, T, V)."""
    B, T = idx.shape
    tok_emb = params["tok_emb"][idx]         # embedding gather kept in XLA (glue)
    pos_emb = params["pos_emb"][:T]          # (T, C)
    return gpt_pallas_forward(tok_emb, pos_emb, params)


# --------------------------- parameter init ------------------------------
def init_params(key):
    C, L, V = N_EMBD, N_LAYER, VOCAB_SIZE

    def normal(k, shape):
        return 0.02 * jax.random.normal(k, shape, dtype=jnp.float32)

    keys = jax.random.split(key, 3 + 4 * L)
    ki = iter(keys)
    params = {
        "tok_emb": normal(next(ki), (V, C)),                  # nn.Embedding
        "pos_emb": normal(next(ki), (BLOCK_SIZE, C)),         # nn.Embedding
        "lnf_g": jnp.ones((1, C), jnp.float32),
        "lnf_b": jnp.zeros((1, C), jnp.float32),
        # lm_head: torch weight (V, C) -> pre-transposed (C, V); zero bias
        "w_lm": normal(next(ki), (C, V)).astype(jnp.bfloat16),
        "b_lm": jnp.zeros((1, V), jnp.float32),
    }
    wqkv, wproj, wfc1, wfc2 = [], [], [], []
    for _ in range(L):
        wqkv.append(normal(next(ki), (C, 3 * C)))             # c_attn (no bias)
        wproj.append(normal(next(ki), (C, C)))                # c_proj (no bias)
        wfc1.append(normal(next(ki), (C, 4 * C)))
        wfc2.append(normal(next(ki), (4 * C, C)))
    params.update({
        "ln1_g": jnp.ones((L, 1, C), jnp.float32),
        "ln1_b": jnp.zeros((L, 1, C), jnp.float32),
        "ln2_g": jnp.ones((L, 1, C), jnp.float32),
        "ln2_b": jnp.zeros((L, 1, C), jnp.float32),
        "w_qkv": jnp.stack(wqkv).astype(jnp.bfloat16),
        "w_proj": jnp.stack(wproj).astype(jnp.bfloat16),
        "w_fc1": jnp.stack(wfc1).astype(jnp.bfloat16),
        "b_fc1": jnp.zeros((L, 1, 4 * C), jnp.float32),
        "w_fc2": jnp.stack(wfc2).astype(jnp.bfloat16),
        "b_fc2": jnp.zeros((L, 1, C), jnp.float32),
    })
    return params


if __name__ == "__main__":
    key = jax.random.PRNGKey(0)
    pkey, dkey = jax.random.split(key)
    params = init_params(pkey)

    B, T = 2, BLOCK_SIZE
    idx = jax.random.randint(dkey, (B, T), 0, VOCAB_SIZE, dtype=jnp.int32)

    logits = gpt_forward(idx, params)
    logits = jax.block_until_ready(logits)

    assert logits.shape == (B, T, VOCAB_SIZE), logits.shape
    assert bool(jnp.all(jnp.isfinite(logits)))
    print("KERNEL_OK")
</pallas_src>

<mosaic_0001>
module attributes {stable_mosaic.version = 11 : i64} {
  func.func @gpt_fused_kernel(%arg0: i32, %arg1: memref<1x64x128xf32, #tpu.memory_space<vmem>>, %arg2: memref<64x128xf32, #tpu.memory_space<vmem>>, %arg3: memref<2x1x128xf32, #tpu.memory_space<vmem>>, %arg4: memref<2x1x128xf32, #tpu.memory_space<vmem>>, %arg5: memref<2x128x384xbf16, #tpu.memory_space<vmem>>, %arg6: memref<2x128x128xbf16, #tpu.memory_space<vmem>>, %arg7: memref<2x1x128xf32, #tpu.memory_space<vmem>>, %arg8: memref<2x1x128xf32, #tpu.memory_space<vmem>>, %arg9: memref<2x128x512xbf16, #tpu.memory_space<vmem>>, %arg10: memref<2x1x512xf32, #tpu.memory_space<vmem>>, %arg11: memref<2x512x128xbf16, #tpu.memory_space<vmem>>, %arg12: memref<2x1x128xf32, #tpu.memory_space<vmem>>, %arg13: memref<1x128xf32, #tpu.memory_space<vmem>>, %arg14: memref<1x128xf32, #tpu.memory_space<vmem>>, %arg15: memref<128x128xbf16, #tpu.memory_space<vmem>>, %arg16: memref<1x128xf32, #tpu.memory_space<vmem>>, %arg17: memref<1x64x128xf32, #tpu.memory_space<vmem>>) attributes {dimension_semantics = [#tpu.dimension_semantics<parallel>], iteration_bounds = array<i64: 2>, scalar_prefetch = 0 : i64, scratch_operands = 0 : i64, tpu.core_type = #tpu.core_type<tc>, window_params = [{transform_indices = @transform_0, window_bounds = array<i64: 1, 64, 128>}, {pipeline_mode = #tpu.pipeline_mode<synchronous>, transform_indices = @transform_1, window_bounds = array<i64: 64, 128>}, {pipeline_mode = #tpu.pipeline_mode<synchronous>, transform_indices = @transform_2, window_bounds = array<i64: 2, 1, 128>}, {pipeline_mode = #tpu.pipeline_mode<synchronous>, transform_indices = @transform_3, window_bounds = array<i64: 2, 1, 128>}, {pipeline_mode = #tpu.pipeline_mode<synchronous>, transform_indices = @transform_4, window_bounds = array<i64: 2, 128, 384>}, {pipeline_mode = #tpu.pipeline_mode<synchronous>, transform_indices = @transform_5, window_bounds = array<i64: 2, 128, 128>}, {pipeline_mode = #tpu.pipeline_mode<synchronous>, transform_indices = @transform_6, window_bounds = array<i64: 2, 1, 128>}, {pipeline_mode = #tpu.pipeline_mode<synchronous>, transform_indices = @transform_7, window_bounds = array<i64: 2, 1, 128>}, {pipeline_mode = #tpu.pipeline_mode<synchronous>, transform_indices = @transform_8, window_bounds = array<i64: 2, 128, 512>}, {pipeline_mode = #tpu.pipeline_mode<synchronous>, transform_indices = @transform_9, window_bounds = array<i64: 2, 1, 512>}, {pipeline_mode = #tpu.pipeline_mode<synchronous>, transform_indices = @transform_10, window_bounds = array<i64: 2, 512, 128>}, {pipeline_mode = #tpu.pipeline_mode<synchronous>, transform_indices = @transform_11, window_bounds = array<i64: 2, 1, 128>}, {pipeline_mode = #tpu.pipeline_mode<synchronous>, transform_indices = @transform_12, window_bounds = array<i64: 1, 128>}, {pipeline_mode = #tpu.pipeline_mode<synchronous>, transform_indices = @transform_13, window_bounds = array<i64: 1, 128>}, {pipeline_mode = #tpu.pipeline_mode<synchronous>, transform_indices = @transform_14, window_bounds = array<i64: 128, 128>}, {pipeline_mode = #tpu.pipeline_mode<synchronous>, transform_indices = @transform_15, window_bounds = array<i64: 1, 128>}, {transform_indices = @transform_16, window_bounds = array<i64: 1, 64, 128>}]} {
    %c0 = arith.constant 0 : index
    %c0_0 = arith.constant 0 : index
    %c0_1 = arith.constant 0 : index
    %0 = vector.load %arg1[%c0, %c0_0, %c0_1] : memref<1x64x128xf32, #tpu.memory_space<vmem>>, vector<1x64x128xf32>
    %1 = vector.shape_cast %0 : vector<1x64x128xf32> to vector<64x128xf32>
    %c0_2 = arith.constant 0 : index
    %c0_3 = arith.constant 0 : index
    %2 = vector.load %arg2[%c0_2, %c0_3] : memref<64x128xf32, #tpu.memory_space<vmem>>, vector<64x128xf32>
    %3 = arith.addf %1, %2 : vector<64x128xf32>
    %4 = tpu.iota {dimensions = array<i32: 0>} : vector<64x64xi32>
    %5 = tpu.iota {dimensions = array<i32: 1>} : vector<64x64xi32>
    %6 = arith.cmpi sle, %5, %4 : vector<64x64xi32>
    %c0_4 = arith.constant 0 : index
    %c0_5 = arith.constant 0 : index
    %c0_6 = arith.constant 0 : index
    %7 = vector.load %arg3[%c0_4, %c0_5, %c0_6] : memref<2x1x128xf32, #tpu.memory_space<vmem>>, vector<1x1x128xf32>
    %8 = vector.shape_cast %7 : vector<1x1x128xf32> to vector<1x128xf32>
    %c0_7 = arith.constant 0 : index
    %c0_8 = arith.constant 0 : index
    %c0_9 = arith.constant 0 : index
    %9 = vector.load %arg4[%c0_7, %c0_8, %c0_9] : memref<2x1x128xf32, #tpu.memory_space<vmem>>, vector<1x1x128xf32>
    %10 = vector.shape_cast %9 : vector<1x1x128xf32> to vector<1x128xf32>
    %cst = arith.constant dense<0.000000e+00> : vector<64xf32>
    %11 = vector.multi_reduction <add>, %3, %cst [1] : vector<64x128xf32> to vector<64xf32>
    %12 = vector.shape_cast %11 : vector<64xf32> to vector<64x1xf32>
    %cst_10 = arith.constant 1.280000e+02 : f32
    %13 = vector.broadcast %cst_10 : f32 to vector<64x1xf32>
    %14 = arith.divf %12, %13 : vector<64x1xf32>
    %15 = vector.broadcast %14 : vector<64x1xf32> to vector<64x128xf32>
    %16 = arith.subf %3, %15 : vector<64x128xf32>
    %17 = arith.mulf %16, %16 : vector<64x128xf32>
    %cst_11 = arith.constant dense<0.000000e+00> : vector<64xf32>
    %18 = vector.multi_reduction <add>, %17, %cst_11 [1] : vector<64x128xf32> to vector<64xf32>
    %19 = vector.shape_cast %18 : vector<64xf32> to vector<64x1xf32>
    %cst_12 = arith.constant 1.280000e+02 : f32
    %20 = vector.broadcast %cst_12 : f32 to vector<64x1xf32>
    %21 = arith.divf %19, %20 : vector<64x1xf32>
    %cst_13 = arith.constant 9.99999974E-6 : f32
    %22 = vector.broadcast %cst_13 : f32 to vector<64x1xf32>
    %23 = arith.addf %21, %22 : vector<64x1xf32>
    %24 = math.rsqrt %23 : vector<64x1xf32>
    %25 = vector.broadcast %24 : vector<64x1xf32> to vector<64x128xf32>
    %26 = arith.mulf %16, %25 : vector<64x128xf32>
    %27 = vector.broadcast %8 : vector<1x128xf32> to vector<64x128xf32>
    %28 = arith.mulf %26, %27 : vector<64x128xf32>
    %29 = vector.broadcast %10 : vector<1x128xf32> to vector<64x128xf32>
    %30 = arith.addf %28, %29 : vector<64x128xf32>
    %c0_14 = arith.constant 0 : index
    %c0_15 = arith.constant 0 : index
    %c0_16 = arith.constant 0 : index
    %31 = vector.load %arg5[%c0_14, %c0_15, %c0_16] : memref<2x128x384xbf16, #tpu.memory_space<vmem>>, vector<1x128x384xbf16>
    %32 = vector.shape_cast %31 : vector<1x128x384xbf16> to vector<128x384xbf16>
    %33 = arith.truncf %30 : vector<64x128xf32> to vector<64x128xbf16>
    %cst_17 = arith.constant dense<0.000000e+00> : vector<64x384xf32>
    %34 = tpu.matmul %33, %32, %cst_17 {dimension_numbers = #tpu.dot_dimension_numbers<[1], [0], [0], [1], [0, 0, 1, 1], [], []>} : vector<64x128xbf16>, vector<128x384xbf16>, vector<64x384xf32> -> vector<64x384xf32>
    %35 = vector.extract_strided_slice %34 {offsets = [0, 0], sizes = [64, 32], strides = [1, 1]} : vector<64x384xf32> to vector<64x32xf32>
    %36 = arith.truncf %35 : vector<64x32xf32> to vector<64x32xbf16>
    %37 = vector.extract_strided_slice %34 {offsets = [0, 128], sizes = [64, 32], strides = [1, 1]} : vector<64x384xf32> to vector<64x32xf32>
    %38 = arith.truncf %37 : vector<64x32xf32> to vector<64x32xbf16>
    %39 = vector.extract_strided_slice %34 {offsets = [0, 256], sizes = [64, 32], strides = [1, 1]} : vector<64x384xf32> to vector<64x32xf32>
    %40 = arith.truncf %39 : vector<64x32xf32> to vector<64x32xbf16>
    %cst_18 = arith.constant dense<0.000000e+00> : vector<64x64xf32>
    %41 = tpu.matmul %36, %38, %cst_18 {dimension_numbers = #tpu.dot_dimension_numbers<[1], [1], [0], [0], [0, 0, 1, 0], [], []>} : vector<64x32xbf16>, vector<64x32xbf16>, vector<64x64xf32> -> vector<64x64xf32>
    %cst_19 = arith.constant 0.176776692 : f32
    %42 = vector.broadcast %cst_19 : f32 to vector<64x64xf32>
    %43 = arith.mulf %41, %42 : vector<64x64xf32>
    %cst_20 = arith.constant -1.000000e+30 : f32
    %44 = vector.broadcast %cst_20 : f32 to vector<64x64xf32>
    %45 = arith.select %6, %43, %44 : vector<64x64xi1>, vector<64x64xf32>
    %cst_21 = arith.constant dense<0xFF800000> : vector<64xf32>
    %46 = vector.multi_reduction <maximumf>, %45, %cst_21 [1] : vector<64x64xf32> to vector<64xf32>
    %47 = vector.shape_cast %46 : vector<64xf32> to vector<64x1xf32>
    %48 = vector.broadcast %47 : vector<64x1xf32> to vector<64x64xf32>
    %49 = arith.subf %45, %48 : vector<64x64xf32>
    %50 = math.exp %49 : vector<64x64xf32>
    %cst_22 = arith.constant dense<0.000000e+00> : vector<64xf32>
    %51 = vector.multi_reduction <add>, %50, %cst_22 [1] : vector<64x64xf32> to vector<64xf32>
    %52 = vector.shape_cast %51 : vector<64xf32> to vector<64x1xf32>
    %53 = tpu.reciprocal %52 {approx = true} : vector<64x1xf32> -> vector<64x1xf32>
    %54 = vector.broadcast %53 : vector<64x1xf32> to vector<64x64xf32>
    %55 = arith.mulf %50, %54 : vector<64x64xf32>
    %56 = arith.truncf %55 : vector<64x64xf32> to vector<64x64xbf16>
    %cst_23 = arith.constant dense<0.000000e+00> : vector<64x32xf32>
    %57 = tpu.matmul %56, %40, %cst_23 {dimension_numbers = #tpu.dot_dimension_numbers<[1], [0], [0], [1], [0, 0, 1, 1], [], []>} : vector<64x64xbf16>, vector<64x32xbf16>, vector<64x32xf32> -> vector<64x32xf32>
    %58 = vector.extract_strided_slice %34 {offsets = [0, 32], sizes = [64, 32], strides = [1, 1]} : vector<64x384xf32> to vector<64x32xf32>
    %59 = arith.truncf %58 : vector<64x32xf32> to vector<64x32xbf16>
    %60 = vector.extract_strided_slice %34 {offsets = [0, 160], sizes = [64, 32], strides = [1, 1]} : vector<64x384xf32> to vector<64x32xf32>
    %61 = arith.truncf %60 : vector<64x32xf32> to vector<64x32xbf16>
    %62 = vector.extract_strided_slice %34 {offsets = [0, 288], sizes = [64, 32], strides = [1, 1]} : vector<64x384xf32> to vector<64x32xf32>
    %63 = arith.truncf %62 : vector<64x32xf32> to vector<64x32xbf16>
    %cst_24 = arith.constant dense<0.000000e+00> : vector<64x64xf32>
    %64 = tpu.matmul %59, %61, %cst_24 {dimension_numbers = #tpu.dot_dimension_numbers<[1], [1], [0], [0], [0, 0, 1, 0], [], []>} : vector<64x32xbf16>, vector<64x32xbf16>, vector<64x64xf32> -> vector<64x64xf32>
    %cst_25 = arith.constant 0.176776692 : f32
    %65 = vector.broadcast %cst_25 : f32 to vector<64x64xf32>
    %66 = arith.mulf %64, %65 : vector<64x64xf32>
    %cst_26 = arith.constant -1.000000e+30 : f32
    %67 = vector.broadcast %cst_26 : f32 to vector<64x64xf32>
    %68 = arith.select %6, %66, %67 : vector<64x64xi1>, vector<64x64xf32>
    %cst_27 = arith.constant dense<0xFF800000> : vector<64xf32>
    %69 = vector.multi_reduction <maximumf>, %68, %cst_27 [1] : vector<64x64xf32> to vector<64xf32>
    %70 = vector.shape_cast %69 : vector<64xf32> to vector<64x1xf32>
    %71 = vector.broadcast %70 : vector<64x1xf32> to vector<64x64xf32>
    %72 = arith.subf %68, %71 : vector<64x64xf32>
    %73 = math.exp %72 : vector<64x64xf32>
    %cst_28 = arith.constant dense<0.000000e+00> : vector<64xf32>
    %74 = vector.multi_reduction <add>, %73, %cst_28 [1] : vector<64x64xf32> to vector<64xf32>
    %75 = vector.shape_cast %74 : vector<64xf32> to vector<64x1xf32>
    %76 = tpu.reciprocal %75 {approx = true} : vector<64x1xf32> -> vector<64x1xf32>
    %77 = vector.broadcast %76 : vector<64x1xf32> to vector<64x64xf32>
    %78 = arith.mulf %73, %77 : vector<64x64xf32>
    %79 = arith.truncf %78 : vector<64x64xf32> to vector<64x64xbf16>
    %cst_29 = arith.constant dense<0.000000e+00> : vector<64x32xf32>
    %80 = tpu.matmul %79, %63, %cst_29 {dimension_numbers = #tpu.dot_dimension_numbers<[1], [0], [0], [1], [0, 0, 1, 1], [], []>} : vector<64x64xbf16>, vector<64x32xbf16>, vector<64x32xf32> -> vector<64x32xf32>
    %81 = vector.extract_strided_slice %34 {offsets = [0, 64], sizes = [64, 32], strides = [1, 1]} : vector<64x384xf32> to vector<64x32xf32>
    %82 = arith.truncf %81 : vector<64x32xf32> to vector<64x32xbf16>
    %83 = vector.extract_strided_slice %34 {offsets = [0, 192], sizes = [64, 32], strides = [1, 1]} : vector<64x384xf32> to vector<64x32xf32>
    %84 = arith.truncf %83 : vector<64x32xf32> to vector<64x32xbf16>
    %85 = vector.extract_strided_slice %34 {offsets = [0, 320], sizes = [64, 32], strides = [1, 1]} : vector<64x384xf32> to vector<64x32xf32>
    %86 = arith.truncf %85 : vector<64x32xf32> to vector<64x32xbf16>
    %cst_30 = arith.constant dense<0.000000e+00> : vector<64x64xf32>
    %87 = tpu.matmul %82, %84, %cst_30 {dimension_numbers = #tpu.dot_dimension_numbers<[1], [1], [0], [0], [0, 0, 1, 0], [], []>} : vector<64x32xbf16>, vector<64x32xbf16>, vector<64x64xf32> -> vector<64x64xf32>
    %cst_31 = arith.constant 0.176776692 : f32
    %88 = vector.broadcast %cst_31 : f32 to vector<64x64xf32>
    %89 = arith.mulf %87, %88 : vector<64x64xf32>
    %cst_32 = arith.constant -1.000000e+30 : f32
    %90 = vector.broadcast %cst_32 : f32 to vector<64x64xf32>
    %91 = arith.select %6, %89, %90 : vector<64x64xi1>, vector<64x64xf32>
    %cst_33 = arith.constant dense<0xFF800000> : vector<64xf32>
    %92 = vector.multi_reduction <maximumf>, %91, %cst_33 [1] : vector<64x64xf32> to vector<64xf32>
    %93 = vector.shape_cast %92 : vector<64xf32> to vector<64x1xf32>
    %94 = vector.broadcast %93 : vector<64x1xf32> to vector<64x64xf32>
    %95 = arith.subf %91, %94 : vector<64x64xf32>
    %96 = math.exp %95 : vector<64x64xf32>
    %cst_34 = arith.constant dense<0.000000e+00> : vector<64xf32>
    %97 = vector.multi_reduction <add>, %96, %cst_34 [1] : vector<64x64xf32> to vector<64xf32>
    %98 = vector.shape_cast %97 : vector<64xf32> to vector<64x1xf32>
    %99 = tpu.reciprocal %98 {approx = true} : vector<64x1xf32> -> vector<64x1xf32>
    %100 = vector.broadcast %99 : vector<64x1xf32> to vector<64x64xf32>
    %101 = arith.mulf %96, %100 : vector<64x64xf32>
    %102 = arith.truncf %101 : vector<64x64xf32> to vector<64x64xbf16>
    %cst_35 = arith.constant dense<0.000000e+00> : vector<64x32xf32>
    %103 = tpu.matmul %102, %86, %cst_35 {dimension_numbers = #tpu.dot_dimension_numbers<[1], [0], [0], [1], [0, 0, 1, 1], [], []>} : vector<64x64xbf16>, vector<64x32xbf16>, vector<64x32xf32> -> vector<64x32xf32>
    %104 = vector.extract_strided_slice %34 {offsets = [0, 96], sizes = [64, 32], strides = [1, 1]} : vector<64x384xf32> to vector<64x32xf32>
    %105 = arith.truncf %104 : vector<64x32xf32> to vector<64x32xbf16>
    %106 = vector.extract_strided_slice %34 {offsets = [0, 224], sizes = [64, 32], strides = [1, 1]} : vector<64x384xf32> to vector<64x32xf32>
    %107 = arith.truncf %106 : vector<64x32xf32> to vector<64x32xbf16>
    %108 = vector.extract_strided_slice %34 {offsets = [0, 352], sizes = [64, 32], strides = [1, 1]} : vector<64x384xf32> to vector<64x32xf32>
    %109 = arith.truncf %108 : vector<64x32xf32> to vector<64x32xbf16>
    %cst_36 = arith.constant dense<0.000000e+00> : vector<64x64xf32>
    %110 = tpu.matmul %105, %107, %cst_36 {dimension_numbers = #tpu.dot_dimension_numbers<[1], [1], [0], [0], [0, 0, 1, 0], [], []>} : vector<64x32xbf16>, vector<64x32xbf16>, vector<64x64xf32> -> vector<64x64xf32>
    %cst_37 = arith.constant 0.176776692 : f32
    %111 = vector.broadcast %cst_37 : f32 to vector<64x64xf32>
    %112 = arith.mulf %110, %111 : vector<64x64xf32>
    %cst_38 = arith.constant -1.000000e+30 : f32
    %113 = vector.broadcast %cst_38 : f32 to vector<64x64xf32>
    %114 = arith.select %6, %112, %113 : vector<64x64xi1>, vector<64x64xf32>
    %cst_39 = arith.constant dense<0xFF800000> : vector<64xf32>
    %115 = vector.multi_reduction <maximumf>, %114, %cst_39 [1] : vector<64x64xf32> to vector<64xf32>
    %116 = vector.shape_cast %115 : vector<64xf32> to vector<64x1xf32>
    %117 = vector.broadcast %116 : vector<64x1xf32> to vector<64x64xf32>
    %118 = arith.subf %114, %117 : vector<64x64xf32>
    %119 = math.exp %118 : vector<64x64xf32>
    %cst_40 = arith.constant dense<0.000000e+00> : vector<64xf32>
    %120 = vector.multi_reduction <add>, %119, %cst_40 [1] : vector<64x64xf32> to vector<64xf32>
    %121 = vector.shape_cast %120 : vector<64xf32> to vector<64x1xf32>
    %122 = tpu.reciprocal %121 {approx = true} : vector<64x1xf32> -> vector<64x1xf32>
    %123 = vector.broadcast %122 : vector<64x1xf32> to vector<64x64xf32>
    %124 = arith.mulf %119, %123 : vector<64x64xf32>
    %125 = arith.truncf %124 : vector<64x64xf32> to vector<64x64xbf16>
    %cst_41 = arith.constant dense<0.000000e+00> : vector<64x32xf32>
    %126 = tpu.matmul %125, %109, %cst_41 {dimension_numbers = #tpu.dot_dimension_numbers<[1], [0], [0], [1], [0, 0, 1, 1], [], []>} : vector<64x64xbf16>, vector<64x32xbf16>, vector<64x32xf32> -> vector<64x32xf32>
    %127 = tpu.concatenate %57, %80, %103, %126 in 1 : vector<64x32xf32>, vector<64x32xf32>, vector<64x32xf32>, vector<64x32xf32> -> vector<64x128xf32>
    %c0_42 = arith.constant 0 : index
    %c0_43 = arith.constant 0 : index
    %c0_44 = arith.constant 0 : index
    %128 = vector.load %arg6[%c0_42, %c0_43, %c0_44] : memref<2x128x128xbf16, #tpu.memory_space<vmem>>, vector<1x128x128xbf16>
    %129 = vector.shape_cast %128 : vector<1x128x128xbf16> to vector<128x128xbf16>
    %130 = arith.truncf %127 : vector<64x128xf32> to vector<64x128xbf16>
    %cst_45 = arith.constant dense<0.000000e+00> : vector<64x128xf32>
    %131 = tpu.matmul %130, %129, %cst_45 {dimension_numbers = #tpu.dot_dimension_numbers<[1], [0], [0], [1], [0, 0, 1, 1], [], []>} : vector<64x128xbf16>, vector<128x128xbf16>, vector<64x128xf32> -> vector<64x128xf32>
    %132 = arith.addf %3, %131 : vector<64x128xf32>
    %c0_46 = arith.constant 0 : index
    %c0_47 = arith.constant 0 : index
    %c0_48 = arith.constant 0 : index
    %133 = vector.load %arg7[%c0_46, %c0_47, %c0_48] : memref<2x1x128xf32, #tpu.memory_space<vmem>>, vector<1x1x128xf32>
    %134 = vector.shape_cast %133 : vector<1x1x128xf32> to vector<1x128xf32>
    %c0_49 = arith.constant 0 : index
    %c0_50 = arith.constant 0 : index
    %c0_51 = arith.constant 0 : index
    %135 = vector.load %arg8[%c0_49, %c0_50, %c0_51] : memref<2x1x128xf32, #tpu.memory_space<vmem>>, vector<1x1x128xf32>
    %136 = vector.shape_cast %135 : vector<1x1x128xf32> to vector<1x128xf32>
    %cst_52 = arith.constant dense<0.000000e+00> : vector<64xf32>
    %137 = vector.multi_reduction <add>, %132, %cst_52 [1] : vector<64x128xf32> to vector<64xf32>
    %138 = vector.shape_cast %137 : vector<64xf32> to vector<64x1xf32>
    %cst_53 = arith.constant 1.280000e+02 : f32
    %139 = vector.broadcast %cst_53 : f32 to vector<64x1xf32>
    %140 = arith.divf %138, %139 : vector<64x1xf32>
    %141 = vector.broadcast %140 : vector<64x1xf32> to vector<64x128xf32>
    %142 = arith.subf %132, %141 : vector<64x128xf32>
    %143 = arith.mulf %142, %142 : vector<64x128xf32>
    %cst_54 = arith.constant dense<0.000000e+00> : vector<64xf32>
    %144 = vector.multi_reduction <add>, %143, %cst_54 [1] : vector<64x128xf32> to vector<64xf32>
    %145 = vector.shape_cast %144 : vector<64xf32> to vector<64x1xf32>
    %cst_55 = arith.constant 1.280000e+02 : f32
    %146 = vector.broadcast %cst_55 : f32 to vector<64x1xf32>
    %147 = arith.divf %145, %146 : vector<64x1xf32>
    %cst_56 = arith.constant 9.99999974E-6 : f32
    %148 = vector.broadcast %cst_56 : f32 to vector<64x1xf32>
    %149 = arith.addf %147, %148 : vector<64x1xf32>
    %150 = math.rsqrt %149 : vector<64x1xf32>
    %151 = vector.broadcast %150 : vector<64x1xf32> to vector<64x128xf32>
    %152 = arith.mulf %142, %151 : vector<64x128xf32>
    %153 = vector.broadcast %134 : vector<1x128xf32> to vector<64x128xf32>
    %154 = arith.mulf %152, %153 : vector<64x128xf32>
    %155 = vector.broadcast %136 : vector<1x128xf32> to vector<64x128xf32>
    %156 = arith.addf %154, %155 : vector<64x128xf32>
    %c0_57 = arith.constant 0 : index
    %c0_58 = arith.constant 0 : index
    %c0_59 = arith.constant 0 : index
    %157 = vector.load %arg9[%c0_57, %c0_58, %c0_59] : memref<2x128x512xbf16, #tpu.memory_space<vmem>>, vector<1x128x512xbf16>
    %158 = vector.shape_cast %157 : vector<1x128x512xbf16> to vector<128x512xbf16>
    %159 = arith.truncf %156 : vector<64x128xf32> to vector<64x128xbf16>
    %cst_60 = arith.constant dense<0.000000e+00> : vector<64x512xf32>
    %160 = tpu.matmul %159, %158, %cst_60 {dimension_numbers = #tpu.dot_dimension_numbers<[1], [0], [0], [1], [0, 0, 1, 1], [], []>} : vector<64x128xbf16>, vector<128x512xbf16>, vector<64x512xf32> -> vector<64x512xf32>
    %c0_61 = arith.constant 0 : index
    %c0_62 = arith.constant 0 : index
    %c0_63 = arith.constant 0 : index
    %161 = vector.load %arg10[%c0_61, %c0_62, %c0_63] : memref<2x1x512xf32, #tpu.memory_space<vmem>>, vector<1x1x512xf32>
    %162 = vector.shape_cast %161 : vector<1x1x512xf32> to vector<1x512xf32>
    %163 = vector.broadcast %162 : vector<1x512xf32> to vector<64x512xf32>
    %164 = arith.addf %160, %163 : vector<64x512xf32>
    %cst_64 = arith.constant 0.000000e+00 : f32
    %165 = vector.broadcast %cst_64 : f32 to vector<64x512xf32>
    %166 = arith.maximumf %164, %165 : vector<64x512xf32>
    %c0_65 = arith.constant 0 : index
    %c0_66 = arith.constant 0 : index
    %c0_67 = arith.constant 0 : index
    %167 = vector.load %arg11[%c0_65, %c0_66, %c0_67] : memref<2x512x128xbf16, #tpu.memory_space<vmem>>, vector<1x512x128xbf16>
    %168 = vector.shape_cast %167 : vector<1x512x128xbf16> to vector<512x128xbf16>
    %169 = arith.truncf %166 : vector<64x512xf32> to vector<64x512xbf16>
    %cst_68 = arith.constant dense<0.000000e+00> : vector<64x128xf32>
    %170 = tpu.matmul %169, %168, %cst_68 {dimension_numbers = #tpu.dot_dimension_numbers<[1], [0], [0], [1], [0, 0, 1, 1], [], []>} : vector<64x512xbf16>, vector<512x128xbf16>, vector<64x128xf32> -> vector<64x128xf32>
    %c0_69 = arith.constant 0 : index
    %c0_70 = arith.constant 0 : index
    %c0_71 = arith.constant 0 : index
    %171 = vector.load %arg12[%c0_69, %c0_70, %c0_71] : memref<2x1x128xf32, #tpu.memory_space<vmem>>, vector<1x1x128xf32>
    %172 = vector.shape_cast %171 : vector<1x1x128xf32> to vector<1x128xf32>
    %173 = vector.broadcast %172 : vector<1x128xf32> to vector<64x128xf32>
    %174 = arith.addf %170, %173 : vector<64x128xf32>
    %175 = arith.addf %132, %174 : vector<64x128xf32>
    %c1 = arith.constant 1 : index
    %c0_72 = arith.constant 0 : index
    %c0_73 = arith.constant 0 : index
    %176 = vector.load %arg3[%c1, %c0_72, %c0_73] : memref<2x1x128xf32, #tpu.memory_space<vmem>>, vector<1x1x128xf32>
    %177 = vector.shape_cast %176 : vector<1x1x128xf32> to vector<1x128xf32>
    %c1_74 = arith.constant 1 : index
    %c0_75 = arith.constant 0 : index
    %c0_76 = arith.constant 0 : index
    %178 = vector.load %arg4[%c1_74, %c0_75, %c0_76] : memref<2x1x128xf32, #tpu.memory_space<vmem>>, vector<1x1x128xf32>
    %179 = vector.shape_cast %178 : vector<1x1x128xf32> to vector<1x128xf32>
    %cst_77 = arith.constant dense<0.000000e+00> : vector<64xf32>
    %180 = vector.multi_reduction <add>, %175, %cst_77 [1] : vector<64x128xf32> to vector<64xf32>
    %181 = vector.shape_cast %180 : vector<64xf32> to vector<64x1xf32>
    %cst_78 = arith.constant 1.280000e+02 : f32
    %182 = vector.broadcast %cst_78 : f32 to vector<64x1xf32>
    %183 = arith.divf %181, %182 : vector<64x1xf32>
    %184 = vector.broadcast %183 : vector<64x1xf32> to vector<64x128xf32>
    %185 = arith.subf %175, %184 : vector<64x128xf32>
    %186 = arith.mulf %185, %185 : vector<64x128xf32>
    %cst_79 = arith.constant dense<0.000000e+00> : vector<64xf32>
    %187 = vector.multi_reduction <add>, %186, %cst_79 [1] : vector<64x128xf32> to vector<64xf32>
    %188 = vector.shape_cast %187 : vector<64xf32> to vector<64x1xf32>
    %cst_80 = arith.constant 1.280000e+02 : f32
    %189 = vector.broadcast %cst_80 : f32 to vector<64x1xf32>
    %190 = arith.divf %188, %189 : vector<64x1xf32>
    %cst_81 = arith.constant 9.99999974E-6 : f32
    %191 = vector.broadcast %cst_81 : f32 to vector<64x1xf32>
    %192 = arith.addf %190, %191 : vector<64x1xf32>
    %193 = math.rsqrt %192 : vector<64x1xf32>
    %194 = vector.broadcast %193 : vector<64x1xf32> to vector<64x128xf32>
    %195 = arith.mulf %185, %194 : vector<64x128xf32>
    %196 = vector.broadcast %177 : vector<1x128xf32> to vector<64x128xf32>
    %197 = arith.mulf %195, %196 : vector<64x128xf32>
    %198 = vector.broadcast %179 : vector<1x128xf32> to vector<64x128xf32>
    %199 = arith.addf %197, %198 : vector<64x128xf32>
    %c1_82 = arith.constant 1 : index
    %c0_83 = arith.constant 0 : index
    %c0_84 = arith.constant 0 : index
    %200 = vector.load %arg5[%c1_82, %c0_83, %c0_84] : memref<2x128x384xbf16, #tpu.memory_space<vmem>>, vector<1x128x384xbf16>
    %201 = vector.shape_cast %200 : vector<1x128x384xbf16> to vector<128x384xbf16>
    %202 = arith.truncf %199 : vector<64x128xf32> to vector<64x128xbf16>
    %cst_85 = arith.constant dense<0.000000e+00> : vector<64x384xf32>
    %203 = tpu.matmul %202, %201, %cst_85 {dimension_numbers = #tpu.dot_dimension_numbers<[1], [0], [0], [1], [0, 0, 1, 1], [], []>} : vector<64x128xbf16>, vector<128x384xbf16>, vector<64x384xf32> -> vector<64x384xf32>
    %204 = vector.extract_strided_slice %203 {offsets = [0, 0], sizes = [64, 32], strides = [1, 1]} : vector<64x384xf32> to vector<64x32xf32>
    %205 = arith.truncf %204 : vector<64x32xf32> to vector<64x32xbf16>
    %206 = vector.extract_strided_slice %203 {offsets = [0, 128], sizes = [64, 32], strides = [1, 1]} : vector<64x384xf32> to vector<64x32xf32>
    %207 = arith.truncf %206 : vector<64x32xf32> to vector<64x32xbf16>
    %208 = vector.extract_strided_slice %203 {offsets = [0, 256], sizes = [64, 32], strides = [1, 1]} : vector<64x384xf32> to vector<64x32xf32>
    %209 = arith.truncf %208 : vector<64x32xf32> to vector<64x32xbf16>
    %cst_86 = arith.constant dense<0.000000e+00> : vector<64x64xf32>
    %210 = tpu.matmul %205, %207, %cst_86 {dimension_numbers = #tpu.dot_dimension_numbers<[1], [1], [0], [0], [0, 0, 1, 0], [], []>} : vector<64x32xbf16>, vector<64x32xbf16>, vector<64x64xf32> -> vector<64x64xf32>
    %cst_87 = arith.constant 0.176776692 : f32
    %211 = vector.broadcast %cst_87 : f32 to vector<64x64xf32>
    %212 = arith.mulf %210, %211 : vector<64x64xf32>
    %cst_88 = arith.constant -1.000000e+30 : f32
    %213 = vector.broadcast %cst_88 : f32 to vector<64x64xf32>
    %214 = arith.select %6, %212, %213 : vector<64x64xi1>, vector<64x64xf32>
    %cst_89 = arith.constant dense<0xFF800000> : vector<64xf32>
    %215 = vector.multi_reduction <maximumf>, %214, %cst_89 [1] : vector<64x64xf32> to vector<64xf32>
    %216 = vector.shape_cast %215 : vector<64xf32> to vector<64x1xf32>
    %217 = vector.broadcast %216 : vector<64x1xf32> to vector<64x64xf32>
    %218 = arith.subf %214, %217 : vector<64x64xf32>
    %219 = math.exp %218 : vector<64x64xf32>
    %cst_90 = arith.constant dense<0.000000e+00> : vector<64xf32>
    %220 = vector.multi_reduction <add>, %219, %cst_90 [1] : vector<64x64xf32> to vector<64xf32>
    %221 = vector.shape_cast %220 : vector<64xf32> to vector<64x1xf32>
    %222 = tpu.reciprocal %221 {approx = true} : vector<64x1xf32> -> vector<64x1xf32>
    %223 = vector.broadcast %222 : vector<64x1xf32> to vector<64x64xf32>
    %224 = arith.mulf %219, %223 : vector<64x64xf32>
    %225 = arith.truncf %224 : vector<64x64xf32> to vector<64x64xbf16>
    %cst_91 = arith.constant dense<0.000000e+00> : vector<64x32xf32>
    %226 = tpu.matmul %225, %209, %cst_91 {dimension_numbers = #tpu.dot_dimension_numbers<[1], [0], [0], [1], [0, 0, 1, 1], [], []>} : vector<64x64xbf16>, vector<64x32xbf16>, vector<64x32xf32> -> vector<64x32xf32>
    %227 = vector.extract_strided_slice %203 {offsets = [0, 32], sizes = [64, 32], strides = [1, 1]} : vector<64x384xf32> to vector<64x32xf32>
    %228 = arith.truncf %227 : vector<64x32xf32> to vector<64x32xbf16>
    %229 = vector.extract_strided_slice %203 {offsets = [0, 160], sizes = [64, 32], strides = [1, 1]} : vector<64x384xf32> to vector<64x32xf32>
    %230 = arith.truncf %229 : vector<64x32xf32> to vector<64x32xbf16>
    %231 = vector.extract_strided_slice %203 {offsets = [0, 288], sizes = [64, 32], strides = [1, 1]} : vector<64x384xf32> to vector<64x32xf32>
    %232 = arith.truncf %231 : vector<64x32xf32> to vector<64x32xbf16>
    %cst_92 = arith.constant dense<0.000000e+00> : vector<64x64xf32>
    %233 = tpu.matmul %228, %230, %cst_92 {dimension_numbers = #tpu.dot_dimension_numbers<[1], [1], [0], [0], [0, 0, 1, 0], [], []>} : vector<64x32xbf16>, vector<64x32xbf16>, vector<64x64xf32> -> vector<64x64xf32>
    %cst_93 = arith.constant 0.176776692 : f32
    %234 = vector.broadcast %cst_93 : f32 to vector<64x64xf32>
    %235 = arith.mulf %233, %234 : vector<64x64xf32>
    %cst_94 = arith.constant -1.000000e+30 : f32
    %236 = vector.broadcast %cst_94 : f32 to vector<64x64xf32>
    %237 = arith.select %6, %235, %236 : vector<64x64xi1>, vector<64x64xf32>
    %cst_95 = arith.constant dense<0xFF800000> : vector<64xf32>
    %238 = vector.multi_reduction <maximumf>, %237, %cst_95 [1] : vector<64x64xf32> to vector<64xf32>
    %239 = vector.shape_cast %238 : vector<64xf32> to vector<64x1xf32>
    %240 = vector.broadcast %239 : vector<64x1xf32> to vector<64x64xf32>
    %241 = arith.subf %237, %240 : vector<64x64xf32>
    %242 = math.exp %241 : vector<64x64xf32>
    %cst_96 = arith.constant dense<0.000000e+00> : vector<64xf32>
    %243 = vector.multi_reduction <add>, %242, %cst_96 [1] : vector<64x64xf32> to vector<64xf32>
    %244 = vector.shape_cast %243 : vector<64xf32> to vector<64x1xf32>
    %245 = tpu.reciprocal %244 {approx = true} : vector<64x1xf32> -> vector<64x1xf32>
    %246 = vector.broadcast %245 : vector<64x1xf32> to vector<64x64xf32>
    %247 = arith.mulf %242, %246 : vector<64x64xf32>
    %248 = arith.truncf %247 : vector<64x64xf32> to vector<64x64xbf16>
    %cst_97 = arith.constant dense<0.000000e+00> : vector<64x32xf32>
    %249 = tpu.matmul %248, %232, %cst_97 {dimension_numbers = #tpu.dot_dimension_numbers<[1], [0], [0], [1], [0, 0, 1, 1], [], []>} : vector<64x64xbf16>, vector<64x32xbf16>, vector<64x32xf32> -> vector<64x32xf32>
    %250 = vector.extract_strided_slice %203 {offsets = [0, 64], sizes = [64, 32], strides = [1, 1]} : vector<64x384xf32> to vector<64x32xf32>
    %251 = arith.truncf %250 : vector<64x32xf32> to vector<64x32xbf16>
    %252 = vector.extract_strided_slice %203 {offsets = [0, 192], sizes = [64, 32], strides = [1, 1]} : vector<64x384xf32> to vector<64x32xf32>
    %253 = arith.truncf %252 : vector<64x32xf32> to vector<64x32xbf16>
    %254 = vector.extract_strided_slice %203 {offsets = [0, 320], sizes = [64, 32], strides = [1, 1]} : vector<64x384xf32> to vector<64x32xf32>
    %255 = arith.truncf %254 : vector<64x32xf32> to vector<64x32xbf16>
    %cst_98 = arith.constant dense<0.000000e+00> : vector<64x64xf32>
    %256 = tpu.matmul %251, %253, %cst_98 {dimension_numbers = #tpu.dot_dimension_numbers<[1], [1], [0], [0], [0, 0, 1, 0], [], []>} : vector<64x32xbf16>, vector<64x32xbf16>, vector<64x64xf32> -> vector<64x64xf32>
    %cst_99 = arith.constant 0.176776692 : f32
    %257 = vector.broadcast %cst_99 : f32 to vector<64x64xf32>
    %258 = arith.mulf %256, %257 : vector<64x64xf32>
    %cst_100 = arith.constant -1.000000e+30 : f32
    %259 = vector.broadcast %cst_100 : f32 to vector<64x64xf32>
    %260 = arith.select %6, %258, %259 : vector<64x64xi1>, vector<64x64xf32>
    %cst_101 = arith.constant dense<0xFF800000> : vector<64xf32>
    %261 = vector.multi_reduction <maximumf>, %260, %cst_101 [1] : vector<64x64xf32> to vector<64xf32>
    %262 = vector.shape_cast %261 : vector<64xf32> to vector<64x1xf32>
    %263 = vector.broadcast %262 : vector<64x1xf32> to vector<64x64xf32>
    %264 = arith.subf %260, %263 : vector<64x64xf32>
    %265 = math.exp %264 : vector<64x64xf32>
    %cst_102 = arith.constant dense<0.000000e+00> : vector<64xf32>
    %266 = vector.multi_reduction <add>, %265, %cst_102 [1] : vector<64x64xf32> to vector<64xf32>
    %267 = vector.shape_cast %266 : vector<64xf32> to vector<64x1xf32>
    %268 = tpu.reciprocal %267 {approx = true} : vector<64x1xf32> -> vector<64x1xf32>
    %269 = vector.broadcast %268 : vector<64x1xf32> to vector<64x64xf32>
    %270 = arith.mulf %265, %269 : vector<64x64xf32>
    %271 = arith.truncf %270 : vector<64x64xf32> to vector<64x64xbf16>
    %cst_103 = arith.constant dense<0.000000e+00> : vector<64x32xf32>
    %272 = tpu.matmul %271, %255, %cst_103 {dimension_numbers = #tpu.dot_dimension_numbers<[1], [0], [0], [1], [0, 0, 1, 1], [], []>} : vector<64x64xbf16>, vector<64x32xbf16>, vector<64x32xf32> -> vector<64x32xf32>
    %273 = vector.extract_strided_slice %203 {offsets = [0, 96], sizes = [64, 32], strides = [1, 1]} : vector<64x384xf32> to vector<64x32xf32>
    %274 = arith.truncf %273 : vector<64x32xf32> to vector<64x32xbf16>
    %275 = vector.extract_strided_slice %203 {offsets = [0, 224], sizes = [64, 32], strides = [1, 1]} : vector<64x384xf32> to vector<64x32xf32>
    %276 = arith.truncf %275 : vector<64x32xf32> to vector<64x32xbf16>
    %277 = vector.extract_strided_slice %203 {offsets = [0, 352], sizes = [64, 32], strides = [1, 1]} : vector<64x384xf32> to vector<64x32xf32>
    %278 = arith.truncf %277 : vector<64x32xf32> to vector<64x32xbf16>
    %cst_104 = arith.constant dense<0.000000e+00> : vector<64x64xf32>
    %279 = tpu.matmul %274, %276, %cst_104 {dimension_numbers = #tpu.dot_dimension_numbers<[1], [1], [0], [0], [0, 0, 1, 0], [], []>} : vector<64x32xbf16>, vector<64x32xbf16>, vector<64x64xf32> -> vector<64x64xf32>
    %cst_105 = arith.constant 0.176776692 : f32
    %280 = vector.broadcast %cst_105 : f32 to vector<64x64xf32>
    %281 = arith.mulf %279, %280 : vector<64x64xf32>
    %cst_106 = arith.constant -1.000000e+30 : f32
    %282 = vector.broadcast %cst_106 : f32 to vector<64x64xf32>
    %283 = arith.select %6, %281, %282 : vector<64x64xi1>, vector<64x64xf32>
    %cst_107 = arith.constant dense<0xFF800000> : vector<64xf32>
    %284 = vector.multi_reduction <maximumf>, %283, %cst_107 [1] : vector<64x64xf32> to vector<64xf32>
    %285 = vector.shape_cast %284 : vector<64xf32> to vector<64x1xf32>
    %286 = vector.broadcast %285 : vector<64x1xf32> to vector<64x64xf32>
    %287 = arith.subf %283, %286 : vector<64x64xf32>
    %288 = math.exp %287 : vector<64x64xf32>
    %cst_108 = arith.constant dense<0.000000e+00> : vector<64xf32>
    %289 = vector.multi_reduction <add>, %288, %cst_108 [1] : vector<64x64xf32> to vector<64xf32>
    %290 = vector.shape_cast %289 : vector<64xf32> to vector<64x1xf32>
    %291 = tpu.reciprocal %290 {approx = true} : vector<64x1xf32> -> vector<64x1xf32>
    %292 = vector.broadcast %291 : vector<64x1xf32> to vector<64x64xf32>
    %293 = arith.mulf %288, %292 : vector<64x64xf32>
    %294 = arith.truncf %293 : vector<64x64xf32> to vector<64x64xbf16>
    %cst_109 = arith.constant dense<0.000000e+00> : vector<64x32xf32>
    %295 = tpu.matmul %294, %278, %cst_109 {dimension_numbers = #tpu.dot_dimension_numbers<[1], [0], [0], [1], [0, 0, 1, 1], [], []>} : vector<64x64xbf16>, vector<64x32xbf16>, vector<64x32xf32> -> vector<64x32xf32>
    %296 = tpu.concatenate %226, %249, %272, %295 in 1 : vector<64x32xf32>, vector<64x32xf32>, vector<64x32xf32>, vector<64x32xf32> -> vector<64x128xf32>
    %c1_110 = arith.constant 1 : index
    %c0_111 = arith.constant 0 : index
    %c0_112 = arith.constant 0 : index
    %297 = vector.load %arg6[%c1_110, %c0_111, %c0_112] : memref<2x128x128xbf16, #tpu.memory_space<vmem>>, vector<1x128x128xbf16>
    %298 = vector.shape_cast %297 : vector<1x128x128xbf16> to vector<128x128xbf16>
    %299 = arith.truncf %296 : vector<64x128xf32> to vector<64x128xbf16>
    %cst_113 = arith.constant dense<0.000000e+00> : vector<64x128xf32>
    %300 = tpu.matmul %299, %298, %cst_113 {dimension_numbers = #tpu.dot_dimension_numbers<[1], [0], [0], [1], [0, 0, 1, 1], [], []>} : vector<64x128xbf16>, vector<128x128xbf16>, vector<64x128xf32> -> vector<64x128xf32>
    %301 = arith.addf %175, %300 : vector<64x128xf32>
    %c1_114 = arith.constant 1 : index
    %c0_115 = arith.constant 0 : index
    %c0_116 = arith.constant 0 : index
    %302 = vector.load %arg7[%c1_114, %c0_115, %c0_116] : memref<2x1x128xf32, #tpu.memory_space<vmem>>, vector<1x1x128xf32>
    %303 = vector.shape_cast %302 : vector<1x1x128xf32> to vector<1x128xf32>
    %c1_117 = arith.constant 1 : index
    %c0_118 = arith.constant 0 : index
    %c0_119 = arith.constant 0 : index
    %304 = vector.load %arg8[%c1_117, %c0_118, %c0_119] : memref<2x1x128xf32, #tpu.memory_space<vmem>>, vector<1x1x128xf32>
    %305 = vector.shape_cast %304 : vector<1x1x128xf32> to vector<1x128xf32>
    %cst_120 = arith.constant dense<0.000000e+00> : vector<64xf32>
    %306 = vector.multi_reduction <add>, %301, %cst_120 [1] : vector<64x128xf32> to vector<64xf32>
    %307 = vector.shape_cast %306 : vector<64xf32> to vector<64x1xf32>
    %cst_121 = arith.constant 1.280000e+02 : f32
    %308 = vector.broadcast %cst_121 : f32 to vector<64x1xf32>
    %309 = arith.divf %307, %308 : vector<64x1xf32>
    %310 = vector.broadcast %309 : vector<64x1xf32> to vector<64x128xf32>
    %311 = arith.subf %301, %310 : vector<64x128xf32>
    %312 = arith.mulf %311, %311 : vector<64x128xf32>
    %cst_122 = arith.constant dense<0.000000e+00> : vector<64xf32>
    %313 = vector.multi_reduction <add>, %312, %cst_122 [1] : vector<64x128xf32> to vector<64xf32>
    %314 = vector.shape_cast %313 : vector<64xf32> to vector<64x1xf32>
    %cst_123 = arith.constant 1.280000e+02 : f32
    %315 = vector.broadcast %cst_123 : f32 to vector<64x1xf32>
    %316 = arith.divf %314, %315 : vector<64x1xf32>
    %cst_124 = arith.constant 9.99999974E-6 : f32
    %317 = vector.broadcast %cst_124 : f32 to vector<64x1xf32>
    %318 = arith.addf %316, %317 : vector<64x1xf32>
    %319 = math.rsqrt %318 : vector<64x1xf32>
    %320 = vector.broadcast %319 : vector<64x1xf32> to vector<64x128xf32>
    %321 = arith.mulf %311, %320 : vector<64x128xf32>
    %322 = vector.broadcast %303 : vector<1x128xf32> to vector<64x128xf32>
    %323 = arith.mulf %321, %322 : vector<64x128xf32>
    %324 = vector.broadcast %305 : vector<1x128xf32> to vector<64x128xf32>
    %325 = arith.addf %323, %324 : vector<64x128xf32>
    %c1_125 = arith.constant 1 : index
    %c0_126 = arith.constant 0 : index
    %c0_127 = arith.constant 0 : index
    %326 = vector.load %arg9[%c1_125, %c0_126, %c0_127] : memref<2x128x512xbf16, #tpu.memory_space<vmem>>, vector<1x128x512xbf16>
    %327 = vector.shape_cast %326 : vector<1x128x512xbf16> to vector<128x512xbf16>
    %328 = arith.truncf %325 : vector<64x128xf32> to vector<64x128xbf16>
    %cst_128 = arith.constant dense<0.000000e+00> : vector<64x512xf32>
    %329 = tpu.matmul %328, %327, %cst_128 {dimension_numbers = #tpu.dot_dimension_numbers<[1], [0], [0], [1], [0, 0, 1, 1], [], []>} : vector<64x128xbf16>, vector<128x512xbf16>, vector<64x512xf32> -> vector<64x512xf32>
    %c1_129 = arith.constant 1 : index
    %c0_130 = arith.constant 0 : index
    %c0_131 = arith.constant 0 : index
    %330 = vector.load %arg10[%c1_129, %c0_130, %c0_131] : memref<2x1x512xf32, #tpu.memory_space<vmem>>, vector<1x1x512xf32>
    %331 = vector.shape_cast %330 : vector<1x1x512xf32> to vector<1x512xf32>
    %332 = vector.broadcast %331 : vector<1x512xf32> to vector<64x512xf32>
    %333 = arith.addf %329, %332 : vector<64x512xf32>
    %cst_132 = arith.constant 0.000000e+00 : f32
    %334 = vector.broadcast %cst_132 : f32 to vector<64x512xf32>
    %335 = arith.maximumf %333, %334 : vector<64x512xf32>
    %c1_133 = arith.constant 1 : index
    %c0_134 = arith.constant 0 : index
    %c0_135 = arith.constant 0 : index
    %336 = vector.load %arg11[%c1_133, %c0_134, %c0_135] : memref<2x512x128xbf16, #tpu.memory_space<vmem>>, vector<1x512x128xbf16>
    %337 = vector.shape_cast %336 : vector<1x512x128xbf16> to vector<512x128xbf16>
    %338 = arith.truncf %335 : vector<64x512xf32> to vector<64x512xbf16>
    %cst_136 = arith.constant dense<0.000000e+00> : vector<64x128xf32>
    %339 = tpu.matmul %338, %337, %cst_136 {dimension_numbers = #tpu.dot_dimension_numbers<[1], [0], [0], [1], [0, 0, 1, 1], [], []>} : vector<64x512xbf16>, vector<512x128xbf16>, vector<64x128xf32> -> vector<64x128xf32>
    %c1_137 = arith.constant 1 : index
    %c0_138 = arith.constant 0 : index
    %c0_139 = arith.constant 0 : index
    %340 = vector.load %arg12[%c1_137, %c0_138, %c0_139] : memref<2x1x128xf32, #tpu.memory_space<vmem>>, vector<1x1x128xf32>
    %341 = vector.shape_cast %340 : vector<1x1x128xf32> to vector<1x128xf32>
    %342 = vector.broadcast %341 : vector<1x128xf32> to vector<64x128xf32>
    %343 = arith.addf %339, %342 : vector<64x128xf32>
    %344 = arith.addf %301, %343 : vector<64x128xf32>
    %c0_140 = arith.constant 0 : index
    %c0_141 = arith.constant 0 : index
    %345 = vector.load %arg13[%c0_140, %c0_141] : memref<1x128xf32, #tpu.memory_space<vmem>>, vector<1x128xf32>
    %c0_142 = arith.constant 0 : index
    %c0_143 = arith.constant 0 : index
    %346 = vector.load %arg14[%c0_142, %c0_143] : memref<1x128xf32, #tpu.memory_space<vmem>>, vector<1x128xf32>
    %cst_144 = arith.constant dense<0.000000e+00> : vector<64xf32>
    %347 = vector.multi_reduction <add>, %344, %cst_144 [1] : vector<64x128xf32> to vector<64xf32>
    %348 = vector.shape_cast %347 : vector<64xf32> to vector<64x1xf32>
    %cst_145 = arith.constant 1.280000e+02 : f32
    %349 = vector.broadcast %cst_145 : f32 to vector<64x1xf32>
    %350 = arith.divf %348, %349 : vector<64x1xf32>
    %351 = vector.broadcast %350 : vector<64x1xf32> to vector<64x128xf32>
    %352 = arith.subf %344, %351 : vector<64x128xf32>
    %353 = arith.mulf %352, %352 : vector<64x128xf32>
    %cst_146 = arith.constant dense<0.000000e+00> : vector<64xf32>
    %354 = vector.multi_reduction <add>, %353, %cst_146 [1] : vector<64x128xf32> to vector<64xf32>
    %355 = vector.shape_cast %354 : vector<64xf32> to vector<64x1xf32>
    %cst_147 = arith.constant 1.280000e+02 : f32
    %356 = vector.broadcast %cst_147 : f32 to vector<64x1xf32>
    %357 = arith.divf %355, %356 : vector<64x1xf32>
    %cst_148 = arith.constant 9.99999974E-6 : f32
    %358 = vector.broadcast %cst_148 : f32 to vector<64x1xf32>
    %359 = arith.addf %357, %358 : vector<64x1xf32>
    %360 = math.rsqrt %359 : vector<64x1xf32>
    %361 = vector.broadcast %360 : vector<64x1xf32> to vector<64x128xf32>
    %362 = arith.mulf %352, %361 : vector<64x128xf32>
    %363 = vector.broadcast %345 : vector<1x128xf32> to vector<64x128xf32>
    %364 = arith.mulf %362, %363 : vector<64x128xf32>
    %365 = vector.broadcast %346 : vector<1x128xf32> to vector<64x128xf32>
    %366 = arith.addf %364, %365 : vector<64x128xf32>
    %c0_149 = arith.constant 0 : index
    %c0_150 = arith.constant 0 : index
    %367 = vector.load %arg15[%c0_149, %c0_150] : memref<128x128xbf16, #tpu.memory_space<vmem>>, vector<128x128xbf16>
    %368 = arith.truncf %366 : vector<64x128xf32> to vector<64x128xbf16>
    %cst_151 = arith.constant dense<0.000000e+00> : vector<64x128xf32>
    %369 = tpu.matmul %368, %367, %cst_151 {dimension_numbers = #tpu.dot_dimension_numbers<[1], [0], [0], [1], [0, 0, 1, 1], [], []>} : vector<64x128xbf16>, vector<128x128xbf16>, vector<64x128xf32> -> vector<64x128xf32>
    %c0_152 = arith.constant 0 : index
    %c0_153 = arith.constant 0 : index
    %370 = vector.load %arg16[%c0_152, %c0_153] : memref<1x128xf32, #tpu.memory_space<vmem>>, vector<1x128xf32>
    %371 = vector.broadcast %370 : vector<1x128xf32> to vector<64x128xf32>
    %372 = arith.addf %369, %371 : vector<64x128xf32>
    %c0_154 = arith.constant 0 : index
    %c0_155 = arith.constant 0 : index
    %c0_156 = arith.constant 0 : index
    %373 = vector.load %arg17[%c0_154, %c0_155, %c0_156] : memref<1x64x128xf32, #tpu.memory_space<vmem>>, vector<1x64x128xf32>
    %374 = vector.shape_cast %373 : vector<1x64x128xf32> to vector<64x128xf32>
    %375 = vector.shape_cast %372 : vector<64x128xf32> to vector<1x64x128xf32>
    tpu.vector_store %arg17[%c0_154, %c0_155, %c0_156], %375 {strides = array<i32>} : memref<1x64x128xf32, #tpu.memory_space<vmem>>, vector<1x64x128xf32>,
    return
  }
  func.func @transform_0(%arg0: i32) -> (i32, i32, i32) {
    %c0_i32 = arith.constant 0 : i32
    %c0_i32_0 = arith.constant 0 : i32
    %c0_i32_1 = arith.constant 0 : i32
    return %arg0, %c0_i32, %c0_i32_0 : i32, i32, i32
  }
  func.func @transform_1(%arg0: i32) -> (i32, i32) {
    %c0_i32 = arith.constant 0 : i32
    %c0_i32_0 = arith.constant 0 : i32
    %c0_i32_1 = arith.constant 0 : i32
    return %c0_i32, %c0_i32_0 : i32, i32
  }
  func.func @transform_2(%arg0: i32) -> (i32, i32, i32) {
    %c0_i32 = arith.constant 0 : i32
    %c0_i32_0 = arith.constant 0 : i32
    %c0_i32_1 = arith.constant 0 : i32
    %c0_i32_2 = arith.constant 0 : i32
    return %c0_i32, %c0_i32_0, %c0_i32_1 : i32, i32, i32
  }
  func.func @transform_3(%arg0: i32) -> (i32, i32, i32) {
    %c0_i32 = arith.constant 0 : i32
    %c0_i32_0 = arith.constant 0 : i32
    %c0_i32_1 = arith.constant 0 : i32
    %c0_i32_2 = arith.constant 0 : i32
    return %c0_i32, %c0_i32_0, %c0_i32_1 : i32, i32, i32
  }
  func.func @transform_4(%arg0: i32) -> (i32, i32, i32) {
    %c0_i32 = arith.constant 0 : i32
    %c0_i32_0 = arith.constant 0 : i32
    %c0_i32_1 = arith.constant 0 : i32
    %c0_i32_2 = arith.constant 0 : i32
    return %c0_i32, %c0_i32_0, %c0_i32_1 : i32, i32, i32
  }
  func.func @transform_5(%arg0: i32) -> (i32, i32, i32) {
    %c0_i32 = arith.constant 0 : i32
    %c0_i32_0 = arith.constant 0 : i32
    %c0_i32_1 = arith.constant 0 : i32
    %c0_i32_2 = arith.constant 0 : i32
    return %c0_i32, %c0_i32_0, %c0_i32_1 : i32, i32, i32
  }
  func.func @transform_6(%arg0: i32) -> (i32, i32, i32) {
    %c0_i32 = arith.constant 0 : i32
    %c0_i32_0 = arith.constant 0 : i32
    %c0_i32_1 = arith.constant 0 : i32
    %c0_i32_2 = arith.constant 0 : i32
    return %c0_i32, %c0_i32_0, %c0_i32_1 : i32, i32, i32
  }
  func.func @transform_7(%arg0: i32) -> (i32, i32, i32) {
    %c0_i32 = arith.constant 0 : i32
    %c0_i32_0 = arith.constant 0 : i32
    %c0_i32_1 = arith.constant 0 : i32
    %c0_i32_2 = arith.constant 0 : i32
    return %c0_i32, %c0_i32_0, %c0_i32_1 : i32, i32, i32
  }
  func.func @transform_8(%arg0: i32) -> (i32, i32, i32) {
    %c0_i32 = arith.constant 0 : i32
    %c0_i32_0 = arith.constant 0 : i32
    %c0_i32_1 = arith.constant 0 : i32
    %c0_i32_2 = arith.constant 0 : i32
    return %c0_i32, %c0_i32_0, %c0_i32_1 : i32, i32, i32
  }
  func.func @transform_9(%arg0: i32) -> (i32, i32, i32) {
    %c0_i32 = arith.constant 0 : i32
    %c0_i32_0 = arith.constant 0 : i32
    %c0_i32_1 = arith.constant 0 : i32
    %c0_i32_2 = arith.constant 0 : i32
    return %c0_i32, %c0_i32_0, %c0_i32_1 : i32, i32, i32
  }
  func.func @transform_10(%arg0: i32) -> (i32, i32, i32) {
    %c0_i32 = arith.constant 0 : i32
    %c0_i32_0 = arith.constant 0 : i32
    %c0_i32_1 = arith.constant 0 : i32
    %c0_i32_2 = arith.constant 0 : i32
    return %c0_i32, %c0_i32_0, %c0_i32_1 : i32, i32, i32
  }
  func.func @transform_11(%arg0: i32) -> (i32, i32, i32) {
    %c0_i32 = arith.constant 0 : i32
    %c0_i32_0 = arith.constant 0 : i32
    %c0_i32_1 = arith.constant 0 : i32
    %c0_i32_2 = arith.constant 0 : i32
    return %c0_i32, %c0_i32_0, %c0_i32_1 : i32, i32, i32
  }
  func.func @transform_12(%arg0: i32) -> (i32, i32) {
    %c0_i32 = arith.constant 0 : i32
    %c0_i32_0 = arith.constant 0 : i32
    %c0_i32_1 = arith.constant 0 : i32
    return %c0_i32, %c0_i32_0 : i32, i32
  }
  func.func @transform_13(%arg0: i32) -> (i32, i32) {
    %c0_i32 = arith.constant 0 : i32
    %c0_i32_0 = arith.constant 0 : i32
    %c0_i32_1 = arith.constant 0 : i32
    return %c0_i32, %c0_i32_0 : i32, i32
  }
  func.func @transform_14(%arg0: i32) -> (i32, i32) {
    %c0_i32 = arith.constant 0 : i32
    %c0_i32_0 = arith.constant 0 : i32
    %c0_i32_1 = arith.constant 0 : i32
    return %c0_i32, %c0_i32_0 : i32, i32
  }
  func.func @transform_15(%arg0: i32) -> (i32, i32) {
    %c0_i32 = arith.constant 0 : i32
    %c0_i32_0 = arith.constant 0 : i32
    %c0_i32_1 = arith.constant 0 : i32
    return %c0_i32, %c0_i32_0 : i32, i32
  }
  func.func @transform_16(%arg0: i32) -> (i32, i32, i32) {
    %c0_i32 = arith.constant 0 : i32
    %c0_i32_0 = arith.constant 0 : i32
    %c0_i32_1 = arith.constant 0 : i32
    return %arg0, %c0_i32, %c0_i32_0 : i32, i32, i32
  }
}

</mosaic_0001>

<bundles_post_ra>
// kernel: gpt_forward.1
= control target key start
LH: loop header
LB: loop body
LE: loop exit
PB: predicated region body
PF: predicated region fallthrough
CT: control target
= control target key end

     0   :  { %s11920_s0 = inlined_call_operand.vmem [shape: f32[2,64,128], index: 0, kind: input, shape index: {}]   ;;  %s11921_s1 = inlined_call_operand.hbm [shape: f32[64,128], index: 1, kind: input, shape index: {}]   ;;  %s11922_s2 = inlined_call_operand.hbm [shape: f32[2,1,128], index: 2, kind: input, shape index: {}]   ;;  %s11923_s3 = inlined_call_operand.hbm [shape: f32[2,1,128], index: 3, kind: input, shape index: {}]   ;;  %s11924_s4 = inlined_call_operand.hbm [shape: bf16[2,128,384], index: 4, kind: input, shape index: {}]   ;;  %s11925_s5 = inlined_call_operand.vmem [shape: bf16[2,128,128], index: 5, kind: input, shape index: {}]   ;;  %s11926_s6 = inlined_call_operand.hbm [shape: f32[2,1,128], index: 6, kind: input, shape index: {}]   ;;  %s11927_s7 = inlined_call_operand.hbm [shape: f32[2,1,128], index: 7, kind: input, shape index: {}]   ;;  %s11928_s8 = inlined_call_operand.vmem [shape: bf16[2,128,512], index: 8, kind: input, shape index: {}]   ;;  %s11929_s9 = inlined_call_operand.hbm [shape: f32[2,1,512], index: 9, kind: input, shape index: {}]   ;;  %s11930_s10 = inlined_call_operand.vmem [shape: bf16[2,512,128], index: 10, kind: input, shape index: {}]   ;;  %s11931_s11 = inlined_call_operand.hbm [shape: f32[2,1,128], index: 11, kind: input, shape index: {}]   ;;  %s11932_s12 = inlined_call_operand.hbm [shape: f32[1,128], index: 12, kind: input, shape index: {}]   ;;  %s11933_s13 = inlined_call_operand.hbm [shape: f32[1,128], index: 13, kind: input, shape index: {}]   ;;  %s11934_s14 = inlined_call_operand.vmem [shape: bf16[128,128], index: 14, kind: input, shape index: {}]   ;;  %s11935_s15 = inlined_call_operand.hbm [shape: f32[1,128], index: 15, kind: input, shape index: {}]   ;;  %s11936_s16 = inlined_call_operand.hbm [shape: f32[2,64,128], index: 16, kind: output, shape index: {}]  }
   0x1   :  { %11976 = sst [smem:[#allocation43_spill]] %s11920_s0 }
   0x2   :  { %11977 = sst [smem:[#allocation44_spill]] %s11922_s2 }
   0x3   :  { %11978 = sst [smem:[#allocation45_spill]] %s11924_s4 }
   0x4   :  { %11979 = sst [smem:[#allocation46_spill]] %s11927_s7 }
   0x5   :  { %11980 = sst [smem:[#allocation47_spill]] %s11934_s14 }
   0x6   :  { %11981 = sst [smem:[#allocation48_spill]] %s11936_s16 }
   0x7   :  { %21 = vsyncpa [#allocation3], 0 }
   0x8   :  { %22 = vsyncpa [#allocation6], 0 }
   0x9   :  { %23 = vsyncpa [#allocation9], 0 }
   0xa   :  { %24 = vsyncpa [#allocation12], 0 }
   0xb   :  { %25 = vsyncpa [#allocation15], 0 }
   0xc   :  { %26 = vsyncpa [#allocation18], 0 }
   0xd   :  { %27 = vsyncpa [#allocation4], 0 }
   0xe   :  { %29 = vsyncpa [#allocation4 + $0x1], 0  ;;  %s9369_s21 = smov 0   ;;  %s9371_s22 = smov 0  }
   0xf   :  { %s9373_s23 = smov 0   ;;  %s9375_s24 = smov 0  }
  0x10 LB: > { %11982 = sst [smem:[#allocation28_spill]] %s9244_s21  ;;  %s9390_s25 = sadd.s32 4294967295, %s9256_s24   ;;  %s9256_s24 = sphi %s9375_s24, %s12080_s24   ;;  %s9252_s23 = sphi %s9373_s23, %s12083_s23   ;;  %s9248_s22 = sphi %s9371_s22, %s12082_s22   ;;  %s9244_s21 = sphi %s9369_s21, %s12081_s21  }
  0x11   : > { %11983 = sst [smem:[#allocation29_spill]] %s9248_s22  ;;  %s6813_s26 = sadd.s32 4294967294, %s9256_s24  }
  0x12   : > { %11984 = sst [smem:[#allocation30_spill]] %s9252_s23  ;;  %s9394_s27 = sadd.s32 1, %s9256_s24  }
  0x13   : > { %11985 = sst [smem:[#allocation31_spill]] %s9256_s24  ;;  %s383_s28 = sadd.s32 1, %s9252_s23 }
  0x14   : > { %11986 = sst [smem:[#allocation32_spill]] %s9394_s27  ;;  %s380_s29 = ssub.s32 %s9256_s24, %s9394_s27 }
  0x15   : > { %p393_p0 = scmp.ne.s32.totalorder %s9252_s23, %s9248_s22  ;;  %p381_p1 = scmp.eq.s32.totalorder %s380_s29, 0 }
  0x16   : > { %p394_p2 = scmp.eq.s32.totalorder %s9390_s25, 1  ;;  %p399_p3 = scmp.ne.s32.totalorder %s9248_s22, %s9244_s21 }
  0x17   : > { %p400_p4 = scmp.eq.s32.totalorder %s6813_s26, 1  ;;  %p6814_p7 = scmp.ge.s32.totalorder %s9256_s24, 1 }
  0x18   : > { %s9405_s30 = scalar_select %p381_p1, %s9252_s23, %s383_s28  }
  0x19   : > { %p9407_p5 = por %p394_p2, %p393_p0  ;;  %p9411_p6 = por %p400_p4, %p399_p3 }
  0x1a   : > { %11987 = sst [smem:[#allocation33_spill]] %s9405_s30  ;;  %p407_p8 = scmp.lt.s32.totalorder %s9256_s24, 3 }
  0x1b   : > { %s11988_s0 = scalar_select %p9407_p5, 1, 0 }
  0x1c   : > { %s11990_s17 = scalar_select %p9411_p6, 1, 0 }
  0x1d   : > { %11989 = sst [smem:[#allocation34_spill]] %s11988_s0  ;;  %p11943_p9 = scmp.eq.s32.totalorder %s9390_s25, 0 }
  0x1e   : > { %11991 = sst [smem:[#allocation35_spill]] %s11990_s17  ;;  %p9418_p10 = pnand %p6814_p7, %p407_p8 }
  0x1f   : > { %s9258_s19 = smov [#allocation5]   ;;  %s9259_s28 = smov [#allocation8]  }
  0x20   : > { %s11992_s18 = scalar_select %p9418_p10, 1, 0 }
  0x21   : > { %s432_s20 = sshll.u32 %s9258_s19, 4  ;;  %p8040_p11 = pneg %p9418_p10  ;;  %s433_s20 = int_to_ptr.vmem [resolvable:$true] %s432_s20 }
  0x22   : > { %s458_s29 = sshll.u32 %s9259_s28, 4  ;;  %s11994_s2 = sld [smem:[#allocation44_spill]]  ;;  %s9430_s29 = int_to_ptr.vmem [resolvable:$true] %s458_s29 }
  0x23   : > { %p9426_p12 = pnand %p11943_p9, %p8040_p11 }
  0x25   : > { %p9440_p0 = pneg %p9426_p12 }
  0x28   : > { %s8862_s27 = scalar_lea.hbm %s11994_s2, 32 }
  0x29   : > { %p8863_p13 = scmp.ne.s32.totalorder %s11994_s2, %s8862_s27  ;;  %p8869_p3 = scmp.lt.u32.totalorder %s8862_s27, %s11994_s2 }
  0x2b   : > { %p8865_p1 = pnand %p9440_p0, %p8863_p13 }
  0x2d   : > { %p8866_p2 = pneg %p8865_p1 }
  0x2f   : > { %p8871_p4 = pnand %p8869_p3, %p8866_p2 }
  0x31   : > { %8874 = shalt.err (!%p8871_p4)
}
  0x32   : > { %s8875_s23 = scalar_lea.vmem %s433_s20, 32  ;;  %p8883_p9 = scmp.lt.s32.totalorder %s433_s20, %s433_s20 }
  0x33   : > { %p8876_p7 = scmp.ne.s32.totalorder %s433_s20, %s8875_s23  ;;  %p8884_p6 = scmp.lt.s32.totalorder %s8875_s23, %s8875_s23 }
  0x35   : > { %p8878_p8 = pnand %p8876_p7, %p9440_p0  ;;  %p8885_p5 = por %p8884_p6, %p8883_p9 }
  0x37   : > { %p8879_p11 = pneg %p8878_p8 }
  0x39   : > { %p8886_p10 = pnand %p8885_p5, %p8879_p11 }
  0x3b   : > { %8889 = shalt.err (!%p8886_p10)
}
  0x3c   : > { %s11952_s21 = smov 16   ;;  %s11954_s30 = smov 1  }
  0x3d   : > { %8046 = dma.hbm_to_vmem [thread:$0]  (!%p9426_p12), %s11994_s2, 32, %s433_s20, [#allocation6], %s11952_s21, %s11952_s21, %s11954_s30  }
  0x3e   : > { %s11996_s4 = sld [smem:[#allocation45_spill]] }
  0x44   : > { %s8890_s16 = scalar_lea.hbm %s11996_s4, 6144 }
  0x45   : > { %p8891_p5 = scmp.ne.s32.totalorder %s11996_s4, %s8890_s16  ;;  %p8897_p10 = scmp.lt.u32.totalorder %s8890_s16, %s11996_s4 }
  0x47   : > { %p8893_p6 = pnand %p8891_p5, %p9440_p0 }
  0x49   : > { %p8894_p9 = pneg %p8893_p6 }
  0x4b   : > { %p8899_p13 = pnand %p8897_p10, %p8894_p9 }
  0x4d   : > { %8902 = shalt.err (!%p8899_p13)
}
  0x4e   : > { %s8903_s20 = scalar_lea.vmem %s9430_s29, 6144  ;;  %p8911_p4 = scmp.lt.s32.totalorder %s9430_s29, %s9430_s29 }
  0x4f   : > { %p8904_p1 = scmp.ne.s32.totalorder %s9430_s29, %s8903_s20  ;;  %p8912_p7 = scmp.lt.s32.totalorder %s8903_s20, %s8903_s20 }
  0x51   : > { %p8906_p2 = pnand %p8904_p1, %p9440_p0  ;;  %p8913_p8 = por %p8912_p7, %p8911_p4 }
  0x53   : > { %p8907_p3 = pneg %p8906_p2 }
  0x55   : > { %p8914_p11 = pnand %p8913_p8, %p8907_p3 }
  0x57   : > { %8917 = shalt.err (!%p8914_p11)
}
  0x58   : > { %s9262_s0 = smov 192   ;;  %s9263_s14 = smov 12  }
  0x59   : > { %8052 = dma.hbm_to_vmem [thread:$0]  (!%p9426_p12), %s11996_s4, 6144, %s9430_s29, [#allocation9], %s9262_s0, %s9262_s0, %s9263_s14  }
  0x5a   : > { %s9264_s24 = smov [#allocation11]   ;;  %s9265_s17 = smov [#allocation14]  }
  0x5b   : > { %s487_s27 = sshll.u32 %s9264_s24, 4  ;;  %s519_s28 = sshll.u32 %s9265_s17, 4  ;;  %s488_s27 = int_to_ptr.vmem [resolvable:$true] %s487_s27  ;;  %s9482_s28 = int_to_ptr.vmem [resolvable:$true] %s519_s28 }
  0x5c   : > { %s11997_s7 = sld [smem:[#allocation46_spill]] }
  0x62   : > { %s8918_s21 = scalar_lea.hbm %s11997_s7, 32 }
  0x63   : > { %p8919_p5 = scmp.ne.s32.totalorder %s11997_s7, %s8918_s21  ;;  %p8925_p10 = scmp.lt.u32.totalorder %s8918_s21, %s11997_s7 }
  0x65   : > { %p8921_p6 = pnand %p8919_p5, %p9440_p0 }
  0x67   : > { %p8922_p9 = pneg %p8921_p6 }
  0x69   : > { %p8927_p13 = pnand %p8925_p10, %p8922_p9 }
  0x6b   : > { %8930 = shalt.err (!%p8927_p13)
}
  0x6c   : > { %s8931_s0 = scalar_lea.vmem %s488_s27, 32  ;;  %p8939_p4 = scmp.lt.s32.totalorder %s488_s27, %s488_s27 }
  0x6d   : > { %p8932_p1 = scmp.ne.s32.totalorder %s488_s27, %s8931_s0  ;;  %p8940_p7 = scmp.lt.s32.totalorder %s8931_s0, %s8931_s0 }
  0x6f   : > { %p8934_p2 = pnand %p8932_p1, %p9440_p0  ;;  %p8941_p8 = por %p8940_p7, %p8939_p4 }
  0x71   : > { %p8935_p3 = pneg %p8934_p2 }
  0x73   : > { %p8942_p11 = pnand %p8941_p8, %p8935_p3 }
  0x75   : > { %8945 = shalt.err (!%p8942_p11)
}
  0x76   : > { %s11998_s2 = smov 1   ;;  %s11999_s30 = smov 16  }
  0x77   : > { %8058 = dma.hbm_to_vmem [thread:$0]  (!%p9426_p12), %s11997_s7, 32, %s488_s27, [#allocation12], %s11999_s30, %s11999_s30, %s11998_s2  }
  0x78   : > { %s8946_s17 = scalar_lea.hbm %s11931_s11, 32 }
  0x79   : > { %p8947_p5 = scmp.ne.s32.totalorder %s11931_s11, %s8946_s17  ;;  %p8953_p10 = scmp.lt.u32.totalorder %s8946_s17, %s11931_s11 }
  0x7b   : > { %p8949_p6 = pnand %p8947_p5, %p9440_p0 }
  0x7d   : > { %p8950_p9 = pneg %p8949_p6 }
  0x7f   : > { %p8955_p13 = pnand %p8953_p10, %p8950_p9 }
  0x81   : > { %8958 = shalt.err (!%p8955_p13)
}
  0x82   : > { %s8959_s27 = scalar_lea.vmem %s9482_s28, 32  ;;  %p8967_p4 = scmp.lt.s32.totalorder %s9482_s28, %s9482_s28 }
  0x83   : > { %p8960_p1 = scmp.ne.s32.totalorder %s9482_s28, %s8959_s27  ;;  %p8968_p7 = scmp.lt.s32.totalorder %s8959_s27, %s8959_s27 }
  0x85   : > { %p8962_p2 = pnand %p8960_p1, %p9440_p0  ;;  %p8969_p8 = por %p8968_p7, %p8967_p4 }
  0x87   : > { %p8963_p3 = pneg %p8962_p2 }
  0x89   : > { %p8970_p11 = pnand %p8969_p8, %p8963_p3 }
  0x8b   : > { %8973 = shalt.err (!%p8970_p11)
}
  0x8c   : > { %8064 = dma.hbm_to_vmem [thread:$0]  (!%p9426_p12), %s11931_s11, 32, %s9482_s28, [#allocation15], %s11999_s30, %s11999_s30, %s11998_s2  }
  0x8d   : > { %s9266_s21 = smov [#allocation17]   ;;  %s9267_s24 = smov [#allocation2]  }
  0x8e   : > { %s544_s22 = sshll.u32 %s9266_s21, 4  ;;  %s419_s17 = sshll.u32 %s9267_s24, 4  ;;  %s545_s22 = int_to_ptr.vmem [resolvable:$true] %s544_s22  ;;  %s9531_s17 = int_to_ptr.vmem [resolvable:$true] %s419_s17 }
  0x8f   : > { %s8974_s16 = scalar_lea.hbm %s11933_s13, 16 }
  0x90   : > { %p8975_p5 = scmp.ne.s32.totalorder %s11933_s13, %s8974_s16  ;;  %p8981_p10 = scmp.lt.u32.totalorder %s8974_s16, %s11933_s13 }
  0x92   : > { %p8977_p6 = pnand %p8975_p5, %p9440_p0 }
  0x94   : > { %p8978_p9 = pneg %p8977_p6 }
  0x96   : > { %p8983_p13 = pnand %p8981_p10, %p8978_p9 }
  0x98   : > { %8986 = shalt.err (!%p8983_p13)
}
  0x99   : > { %s8987_s14 = scalar_lea.vmem %s545_s22, 16  ;;  %s8994_s21 = scalar_lea.vmem %s545_s22, 32 }
  0x9a   : > { %p8988_p1 = scmp.ne.s32.totalorder %s545_s22, %s8987_s14  ;;  %p8995_p4 = scmp.lt.s32.totalorder %s545_s22, %s545_s22 }
  0x9b   : > { %p8996_p7 = scmp.lt.s32.totalorder %s8994_s21, %s8987_s14 }
  0x9c   : > { %p8990_p2 = pnand %p8988_p1, %p9440_p0 }
  0x9d   : > { %p8997_p8 = por %p8996_p7, %p8995_p4 }
  0x9e   : > { %p8991_p3 = pneg %p8990_p2 }
  0xa0   : > { %p8998_p11 = pnand %p8997_p8, %p8991_p3 }
  0xa2   : > { %9001 = shalt.err (!%p8998_p11)
}
  0xa3   : > { %8070 = dma.hbm_to_vmem [thread:$0]  (!%p9426_p12), %s11933_s13, 16, %s545_s22, [#allocation18]  }
  0xa4   : > { %s9002_s29 = scalar_lea.hbm %s11921_s1, 1024 }
  0xa5   : > { %p9003_p5 = scmp.ne.s32.totalorder %s11921_s1, %s9002_s29  ;;  %p9009_p10 = scmp.lt.u32.totalorder %s9002_s29, %s11921_s1 }
  0xa7   : > { %p9005_p6 = pnand %p9003_p5, %p9440_p0 }
  0xa9   : > { %p9006_p9 = pneg %p9005_p6 }
  0xab   : > { %p9011_p13 = pnand %p9009_p10, %p9006_p9 }
  0xad   : > { %9014 = shalt.err (!%p9011_p13)
}
  0xae   : > { %s9015_s22 = scalar_lea.vmem %s9531_s17, 1024  ;;  %p9023_p4 = scmp.lt.s32.totalorder %s9531_s17, %s9531_s17 }
  0xaf   : > { %p9016_p1 = scmp.ne.s32.totalorder %s9531_s17, %s9015_s22  ;;  %p9024_p7 = scmp.lt.s32.totalorder %s9015_s22, %s9015_s22 }
  0xb1   : > { %p9018_p2 = pnand %p9016_p1, %p9440_p0  ;;  %p9025_p8 = por %p9024_p7, %p9023_p4 }
  0xb3   : > { %p9019_p3 = pneg %p9018_p2 }
  0xb5   : > { %p9026_p11 = pnand %p9025_p8, %p9019_p3 }
  0xb7   : > { %9029 = shalt.err (!%p9026_p11)
}
  0xb8   : > { %s9268_s21 = smov 128   ;;  %s9269_s24 = smov 8  }
  0xb9   : > { %8043 = dma.hbm_to_vmem [thread:$0]  (!%p9426_p12), %s11921_s1, 1024, %s9531_s17, [#allocation3], %s9268_s21, %s9268_s21, %s9269_s24  }
  0xba   : > { %s9270_s16 = smov [#allocation7]   ;;  %s9271_s27 = smov [#allocation10]  }
  0xbb   : > { %s445_s29 = sshll.u32 %s9270_s16, 4  ;;  %s474_s0 = sshll.u32 %s9271_s27, 4  ;;  %s446_s29 = int_to_ptr.vmem [resolvable:$true] %s445_s29  ;;  %s9574_s0 = int_to_ptr.vmem [resolvable:$true] %s474_s0 }
  0xbc   : > { %s9030_s22 = scalar_lea.hbm %s11923_s3, 32 }
  0xbd   : > { %p9031_p5 = scmp.ne.s32.totalorder %s11923_s3, %s9030_s22  ;;  %p9037_p10 = scmp.lt.u32.totalorder %s9030_s22, %s11923_s3 }
  0xbf   : > { %p9033_p6 = pnand %p9031_p5, %p9440_p0 }
  0xc1   : > { %p9034_p9 = pneg %p9033_p6 }
  0xc3   : > { %p9039_p13 = pnand %p9037_p10, %p9034_p9 }
  0xc5   : > { %9042 = shalt.err (!%p9039_p13)
}
  0xc6   : > { %s9043_s21 = scalar_lea.vmem %s446_s29, 32  ;;  %p9051_p4 = scmp.lt.s32.totalorder %s446_s29, %s446_s29 }
  0xc7   : > { %p9044_p1 = scmp.ne.s32.totalorder %s446_s29, %s9043_s21  ;;  %p9052_p7 = scmp.lt.s32.totalorder %s9043_s21, %s9043_s21 }
  0xc9   : > { %p9046_p2 = pnand %p9044_p1, %p9440_p0  ;;  %p9053_p8 = por %p9052_p7, %p9051_p4 }
  0xcb   : > { %p9047_p3 = pneg %p9046_p2 }
  0xcd   : > { %p9054_p11 = pnand %p9053_p8, %p9047_p3 }
  0xcf   : > { %9057 = shalt.err (!%p9054_p11)
}
  0xd0   : > { %8049 = dma.hbm_to_vmem [thread:$0]  (!%p9426_p12), %s11923_s3, 32, %s446_s29, [#allocation6], %s11999_s30, %s11999_s30, %s11998_s2  }
  0xd1   : > { %s9058_s16 = scalar_lea.hbm %s11926_s6, 32 }
  0xd2   : > { %p9059_p5 = scmp.ne.s32.totalorder %s11926_s6, %s9058_s16  ;;  %p9065_p10 = scmp.lt.u32.totalorder %s9058_s16, %s11926_s6 }
  0xd4   : > { %p9061_p6 = pnand %p9059_p5, %p9440_p0 }
  0xd6   : > { %p9062_p9 = pneg %p9061_p6 }
  0xd8   : > { %p9067_p13 = pnand %p9065_p10, %p9062_p9 }
  0xda   : > { %9070 = shalt.err (!%p9067_p13)
}
  0xdb   : > { %s9071_s29 = scalar_lea.vmem %s9574_s0, 32  ;;  %p9079_p4 = scmp.lt.s32.totalorder %s9574_s0, %s9574_s0 }
  0xdc   : > { %p9072_p1 = scmp.ne.s32.totalorder %s9574_s0, %s9071_s29  ;;  %p9080_p7 = scmp.lt.s32.totalorder %s9071_s29, %s9071_s29 }
  0xde   : > { %p9074_p2 = pnand %p9072_p1, %p9440_p0  ;;  %p9081_p8 = por %p9080_p7, %p9079_p4 }
  0xe0   : > { %p9075_p3 = pneg %p9074_p2 }
  0xe2   : > { %p9082_p11 = pnand %p9081_p8, %p9075_p3 }
  0xe4   : > { %9085 = shalt.err (!%p9082_p11)
}
  0xe5   : > { %8055 = dma.hbm_to_vmem [thread:$0]  (!%p9426_p12), %s11926_s6, 32, %s9574_s0, [#allocation9], %s11999_s30, %s11999_s30, %s11998_s2  }
  0xe6   : > { %s9272_s21 = smov [#allocation13]   ;;  %s9086_s20 = scalar_lea.hbm %s11929_s9, 128 }
  0xe7   : > { %s503_s4 = sshll.u32 %s9272_s21, 4  ;;  %p9087_p5 = scmp.ne.s32.totalorder %s11929_s9, %s9086_s20  ;;  %s504_s4 = int_to_ptr.vmem [resolvable:$true] %s503_s4 }
  0xe8   : > { %p9093_p10 = scmp.lt.u32.totalorder %s9086_s20, %s11929_s9 }
  0xe9   : > { %p9089_p6 = pnand %p9087_p5, %p9440_p0 }
  0xeb   : > { %p9090_p9 = pneg %p9089_p6 }
  0xed   : > { %p9095_p13 = pnand %p9093_p10, %p9090_p9 }
  0xef   : > { %9098 = shalt.err (!%p9095_p13)
}
  0xf0   : > { %s9099_s2 = scalar_lea.vmem %s504_s4, 128  ;;  %p9107_p4 = scmp.lt.s32.totalorder %s504_s4, %s504_s4 }
  0xf1   : > { %p9100_p1 = scmp.ne.s32.totalorder %s504_s4, %s9099_s2  ;;  %p9108_p7 = scmp.lt.s32.totalorder %s9099_s2, %s9099_s2 }
  0xf3   : > { %p9102_p2 = pnand %p9100_p1, %p9440_p0  ;;  %p9109_p8 = por %p9108_p7, %p9107_p4 }
  0xf5   : > { %p9103_p3 = pneg %p9102_p2 }
  0xf7   : > { %p9110_p11 = pnand %p9109_p8, %p9103_p3 }
  0xf9   : > { %9113 = shalt.err (!%p9110_p11)
}
  0xfa   : > { %s9273_s30 = smov 64   ;;  %s9274_s0 = smov 4  }
  0xfb   : > { %8061 = dma.hbm_to_vmem [thread:$0]  (!%p9426_p12), %s11929_s9, 128, %s504_s4, [#allocation12], %s9273_s30, %s9273_s30, %s9274_s0  }
  0xfc   : > { %s9275_s23 = smov [#allocation16]   ;;  %s9276_s21 = smov [#allocation19]  }
  0xfd   : > { %s533_s17 = sshll.u32 %s9275_s23, 4  ;;  %s558_s7 = sshll.u32 %s9276_s21, 4  ;;  %s534_s17 = int_to_ptr.vmem [resolvable:$true] %s533_s17  ;;  %s559_s7 = int_to_ptr.vmem [resolvable:$true] %s558_s7 }
  0xfe   : > { %s9114_s16 = scalar_lea.hbm %s11932_s12, 16 }
  0xff   : > { %p9115_p5 = scmp.ne.s32.totalorder %s11932_s12, %s9114_s16  ;;  %p9121_p10 = scmp.lt.u32.totalorder %s9114_s16, %s11932_s12 }
 0x101   : > { %p9117_p6 = pnand %p9115_p5, %p9440_p0 }
 0x103   : > { %p9118_p9 = pneg %p9117_p6 }
 0x105   : > { %p9123_p13 = pnand %p9121_p10, %p9118_p9 }
 0x107   : > { %9126 = shalt.err (!%p9123_p13)
}
 0x108   : > { %s9127_s4 = scalar_lea.vmem %s534_s17, 16  ;;  %s9134_s30 = scalar_lea.vmem %s534_s17, 32 }
 0x109   : > { %p9128_p1 = scmp.ne.s32.totalorder %s534_s17, %s9127_s4  ;;  %p9135_p4 = scmp.lt.s32.totalorder %s534_s17, %s534_s17 }
 0x10a   : > { %p9136_p7 = scmp.lt.s32.totalorder %s9134_s30, %s9127_s4 }
 0x10b   : > { %p9130_p2 = pnand %p9128_p1, %p9440_p0 }
 0x10c   : > { %p9137_p8 = por %p9136_p7, %p9135_p4 }
 0x10d   : > { %p9131_p3 = pneg %p9130_p2 }
 0x10f   : > { %p9138_p11 = pnand %p9137_p8, %p9131_p3 }
 0x111   : > { %9141 = shalt.err (!%p9138_p11)
}
 0x112   : > { %8067 = dma.hbm_to_vmem [thread:$0]  (!%p9426_p12), %s11932_s12, 16, %s534_s17, [#allocation15]  }
 0x113   : > { %s9142_s21 = scalar_lea.hbm %s11935_s15, 16 }
 0x114   : > { %p9143_p5 = scmp.ne.s32.totalorder %s11935_s15, %s9142_s21  ;;  %p9149_p10 = scmp.lt.u32.totalorder %s9142_s21, %s11935_s15 }
 0x116   : > { %p9145_p6 = pnand %p9143_p5, %p9440_p0 }
 0x118   : > { %p9146_p9 = pneg %p9145_p6 }
 0x11a   : > { %p9151_p13 = pnand %p9149_p10, %p9146_p9 }
 0x11c   : > { %9154 = shalt.err (!%p9151_p13)
}
 0x11d   : > { %s9155_s28 = scalar_lea.vmem %s559_s7, 16  ;;  %s9162_s17 = scalar_lea.vmem %s559_s7, 32 }
 0x11e   : > { %p9156_p1 = scmp.ne.s32.totalorder %s559_s7, %s9155_s28  ;;  %p9163_p4 = scmp.lt.s32.totalorder %s559_s7, %s559_s7 }
 0x11f   : > { %p9164_p7 = scmp.lt.s32.totalorder %s9162_s17, %s9155_s28 }
 0x120   : > { %p9158_p2 = pnand %p9156_p1, %p9440_p0 }
 0x121   : > { %p9165_p8 = por %p9164_p7, %p9163_p4 }
 0x122   : > { %p9159_p3 = pneg %p9158_p2 }
 0x124   : > { %p9166_p11 = pnand %p9165_p8, %p9159_p3 }
 0x126   : > { %9169 = shalt.err (!%p9166_p11)
}
 0x127   : > { %8073 = dma.hbm_to_vmem [thread:$0]  (!%p9426_p12), %s11935_s15, 16, %s559_s7, [#allocation18]  }
 0x128   : > { %p12000_p5 = scmp.ne.s32.totalorder %s11992_s18, 0 }
 0x12a   : > { %579 = sbr.rel (%p12000_p5) target bundleno = 8957 (0x22fd), region = 84 }
 0x131   : > { %p12001_p6 = scmp.eq.s32.totalorder %s9390_s25, 0 }
 0x133   : > { %9215 = dma.done.wait (%p12001_p6), [#allocation3], 1024   ;;  %p12002_p0 = pmov %p12001_p6 }
 0x135   : > { %9217 = vsyncadd (%p12002_p0), [#allocation3], 4294966272  ;;  %p12003_p9 = pmov %p12002_p0 }
 0x136   : > { %p12004_p10 = pmov %p12002_p0 }
 0x137   : > { %9219 = dma.done.wait (%p12003_p9), [#allocation6], 64  }
 0x138   : > { %9221 = vsyncadd (%p12004_p10), [#allocation6], 4294967232  ;;  %p12005_p13 = pmov %p12002_p0 }
 0x139   : > { %p12006_p12 = pmov %p12002_p0 }
 0x13a   : > { %9223 = dma.done.wait (%p12005_p13), [#allocation9], 6176  }
 0x13b   : > { %9225 = vsyncadd (%p12006_p12), [#allocation9], 4294961120  ;;  %p12007_p1 = pmov %p12002_p0 }
 0x13c   : > { %p12008_p2 = pmov %p12002_p0 }
 0x13d   : > { %9227 = dma.done.wait (%p12007_p1), [#allocation12], 160  }
 0x13e   : > { %9229 = vsyncadd (%p12008_p2), [#allocation12], 4294967136  ;;  %p12009_p3 = pmov %p12002_p0 }
 0x13f   : > { %p12010_p4 = pmov %p12002_p0 }
 0x140   : > { %9231 = dma.done.wait (%p12009_p3), [#allocation15], 48  }
 0x141   : > { %9233 = vsyncadd (%p12010_p4), [#allocation15], 4294967248  ;;  %p12011_p7 = pmov %p12002_p0 }
 0x142   : > { %p12012_p8 = pmov %p12002_p0 }
 0x143   : > { %9235 = dma.done.wait (%p12011_p7), [#allocation18], 32  }
 0x144   : > { %9237 = vsyncadd (%p12012_p8), [#allocation18], 4294967264  ;;  %p669_p11 = scmp.lt.s32.totalorder %s9390_s25, 1  ;;  %s12013_s4 = sld [smem:[#allocation43_spill]]  ;;  %v683_v1 = vld [vmem:[#allocation2] sm:$0xff]  ;;  %v685_v4 = vld [vmem:[#allocation2 + $0x10] sm:$0xff] }
 0x145   : > { %v684_v6 = vld [vmem:[#allocation2 + $0x8] sm:$0xff]  ;;  %v686_v9 = vld [vmem:[#allocation2 + $0x18] sm:$0xff]  ;;  %v687_v13 = vld [vmem:[#allocation2 + $0x20] sm:$0xff]  ;;  %vm1151_vm0 = vcmask 261120   ;;  %vm1257_vm2 = vcmask 523264   ;;  %s9278_s0 = smov 96  }
 0x146   : > { %s670_s18 = scalar_select %p669_p11, %s9390_s25, 1  ;;  %v688_v15 = vld [vmem:[#allocation2 + $0x28] sm:$0xff]  ;;  %v689_v17 = vld [vmem:[#allocation2 + $0x30] sm:$0xff]  ;;  %v690_v20 = vld [vmem:[#allocation2 + $0x38] sm:$0xff]  ;;  %vm2457_vm10 = vcmask 785408  }
 0x147   : > { %v8278_v24 = vld [vmem:[#allocation8 + $0x4] ss:$12 sps:$4 sm:$0xff]   ;;  %v8280_v25 = vld [vmem:[#allocation8] ss:$12 sps:$4 sm:$0xff]   ;;  %v8281_v26 = vld [vmem:[#allocation8 + $0x1c] ss:$12 sps:$4 sm:$0xff]  }
 0x148   : > { %s7236_s26 = sshll.u32 %s670_s18, 6  ;;  %v8283_v27 = vld [vmem:[#allocation8 + $0x8] ss:$12 sps:$4 sm:$0xff]   ;;  %1001 = vmatprep.subr.bf16.mxu0 %v8278_v24  ;;  %v8284_v60 = vld [vmem:[#allocation8 + $0x18] ss:$12 sps:$4 sm:$0xff]   ;;  %s9279_s22 = smov 64  }
 0x149   : > { %1002 = vmatpush1.bf16.msra.mxu0 %v8280_v25  ;;  %7586 = vmatprep.subr.bf16.mxu1 %v8283_v27  ;;  %v8285_v61 = vld [vmem:[#allocation8 + $0x34] ss:$12 sps:$4 sm:$0xff]   ;;  %v8288_v63 = vld [vmem:[#allocation8 + $0x30] ss:$12 sps:$4 sm:$0xff]   ;;  %s9280_s29 = smov 32   ;;  %s12070_s7 = sld [smem:[#allocation47_spill]] }
 0x14a   : > { %s673_s30 = scalar_lea.vmem %s12013_s4, %s7236_s26  ;;  %1003 = vmatprep.subr.bf16.mxu0 %v8281_v26  ;;  %7587 = vmatpush3.bf16.msra.mxu1 %v8283_v27  ;;  %v8287_v62 = vld [vmem:[#allocation8 + $0x20] ss:$12 sps:$4 sm:$0xff]   ;;  %v8309_v24 = vld [vmem:[#allocation8 + $0xb0] ss:$12 sps:$4 sm:$0xff]   ;;  %s12071_s2 = sld [smem:[#allocation29_spill]] }
 0x14b   : > { %v675_v0 = vld [vmem:[%s673_s30] sm:$0xff]  ;;  %v677_v2 = vld [vmem:[%s673_s30 + $0x10] sm:$0xff]  ;;  %v676_v5 = vld [vmem:[%s673_s30 + $0x8] sm:$0xff]  ;;  %7588 = vmatprep.subr.bf16.mxu1 %v8287_v62  ;;  %s12073_s23 = sld [smem:[#allocation48_spill]]  ;;  %s9281_s16 = smov [#allocation20]  }
 0x14c   : > { %v9708_v3 = vadd.f32 %v683_v1, %v675_v0  ;;  %v9710_v7 = vadd.f32 %v685_v4, %v677_v2  ;;  %v678_v8 = vld [vmem:[%s673_s30 + $0x18] sm:$0xff]  ;;  %v9713_v10 = vadd.f32 %v684_v6, %v676_v5  ;;  %v679_v12 = vld [vmem:[%s673_s30 + $0x20] sm:$0xff]  ;;  %v680_v14 = vld [vmem:[%s673_s30 + $0x28] sm:$0xff]  ;;  %s9174_s27 = sshll.u32 %s9281_s16, 4  ;;  %s9175_s27 = int_to_ptr.vmem [resolvable:$false] %s9174_s27 }
 0x14d   : > { %v9716_v11 = vadd.f32 %v686_v9, %v678_v8  ;;  %v681_v16 = vld [vmem:[%s673_s30 + $0x30] sm:$0xff]  ;;  %v9719_v18 = vadd.f32 %v687_v13, %v679_v12  ;;  %v682_v19 = vld [vmem:[%s673_s30 + $0x38] sm:$0xff]  ;;  %v9722_v21 = vadd.f32 %v688_v15, %v680_v14  ;;  %1004 = vmatpush1.bf16.msra.mxu0 %v8284_v60  ;;  %v8297_v8 = vld [vmem:[#allocation8 + $0x7c] ss:$12 sps:$4 sm:$0xff]   ;;  %s12072_s30 = sld [smem:[#allocation34_spill]]  ;;  %s9176_s28 = scalar_lea.vmem %s9175_s27, 2048 }
 0x14e   : > { %720 = vadd.xlane.f32.xlu0 %v9708_v3  ;;  %724 = vadd.xlane.f32.xlu1 %v9710_v7  ;;  %v9725_v22 = vadd.f32 %v689_v17, %v681_v16  ;;  %v9728_v23 = vadd.f32 %v690_v20, %v682_v19  ;;  %v8289_v0 = vld [vmem:[#allocation8 + $0x4c] ss:$12 sps:$4 sm:$0xff]   ;;  %v8292_v2 = vld [vmem:[#allocation8 + $0x48] ss:$12 sps:$4 sm:$0xff]   ;;  %v8293_v4 = vld [vmem:[#allocation8 + $0x64] ss:$12 sps:$4 sm:$0xff]  }
 0x14f   : > { %12014 = vst [vmem:[#allocation36_spill] sm:$0xff] %v9719_v18  ;;  %12015 = vst [vmem:[#allocation37_spill] sm:$0xff] %v9722_v21  ;;  %1005 = vmatprep.subr.bf16.mxu0 %v8285_v61  ;;  %7589 = vmatpush3.bf16.msra.mxu1 %v8287_v62  ;;  %v8291_v1 = vld [vmem:[#allocation8 + $0x38] ss:$12 sps:$4 sm:$0xff]   ;;  %v8295_v5 = vld [vmem:[#allocation8 + $0x50] ss:$12 sps:$4 sm:$0xff]  }
 0x150   : > { %12016 = vst [vmem:[#allocation38_spill] sm:$0xff] %v9725_v22  ;;  %12017 = vst [vmem:[#allocation39_spill] sm:$0xff] %v9728_v23  ;;  %7590 = vmatprep.subr.bf16.mxu1 %v8291_v1  ;;  %v8296_v6 = vld [vmem:[#allocation8 + $0x60] ss:$12 sps:$4 sm:$0xff]   ;;  %v8299_v9 = vld [vmem:[#allocation8 + $0x68] ss:$12 sps:$4 sm:$0xff]  }
 0x151   : > { %1006 = vmatpush1.bf16.msra.mxu0 %v8288_v63  ;;  %v8300_v12 = vld [vmem:[#allocation8 + $0x78] ss:$12 sps:$4 sm:$0xff]   ;;  %v8301_v13 = vld [vmem:[#allocation8 + $0x94] ss:$12 sps:$4 sm:$0xff]   ;;  %v8304_v15 = vld [vmem:[#allocation8 + $0x90] ss:$12 sps:$4 sm:$0xff]   ;;  %s12074_s20 = smov %s12073_s23 }
 0x152   : > { %722 = vadd.xlane.f32.xlu0 %v9713_v10  ;;  %726 = vadd.xlane.f32.xlu1 %v9716_v11  ;;  %v8303_v14 = vld [vmem:[#allocation8 + $0x80] ss:$12 sps:$4 sm:$0xff]   ;;  %v8307_v17 = vld [vmem:[#allocation8 + $0x98] ss:$12 sps:$4 sm:$0xff]   ;;  %v8308_v19 = vld [vmem:[#allocation8 + $0xa8] ss:$12 sps:$4 sm:$0xff]  }
 0x153   : > { %1007 = vmatprep.subr.bf16.mxu0 %v8289_v0  ;;  %7591 = vmatpush3.bf16.msra.mxu1 %v8291_v1  ;;  %v8305_v16 = vld [vmem:[#allocation8 + $0xac] ss:$12 sps:$4 sm:$0xff]   ;;  %v11956_v20 = vmov 0   ;;  %v6843_v0 = vld [vmem:[#allocation7] ss:$0 sm:$0xff]  ;;  %s666_s18 = sand.u32 1, %s12071_s2  }
 0x154   : > { %7592 = vmatprep.subr.bf16.mxu1 %v8295_v5  ;;  %1033 = vmatprep.mubr.bf16.mxu0 %v11956_v20  ;;  %s6839_s26 = sshll.u32 %s666_s18, 6  ;;  %p12075_p6 = scmp.ne.s32.totalorder %s12072_s30, 0 }
 0x155   : > { %1008 = vmatpush1.bf16.msra.mxu0 %v8292_v2  ;;  %s668_s19 = scalar_lea.vmem [#allocation20], %s6839_s26 }
 0x156   : > { %728 = vadd.xlane.f32.xlu0 %v9719_v18  ;;  %730 = vadd.xlane.f32.xlu1 %v9722_v21  ;;  %s6644_s4 = sshll.u32 %s668_s19, 4  ;;  %s11870_s4 = int_to_ptr.vmem [resolvable:$true] %s6644_s4 }
 0x157   : > { %1009 = vmatprep.subr.bf16.mxu0 %v8293_v4  ;;  %7593 = vmatpush3.bf16.msra.mxu1 %v8295_v5  ;;  %s9170_s24 = scalar_lea.vmem %s11870_s4, 1024  ;;  %p9177_p10 = scmp.lt.s32.totalorder %s11870_s4, %s9175_s27 }
 0x158   : > { %7594 = vmatprep.subr.bf16.mxu1 %v8299_v9  ;;  %p9171_p5 = scmp.ne.s32.totalorder %s11870_s4, %s9170_s24  ;;  %p9178_p13 = scmp.lt.s32.totalorder %s9176_s28, %s9170_s24 }
 0x159   : > { %1010 = vmatpush1.bf16.msra.mxu0 %v8296_v6 }
 0x15a   : > { %732 = vadd.xlane.f32.xlu0 %v9725_v22  ;;  %734 = vadd.xlane.f32.xlu1 %v9728_v23  ;;  %p9172_p0 = pnand %p9171_p5, %p12075_p6  ;;  %p9179_p12 = por %p9178_p13, %p9177_p10 }
 0x15b   : > { %1011 = vmatprep.subr.bf16.mxu0 %v8297_v8  ;;  %7595 = vmatpush3.bf16.msra.mxu1 %v8299_v9 }
 0x15c   : > { %7596 = vmatprep.subr.bf16.mxu1 %v8303_v14  ;;  %p9173_p9 = pneg %p9172_p0 }
 0x15d   : > { %1012 = vmatpush1.bf16.msra.mxu0 %v8300_v12 }
 0x15e   : > { %1013 = vmatprep.subr.bf16.mxu0 %v8301_v13  ;;  %p9180_p1 = pnand %p9179_p12, %p9173_p9 }
 0x15f   : > { %7597 = vmatpush3.bf16.msra.mxu1 %v8303_v14 }
 0x160   : > { %7598 = vmatprep.subr.bf16.mxu1 %v8307_v17 }
 0x161   : > { %1014 = vmatpush1.bf16.msra.mxu0 %v8304_v15 }
 0x162   : > { %1015 = vmatprep.subr.bf16.mxu0 %v8305_v16 }
 0x163   : > { %7599 = vmatpush3.bf16.msra.mxu1 %v8307_v17 }
 0x164   : > { %7600 = vmatprep.subr.bf16.mxu1 %v8309_v24 }
 0x165   : > { %1016 = vmatpush1.bf16.msra.mxu0 %v8308_v19 }
 0x167   : > { %7601 = vmatpush3.bf16.msra.mxu1 %v8309_v24 }
 0x1db   : > { %v721_v28 = vpop.xlane.xlu0 %720  ;;  %v725_v30 = vpop.xlane.xlu1 %724 }
 0x1dc   : > { %v737_v29 = vmul.f32 0.0078125, %v721_v28  ;;  %v739_v31 = vmul.f32 0.0078125, %v725_v30 }
 0x1de   : > { %v9733_v32 = vsub.f32 %v9708_v3, %v737_v29  ;;  %v9736_v34 = vsub.f32 %v9710_v7, %v739_v31 }
 0x1df   : > { %v723_v33 = vpop.xlane.xlu0 %722  ;;  %v727_v37 = vpop.xlane.xlu1 %726 }
 0x1e0   : > { %v738_v35 = vmul.f32 0.0078125, %v723_v33  ;;  %v753_v36 = vmul.f32 %v9733_v32, %v9733_v32  ;;  %v740_v38 = vmul.f32 0.0078125, %v727_v37  ;;  %v755_v39 = vmul.f32 %v9736_v34, %v9736_v34 }
 0x1e2   : > { %761 = vadd.xlane.f32.xlu0 %v753_v36  ;;  %v9743_v40 = vsub.f32 %v9713_v10, %v738_v35  ;;  %v9746_v42 = vsub.f32 %v9716_v11, %v740_v38 }
 0x1e3   : > { %v729_v41 = vpop.xlane.xlu0 %728  ;;  %v731_v45 = vpop.xlane.xlu1 %730 }
 0x1e4   : > { %v741_v43 = vmul.f32 0.0078125, %v729_v41  ;;  %v754_v44 = vmul.f32 %v9743_v40, %v9743_v40  ;;  %v742_v46 = vmul.f32 0.0078125, %v731_v45  ;;  %v756_v47 = vmul.f32 %v9746_v42, %v9746_v42 }
 0x1e6   : > { %765 = vadd.xlane.f32.xlu0 %v755_v39  ;;  %763 = vadd.xlane.f32.xlu1 %v754_v44  ;;  %v9753_v48 = vsub.f32 %v9719_v18, %v741_v43  ;;  %v9756_v50 = vsub.f32 %v9722_v21, %v742_v46 }
 0x1e7   : > { %v733_v49 = vpop.xlane.xlu0 %732  ;;  %v735_v53 = vpop.xlane.xlu1 %734 }
 0x1e8   : > { %v743_v51 = vmul.f32 0.0078125, %v733_v49  ;;  %v757_v52 = vmul.f32 %v9753_v48, %v9753_v48  ;;  %v744_v54 = vmul.f32 0.0078125, %v735_v53  ;;  %v758_v55 = vmul.f32 %v9756_v50, %v9756_v50 }
 0x1ea   : > { %767 = vadd.xlane.f32.xlu1 %v756_v47  ;;  %769 = vadd.xlane.f32.xlu0 %v757_v52  ;;  %v9763_v56 = vsub.f32 %v9725_v22, %v743_v51  ;;  %v9766_v57 = vsub.f32 %v9728_v23, %v744_v54 }
 0x1ec   : > { %v759_v58 = vmul.f32 %v9763_v56, %v9763_v56  ;;  %v760_v59 = vmul.f32 %v9766_v57, %v9766_v57 }
 0x1ee   : > { %771 = vadd.xlane.f32.xlu1 %v758_v55  ;;  %773 = vadd.xlane.f32.xlu0 %v759_v58  ;;  %v6842_v58 = vld [vmem:[#allocation5] ss:$0 sm:$0xff] }
 0x1f2   : > { %775 = vadd.xlane.f32.xlu1 %v760_v59 }
 0x26f   : > { %v762_v25 = vpop.xlane.xlu0 %761 }
 0x270   : > { %v777_v26 = vmul.f32 0.0078125, %v762_v25 }
 0x272   : > { %v785_v27 = vadd.f32 1e-05, %v777_v26 }
 0x273   : > { %v764_v28 = vpop.xlane.xlu1 %763  ;;  %v766_v29 = vpop.xlane.xlu0 %765 }
 0x274   : > { %8526 = vrsqrt.f32 %v785_v27  ;;  %v778_v30 = vmul.f32 0.0078125, %v764_v28  ;;  %v779_v31 = vmul.f32 0.0078125, %v766_v29 }
 0x276   : > { %v786_v33 = vadd.f32 1e-05, %v778_v30  ;;  %v787_v35 = vadd.f32 1e-05, %v779_v31 }
 0x277   : > { %v768_v36 = vpop.xlane.xlu1 %767  ;;  %v770_v37 = vpop.xlane.xlu0 %769 }
 0x278   : > { %8528 = vrsqrt.f32 %v786_v33  ;;  %v780_v38 = vmul.f32 0.0078125, %v768_v36  ;;  %v781_v39 = vmul.f32 0.0078125, %v770_v37 }
 0x279   : > { %8530 = vrsqrt.f32 %v787_v35 }
 0x27a   : > { %v788_v41 = vadd.f32 1e-05, %v780_v38  ;;  %v789_v43 = vadd.f32 1e-05, %v781_v39 }
 0x27b   : > { %v772_v44 = vpop.xlane.xlu1 %771  ;;  %v774_v45 = vpop.xlane.xlu0 %773 }
 0x27c   : > { %8532 = vrsqrt.f32 %v788_v41  ;;  %v782_v46 = vmul.f32 0.0078125, %v772_v44  ;;  %v783_v47 = vmul.f32 0.0078125, %v774_v45 }
 0x27d   : > { %8534 = vrsqrt.f32 %v789_v43 }
 0x27e   : > { %v8527_v49 = vpop.eup %8526  ;;  %v790_v51 = vadd.f32 1e-05, %v782_v46  ;;  %v791_v52 = vadd.f32 1e-05, %v783_v47 }
 0x27f   : > { %v776_v53 = vpop.xlane.xlu1 %775  ;;  %v801_v54 = vmul.f32 %v8527_v49, %v9733_v32 }
 0x280   : > { %8536 = vrsqrt.f32 %v790_v51  ;;  %v784_v55 = vmul.f32 0.0078125, %v776_v53 }
 0x281   : > { %8538 = vrsqrt.f32 %v791_v52  ;;  %v815_v63 = vmul.f32 %v6842_v58, %v801_v54 }
 0x282   : > { %v8529_v59 = vpop.eup %8528  ;;  %v792_v60 = vadd.f32 1e-05, %v784_v55 }
 0x283   : > { %v8531_v61 = vpop.eup %8530  ;;  %v802_v62 = vmul.f32 %v8529_v59, %v9743_v40  ;;  %v829_v8 = vadd.f32 %v6843_v0, %v815_v63 }
 0x284   : > { %8540 = vrsqrt.f32 %v792_v60  ;;  %v803_v1 = vmul.f32 %v8531_v61, %v9736_v34 }
 0x285   : > { %v816_v2 = vmul.f32 %v6842_v58, %v802_v62 }
 0x286   : > { %v8533_v4 = vpop.eup %8532  ;;  %v817_v5 = vmul.f32 %v6842_v58, %v803_v1 }
 0x287   : > { %v8535_v6 = vpop.eup %8534  ;;  %v830_v32 = vadd.f32 %v6843_v0, %v816_v2  ;;  %v804_v9 = vmul.f32 %v8533_v4, %v9746_v42 }
 0x288   : > { %v805_v12 = vmul.f32 %v8535_v6, %v9753_v48  ;;  %v831_v16 = vadd.f32 %v6843_v0, %v817_v5 }
 0x289   : > { %v869_v13 = vpack.c.bf16 %v830_v32, %v829_v8  ;;  %v818_v14 = vmul.f32 %v6842_v58, %v804_v9 }
 0x28a   : > { %v8537_v15 = vpop.eup %8536  ;;  %v819_v19 = vmul.f32 %v6842_v58, %v805_v12 }
 0x28b   : > { %v8539_v40 = vpop.eup %8538  ;;  %1034 = vmatmul.mubr.bf16.vlgmr.msra.gmra.mrb[0].mxu0 %v869_v13  ;;  %7602 = vmatprep.mubr.bf16.mxu1 %v869_v13  ;;  %v832_v17 = vadd.f32 %v6843_v0, %v818_v14  ;;  %v806_v34 = vmul.f32 %v8537_v15, %v9756_v50 }
 0x28c   : > { %1043 = vmatprep.mubr.bf16.mxu0 %v11956_v20  ;;  %v807_v24 = vmul.f32 %v8539_v40, %v9763_v56  ;;  %v833_v48 = vadd.f32 %v6843_v0, %v819_v19 }
 0x28d   : > { %v870_v25 = vpack.c.bf16 %v832_v17, %v831_v16  ;;  %v820_v26 = vmul.f32 %v6842_v58, %v806_v34  ;;  %v699_v34 = vlaneseq }
 0x28e   : > { %v8541_v42 = vpop.eup %8540  ;;  %v821_v29 = vmul.f32 %v6842_v58, %v807_v24 }
 0x28f   : > { %7603 = vmatmul.mubr.bf16.vlgmr.msra.gmra.mrb[0].mxu1 %v870_v25  ;;  %v834_v27 = vadd.f32 %v6843_v0, %v820_v26  ;;  %v808_v28 = vmul.f32 %v8541_v42, %v9766_v57  ;;  %v9840_v19 = vshrl.u32 %v699_v34, 7  ;;  %v709_v24 = vand.u32 127, %v699_v34 }
 0x290   : > { %v835_v33 = vadd.f32 %v6843_v0, %v821_v29 }
 0x291   : > { %v871_v30 = vpack.c.bf16 %v834_v27, %v833_v48  ;;  %v822_v31 = vmul.f32 %v6842_v58, %v808_v28  ;;  %12018 = vst [vmem:[#allocation40_spill] sm:$0xff] %v9840_v19  ;;  %v702_v26 = vadd.s32 16, %v9840_v19  ;;  %vm9845_vm1 = vcmp.le.s32.totalorder %v709_v24, %v9840_v19 }
 0x292   : > { %v703_v28 = vadd.s32 24, %v9840_v19 }
 0x293   : > { %1044 = vmatmul.mubr.bf16.gmra.mrb[4].mxu0 %v870_v25  ;;  %7606 = vmatprep.mubr.bf16.mxu1 %v871_v30  ;;  %v836_v50 = vadd.f32 %v6843_v0, %v822_v31  ;;  %v701_v25 = vadd.s32 8, %v9840_v19  ;;  %vm9854_vm4 = vcmp.le.s32.totalorder %v709_v24, %v702_v26 }
 0x294   : > { %1053 = vmatprep.mubr.bf16.mxu0 %v11956_v20  ;;  %vm9861_vm5 = vcmp.le.s32.totalorder %v709_v24, %v703_v28 }
 0x295   : > { %v872_v35 = vpack.c.bf16 %v836_v50, %v835_v33  ;;  %vm9850_vm3 = vcmp.le.s32.totalorder %v709_v24, %v701_v25 }
 0x297   : > { %7607 = vmatmul.mubr.bf16.gmra.mrb[4].mxu1 %v872_v35 }
 0x29b   : > { %1054 = vmatmul.mubr.bf16.gmra.mrb[8].mxu0 %v871_v30 }
 0x29c   : > { %1063 = vmatprep.mubr.bf16.mxu0 %v11956_v20 }
 0x2a3   : > { %1064 = vmatmul.mubr.bf16.gmra.mrb[12].mxu0 %v872_v35 }
 0x35e   : > { %v1035_v56 = vpop.f32.mrb[0].mxu0 }
 0x35f   : > { %v1037_v36 = vpop.f32.mrb[1].mxu0 }
 0x360   : > { %v1039_v37 = vpop.f32.mrb[2].mxu0 }
 0x361   : > { %v9784_v57 = vpack.c.bf16 %v1039_v37, %v1035_v56  ;;  %v1041_v38 = vpop.f32.mrb[3].mxu0 }
 0x362   : > { %v9786_v39 = vpack.c.bf16 %v1041_v38, %v1037_v36  ;;  %v7604_v41 = vpop.f32.mrb[0].mxu1 }
 0x363   : > { %v1108_v43 = vpop.f32.mrb[1].mxu1  ;;  %7618 = vmatprep.mubr.msk.bf16.mxu0 %vm1151_vm0, %v9784_v57 }
 0x364   : > { %v7605_v44 = vpop.f32.mrb[2].mxu1  ;;  %7962 = vmatprep.subr.msk.bf16.mxu0 %vm1151_vm0, %v9786_v39  ;;  %v1165_v45 = vsel %vm1151_vm0, %v9786_v39, 0 }
 0x365   : > { %v9794_v46 = vpack.c.bf16 %v7605_v44, %v7604_v41  ;;  %v1111_v47 = vpop.f32.mrb[3].mxu1  ;;  %7611 = vmatpush3.bf16.xpose.msra.mxu0 %v1165_v45 }
 0x366   : > { %v9796_v49 = vpack.c.bf16 %v1111_v47, %v1108_v43  ;;  %v1045_v51 = vpop.f32.mrb[4].mxu0  ;;  %v704_v43 = vadd.s32 32, %v9840_v19 }
 0x367   : > { %v1047_v52 = vpop.f32.mrb[5].mxu0 }
 0x368   : > { %v1049_v53 = vpop.f32.mrb[6].mxu0  ;;  %7626 = vmatprep.subr.bf16.mxu1 %v9796_v49  ;;  %vm9876_vm6 = vcmp.le.s32.totalorder %v709_v24, %v704_v43 }
 0x369   : > { %v9799_v54 = vpack.c.bf16 %v1049_v53, %v1045_v51  ;;  %v1051_v55 = vpop.f32.mrb[7].mxu0  ;;  %7627 = vmatpush3.bf16.msra.mxu1 %v9796_v49  ;;  %v705_v51 = vadd.s32 40, %v9840_v19 }
 0x36a   : > { %v9802_v58 = vpack.c.bf16 %v1051_v55, %v1047_v52  ;;  %v7608_v59 = vpop.f32.mrb[4].mxu1  ;;  %7628 = vmatprep.subr.bf16.mxu1 %v9794_v46  ;;  %v706_v52 = vadd.s32 48, %v9840_v19 }
 0x36b   : > { %v1124_v60 = vpop.f32.mrb[5].mxu1  ;;  %vm9882_vm7 = vcmp.le.s32.totalorder %v709_v24, %v705_v51 }
 0x36c   : > { %v7609_v61 = vpop.f32.mrb[6].mxu1  ;;  %7963 = vmatprep.subr.msk.bf16.mxu0 %vm1151_vm0, %v9802_v58  ;;  %v1168_v62 = vsel %vm1151_vm0, %v9802_v58, 0  ;;  %vm9886_vm8 = vcmp.le.s32.totalorder %v709_v24, %v706_v52 }
 0x36d   : > { %v9809_v63 = vpack.c.bf16 %v7609_v61, %v7608_v59  ;;  %v1127_v0 = vpop.f32.mrb[7].mxu1  ;;  %7613 = vmatpush3.bf16.xpose.msra.mxu0 %v1168_v62  ;;  %7629 = vmatpush3.bf16.msra.mxu1 %v9794_v46  ;;  %v12027_v61 = vmov 0  ;;  %v707_v62 = vadd.s32 56, %v9840_v19 }
 0x36e   : > { %v9812_v1 = vpack.c.bf16 %v1127_v0, %v1124_v60  ;;  %v1055_v2 = vpop.f32.mrb[8].mxu0  ;;  %v12028_v61 = vsel %vm9876_vm6, 4294967295, %v12027_v61 }
 0x36f   : > { %v1057_v4 = vpop.f32.mrb[9].mxu0  ;;  %12029 = vst [vmem:[#allocation41_spill] sm:$0xff] %v12028_v61  ;;  %vm9893_vm9 = vcmp.le.s32.totalorder %v709_v24, %v707_v62 }
 0x370   : > { %v1059_v5 = vpop.f32.mrb[10].mxu0  ;;  %7630 = vmatprep.subr.bf16.mxu1 %v9812_v1 }
 0x371   : > { %v9815_v6 = vpack.c.bf16 %v1059_v5, %v1055_v2  ;;  %v1061_v8 = vpop.f32.mrb[11].mxu0  ;;  %7631 = vmatpush3.bf16.msra.mxu1 %v9812_v1 }
 0x372   : > { %v9818_v32 = vpack.c.bf16 %v1061_v8, %v1057_v4  ;;  %7632 = vmatprep.subr.bf16.mxu1 %v9809_v63 }
 0x374   : > { %7964 = vmatprep.subr.msk.bf16.mxu0 %vm1151_vm0, %v9818_v32  ;;  %v1171_v9 = vsel %vm1151_vm0, %v9818_v32, 0 }
 0x375   : > { %7615 = vmatpush3.bf16.xpose.msra.mxu0 %v1171_v9  ;;  %7633 = vmatpush3.bf16.msra.mxu1 %v9809_v63 }
 0x376   : > { %v1065_v12 = vpop.f32.mrb[12].mxu0 }
 0x377   : > { %v1067_v13 = vpop.f32.mrb[13].mxu0 }
 0x378   : > { %v1069_v14 = vpop.f32.mrb[14].mxu0 }
 0x379   : > { %v9826_v15 = vpack.c.bf16 %v1069_v14, %v1065_v12  ;;  %v1071_v16 = vpop.f32.mrb[15].mxu0 }
 0x37a   : > { %v9828_v40 = vpack.c.bf16 %v1071_v16, %v1067_v13 }
 0x37c   : > { %7965 = vmatprep.subr.msk.bf16.mxu0 %vm1151_vm0, %v9828_v40  ;;  %v1174_v17 = vsel %vm1151_vm0, %v9828_v40, 0 }
 0x37d   : > { %7617 = vmatpush3.bf16.xpose.msra.mxu0 %v1174_v17 }
 0x384   : > { %7619 = vmatmul.mubr.msk.bf16.vlgmr.msra.gmra.mrb[16].mxu0 %vm1151_vm0, %v9799_v54 }
 0x385   : > { %7622 = vmatprep.mubr.msk.bf16.mxu0 %vm1151_vm0, %v9815_v6 }
 0x38c   : > { %7623 = vmatmul.mubr.msk.bf16.gmra.mrb[20].mxu0 %vm1151_vm0, %v9826_v15 }
 0x457   : > { %v7620_v42 = vpop.f32.mrb[16].mxu0 }
 0x458   : > { %v1210_v48 = vpop.f32.mrb[17].mxu0  ;;  %v1243_v29 = vmul.f32 0.17677669, %v7620_v42 }
 0x459   : > { %v1241_v30 = vmul.f32 0.17677669, %v1210_v48  ;;  %v7621_v31 = vpop.f32.mrb[18].mxu0 }
 0x45a   : > { %v1213_v33 = vpop.f32.mrb[19].mxu0  ;;  %v1244_v56 = vmul.f32 0.17677669, %v7621_v31  ;;  %v1251_v45 = vsel %vm9854_vm4, %v1243_v29, -1e+30 }
 0x45b   : > { %v1242_v36 = vmul.f32 0.17677669, %v1213_v33  ;;  %v1249_v37 = vsel %vm9845_vm1, %v1241_v30, -1e+30  ;;  %v1264_v60 = vsel %vm1257_vm2, %v1251_v45, -inf }
 0x45c   : > { %v1258_v38 = vsel %vm1257_vm2, %v1249_v37, -inf  ;;  %v1252_v55 = vsel %vm9861_vm5, %v1244_v56, -1e+30 }
 0x45d   : > { %1259 = vmax.xlane.f32.xlu0 %v1258_v38  ;;  %v1250_v44 = vsel %vm9850_vm3, %v1242_v36, -1e+30  ;;  %v1267_v8 = vsel %vm1257_vm2, %v1252_v55, -inf }
 0x45e   : > { %v1261_v47 = vsel %vm1257_vm2, %v1250_v44, -inf }
 0x45f   : > { %1262 = vmax.xlane.f32.xlu1 %v1261_v47  ;;  %v7624_v53 = vpop.f32.mrb[20].mxu0 }
 0x460   : > { %v1226_v59 = vpop.f32.mrb[21].mxu0  ;;  %v1247_v0 = vmul.f32 0.17677669, %v7624_v53 }
 0x461   : > { %v1245_v2 = vmul.f32 0.17677669, %v1226_v59  ;;  %1265 = vmax.xlane.f32.xlu0 %v1264_v60  ;;  %v7625_v4 = vpop.f32.mrb[22].mxu0 }
 0x462   : > { %v1229_v5 = vpop.f32.mrb[23].mxu0  ;;  %v1248_v13 = vmul.f32 0.17677669, %v7625_v4  ;;  %v1255_v26 = vsel %vm9886_vm8, %v1247_v0, -1e+30 }
 0x463   : > { %v1246_v14 = vmul.f32 0.17677669, %v1229_v5  ;;  %1268 = vmax.xlane.f32.xlu1 %v1267_v8  ;;  %v1253_v16 = vsel %vm9876_vm6, %v1245_v2, -1e+30  ;;  %v1276_v28 = vsel %vm1257_vm2, %v1255_v26, -inf }
 0x464   : > { %v1270_v17 = vsel %vm1257_vm2, %v1253_v16, -inf  ;;  %v1256_v48 = vsel %vm9893_vm9, %v1248_v13, -1e+30 }
 0x465   : > { %1271 = vmax.xlane.f32.xlu0 %v1270_v17  ;;  %v1254_v25 = vsel %vm9882_vm7, %v1246_v14, -1e+30  ;;  %v1279_v24 = vsel %vm1257_vm2, %v1256_v48, -inf }
 0x466   : > { %v1273_v42 = vsel %vm1257_vm2, %v1254_v25, -inf }
 0x467   : > { %1274 = vmax.xlane.f32.xlu1 %v1273_v42 }
 0x469   : > { %1277 = vmax.xlane.f32.xlu0 %v1276_v28 }
 0x46b   : > { %1280 = vmax.xlane.f32.xlu1 %v1279_v24 }
 0x4ea   : > { %v1260_v29 = vpop.xlane.xlu0 %1259 }
 0x4eb   : > { %v1282_v30 = vsub.f32 %v1249_v37, %v1260_v29 }
 0x4ec   : > { %v1263_v31 = vpop.xlane.xlu1 %1262 }
 0x4ed   : > { %v1283_v56 = vsub.f32 %v1250_v44, %v1263_v31  ;;  %v1290_v38 = vmul.f32 1.442695, %v1282_v30 }
 0x4ee   : > { %v1266_v33 = vpop.xlane.xlu0 %1265 }
 0x4ef   : > { %v1284_v36 = vsub.f32 %v1251_v45, %v1266_v33  ;;  %v1292_v53 = vmul.f32 1.442695, %v1283_v56 }
 0x4f0   : > { %v1269_v43 = vpop.xlane.xlu1 %1268 }
 0x4f1   : > { %v1294_v47 = vmul.f32 1.442695, %v1284_v36  ;;  %v1285_v51 = vsub.f32 %v1252_v55, %v1269_v43 }
 0x4f2   : > { %v1272_v52 = vpop.xlane.xlu0 %1271 }
 0x4f3   : > { %8542 = vpow2.f32 %v1294_v47  ;;  %v1296_v59 = vmul.f32 1.442695, %v1285_v51  ;;  %v1286_v60 = vsub.f32 %v1253_v16, %v1272_v52 }
 0x4f4   : > { %8544 = vpow2.f32 %v1290_v38  ;;  %v1275_v28 = vpop.xlane.xlu1 %1274 }
 0x4f5   : > { %8546 = vpow2.f32 %v1296_v59  ;;  %v1298_v2 = vmul.f32 1.442695, %v1286_v60  ;;  %v1287_v30 = vsub.f32 %v1254_v25, %v1275_v28 }
 0x4f6   : > { %v1278_v62 = vpop.xlane.xlu0 %1277  ;;  %8548 = vpow2.f32 %v1292_v53 }
 0x4f7   : > { %v1288_v0 = vsub.f32 %v1255_v26, %v1278_v62  ;;  %v1300_v33 = vmul.f32 1.442695, %v1287_v30 }
 0x4f8   : > { %v1281_v24 = vpop.xlane.xlu1 %1280 }
 0x4f9   : > { %v1302_v37 = vmul.f32 1.442695, %v1288_v0  ;;  %v1289_v29 = vsub.f32 %v1256_v48, %v1281_v24 }
 0x4fb   : > { %8550 = vpow2.f32 %v1302_v37  ;;  %v1304_v31 = vmul.f32 1.442695, %v1289_v29 }
 0x4fc   : > { %8552 = vpow2.f32 %v1298_v2 }
 0x4fd   : > { %v8543_v4 = vpop.eup %8542  ;;  %8554 = vpow2.f32 %v1304_v31 }
 0x4fe   : > { %v8545_v44 = vpop.eup %8544  ;;  %v1312_v45 = vsel %vm1257_vm2, %v8543_v4, 0.0  ;;  %8556 = vpow2.f32 %v1300_v33 }
 0x4ff   : > { %v8547_v5 = vpop.eup %8546  ;;  %1313 = vadd.xlane.f32.xlu0 %v1312_v45  ;;  %v1306_v13 = vsel %vm1257_vm2, %v8545_v44, 0.0 }
 0x500   : > { %v1315_v55 = vsel %vm1257_vm2, %v8547_v5, 0.0  ;;  %v8549_v8 = vpop.eup %8548 }
 0x501   : > { %1316 = vadd.xlane.f32.xlu1 %v1315_v55  ;;  %v1309_v14 = vsel %vm1257_vm2, %v8549_v8, 0.0 }
 0x503   : > { %1307 = vadd.xlane.f32.xlu0 %v1306_v13 }
 0x505   : > { %v9910_v16 = vpop.eup %8550  ;;  %1310 = vadd.xlane.f32.xlu1 %v1309_v14 }
 0x506   : > { %v1324_v17 = vsel %vm1257_vm2, %v9910_v16, 0.0  ;;  %v9914_v26 = vpop.eup %8552 }
 0x507   : > { %1325 = vadd.xlane.f32.xlu0 %v1324_v17  ;;  %v1318_v42 = vsel %vm1257_vm2, %v9914_v26, 0.0  ;;  %v8555_v56 = vpop.eup %8554 }
 0x508   : > { %v1327_v36 = vsel %vm1257_vm2, %v8555_v56, 0.0  ;;  %v8557_v38 = vpop.eup %8556 }
 0x509   : > { %v1321_v43 = vsel %vm1257_vm2, %v8557_v38, 0.0 }
 0x50b   : > { %1319 = vadd.xlane.f32.xlu0 %v1318_v42 }
 0x516   : > { %1445 = vrot.lane.b32.xlu1 %v9802_v58, %s9278_s0 }
 0x51a   : > { %1447 = vrot.lane.b32.xlu1 %v9818_v32, %s9278_s0 }
 0x521   : > { %1443 = vrot.lane.b32.xlu0 %v9786_v39, %s9278_s0 }
 0x525   : > { %1431 = vrot.lane.b32.xlu0 %v9784_v57, %s9278_s0 }
 0x529   : > { %1435 = vrot.lane.b32.xlu0 %v9815_v6, %s9278_s0 }
 0x53e   : > { %1328 = vadd.xlane.f32.xlu1 %v1327_v36 }
 0x542   : > { %1322 = vadd.xlane.f32.xlu1 %v1321_v43 }
 0x553   : > { %1449 = vrot.lane.b32.xlu1 %v9828_v40, %s9278_s0 }
 0x557   : > { %1433 = vrot.lane.b32.xlu1 %v9799_v54, %s9278_s0 }
 0x55b   : > { %1437 = vrot.lane.b32.xlu1 %v9826_v15, %s9278_s0 }
 0x58c   : > { %v1314_v25 = vpop.xlane.xlu0 %1313 }
 0x58e   : > { %v1317_v48 = vpop.xlane.xlu1 %1316 }
 0x58f   : > { %8558 = vrcp.f32 %v1317_v48 }
 0x590   : > { %v1308_v47 = vpop.xlane.xlu0 %1307 }
 0x591   : > { %8560 = vrcp.f32 %v1308_v47 }
 0x592   : > { %8562 = vrcp.f32 %v1314_v25  ;;  %v1311_v51 = vpop.xlane.xlu1 %1310 }
 0x593   : > { %8564 = vrcp.f32 %v1311_v51 }
 0x594   : > { %v1326_v52 = vpop.xlane.xlu0 %1325 }
 0x596   : > { %v1446_v28 = vpop.permute.xlu1 %1445 }
 0x597   : > { %v1467_v24 = vsel %vm1151_vm0, %v1446_v28, 0 }
 0x598   : > { %v1320_v53 = vpop.xlane.xlu0 %1319 }
 0x599   : > { %v8559_v59 = vpop.eup %8558 }
 0x59a   : > { %v1341_v37 = vmul.f32 %v8559_v59, %v8547_v5  ;;  %v1448_v5 = vpop.permute.xlu1 %1447 }
 0x59b   : > { %v8561_v60 = vpop.eup %8560 }
 0x59c   : > { %v8563_v62 = vpop.eup %8562  ;;  %v1444_v0 = vpop.permute.xlu0 %1443  ;;  %v1338_v45 = vmul.f32 %v8561_v60, %v8545_v44 }
 0x59d   : > { %v8565_v2 = vpop.eup %8564  ;;  %7966 = vmatprep.subr.msk.bf16.mxu1 %vm1151_vm0, %v1444_v0  ;;  %v1340_v13 = vmul.f32 %v8563_v62, %v8543_v4  ;;  %v1464_v42 = vsel %vm1151_vm0, %v1444_v0, 0  ;;  %v1470_v4 = vsel %vm1151_vm0, %v1448_v5, 0 }
 0x59e   : > { %v1339_v55 = vmul.f32 %v8565_v2, %v8549_v8 }
 0x59f   : > { %v1347_v17 = vpack.c.bf16 %v1341_v37, %v1340_v13 }
 0x5a0   : > { %v1346_v14 = vpack.c.bf16 %v1339_v55, %v1338_v45  ;;  %v1432_v59 = vpop.permute.xlu0 %1431 }
 0x5a2   : > { %7634 = vmatprep.mubr.msk.bf16.mxu1 %vm1257_vm2, %v1346_v14 }
 0x5a3   : > { %7635 = vmatmul.mubr.msk.bf16.vlgmr.msra.gmra.mrb[8].mxu1 %vm1257_vm2, %v1347_v17 }
 0x5a4   : > { %7643 = vmatpush3.bf16.xpose.msra.mxu1 %v1464_v42  ;;  %v1436_v62 = vpop.permute.xlu0 %1435 }
 0x5a5   : > { %7967 = vmatprep.subr.msk.bf16.mxu1 %vm1151_vm0, %v1446_v28 }
 0x5ac   : > { %7645 = vmatpush3.bf16.xpose.msra.mxu1 %v1467_v24 }
 0x5ad   : > { %7968 = vmatprep.subr.msk.bf16.mxu1 %vm1151_vm0, %v1448_v5 }
 0x5b4   : > { %7647 = vmatpush3.bf16.xpose.msra.mxu1 %v1470_v4 }
 0x5cb   : > { %v1329_v44 = vpop.xlane.xlu1 %1328 }
 0x5cc   : > { %8566 = vrcp.f32 %v1329_v44 }
 0x5cd   : > { %8568 = vrcp.f32 %v1320_v53 }
 0x5ce   : > { %8570 = vrcp.f32 %v1326_v52 }
 0x5cf   : > { %v1323_v8 = vpop.xlane.xlu1 %1322 }
 0x5d0   : > { %8572 = vrcp.f32 %v1323_v8 }
 0x5d3   : > { %v1450_v29 = vpop.permute.xlu1 %1449 }
 0x5d4   : > { %7969 = vmatprep.subr.msk.bf16.mxu1 %vm1151_vm0, %v1450_v29  ;;  %v1473_v30 = vsel %vm1151_vm0, %v1450_v29, 0 }
 0x5d5   : > { %7649 = vmatpush3.bf16.xpose.msra.mxu1 %v1473_v30 }
 0x5d6   : > { %v8567_v31 = vpop.eup %8566 }
 0x5d7   : > { %v8569_v33 = vpop.eup %8568  ;;  %v1345_v25 = vmul.f32 %v8567_v31, %v8555_v56  ;;  %v1434_v60 = vpop.permute.xlu1 %1433 }
 0x5d8   : > { %v8571_v36 = vpop.eup %8570  ;;  %v1342_v48 = vmul.f32 %v8569_v33, %v9914_v26 }
 0x5d9   : > { %v1344_v51 = vmul.f32 %v8571_v36, %v9910_v16 }
 0x5da   : > { %v8573_v43 = vpop.eup %8572 }
 0x5db   : > { %v1343_v47 = vmul.f32 %v8573_v43, %v8557_v38  ;;  %v1349_v52 = vpack.c.bf16 %v1345_v25, %v1344_v51  ;;  %v1438_v56 = vpop.permute.xlu1 %1437 }
 0x5dd   : > { %v1348_v53 = vpack.c.bf16 %v1343_v47, %v1342_v48 }
 0x5df   : > { %7638 = vmatprep.mubr.msk.bf16.mxu1 %vm1257_vm2, %v1348_v53 }
 0x5e0   : > { %7639 = vmatmul.mubr.msk.bf16.gmra.mrb[12].mxu1 %vm1257_vm2, %v1349_v52 }
 0x5e1   : > { %7650 = vmatprep.mubr.msk.bf16.mxu1 %vm1151_vm0, %v1432_v59 }
 0x5e8   : > { %7651 = vmatmul.mubr.msk.bf16.vlgmr.msra.gmra.mrb[16].mxu1 %vm1151_vm0, %v1434_v60 }
 0x5e9   : > { %7654 = vmatprep.mubr.msk.bf16.mxu1 %vm1151_vm0, %v1436_v62 }
 0x5f0   : > { %7655 = vmatmul.mubr.msk.bf16.gmra.mrb[20].mxu1 %vm1151_vm0, %v1438_v56 }
 0x676   : > { %v9954_v26 = vpop.f32.mrb[8].mxu1 }
 0x677   : > { %v9956_v16 = vpop.f32.mrb[9].mxu1 }
 0x678   : > { %v9958_v38 = vpop.f32.mrb[10].mxu1 }
 0x679   : > { %v9960_v0 = vpop.f32.mrb[11].mxu1 }
 0x6b3   : > { %v9962_v2 = vpop.f32.mrb[12].mxu1 }
 0x6b4   : > { %v9964_v37 = vpop.f32.mrb[13].mxu1 }
 0x6b5   : > { %v9966_v45 = vpop.f32.mrb[14].mxu1 }
 0x6b6   : > { %v9968_v55 = vpop.f32.mrb[15].mxu1 }
 0x6bb   : > { %v7652_v13 = vpop.f32.mrb[16].mxu1 }
 0x6bc   : > { %v1542_v14 = vmul.f32 0.17677669, %v7652_v13  ;;  %v1509_v17 = vpop.f32.mrb[17].mxu1 }
 0x6bd   : > { %v1540_v42 = vmul.f32 0.17677669, %v1509_v17  ;;  %v7653_v28 = vpop.f32.mrb[18].mxu1 }
 0x6be   : > { %v1512_v24 = vpop.f32.mrb[19].mxu1  ;;  %v1550_v5 = vsel %vm9854_vm4, %v1542_v14, -1e+30  ;;  %v1543_v8 = vmul.f32 0.17677669, %v7653_v28 }
 0x6bf   : > { %v1541_v4 = vmul.f32 0.17677669, %v1512_v24  ;;  %v1562_v44 = vsel %vm1257_vm2, %v1550_v5, -inf  ;;  %v1548_v29 = vsel %vm9845_vm1, %v1540_v42, -1e+30 }
 0x6c0   : > { %1563 = vmax.xlane.f32.xlu0 %v1562_v44  ;;  %v1556_v36 = vsel %vm1257_vm2, %v1548_v29, -inf  ;;  %v1551_v48 = vsel %vm9861_vm5, %v1543_v8, -1e+30 }
 0x6c1   : > { %v1549_v30 = vsel %vm9850_vm3, %v1541_v4, -1e+30  ;;  %v1565_v53 = vsel %vm1257_vm2, %v1551_v48, -inf }
 0x6c2   : > { %v1559_v31 = vsel %vm1257_vm2, %v1549_v30, -inf }
 0x6c3   : > { %1560 = vmax.xlane.f32.xlu1 %v1559_v31  ;;  %v7656_v33 = vpop.f32.mrb[20].mxu1 }
 0x6c4   : > { %v1546_v43 = vmul.f32 0.17677669, %v7656_v33  ;;  %1557 = vmax.xlane.f32.xlu0 %v1556_v36  ;;  %v1525_v25 = vpop.f32.mrb[21].mxu1 }
 0x6c5   : > { %v7657_v47 = vpop.f32.mrb[22].mxu1  ;;  %v1544_v52 = vmul.f32 0.17677669, %v1525_v25 }
 0x6c6   : > { %v1528_v51 = vpop.f32.mrb[23].mxu1  ;;  %v1554_v59 = vsel %vm9886_vm8, %v1546_v43, -1e+30  ;;  %v1547_v13 = vmul.f32 0.17677669, %v7657_v47 }
 0x6c7   : > { %v1574_v60 = vsel %vm1257_vm2, %v1554_v59, -inf  ;;  %v1552_v62 = vsel %vm9876_vm6, %v1544_v52, -1e+30  ;;  %v1545_v14 = vmul.f32 0.17677669, %v1528_v51 }
 0x6c8   : > { %1566 = vmax.xlane.f32.xlu0 %v1565_v53  ;;  %v1568_v56 = vsel %vm1257_vm2, %v1552_v62, -inf  ;;  %v9996_v17 = vsel %vm9893_vm9, %v1547_v13, -1e+30 }
 0x6c9   : > { %v1577_v42 = vsel %vm1257_vm2, %v9996_v17, -inf  ;;  %v10002_v28 = vsel %vm9882_vm7, %v1545_v14, -1e+30 }
 0x6ca   : > { %v1571_v24 = vsel %vm1257_vm2, %v10002_v28, -inf }
 0x6cc   : > { %1575 = vmax.xlane.f32.xlu0 %v1574_v60 }
 0x6d0   : > { %1569 = vmax.xlane.f32.xlu0 %v1568_v56 }
 0x6d4   : > { %1654 = vrot.lane.b32.xlu1 %v9794_v46, %s9278_s0 }
 0x6d8   : > { %1656 = vrot.lane.b32.xlu1 %v9812_v1, %s9278_s0 }
 0x6e6   : > { %1652 = vrot.lane.b32.xlu0 %v9796_v49, %s9278_s0 }
 0x6fc   : > { %1578 = vmax.xlane.f32.xlu1 %v1577_v42 }
 0x700   : > { %1572 = vmax.xlane.f32.xlu1 %v1571_v24 }
 0x711   : > { %1658 = vrot.lane.b32.xlu1 %v9809_v63, %s9278_s0 }
 0x74d   : > { %v1564_v4 = vpop.xlane.xlu0 %1563 }
 0x74e   : > { %v1582_v44 = vsub.f32 %v1550_v5, %v1564_v4 }
 0x750   : > { %v1592_v8 = vmul.f32 1.442695, %v1582_v44  ;;  %v1561_v31 = vpop.xlane.xlu1 %1560 }
 0x751   : > { %v1558_v33 = vpop.xlane.xlu0 %1557  ;;  %v1581_v43 = vsub.f32 %v1549_v30, %v1561_v31 }
 0x752   : > { %8574 = vpow2.f32 %v1592_v8  ;;  %v1580_v36 = vsub.f32 %v1548_v29, %v1558_v33 }
 0x753   : > { %v1590_v53 = vmul.f32 1.442695, %v1581_v43 }
 0x754   : > { %v1588_v25 = vmul.f32 1.442695, %v1580_v36 }
 0x755   : > { %v1567_v47 = vpop.xlane.xlu0 %1566 }
 0x756   : > { %8576 = vpow2.f32 %v1588_v25  ;;  %v1583_v51 = vsub.f32 %v1551_v48, %v1567_v47  ;;  %v1655_v48 = vpop.permute.xlu1 %1654 }
 0x758   : > { %v1594_v52 = vmul.f32 1.442695, %v1583_v51 }
 0x759   : > { %v1576_v60 = vpop.xlane.xlu0 %1575 }
 0x75a   : > { %8578 = vpow2.f32 %v1594_v52  ;;  %v1586_v56 = vsub.f32 %v1554_v59, %v1576_v60 }
 0x75b   : > { %8580 = vpow2.f32 %v1590_v53 }
 0x75c   : > { %v10008_v13 = vpop.eup %8574  ;;  %v1600_v14 = vmul.f32 1.442695, %v1586_v56 }
 0x75d   : > { %v1570_v5 = vpop.xlane.xlu0 %1569  ;;  %v1610_v42 = vsel %vm1257_vm2, %v10008_v13, 0.0 }
 0x75e   : > { %8582 = vpow2.f32 %v1600_v14  ;;  %v1584_v29 = vsub.f32 %v1552_v62, %v1570_v5  ;;  %1611 = vadd.xlane.f32.xlu0 %v1610_v42  ;;  %v1657_v62 = vpop.permute.xlu1 %1656 }
 0x760   : > { %v10012_v30 = vpop.eup %8576  ;;  %v1596_v24 = vmul.f32 1.442695, %v1584_v29 }
 0x761   : > { %v1653_v4 = vpop.permute.xlu0 %1652  ;;  %v1604_v44 = vsel %vm1257_vm2, %v10012_v30, 0.0 }
 0x762   : > { %8584 = vpow2.f32 %v1596_v24  ;;  %1605 = vadd.xlane.f32.xlu0 %v1604_v44  ;;  %7658 = vmatprep.subr.bf16.mxu0 %v1653_v4 }
 0x763   : > { %7659 = vmatpush3.bf16.msra.mxu0 %v1653_v4 }
 0x764   : > { %v8579_v59 = vpop.eup %8578  ;;  %7660 = vmatprep.subr.bf16.mxu0 %v1655_v48 }
 0x765   : > { %v1613_v8 = vsel %vm1257_vm2, %v8579_v59, 0.0  ;;  %v8581_v31 = vpop.eup %8580 }
 0x766   : > { %1614 = vadd.xlane.f32.xlu1 %v1613_v8  ;;  %v1607_v43 = vsel %vm1257_vm2, %v8581_v31, 0.0 }
 0x767   : > { %7661 = vmatpush3.bf16.msra.mxu0 %v1655_v48 }
 0x768   : > { %v10017_v33 = vpop.eup %8582  ;;  %7662 = vmatprep.subr.bf16.mxu0 %v1657_v62 }
 0x769   : > { %v1622_v36 = vsel %vm1257_vm2, %v10017_v33, 0.0 }
 0x76a   : > { %1623 = vadd.xlane.f32.xlu0 %v1622_v36  ;;  %1608 = vadd.xlane.f32.xlu1 %v1607_v43 }
 0x76b   : > { %7663 = vmatpush3.bf16.msra.mxu0 %v1657_v62 }
 0x76c   : > { %v10022_v25 = vpop.eup %8584 }
 0x76d   : > { %v1616_v47 = vsel %vm1257_vm2, %v10022_v25, 0.0 }
 0x76e   : > { %1617 = vadd.xlane.f32.xlu0 %v1616_v47 }
 0x77b   : > { %1751 = vrot.lane.b32.xlu1 %v9802_v58, %s9279_s22 }
 0x77f   : > { %1753 = vrot.lane.b32.xlu1 %v9818_v32, %s9279_s22 }
 0x789   : > { %v1579_v51 = vpop.xlane.xlu1 %1578 }
 0x78a   : > { %v1587_v53 = vsub.f32 %v9996_v17, %v1579_v51 }
 0x78c   : > { %v1602_v52 = vmul.f32 1.442695, %v1587_v53 }
 0x78d   : > { %v1573_v60 = vpop.xlane.xlu1 %1572 }
 0x78e   : > { %8586 = vpow2.f32 %v1602_v52  ;;  %v1585_v56 = vsub.f32 %v10002_v28, %v1573_v60 }
 0x790   : > { %v1598_v14 = vmul.f32 1.442695, %v1585_v56 }
 0x791   : > { %v1659_v5 = vpop.permute.xlu1 %1658 }
 0x792   : > { %7664 = vmatprep.subr.bf16.mxu0 %v1659_v5  ;;  %8588 = vpow2.f32 %v1598_v14 }
 0x793   : > { %7665 = vmatpush3.bf16.msra.mxu0 %v1659_v5 }
 0x798   : > { %v8587_v42 = vpop.eup %8586 }
 0x799   : > { %v1625_v29 = vsel %vm1257_vm2, %v8587_v42, 0.0 }
 0x79a   : > { %1626 = vadd.xlane.f32.xlu0 %v1625_v29 }
 0x79c   : > { %v8589_v24 = vpop.eup %8588 }
 0x79d   : > { %v1619_v48 = vsel %vm1257_vm2, %v8589_v24, 0.0 }
 0x7a3   : > { %1620 = vadd.xlane.f32.xlu1 %v1619_v48 }
 0x7b0   : > { %1749 = vrot.lane.b32.xlu0 %v9786_v39, %s9279_s22 }
 0x7b4   : > { %1741 = vrot.lane.b32.xlu0 %v9784_v57, %s9279_s22  ;;  %1755 = vrot.lane.b32.xlu1 %v9828_v40, %s9279_s22 }
 0x7b8   : > { %1745 = vrot.lane.b32.xlu0 %v9815_v6, %s9279_s22  ;;  %1743 = vrot.lane.b32.xlu1 %v9799_v54, %s9279_s22 }
 0x7bc   : > { %1747 = vrot.lane.b32.xlu1 %v9826_v15, %s9279_s22 }
 0x7eb   : > { %v1612_v17 = vpop.xlane.xlu0 %1611 }
 0x7ef   : > { %v1606_v4 = vpop.xlane.xlu0 %1605 }
 0x7f3   : > { %v1615_v28 = vpop.xlane.xlu1 %1614 }
 0x7f4   : > { %8590 = vrcp.f32 %v1615_v28 }
 0x7f5   : > { %8592 = vrcp.f32 %v1606_v4 }
 0x7f6   : > { %8594 = vrcp.f32 %v1612_v17 }
 0x7f7   : > { %v1609_v44 = vpop.xlane.xlu1 %1608  ;;  %v1624_v14 = vpop.xlane.xlu0 %1623 }
 0x7f8   : > { %8596 = vrcp.f32 %v1609_v44 }
 0x7fb   : > { %v1618_v5 = vpop.xlane.xlu0 %1617  ;;  %v1752_v29 = vpop.permute.xlu1 %1751 }
 0x7fe   : > { %v8591_v8 = vpop.eup %8590 }
 0x7ff   : > { %v8593_v62 = vpop.eup %8592  ;;  %v1639_v47 = vmul.f32 %v8591_v8, %v8579_v59  ;;  %v1754_v28 = vpop.permute.xlu1 %1753 }
 0x800   : > { %v8595_v36 = vpop.eup %8594  ;;  %v1636_v51 = vmul.f32 %v8593_v62, %v10012_v30  ;;  %v1773_v30 = vsel %vm1151_vm0, %v1752_v29, 0 }
 0x801   : > { %v1638_v52 = vmul.f32 %v8595_v36, %v10008_v13  ;;  %v1776_v36 = vsel %vm1151_vm0, %v1754_v28, 0 }
 0x802   : > { %v8597_v43 = vpop.eup %8596 }
 0x803   : > { %v1637_v53 = vmul.f32 %v8597_v43, %v8581_v31  ;;  %v1645_v56 = vpack.c.bf16 %v1639_v47, %v1638_v52 }
 0x805   : > { %v1644_v60 = vpack.c.bf16 %v1637_v53, %v1636_v51 }
 0x807   : > { %7666 = vmatprep.mubr.msk.bf16.mxu0 %vm1257_vm2, %v1644_v60 }
 0x808   : > { %7667 = vmatmul.mubr.msk.bf16.vlgmr.msra.gmra.mrb[24].mxu0 %vm1257_vm2, %v1645_v56 }
 0x827   : > { %v1627_v48 = vpop.xlane.xlu0 %1626 }
 0x828   : > { %8598 = vrcp.f32 %v1627_v48 }
 0x829   : > { %8600 = vrcp.f32 %v1618_v5 }
 0x82a   : > { %8602 = vrcp.f32 %v1624_v14 }
 0x82b   : > { %v1750_v17 = vpop.permute.xlu0 %1749 }
 0x82c   : > { %7970 = vmatprep.subr.msk.bf16.mxu0 %vm1151_vm0, %v1750_v17  ;;  %v1770_v59 = vsel %vm1151_vm0, %v1750_v17, 0 }
 0x82d   : > { %7675 = vmatpush3.bf16.xpose.msra.mxu0 %v1770_v59 }
 0x82e   : > { %7971 = vmatprep.subr.msk.bf16.mxu0 %vm1151_vm0, %v1752_v29 }
 0x82f   : > { %v1742_v56 = vpop.permute.xlu0 %1741 }
 0x830   : > { %v1621_v13 = vpop.xlane.xlu1 %1620 }
 0x831   : > { %8604 = vrcp.f32 %v1621_v13 }
 0x832   : > { %v8599_v31 = vpop.eup %8598 }
 0x833   : > { %v8601_v4 = vpop.eup %8600  ;;  %v1643_v62 = vmul.f32 %v8599_v31, %v8587_v42 }
 0x834   : > { %v8603_v44 = vpop.eup %8602  ;;  %v1640_v43 = vmul.f32 %v8601_v4, %v10022_v25  ;;  %v1756_v51 = vpop.permute.xlu1 %1755 }
 0x835   : > { %7677 = vmatpush3.bf16.xpose.msra.mxu0 %v1773_v30  ;;  %v1642_v53 = vmul.f32 %v8603_v44, %v10017_v33  ;;  %v1779_v42 = vsel %vm1151_vm0, %v1756_v51, 0 }
 0x836   : > { %7972 = vmatprep.subr.msk.bf16.mxu0 %vm1151_vm0, %v1754_v28 }
 0x837   : > { %v1647_v60 = vpack.c.bf16 %v1643_v62, %v1642_v53 }
 0x838   : > { %v1744_v25 = vpop.permute.xlu1 %1743 }
 0x83b   : > { %v8605_v8 = vpop.eup %8604 }
 0x83c   : > { %v1641_v47 = vmul.f32 %v8605_v8, %v8589_v24  ;;  %v1746_v24 = vpop.permute.xlu0 %1745  ;;  %v1748_v33 = vpop.permute.xlu1 %1747 }
 0x83d   : > { %7679 = vmatpush3.bf16.xpose.msra.mxu0 %v1776_v36 }
 0x83e   : > { %7973 = vmatprep.subr.msk.bf16.mxu0 %vm1151_vm0, %v1756_v51  ;;  %v1646_v52 = vpack.c.bf16 %v1641_v47, %v1640_v43 }
 0x840   : > { %7670 = vmatprep.mubr.msk.bf16.mxu0 %vm1257_vm2, %v1646_v52 }
 0x841   : > { %7671 = vmatmul.mubr.msk.bf16.gmra.mrb[28].mxu0 %vm1257_vm2, %v1647_v60 }
 0x842   : > { %7682 = vmatprep.mubr.msk.bf16.mxu0 %vm1151_vm0, %v1742_v56 }
 0x845   : > { %7681 = vmatpush3.bf16.xpose.msra.mxu0 %v1779_v42 }
 0x84c   : > { %7683 = vmatmul.mubr.msk.bf16.vlgmr.msra.gmra.mrb[32].mxu0 %vm1151_vm0, %v1744_v25 }
 0x84d   : > { %7686 = vmatprep.mubr.msk.bf16.mxu0 %vm1151_vm0, %v1746_v24 }
 0x854   : > { %7687 = vmatmul.mubr.msk.bf16.gmra.mrb[36].mxu0 %vm1151_vm0, %v1748_v33 }
 0x8db   : > { %v10066_v14 = vpop.f32.mrb[24].mxu0 }
 0x8dc   : > { %v10068_v5 = vpop.f32.mrb[25].mxu0 }
 0x8dd   : > { %v10070_v29 = vpop.f32.mrb[26].mxu0 }
 0x8de   : > { %v10074_v17 = vpop.f32.mrb[27].mxu0 }
 0x914   : > { %v10078_v59 = vpop.f32.mrb[28].mxu0 }
 0x915   : > { %v10080_v13 = vpop.f32.mrb[29].mxu0 }
 0x916   : > { %v10082_v30 = vpop.f32.mrb[30].mxu0 }
 0x917   : > { %v10086_v4 = vpop.f32.mrb[31].mxu0 }
 0x91f   : > { %v7684_v8 = vpop.f32.mrb[32].mxu0 }
 0x920   : > { %v1848_v62 = vmul.f32 0.17677669, %v7684_v8  ;;  %v1815_v36 = vpop.f32.mrb[33].mxu0 }
 0x921   : > { %v1846_v43 = vmul.f32 0.17677669, %v1815_v36  ;;  %v7685_v47 = vpop.f32.mrb[34].mxu0 }
 0x922   : > { %v1818_v51 = vpop.f32.mrb[35].mxu0  ;;  %v1856_v53 = vsel %vm9854_vm4, %v1848_v62, -1e+30  ;;  %v1849_v56 = vmul.f32 0.17677669, %v7685_v47 }
 0x923   : > { %v1847_v52 = vmul.f32 0.17677669, %v1818_v51  ;;  %v1868_v60 = vsel %vm1257_vm2, %v1856_v53, -inf  ;;  %v1854_v42 = vsel %vm9845_vm1, %v1846_v43, -1e+30 }
 0x924   : > { %1869 = vmax.xlane.f32.xlu0 %v1868_v60  ;;  %v1862_v8 = vsel %vm1257_vm2, %v1854_v42, -inf  ;;  %v1857_v51 = vsel %vm9861_vm5, %v1849_v56, -1e+30 }
 0x925   : > { %v1855_v25 = vsel %vm9850_vm3, %v1847_v52, -1e+30  ;;  %v1871_v44 = vsel %vm1257_vm2, %v1857_v51, -inf }
 0x926   : > { %v1865_v24 = vsel %vm1257_vm2, %v1855_v25, -inf }
 0x927   : > { %1866 = vmax.xlane.f32.xlu1 %v1865_v24  ;;  %v7688_v33 = vpop.f32.mrb[36].mxu0 }
 0x928   : > { %v1852_v36 = vmul.f32 0.17677669, %v7688_v33  ;;  %1863 = vmax.xlane.f32.xlu0 %v1862_v8  ;;  %v1831_v62 = vpop.f32.mrb[37].mxu0 }
 0x929   : > { %v7689_v47 = vpop.f32.mrb[38].mxu0  ;;  %v1850_v43 = vmul.f32 0.17677669, %v1831_v62 }
 0x92a   : > { %v1834_v60 = vpop.f32.mrb[39].mxu0  ;;  %v1860_v52 = vsel %vm9886_vm8, %v1852_v36, -1e+30 }
 0x92b   : > { %v1880_v24 = vsel %vm1257_vm2, %v1860_v52, -inf  ;;  %v1858_v33 = vsel %vm9876_vm6, %v1850_v43, -1e+30  ;;  %v1851_v56 = vmul.f32 0.17677669, %v1834_v60 }
 0x92c   : > { %1872 = vmax.xlane.f32.xlu0 %v1871_v44  ;;  %v1874_v8 = vsel %vm1257_vm2, %v1858_v33, -inf  ;;  %v1853_v44 = vmul.f32 0.17677669, %v7689_v47 }
 0x92d   : > { %v10122_v43 = vsel %vm9882_vm7, %v1851_v56, -1e+30 }
 0x92e   : > { %v10116_v36 = vsel %vm9893_vm9, %v1853_v44, -1e+30 }
 0x92f   : > { %v1883_v62 = vsel %vm1257_vm2, %v10116_v36, -inf }
 0x930   : > { %1881 = vmax.xlane.f32.xlu0 %v1880_v24  ;;  %v1877_v24 = vsel %vm1257_vm2, %v10122_v43, -inf }
 0x934   : > { %1875 = vmax.xlane.f32.xlu0 %v1874_v8 }
 0x938   : > { %1956 = vrot.lane.b32.xlu1 %v9794_v46, %s9279_s22 }
 0x93c   : > { %1958 = vrot.lane.b32.xlu1 %v9812_v1, %s9279_s22 }
 0x94a   : > { %1954 = vrot.lane.b32.xlu0 %v9796_v49, %s9279_s22 }
 0x960   : > { %1884 = vmax.xlane.f32.xlu1 %v1883_v62 }
 0x964   : > { %1878 = vmax.xlane.f32.xlu1 %v1877_v24 }
 0x975   : > { %1960 = vrot.lane.b32.xlu1 %v9809_v63, %s9279_s22 }
 0x9b1   : > { %v1870_v47 = vpop.xlane.xlu0 %1869 }
 0x9b2   : > { %v1888_v60 = vsub.f32 %v1856_v53, %v1870_v47 }
 0x9b4   : > { %v1898_v8 = vmul.f32 1.442695, %v1888_v60  ;;  %v1867_v44 = vpop.xlane.xlu1 %1866 }
 0x9b5   : > { %v1864_v31 = vpop.xlane.xlu0 %1863  ;;  %v1887_v28 = vsub.f32 %v1855_v25, %v1867_v44 }
 0x9b6   : > { %8606 = vpow2.f32 %v1898_v8  ;;  %v1886_v48 = vsub.f32 %v1854_v42, %v1864_v31 }
 0x9b7   : > { %v1896_v19 = vmul.f32 1.442695, %v1887_v28 }
 0x9b8   : > { %v1894_v62 = vmul.f32 1.442695, %v1886_v48 }
 0x9b9   : > { %v1873_v20 = vpop.xlane.xlu0 %1872 }
 0x9ba   : > { %8608 = vpow2.f32 %v1894_v62  ;;  %v1889_v56 = vsub.f32 %v1857_v51, %v1873_v20  ;;  %v1957_v20 = vpop.permute.xlu1 %1956 }
 0x9bc   : > { %v1900_v23 = vmul.f32 1.442695, %v1889_v56 }
 0x9bd   : > { %v1882_v22 = vpop.xlane.xlu0 %1881 }
 0x9be   : > { %8610 = vpow2.f32 %v1900_v23  ;;  %v1892_v24 = vsub.f32 %v1860_v52, %v1882_v22 }
 0x9bf   : > { %8612 = vpow2.f32 %v1896_v19 }
 0x9c0   : > { %v10128_v21 = vpop.eup %8606  ;;  %v1906_v18 = vmul.f32 1.442695, %v1892_v24 }
 0x9c1   : > { %v1876_v53 = vpop.xlane.xlu0 %1875  ;;  %v1916_v47 = vsel %vm1257_vm2, %v10128_v21, 0.0 }
 0x9c2   : > { %8614 = vpow2.f32 %v1906_v18  ;;  %v1890_v31 = vsub.f32 %v1858_v33, %v1876_v53  ;;  %1917 = vadd.xlane.f32.xlu0 %v1916_v47  ;;  %v1959_v18 = vpop.permute.xlu1 %1958 }
 0x9c4   : > { %v10132_v48 = vpop.eup %8608  ;;  %v1902_v42 = vmul.f32 1.442695, %v1890_v31 }
 0x9c5   : > { %v1955_v28 = vpop.permute.xlu0 %1954  ;;  %v1910_v23 = vsel %vm1257_vm2, %v10132_v48, 0.0 }
 0x9c6   : > { %8616 = vpow2.f32 %v1902_v42  ;;  %1911 = vadd.xlane.f32.xlu0 %v1910_v23  ;;  %7690 = vmatprep.subr.bf16.mxu1 %v1955_v28 }
 0x9c7   : > { %7691 = vmatpush3.bf16.msra.mxu1 %v1955_v28 }
 0x9c8   : > { %v8611_v22 = vpop.eup %8610  ;;  %7692 = vmatprep.subr.bf16.mxu1 %v1957_v20 }
 0x9c9   : > { %v1919_v19 = vsel %vm1257_vm2, %v8611_v22, 0.0  ;;  %v8613_v25 = vpop.eup %8612 }
 0x9ca   : > { %1920 = vadd.xlane.f32.xlu1 %v1919_v19  ;;  %v1913_v33 = vsel %vm1257_vm2, %v8613_v25, 0.0 }
 0x9cb   : > { %7693 = vmatpush3.bf16.msra.mxu1 %v1957_v20 }
 0x9cc   : > { %v10137_v51 = vpop.eup %8614  ;;  %7694 = vmatprep.subr.bf16.mxu1 %v1959_v18 }
 0x9cd   : > { %v1928_v52 = vsel %vm1257_vm2, %v10137_v51, 0.0 }
 0x9ce   : > { %1929 = vadd.xlane.f32.xlu0 %v1928_v52  ;;  %1914 = vadd.xlane.f32.xlu1 %v1913_v33 }
 0x9cf   : > { %7695 = vmatpush3.bf16.msra.mxu1 %v1959_v18 }
 0x9d0   : > { %v10142_v60 = vpop.eup %8616 }
 0x9d1   : > { %v1922_v8 = vsel %vm1257_vm2, %v10142_v60, 0.0 }
 0x9d2   : > { %1923 = vadd.xlane.f32.xlu0 %v1922_v8 }
 0x9df   : > { %2053 = vrot.lane.b32.xlu1 %v9802_v58, %s9280_s29 }
 0x9e3   : > { %2055 = vrot.lane.b32.xlu1 %v9818_v32, %s9280_s29 }
 0x9ed   : > { %v1885_v44 = vpop.xlane.xlu1 %1884 }
 0x9ee   : > { %v1893_v62 = vsub.f32 %v10116_v36, %v1885_v44 }
 0x9f0   : > { %v1908_v56 = vmul.f32 1.442695, %v1893_v62 }
 0x9f1   : > { %v1879_v24 = vpop.xlane.xlu1 %1878 }
 0x9f2   : > { %8618 = vpow2.f32 %v1908_v56  ;;  %v1891_v53 = vsub.f32 %v10122_v43, %v1879_v24 }
 0x9f4   : > { %v1904_v47 = vmul.f32 1.442695, %v1891_v53 }
 0x9f5   : > { %v1961_v31 = vpop.permute.xlu1 %1960 }
 0x9f6   : > { %7696 = vmatprep.subr.bf16.mxu1 %v1961_v31  ;;  %8620 = vpow2.f32 %v1904_v47 }
 0x9f7   : > { %7697 = vmatpush3.bf16.msra.mxu1 %v1961_v31 }
 0x9fc   : > { %v8619_v42 = vpop.eup %8618 }
 0x9fd   : > { %v1931_v20 = vsel %vm1257_vm2, %v8619_v42, 0.0 }
 0x9fe   : > { %1932 = vadd.xlane.f32.xlu0 %v1931_v20 }
 0xa00   : > { %v8621_v58 = vpop.eup %8620 }
 0xa01   : > { %v1925_v32 = vsel %vm1257_vm2, %v8621_v58, 0.0 }
 0xa07   : > { %1926 = vadd.xlane.f32.xlu1 %v1925_v32 }
 0xa14   : > { %2051 = vrot.lane.b32.xlu0 %v9786_v39, %s9280_s29 }
 0xa18   : > { %2043 = vrot.lane.b32.xlu0 %v9784_v57, %s9280_s29  ;;  %2057 = vrot.lane.b32.xlu1 %v9828_v40, %s9280_s29 }
 0xa1c   : > { %2047 = vrot.lane.b32.xlu0 %v9815_v6, %s9280_s29  ;;  %2045 = vrot.lane.b32.xlu1 %v9799_v54, %s9280_s29 }
 0xa20   : > { %2049 = vrot.lane.b32.xlu1 %v9826_v15, %s9280_s29 }
 0xa4f   : > { %v1918_v36 = vpop.xlane.xlu0 %1917 }
 0xa53   : > { %v1912_v28 = vpop.xlane.xlu0 %1911 }
 0xa57   : > { %v1921_v43 = vpop.xlane.xlu1 %1920 }
 0xa58   : > { %8622 = vrcp.f32 %v1921_v43 }
 0xa59   : > { %8624 = vrcp.f32 %v1912_v28 }
 0xa5a   : > { %8626 = vrcp.f32 %v1918_v36 }
 0xa5b   : > { %v1915_v39 = vpop.xlane.xlu1 %1914  ;;  %v1930_v8 = vpop.xlane.xlu0 %1929 }
 0xa5c   : > { %8628 = vrcp.f32 %v1915_v39 }
 0xa5f   : > { %v1924_v44 = vpop.xlane.xlu0 %1923  ;;  %v2054_v62 = vpop.permute.xlu1 %2053 }
 0xa62   : > { %v8623_v57 = vpop.eup %8622 }
 0xa63   : > { %v8625_v23 = vpop.eup %8624  ;;  %v1945_v18 = vmul.f32 %v8623_v57, %v8611_v22  ;;  %v2056_v53 = vpop.permute.xlu1 %2055 }
 0xa64   : > { %v8627_v40 = vpop.eup %8626  ;;  %v1942_v6 = vmul.f32 %v8625_v23, %v10132_v48  ;;  %v2075_v48 = vsel %vm1151_vm0, %v2054_v62, 0  ;;  %v2078_v36 = vsel %vm1151_vm0, %v2056_v53, 0 }
 0xa65   : > { %v1944_v54 = vmul.f32 %v8627_v40, %v10128_v21 }
 0xa66   : > { %v8629_v19 = vpop.eup %8628 }
 0xa67   : > { %v1943_v52 = vmul.f32 %v8629_v19, %v8613_v25  ;;  %v1951_v15 = vpack.c.bf16 %v1945_v18, %v1944_v54  ;;  %v12036_v18 = vmov 0  }
 0xa69   : > { %v1950_v33 = vpack.c.bf16 %v1943_v52, %v1942_v6 }
 0xa6b   : > { %7698 = vmatprep.mubr.msk.bf16.mxu1 %vm1257_vm2, %v1950_v33 }
 0xa6c   : > { %7699 = vmatmul.mubr.msk.bf16.vlgmr.msra.gmra.mrb[24].mxu1 %vm1257_vm2, %v1951_v15 }
 0xa8b   : > { %v1933_v56 = vpop.xlane.xlu0 %1932 }
 0xa8c   : > { %8630 = vrcp.f32 %v1933_v56 }
 0xa8d   : > { %8632 = vrcp.f32 %v1924_v44 }
 0xa8e   : > { %8634 = vrcp.f32 %v1930_v8 }
 0xa8f   : > { %v2052_v24 = vpop.permute.xlu0 %2051 }
 0xa90   : > { %7974 = vmatprep.subr.msk.bf16.mxu1 %vm1151_vm0, %v2052_v24  ;;  %v2072_v22 = vsel %vm1151_vm0, %v2052_v24, 0 }
 0xa91   : > { %7707 = vmatpush3.bf16.xpose.msra.mxu1 %v2072_v22 }
 0xa92   : > { %7975 = vmatprep.subr.msk.bf16.mxu1 %vm1151_vm0, %v2054_v62 }
 0xa93   : > { %v2044_v19 = vpop.permute.xlu0 %2043 }
 0xa94   : > { %v1927_v21 = vpop.xlane.xlu1 %1926 }
 0xa95   : > { %8636 = vrcp.f32 %v1927_v21 }
 0xa96   : > { %v8631_v25 = vpop.eup %8630 }
 0xa97   : > { %v8633_v47 = vpop.eup %8632  ;;  %v1949_v32 = vmul.f32 %v8631_v25, %v8619_v42 }
 0xa98   : > { %v8635_v31 = vpop.eup %8634  ;;  %v1946_v43 = vmul.f32 %v8633_v47, %v10142_v60  ;;  %v2058_v39 = vpop.permute.xlu1 %2057 }
 0xa99   : > { %7709 = vmatpush3.bf16.xpose.msra.mxu1 %v2075_v48  ;;  %v1948_v57 = vmul.f32 %v8635_v31, %v10137_v51  ;;  %v2081_v42 = vsel %vm1151_vm0, %v2058_v39, 0 }
 0xa9a   : > { %7976 = vmatprep.subr.msk.bf16.mxu1 %vm1151_vm0, %v2056_v53 }
 0xa9b   : > { %v1953_v40 = vpack.c.bf16 %v1949_v32, %v1948_v57 }
 0xa9c   : > { %v2046_v60 = vpop.permute.xlu1 %2045 }
 0xa9f   : > { %v8637_v20 = vpop.eup %8636 }
 0xaa0   : > { %v1947_v28 = vmul.f32 %v8637_v20, %v8621_v58  ;;  %v2048_v58 = vpop.permute.xlu0 %2047  ;;  %v2050_v51 = vpop.permute.xlu1 %2049 }
 0xaa1   : > { %7711 = vmatpush3.bf16.xpose.msra.mxu1 %v2078_v36 }
 0xaa2   : > { %7977 = vmatprep.subr.msk.bf16.mxu1 %vm1151_vm0, %v2058_v39  ;;  %v1952_v23 = vpack.c.bf16 %v1947_v28, %v1946_v43 }
 0xaa4   : > { %7702 = vmatprep.mubr.msk.bf16.mxu1 %vm1257_vm2, %v1952_v23 }
 0xaa5   : > { %7703 = vmatmul.mubr.msk.bf16.gmra.mrb[28].mxu1 %vm1257_vm2, %v1953_v40 }
 0xaa6   : > { %7714 = vmatprep.mubr.msk.bf16.mxu1 %vm1151_vm0, %v2044_v19 }
 0xaa9   : > { %7713 = vmatpush3.bf16.xpose.msra.mxu1 %v2081_v42 }
 0xab0   : > { %7715 = vmatmul.mubr.msk.bf16.vlgmr.msra.gmra.mrb[32].mxu1 %vm1151_vm0, %v2046_v60 }
 0xab1   : > { %7718 = vmatprep.mubr.msk.bf16.mxu1 %vm1151_vm0, %v2048_v58 }
 0xab8   : > { %7719 = vmatmul.mubr.msk.bf16.gmra.mrb[36].mxu1 %vm1151_vm0, %v2050_v51 }
 0xab9   : > { %2975 = vmatprep.mubr.bf16.mxu1 %v12036_v18 }
 0xb3f   : > { %v10187_v6 = vpop.f32.mrb[24].mxu1 }
 0xb40   : > { %v10189_v52 = vpop.f32.mrb[25].mxu1 }
 0xb41   : > { %v10191_v54 = vpop.f32.mrb[26].mxu1 }
 0xb42   : > { %v10195_v15 = vpop.f32.mrb[27].mxu1 }
 0xb78   : > { %v10199_v44 = vpop.f32.mrb[28].mxu1 }
 0xb79   : > { %v10201_v62 = vpop.f32.mrb[29].mxu1 }
 0xb7a   : > { %v10203_v56 = vpop.f32.mrb[30].mxu1 }
 0xb7b   : > { %v10207_v53 = vpop.f32.mrb[31].mxu1 }
 0xb83   : > { %v7716_v21 = vpop.f32.mrb[32].mxu1 }
 0xb84   : > { %v2117_v48 = vpop.f32.mrb[33].mxu1  ;;  %v2150_v25 = vmul.f32 0.17677669, %v7716_v21 }
 0xb85   : > { %v2148_v47 = vmul.f32 0.17677669, %v2117_v48  ;;  %v7717_v31 = vpop.f32.mrb[34].mxu1 }
 0xb86   : > { %v2120_v20 = vpop.f32.mrb[35].mxu1  ;;  %v2151_v28 = vmul.f32 0.17677669, %v7717_v31  ;;  %v2158_v57 = vsel %vm9854_vm4, %v2150_v25, -1e+30 }
 0xb87   : > { %v2149_v32 = vmul.f32 0.17677669, %v2120_v20  ;;  %v2156_v36 = vsel %vm9845_vm1, %v2148_v47, -1e+30  ;;  %v2170_v42 = vsel %vm1257_vm2, %v2158_v57, -inf }
 0xb88   : > { %v2164_v43 = vsel %vm1257_vm2, %v2156_v36, -inf  ;;  %v2159_v60 = vsel %vm9861_vm5, %v2151_v28, -1e+30 }
 0xb89   : > { %v2157_v39 = vsel %vm9850_vm3, %v2149_v32, -1e+30  ;;  %2165 = vmax.xlane.f32.xlu0 %v2164_v43  ;;  %v2173_v31 = vsel %vm1257_vm2, %v2159_v60, -inf }
 0xb8a   : > { %v2167_v23 = vsel %vm1257_vm2, %v2157_v39, -inf }
 0xb8b   : > { %2168 = vmax.xlane.f32.xlu1 %v2167_v23  ;;  %v7720_v40 = vpop.f32.mrb[36].mxu1 }
 0xb8c   : > { %v2133_v19 = vpop.f32.mrb[37].mxu1  ;;  %v2154_v20 = vmul.f32 0.17677669, %v7720_v40 }
 0xb8d   : > { %v2152_v58 = vmul.f32 0.17677669, %v2133_v19  ;;  %2171 = vmax.xlane.f32.xlu0 %v2170_v42  ;;  %v7721_v51 = vpop.f32.mrb[38].mxu1 }
 0xb8e   : > { %v2136_v21 = vpop.f32.mrb[39].mxu1  ;;  %v2155_v48 = vmul.f32 0.17677669, %v7721_v51  ;;  %v2162_v19 = vsel %vm9886_vm8, %v2154_v20, -1e+30 }
 0xb8f   : > { %v2153_v47 = vmul.f32 0.17677669, %v2136_v21  ;;  %v2160_v25 = vsel %vm9876_vm6, %v2152_v58, -1e+30  ;;  %v2182_v42 = vsel %vm1257_vm2, %v2162_v19, -inf }
 0xb90   : > { %v2163_v28 = vsel %vm9893_vm9, %v2155_v48, -1e+30  ;;  %v2176_v23 = vsel %vm1257_vm2, %v2160_v25, -inf }
 0xb91   : > { %v2161_v32 = vsel %vm9882_vm7, %v2153_v47, -1e+30  ;;  %2174 = vmax.xlane.f32.xlu0 %v2173_v31  ;;  %v2185_v40 = vsel %vm1257_vm2, %v2163_v28, -inf }
 0xb92   : > { %v2179_v43 = vsel %vm1257_vm2, %v2161_v32, -inf }
 0xb93   : > { %2180 = vmax.xlane.f32.xlu1 %v2179_v43 }
 0xb95   : > { %2177 = vmax.xlane.f32.xlu0 %v2176_v23 }
 0xb97   : > { %2186 = vmax.xlane.f32.xlu1 %v2185_v40 }
 0xb99   : > { %2183 = vmax.xlane.f32.xlu0 %v2182_v42 }
 0xbaf   : > { %2256 = vrot.lane.b32.xlu0 %v9796_v49, %s9280_s29 }
 0xc16   : > { %v2166_v58 = vpop.xlane.xlu0 %2165 }
 0xc17   : > { %v2188_v51 = vsub.f32 %v2156_v36, %v2166_v58 }
 0xc18   : > { %v2169_v21 = vpop.xlane.xlu1 %2168 }
 0xc19   : > { %v2196_v31 = vmul.f32 1.442695, %v2188_v51  ;;  %v2189_v43 = vsub.f32 %v2157_v39, %v2169_v21 }
 0xc1a   : > { %v2172_v48 = vpop.xlane.xlu0 %2171 }
 0xc1b   : > { %v2190_v47 = vsub.f32 %v2158_v57, %v2172_v48  ;;  %v2198_v40 = vmul.f32 1.442695, %v2189_v43 }
 0xc1d   : > { %v2200_v22 = vmul.f32 1.442695, %v2190_v47 }
 0xc1e   : > { %v2175_v24 = vpop.xlane.xlu0 %2174 }
 0xc1f   : > { %8638 = vpow2.f32 %v2200_v22  ;;  %v2191_v20 = vsub.f32 %v2159_v60, %v2175_v24 }
 0xc20   : > { %v2181_v23 = vpop.xlane.xlu1 %2180  ;;  %8640 = vpow2.f32 %v2196_v31 }
 0xc21   : > { %v2202_v33 = vmul.f32 1.442695, %v2191_v20 }
 0xc22   : > { %v2178_v8 = vpop.xlane.xlu0 %2177 }
 0xc23   : > { %8642 = vpow2.f32 %v2202_v33  ;;  %v2192_v42 = vsub.f32 %v2160_v25, %v2178_v8  ;;  %v2193_v8 = vsub.f32 %v2161_v32, %v2181_v23 }
 0xc24   : > { %8644 = vpow2.f32 %v2198_v40  ;;  %v2187_v49 = vpop.xlane.xlu1 %2186 }
 0xc25   : > { %v2204_v57 = vmul.f32 1.442695, %v2192_v42  ;;  %v2195_v51 = vsub.f32 %v2163_v28, %v2187_v49  ;;  %v12037_v49 = vpack.i.bf16 %v10074_v17, %v10068_v5 }
 0xc26   : > { %v2184_v61 = vpop.xlane.xlu0 %2183 }
 0xc27   : > { %v2194_v36 = vsub.f32 %v2162_v19, %v2184_v61  ;;  %v2210_v60 = vmul.f32 1.442695, %v2195_v51  ;;  %v2206_v19 = vmul.f32 1.442695, %v2193_v8 }
 0xc29   : > { %v10237_v58 = vpop.eup %8638  ;;  %v2208_v39 = vmul.f32 1.442695, %v2194_v36  ;;  %v12038_v36 = vpack.i.bf16 %v10195_v15, %v10189_v52 }
 0xc2a   : > { %v2257_v21 = vpop.permute.xlu0 %2256  ;;  %v2218_v24 = vsel %vm1257_vm2, %v10237_v58, 0.0  ;;  %v8641_v22 = vpop.eup %8640 }
 0xc2b   : > { %8646 = vpow2.f32 %v2208_v39  ;;  %2219 = vadd.xlane.f32.xlu0 %v2218_v24  ;;  %7722 = vmatprep.subr.bf16.mxu0 %v2257_v21  ;;  %v2212_v61 = vsel %vm1257_vm2, %v8641_v22, 0.0 }
 0xc2c   : > { %7723 = vmatpush3.bf16.msra.mxu0 %v2257_v21  ;;  %8648 = vpow2.f32 %v2204_v57 }
 0xc2d   : > { %v10241_v33 = vpop.eup %8642  ;;  %8650 = vpow2.f32 %v2210_v60 }
 0xc2e   : > { %v2221_v25 = vsel %vm1257_vm2, %v10241_v33, 0.0  ;;  %v8645_v28 = vpop.eup %8644  ;;  %8652 = vpow2.f32 %v2206_v19 }
 0xc2f   : > { %2213 = vadd.xlane.f32.xlu0 %v2212_v61  ;;  %2222 = vadd.xlane.f32.xlu1 %v2221_v25  ;;  %v2215_v48 = vsel %vm1257_vm2, %v8645_v28, 0.0 }
 0xc33   : > { %2216 = vadd.xlane.f32.xlu1 %v2215_v48 }
 0xc35   : > { %v10247_v47 = vpop.eup %8646 }
 0xc36   : > { %v2230_v32 = vsel %vm1257_vm2, %v10247_v47, 0.0  ;;  %v8649_v31 = vpop.eup %8648 }
 0xc37   : > { %2231 = vadd.xlane.f32.xlu1 %v2230_v32  ;;  %v2224_v43 = vsel %vm1257_vm2, %v8649_v31, 0.0  ;;  %v8651_v20 = vpop.eup %8650 }
 0xc38   : > { %v2233_v23 = vsel %vm1257_vm2, %v8651_v20, 0.0  ;;  %v8653_v40 = vpop.eup %8652 }
 0xc39   : > { %v2227_v42 = vsel %vm1257_vm2, %v8653_v40, 0.0 }
 0xc3b   : > { %2225 = vadd.xlane.f32.xlu1 %v2224_v43 }
 0xc3f   : > { %2234 = vadd.xlane.f32.xlu1 %v2233_v23 }
 0xc43   : > { %2228 = vadd.xlane.f32.xlu1 %v2227_v42 }
 0xc45   : > { %2260 = vrot.lane.b32.xlu0 %v9812_v1, %s9280_s29  ;;  %v12039_v1 = vpack.i.bf16 %v10070_v29, %v10066_v14 }
 0xc49   : > { %2262 = vrot.lane.b32.xlu0 %v9809_v63, %s9280_s29  ;;  %v12040_v63 = vpack.i.bf16 %v10191_v54, %v10187_v6 }
 0xc4d   : > { %8159 = vrot.lane.b32.xlu0 %v12037_v49, %s9280_s29 }
 0xc51   : > { %8169 = vrot.lane.b32.xlu0 %v12038_v36, %s9279_s22 }
 0xc54   : > { %2258 = vrot.lane.b32.xlu1 %v9794_v46, %s9280_s29 }
 0xc58   : > { %8164 = vrot.lane.b32.xlu1 %v12039_v1, %s9280_s29 }
 0xc5c   : > { %8174 = vrot.lane.b32.xlu1 %v12040_v63, %s9279_s22 }
 0xcb8   : > { %v2220_v5 = vpop.xlane.xlu0 %2219 }
 0xcbc   : > { %v2214_v17 = vpop.xlane.xlu0 %2213  ;;  %v2223_v57 = vpop.xlane.xlu1 %2222 }
 0xcbd   : > { %8654 = vrcp.f32 %v2214_v17  ;;  %v8316_v17 = vld [vmem:[%s11925_s5 + $0x30] sm:$0xff]  }
 0xcc0   : > { %v2217_v51 = vpop.xlane.xlu1 %2216  ;;  %v2261_v6 = vpop.permute.xlu0 %2260 }
 0xcc1   : > { %8656 = vrcp.f32 %v2217_v51 }
 0xcc2   : > { %8658 = vrcp.f32 %v2223_v57  ;;  %v8317_v57 = vld [vmem:[%s11925_s5 + $0x38] sm:$0xff]  }
 0xcc3   : > { %8660 = vrcp.f32 %v2220_v5 }
 0xcc4   : > { %v2232_v52 = vpop.xlane.xlu1 %2231 }
 0xcc7   : > { %v8655_v39 = vpop.eup %8654 }
 0xcc8   : > { %v2226_v15 = vpop.xlane.xlu1 %2225  ;;  %v2244_v24 = vmul.f32 %v8655_v39, %v8641_v22  ;;  %v2263_v22 = vpop.permute.xlu0 %2262 }
 0xcc9   : > { %8662 = vrcp.f32 %v2226_v15 }
 0xccb   : > { %v8657_v46 = vpop.eup %8656 }
 0xccc   : > { %v2235_v21 = vpop.xlane.xlu1 %2234  ;;  %v2245_v8 = vmul.f32 %v8657_v46, %v8645_v28  ;;  %v8659_v60 = vpop.eup %8658 }
 0xccd   : > { %v8661_v61 = vpop.eup %8660  ;;  %v2247_v19 = vmul.f32 %v8659_v60, %v10241_v33  ;;  %v8311_v33 = vld [vmem:[%s11925_s5 + $0x8] sm:$0xff]  }
 0xcce   : > { %v2252_v14 = vpack.c.bf16 %v2245_v8, %v2244_v24  ;;  %v2246_v32 = vmul.f32 %v8661_v61, %v10237_v58  ;;  %v8310_v58 = vld [vmem:[%s11925_s5] sm:$0xff]   ;;  %v12041_v8 = vpack.i.bf16 %v10082_v30, %v10078_v59  ;;  %v12044_v59 = vpack.i.bf16 %v10207_v53, %v10201_v62  ;;  %v8160_v30 = vpop.permute.xlu0 %8159 }
 0xcd0   : > { %7730 = vmatprep.mubr.msk.bf16.mxu0 %vm1257_vm2, %v2252_v14  ;;  %v2229_v29 = vpop.xlane.xlu1 %2228  ;;  %v2253_v23 = vpack.c.bf16 %v2247_v19, %v2246_v32 }
 0xcd1   : > { %8664 = vrcp.f32 %v2229_v29  ;;  %v12042_v29 = vpack.i.bf16 %v10086_v4, %v10080_v13 }
 0xcd2   : > { %8666 = vrcp.f32 %v2235_v21  ;;  %v8170_v19 = vpop.permute.xlu0 %8169 }
 0xcd3   : > { %8668 = vrcp.f32 %v2232_v52  ;;  %v8663_v25 = vpop.eup %8662 }
 0xcd4   : > { %v2259_v54 = vpop.permute.xlu1 %2258  ;;  %v2248_v43 = vmul.f32 %v8663_v25, %v8649_v31  ;;  %v8312_v31 = vld [vmem:[%s11925_s5 + $0x10] sm:$0xff]   ;;  %v12043_v25 = vpack.i.bf16 %v10203_v56, %v10199_v44  ;;  %v8172_v56 = vunpack.i.h.bf16 %v8170_v19 }
 0xcd5   : > { %7724 = vmatprep.subr.bf16.mxu0 %v2259_v54 }
 0xcd6   : > { %7725 = vmatpush3.bf16.msra.mxu0 %v2259_v54 }
 0xcd7   : > { %7726 = vmatprep.subr.bf16.mxu0 %v2261_v6 }
 0xcd8   : > { %v8165_v13 = vpop.permute.xlu1 %8164 }
 0xcd9   : > { %v8166_v32 = vunpack.i.l.bf16 %v8165_v13 }
 0xcda   : > { %7727 = vmatpush3.bf16.msra.mxu0 %v2261_v6 }
 0xcdb   : > { %v8665_v28 = vpop.eup %8664  ;;  %7728 = vmatprep.subr.bf16.mxu0 %v2263_v22 }
 0xcdc   : > { %v2249_v48 = vmul.f32 %v8665_v28, %v8653_v40  ;;  %v8667_v42 = vpop.eup %8666  ;;  %v8315_v40 = vld [vmem:[%s11925_s5 + $0x28] sm:$0xff]   ;;  %v8175_v4 = vpop.permute.xlu1 %8174  ;;  %v8161_v28 = vunpack.i.l.bf16 %v8160_v30 }
 0xcdd   : > { %v8669_v36 = vpop.eup %8668  ;;  %v2251_v1 = vmul.f32 %v8667_v42, %v8651_v20  ;;  %v8314_v20 = vld [vmem:[%s11925_s5 + $0x20] sm:$0xff]   ;;  %v8176_v44 = vunpack.i.l.bf16 %v8175_v4 }
 0xcde   : > { %7729 = vmatpush3.bf16.msra.mxu0 %v2263_v22  ;;  %v2254_v49 = vpack.c.bf16 %v2249_v48, %v2248_v43  ;;  %v2250_v63 = vmul.f32 %v8669_v36, %v10247_v47  ;;  %v8313_v47 = vld [vmem:[%s11925_s5 + $0x18] sm:$0xff]   ;;  %v8162_v22 = vunpack.i.h.bf16 %v8160_v30  ;;  %v8167_v48 = vunpack.i.h.bf16 %v8165_v13 }
 0xcdf   : > { %7738 = vmatprep.subr.bf16.mxu0 %v8310_v58  ;;  %v8177_v43 = vunpack.i.h.bf16 %v8175_v4  ;;  %v2441_v53 = vsel %vm1151_vm0, %v9956_v16, %v8161_v28  ;;  %v2443_v36 = vsel %vm1151_vm0, %v9954_v26, %v8166_v32 }
 0xce0   : > { %v2255_v5 = vpack.c.bf16 %v2251_v1, %v2250_v63  ;;  %v2442_v62 = vsel %vm1151_vm0, %v9960_v0, %v8162_v22 }
 0xce1   : > { %7731 = vmatmul.mubr.msk.bf16.vlgmr.msra.gmra.mrb[40].mxu0 %vm1257_vm2, %v2253_v23  ;;  %v8171_v23 = vunpack.i.l.bf16 %v8170_v19 }
 0xce2   : > { %7734 = vmatprep.mubr.msk.bf16.mxu0 %vm1257_vm2, %v2254_v49  ;;  %7739 = vmatpush3.bf16.msra.mxu0 %v8310_v58  ;;  %v2444_v49 = vsel %vm1151_vm0, %v9958_v38, %v8167_v48  ;;  %v2451_v58 = vsel %vm1257_vm2, %v2443_v36, %v8176_v44  ;;  %v2450_v38 = vsel %vm1257_vm2, %v2442_v62, %v8172_v56 }
 0xce3   : > { %7740 = vmatprep.subr.bf16.mxu0 %v8311_v33 }
 0xce6   : > { %7741 = vmatpush3.bf16.msra.mxu0 %v8311_v33  ;;  %v2452_v33 = vsel %vm1257_vm2, %v2444_v49, %v8177_v43 }
 0xce7   : > { %7742 = vmatprep.subr.bf16.mxu0 %v8312_v31 }
 0xce9   : > { %7735 = vmatmul.mubr.msk.bf16.gmra.mrb[44].mxu0 %vm1257_vm2, %v2255_v5 }
 0xcea   : > { %7743 = vmatpush3.bf16.msra.mxu0 %v8312_v31 }
 0xceb   : > { %7744 = vmatprep.subr.bf16.mxu0 %v8313_v47 }
 0xcee   : > { %7745 = vmatpush3.bf16.msra.mxu0 %v8313_v47 }
 0xcef   : > { %7746 = vmatprep.subr.bf16.mxu0 %v8314_v20 }
 0xcf2   : > { %7747 = vmatpush3.bf16.msra.mxu0 %v8314_v20  ;;  %v2449_v20 = vsel %vm1257_vm2, %v2441_v53, %v8171_v23 }
 0xcf3   : > { %7748 = vmatprep.subr.bf16.mxu0 %v8315_v40 }
 0xcf6   : > { %7749 = vmatpush3.bf16.msra.mxu0 %v8315_v40 }
 0xcf7   : > { %7750 = vmatprep.subr.bf16.mxu0 %v8316_v17 }
 0xcfa   : > { %7751 = vmatpush3.bf16.msra.mxu0 %v8316_v17 }
 0xcfb   : > { %7752 = vmatprep.subr.bf16.mxu0 %v8317_v57 }
 0xcfe   : > { %7753 = vmatpush3.bf16.msra.mxu0 %v8317_v57 }
 0xdb4   : > { %v7732_v51 = vpop.f32.mrb[40].mxu0 }
 0xdb5   : > { %v2314_v52 = vpop.f32.mrb[41].mxu0 }
 0xdb6   : > { %v7733_v15 = vpop.f32.mrb[42].mxu0 }
 0xdb7   : > { %v8183_v39 = vpack.i.bf16 %v7733_v15, %v7732_v51  ;;  %v2317_v46 = vpop.f32.mrb[43].mxu0 }
 0xdb8   : > { %v8178_v21 = vpack.i.bf16 %v2317_v46, %v2314_v52 }
 0xdb9   : > { %8184 = vrot.lane.b32.xlu1 %v8183_v39, %s9278_s0 }
 0xdba   : > { %8179 = vrot.lane.b32.xlu0 %v8178_v21, %s9278_s0 }
 0xdbc   : > { %v7736_v24 = vpop.f32.mrb[44].mxu0 }
 0xdbd   : > { %8194 = vrot.lane.b32.xlu1 %v12041_v8, %s9280_s29  ;;  %v2330_v14 = vpop.f32.mrb[45].mxu0 }
 0xdbe   : > { %8189 = vrot.lane.b32.xlu0 %v12042_v29, %s9280_s29  ;;  %v7737_v6 = vpop.f32.mrb[46].mxu0 }
 0xdbf   : > { %v8213_v54 = vpack.i.bf16 %v7737_v6, %v7736_v24  ;;  %v2333_v60 = vpop.f32.mrb[47].mxu0 }
 0xdc0   : > { %v8208_v61 = vpack.i.bf16 %v2333_v60, %v2330_v14 }
 0xdc1   : > { %8204 = vrot.lane.b32.xlu1 %v12043_v25, %s9279_s22 }
 0xdc2   : > { %8199 = vrot.lane.b32.xlu0 %v12044_v59, %s9279_s22 }
 0xdc5   : > { %8214 = vrot.lane.b32.xlu1 %v8213_v54, %s9278_s0 }
 0xdc6   : > { %8209 = vrot.lane.b32.xlu0 %v8208_v61, %s9278_s0 }
 0xe2b   : > { %v8185_v42 = vpop.permute.xlu1 %8184 }
 0xe2c   : > { %v8187_v1 = vunpack.i.h.bf16 %v8185_v42  ;;  %v8186_v63 = vunpack.i.l.bf16 %v8185_v42  ;;  %v8180_v5 = vpop.permute.xlu0 %8179 }
 0xe2d   : > { %v8182_v31 = vunpack.i.h.bf16 %v8180_v5  ;;  %v8181_v0 = vunpack.i.l.bf16 %v8180_v5 }
 0xe2e   : > { %v2460_v47 = vsel %vm2457_vm10, %v2451_v58, %v8186_v63  ;;  %v2461_v16 = vsel %vm2457_vm10, %v2452_v33, %v8187_v1  ;;  %v12045_v33 = vld [vmem:[#allocation36_spill] sm:$0xff] }
 0xe2f   : > { %v2483_v40 = vpack.c.bf16 %v2461_v16, %v2460_v47  ;;  %v8195_v17 = vpop.permute.xlu1 %8194  ;;  %v2458_v26 = vsel %vm2457_vm10, %v2449_v20, %v8181_v0  ;;  %v2459_v57 = vsel %vm2457_vm10, %v2450_v38, %v8182_v31  ;;  %v12046_v47 = vld [vmem:[#allocation37_spill] sm:$0xff] }
 0xe30   : > { %v8190_v51 = vpop.permute.xlu0 %8189  ;;  %v2482_v52 = vpack.c.bf16 %v2459_v57, %v2458_v26  ;;  %v8197_v15 = vunpack.i.h.bf16 %v8195_v17  ;;  %v8196_v39 = vunpack.i.l.bf16 %v8195_v17  ;;  %v8320_v17 = vld [vmem:[%s11928_s8 + $0x4] ss:$16 sps:$4 sm:$0xff]   ;;  %v8321_v26 = vld [vmem:[%s11928_s8 + $0x8] ss:$16 sps:$4 sm:$0xff]   ;;  %v8323_v57 = vld [vmem:[%s11928_s8 + $0xc] ss:$16 sps:$4 sm:$0xff]  }
 0xe31   : > { %v8192_v21 = vunpack.i.h.bf16 %v8190_v51  ;;  %v8191_v24 = vunpack.i.l.bf16 %v8190_v51  ;;  %v8326_v51 = vld [vmem:[%s11928_s8 + $0x24] ss:$16 sps:$4 sm:$0xff]   ;;  %2943 = vmatprep.subr.bf16.mxu1 %v8320_v17  ;;  %3016 = vmatprep.subr.bf16.mxu0 %v8323_v57  ;;  %v8347_v17 = vld [vmem:[%s11928_s8 + $0x8c] ss:$16 sps:$4 sm:$0xff]   ;;  %v8345_v57 = vld [vmem:[%s11928_s8 + $0x88] ss:$16 sps:$4 sm:$0xff]  }
 0xe32   : > { %7754 = vmatprep.mubr.bf16.mxu0 %v2482_v52  ;;  %v2448_v60 = vsel %vm1151_vm0, %v9966_v45, %v8197_v15  ;;  %v2447_v61 = vsel %vm1151_vm0, %v9962_v2, %v8196_v39  ;;  %v8329_v52 = vld [vmem:[%s11928_s8 + $0x2c] ss:$16 sps:$4 sm:$0xff]   ;;  %v8324_v15 = vld [vmem:[%s11928_s8 + $0x20] ss:$16 sps:$4 sm:$0xff]   ;;  %v8327_v39 = vld [vmem:[%s11928_s8 + $0x28] ss:$16 sps:$4 sm:$0xff]  }
 0xe33   : > { %v8205_v46 = vpop.permute.xlu1 %8204  ;;  %7755 = vmatmul.mubr.bf16.vlgmr.msra.gmra.mrb[48].mxu0 %v2483_v40  ;;  %v2446_v59 = vsel %vm1151_vm0, %v9968_v55, %v8192_v21  ;;  %v2445_v13 = vsel %vm1151_vm0, %v9964_v37, %v8191_v24  ;;  %v8318_v40 = vld [vmem:[%s11928_s8] ss:$16 sps:$4 sm:$0xff]  }
 0xe34   : > { %v8200_v8 = vpop.permute.xlu0 %8199  ;;  %v8207_v14 = vunpack.i.h.bf16 %v8205_v46  ;;  %v8206_v29 = vunpack.i.l.bf16 %v8205_v46  ;;  %2944 = vmatpush1.bf16.msra.mxu1 %v8318_v40  ;;  %3017 = vmatpush1.bf16.msra.mxu0 %v8321_v26  ;;  %v8344_v40 = vld [vmem:[%s11928_s8 + $0x84] ss:$16 sps:$4 sm:$0xff]   ;;  %v8342_v26 = vld [vmem:[%s11928_s8 + $0x80] ss:$16 sps:$4 sm:$0xff]  }
 0xe35   : > { %v8202_v6 = vunpack.i.h.bf16 %v8200_v8  ;;  %v8201_v54 = vunpack.i.l.bf16 %v8200_v8  ;;  %2945 = vmatprep.subr.bf16.mxu1 %v8326_v51  ;;  %3018 = vmatprep.subr.bf16.mxu0 %v8329_v52  ;;  %v8350_v51 = vld [vmem:[%s11928_s8 + $0xa4] ss:$16 sps:$4 sm:$0xff]   ;;  %v8353_v52 = vld [vmem:[%s11928_s8 + $0xac] ss:$16 sps:$4 sm:$0xff]  }
 0xe36   : > { %v2455_v48 = vsel %vm1257_vm2, %v2447_v61, %v8206_v29  ;;  %v2456_v32 = vsel %vm1257_vm2, %v2448_v60, %v8207_v14 }
 0xe37   : > { %v8215_v25 = vpop.permute.xlu1 %8214  ;;  %v2453_v45 = vsel %vm1257_vm2, %v2445_v13, %v8201_v54  ;;  %v2454_v2 = vsel %vm1257_vm2, %v2446_v59, %v8202_v6 }
 0xe38   : > { %v8217_v30 = vunpack.i.h.bf16 %v8215_v25  ;;  %v8216_v4 = vunpack.i.l.bf16 %v8215_v25  ;;  %v8210_v22 = vpop.permute.xlu0 %8209  ;;  %2946 = vmatpush1.bf16.msra.mxu1 %v8324_v15  ;;  %3019 = vmatpush1.bf16.msra.mxu0 %v8327_v39  ;;  %v8348_v15 = vld [vmem:[%s11928_s8 + $0xa0] ss:$16 sps:$4 sm:$0xff]   ;;  %v8351_v39 = vld [vmem:[%s11928_s8 + $0xa8] ss:$16 sps:$4 sm:$0xff]  }
 0xe39   : > { %v8212_v28 = vunpack.i.h.bf16 %v8210_v22  ;;  %v8211_v19 = vunpack.i.l.bf16 %v8210_v22 }
 0xe3a   : > { %v2464_v43 = vsel %vm2457_vm10, %v2455_v48, %v8216_v4  ;;  %v2465_v55 = vsel %vm2457_vm10, %v2456_v32, %v8217_v30 }
 0xe3b   : > { %v2462_v44 = vsel %vm2457_vm10, %v2453_v45, %v8211_v19  ;;  %v2463_v37 = vsel %vm2457_vm10, %v2454_v2, %v8212_v28  ;;  %v2485_v56 = vpack.c.bf16 %v2465_v55, %v2464_v43 }
 0xe3c   : > { %v2484_v23 = vpack.c.bf16 %v2463_v37, %v2462_v44 }
 0xe3e   : > { %7758 = vmatprep.mubr.bf16.mxu0 %v2484_v23 }
 0xe3f   : > { %7759 = vmatmul.mubr.bf16.gmra.mrb[52].mxu0 %v2485_v56 }
 0xe40   : > { %3048 = vmatprep.mubr.bf16.mxu0 %v12036_v18 }
 0xf06   : > { %v7756_v62 = vpop.f32.mrb[48].mxu0 }
 0xf07   : > { %v2568_v53 = vpop.f32.mrb[49].mxu0  ;;  %v10368_v63 = vadd.f32 %v7756_v62, %v9710_v7  ;;  %v12047_v7 = vld [vmem:[#allocation38_spill] sm:$0xff] }
 0xf08   : > { %v10361_v42 = vadd.f32 %v2568_v53, %v9708_v3  ;;  %v7757_v49 = vpop.f32.mrb[50].mxu0 }
 0xf09   : > { %v2571_v36 = vpop.f32.mrb[51].mxu0  ;;  %v10373_v5 = vadd.f32 %v7757_v49, %v9716_v11  ;;  %v12048_v11 = vld [vmem:[#allocation39_spill] sm:$0xff] }
 0xf0a   : > { %v10364_v1 = vadd.f32 %v2571_v36, %v9713_v10  ;;  %2609 = vadd.xlane.f32.xlu0 %v10361_v42  ;;  %v8332_v36 = vld [vmem:[%s11928_s8 + $0x44] ss:$16 sps:$4 sm:$0xff]  }
 0xf0b   : > { %2947 = vmatprep.subr.bf16.mxu1 %v8332_v36 }
 0xf0c   : > { %2611 = vadd.xlane.f32.xlu1 %v10364_v1 }
 0xf0e   : > { %2613 = vadd.xlane.f32.xlu0 %v10368_v63 }
 0xf12   : > { %2615 = vadd.xlane.f32.xlu0 %v10373_v5  ;;  %v7760_v3 = vpop.f32.mrb[52].mxu0 }
 0xf13   : > { %v2584_v58 = vpop.f32.mrb[53].mxu0  ;;  %v10384_v20 = vadd.f32 %v7760_v3, %v12047_v7  ;;  %v8335_v3 = vld [vmem:[%s11928_s8 + $0x4c] ss:$16 sps:$4 sm:$0xff]   ;;  %v8336_v7 = vld [vmem:[%s11928_s8 + $0x60] ss:$16 sps:$4 sm:$0xff]  }
 0xf14   : > { %v10377_v31 = vadd.f32 %v2584_v58, %v12045_v33  ;;  %v7761_v10 = vpop.f32.mrb[54].mxu0  ;;  %v8330_v58 = vld [vmem:[%s11928_s8 + $0x40] ss:$16 sps:$4 sm:$0xff]   ;;  %v8333_v33 = vld [vmem:[%s11928_s8 + $0x48] ss:$16 sps:$4 sm:$0xff]   ;;  %3020 = vmatprep.subr.bf16.mxu0 %v8335_v3 }
 0xf15   : > { %v2587_v0 = vpop.f32.mrb[55].mxu0  ;;  %v10388_v38 = vadd.f32 %v7761_v10, %v12048_v11  ;;  %2948 = vmatpush1.bf16.msra.mxu1 %v8330_v58  ;;  %3021 = vmatpush1.bf16.msra.mxu0 %v8333_v33  ;;  %v8339_v11 = vld [vmem:[%s11928_s8 + $0x68] ss:$16 sps:$4 sm:$0xff]   ;;  %v10534_v33 = vld [vmem:[#allocation10] ss:$0 sm:$0xff] }
 0xf16   : > { %v10380_v16 = vadd.f32 %v2587_v0, %v12046_v47  ;;  %2617 = vadd.xlane.f32.xlu0 %v10377_v31  ;;  %v8338_v0 = vld [vmem:[%s11928_s8 + $0x64] ss:$16 sps:$4 sm:$0xff]   ;;  %v8341_v47 = vld [vmem:[%s11928_s8 + $0x6c] ss:$16 sps:$4 sm:$0xff]  }
 0xf17   : > { %2949 = vmatprep.subr.bf16.mxu1 %v8338_v0  ;;  %3022 = vmatprep.subr.bf16.mxu0 %v8341_v47 }
 0xf18   : > { %2619 = vadd.xlane.f32.xlu1 %v10380_v16 }
 0xf19   : > { %2950 = vmatpush1.bf16.msra.mxu1 %v8336_v7  ;;  %3023 = vmatpush1.bf16.msra.mxu0 %v8339_v11 }
 0xf1a   : > { %2621 = vadd.xlane.f32.xlu0 %v10384_v20  ;;  %2951 = vmatprep.subr.bf16.mxu1 %v8344_v40 }
 0xf1b   : > { %3024 = vmatprep.subr.bf16.mxu0 %v8347_v17 }
 0xf1c   : > { %2623 = vadd.xlane.f32.xlu1 %v10388_v38 }
 0xf1d   : > { %2952 = vmatpush1.bf16.msra.mxu1 %v8342_v26  ;;  %3025 = vmatpush1.bf16.msra.mxu0 %v8345_v57 }
 0xf1e   : > { %2953 = vmatprep.subr.bf16.mxu1 %v8350_v51  ;;  %3026 = vmatprep.subr.bf16.mxu0 %v8353_v52 }
 0xf21   : > { %2954 = vmatpush1.bf16.msra.mxu1 %v8348_v15  ;;  %3027 = vmatpush1.bf16.msra.mxu0 %v8351_v39  ;;  %v10539_v39 = vld [vmem:[#allocation11] ss:$0 sm:$0xff] }
 0xf97   : > { %v2610_v46 = vpop.xlane.xlu0 %2609 }
 0xf98   : > { %v2625_v21 = vmul.f32 0.0078125, %v2610_v46  ;;  %v8356_v46 = vld [vmem:[%s11928_s8 + $0xc4] ss:$16 sps:$4 sm:$0xff]  }
 0xf99   : > { %v2612_v24 = vpop.xlane.xlu1 %2611  ;;  %2955 = vmatprep.subr.bf16.mxu1 %v8356_v46 }
 0xf9a   : > { %v10417_v8 = vsub.f32 %v10361_v42, %v2625_v21  ;;  %v2626_v14 = vmul.f32 0.0078125, %v2612_v24  ;;  %v8359_v21 = vld [vmem:[%s11928_s8 + $0xcc] ss:$16 sps:$4 sm:$0xff]   ;;  %v8354_v24 = vld [vmem:[%s11928_s8 + $0xc0] ss:$16 sps:$4 sm:$0xff]  }
 0xf9b   : > { %v2614_v29 = vpop.xlane.xlu0 %2613  ;;  %3028 = vmatprep.subr.bf16.mxu0 %v8359_v21  ;;  %2956 = vmatpush1.bf16.msra.mxu1 %v8354_v24 }
 0xf9c   : > { %v10420_v6 = vsub.f32 %v10364_v1, %v2626_v14  ;;  %v2627_v54 = vmul.f32 0.0078125, %v2614_v29  ;;  %v2641_v60 = vmul.f32 %v10417_v8, %v10417_v8  ;;  %v8357_v14 = vld [vmem:[%s11928_s8 + $0xc8] ss:$16 sps:$4 sm:$0xff]   ;;  %v8362_v29 = vld [vmem:[%s11928_s8 + $0xe4] ss:$16 sps:$4 sm:$0xff]  }
 0xf9d   : > { %3029 = vmatpush1.bf16.msra.mxu0 %v8357_v14  ;;  %2957 = vmatprep.subr.bf16.mxu1 %v8362_v29 }
 0xf9e   : > { %v10425_v61 = vsub.f32 %v10368_v63, %v2627_v54  ;;  %2649 = vadd.xlane.f32.xlu0 %v2641_v60  ;;  %v2642_v25 = vmul.f32 %v10420_v6, %v10420_v6  ;;  %v8365_v54 = vld [vmem:[%s11928_s8 + $0xec] ss:$16 sps:$4 sm:$0xff]   ;;  %v8360_v60 = vld [vmem:[%s11928_s8 + $0xe0] ss:$16 sps:$4 sm:$0xff]  }
 0xf9f   : > { %v2616_v59 = vpop.xlane.xlu0 %2615  ;;  %3030 = vmatprep.subr.bf16.mxu0 %v8365_v54  ;;  %2958 = vmatpush1.bf16.msra.mxu1 %v8360_v60 }
 0xfa0   : > { %v2628_v13 = vmul.f32 0.0078125, %v2616_v59  ;;  %2651 = vadd.xlane.f32.xlu1 %v2642_v25  ;;  %v2643_v30 = vmul.f32 %v10425_v61, %v10425_v61  ;;  %v8363_v25 = vld [vmem:[%s11928_s8 + $0xe8] ss:$16 sps:$4 sm:$0xff]   ;;  %v8366_v59 = vld [vmem:[%s11930_s10 + $0x40] sm:$0xff]  }
 0xfa1   : > { %3031 = vmatpush1.bf16.msra.mxu0 %v8363_v25  ;;  %7326 = vmatprep.subr.bf16.mxu1 %v8366_v59  ;;  %v8368_v25 = vld [vmem:[%s11930_s10] sm:$0xff]  }
 0xfa2   : > { %v10432_v4 = vsub.f32 %v10373_v5, %v2628_v13  ;;  %2653 = vadd.xlane.f32.xlu0 %v2643_v30  ;;  %v8367_v13 = vld [vmem:[%s11930_s10 + $0xc0] sm:$0xff]  }
 0xfa3   : > { %v2618_v22 = vpop.xlane.xlu0 %2617  ;;  %7366 = vmatprep.subr.bf16.mxu0 %v8367_v13  ;;  %v8369_v59 = vld [vmem:[%s11930_s10 + $0x80] sm:$0xff]   ;;  %v8370_v13 = vld [vmem:[%s11930_s10 + $0x48] sm:$0xff]  }
 0xfa4   : > { %v2629_v28 = vmul.f32 0.0078125, %v2618_v22  ;;  %v2644_v19 = vmul.f32 %v10432_v4, %v10432_v4 }
 0xfa5   : > { %v2620_v48 = vpop.xlane.xlu1 %2619 }
 0xfa6   : > { %v10437_v32 = vsub.f32 %v10377_v31, %v2629_v28  ;;  %v2630_v45 = vmul.f32 0.0078125, %v2620_v48  ;;  %2655 = vadd.xlane.f32.xlu1 %v2644_v19 }
 0xfa7   : > { %v2622_v2 = vpop.xlane.xlu0 %2621 }
 0xfa8   : > { %v10440_v43 = vsub.f32 %v10380_v16, %v2630_v45  ;;  %v2631_v55 = vmul.f32 0.0078125, %v2622_v2  ;;  %v2645_v44 = vmul.f32 %v10437_v32, %v10437_v32 }
 0xfa9   : > { %v2624_v37 = vpop.xlane.xlu1 %2623 }
 0xfaa   : > { %v10445_v56 = vsub.f32 %v10384_v20, %v2631_v55  ;;  %v2632_v23 = vmul.f32 0.0078125, %v2624_v37  ;;  %2657 = vadd.xlane.f32.xlu0 %v2645_v44  ;;  %v2646_v62 = vmul.f32 %v10440_v43, %v10440_v43 }
 0xfac   : > { %v10450_v53 = vsub.f32 %v10388_v38, %v2632_v23  ;;  %2659 = vadd.xlane.f32.xlu1 %v2646_v62  ;;  %v2647_v49 = vmul.f32 %v10445_v56, %v10445_v56 }
 0xfae   : > { %2661 = vadd.xlane.f32.xlu0 %v2647_v49  ;;  %v2648_v10 = vmul.f32 %v10450_v53, %v10450_v53 }
 0xfb0   : > { %2663 = vadd.xlane.f32.xlu1 %v2648_v10 }
0x102b   : > { %v2650_v30 = vpop.xlane.xlu0 %2649 }
0x102c   : > { %v2665_v22 = vmul.f32 0.0078125, %v2650_v30 }
0x102d   : > { %v2652_v28 = vpop.xlane.xlu1 %2651 }
0x102e   : > { %v2673_v19 = vadd.f32 1e-05, %v2665_v22  ;;  %v2666_v48 = vmul.f32 0.0078125, %v2652_v28 }
0x102f   : > { %v2654_v45 = vpop.xlane.xlu0 %2653 }
0x1030   : > { %8670 = vrsqrt.f32 %v2673_v19  ;;  %v2674_v2 = vadd.f32 1e-05, %v2666_v48  ;;  %v2667_v55 = vmul.f32 0.0078125, %v2654_v45  ;;  %v8372_v19 = vld [vmem:[%s11930_s10 + $0x8] sm:$0xff]  }
0x1031   : > { %v8373_v48 = vld [vmem:[%s11930_s10 + $0x88] sm:$0xff]  }
0x1032   : > { %8672 = vrsqrt.f32 %v2674_v2  ;;  %v2675_v44 = vadd.f32 1e-05, %v2667_v55  ;;  %v8374_v2 = vld [vmem:[%s11930_s10 + $0x50] sm:$0xff]  }
0x1033   : > { %v2656_v37 = vpop.xlane.xlu1 %2655  ;;  %v8375_v55 = vld [vmem:[%s11930_s10 + $0xd0] sm:$0xff]  }
0x1034   : > { %8674 = vrsqrt.f32 %v2675_v44  ;;  %v2668_v23 = vmul.f32 0.0078125, %v2656_v37 }
0x1036   : > { %v2676_v62 = vadd.f32 1e-05, %v2668_v23 }
0x1037   : > { %v2658_v49 = vpop.xlane.xlu0 %2657 }
0x1038   : > { %8676 = vrsqrt.f32 %v2676_v62  ;;  %v2669_v36 = vmul.f32 0.0078125, %v2658_v49 }
0x1039   : > { %v2660_v3 = vpop.xlane.xlu1 %2659 }
0x103a   : > { %v8671_v58 = vpop.eup %8670  ;;  %v2677_v10 = vadd.f32 1e-05, %v2669_v36  ;;  %v2670_v0 = vmul.f32 0.0078125, %v2660_v3  ;;  %v8376_v36 = vld [vmem:[%s11930_s10 + $0x10] sm:$0xff]  }
0x103b   : > { %v2689_v47 = vmul.f32 %v8671_v58, %v10417_v8  ;;  %v2662_v7 = vpop.xlane.xlu0 %2661  ;;  %v8377_v3 = vld [vmem:[%s11930_s10 + $0x90] sm:$0xff]  }
0x103c   : > { %v8673_v11 = vpop.eup %8672  ;;  %8678 = vrsqrt.f32 %v2677_v10  ;;  %v2678_v40 = vadd.f32 1e-05, %v2670_v0  ;;  %v2671_v17 = vmul.f32 0.0078125, %v2662_v7 }
0x103d   : > { %v2703_v26 = vmul.f32 %v10534_v33, %v2689_v47  ;;  %v2690_v57 = vmul.f32 %v8673_v11, %v10420_v6  ;;  %v2664_v51 = vpop.xlane.xlu1 %2663  ;;  %v8380_v11 = vld [vmem:[%s11930_s10 + $0x18] sm:$0xff]  }
0x103e   : > { %v8675_v52 = vpop.eup %8674  ;;  %8680 = vrsqrt.f32 %v2678_v40  ;;  %v2672_v15 = vmul.f32 0.0078125, %v2664_v51  ;;  %v2679_v21 = vadd.f32 1e-05, %v2671_v17  ;;  %v8381_v40 = vld [vmem:[%s11930_s10 + $0x98] sm:$0xff]   ;;  %v8382_v17 = vld [vmem:[%s11930_s10 + $0x60] sm:$0xff]  }
0x103f   : > { %v2704_v46 = vmul.f32 %v10534_v33, %v2690_v57  ;;  %v2717_v8 = vadd.f32 %v10539_v39, %v2703_v26  ;;  %v2691_v29 = vmul.f32 %v8675_v52, %v10425_v61  ;;  %v8371_v61 = vld [vmem:[%s11930_s10 + $0xc8] sm:$0xff]  }
0x1040   : > { %v2680_v24 = vadd.f32 1e-05, %v2672_v15  ;;  %v8384_v15 = vld [vmem:[%s11930_s10 + $0x20] sm:$0xff]  }
0x1041   : > { %v2718_v14 = vadd.f32 %v10539_v39, %v2704_v46  ;;  %v8385_v46 = vld [vmem:[%s11930_s10 + $0xa0] sm:$0xff]  }
0x1042   : > { %v8677_v54 = vpop.eup %8676  ;;  %8682 = vrsqrt.f32 %v2680_v24 }
0x1043   : > { %v2757_v60 = vpack.c.bf16 %v2718_v14, %v2717_v8  ;;  %v2692_v6 = vmul.f32 %v8677_v54, %v10432_v4  ;;  %8684 = vrsqrt.f32 %v2679_v21  ;;  %v2705_v4 = vmul.f32 %v10534_v33, %v2691_v29  ;;  %v8386_v21 = vld [vmem:[%s11930_s10 + $0x68] sm:$0xff]  }
0x1044   : > { %v8388_v54 = vld [vmem:[%s11930_s10 + $0x28] sm:$0xff]  }
0x1045   : > { %2976 = vmatmul.mubr.bf16.vlgmr.msra.gmra.mrb[40].mxu1 %v2757_v60  ;;  %3049 = vmatmul.mubr.bf16.vlgmr.msra.gmra.mrb[56].mxu0 %v2757_v60  ;;  %v2706_v30 = vmul.f32 %v10534_v33, %v2692_v6  ;;  %v2719_v44 = vadd.f32 %v10539_v39, %v2705_v4  ;;  %v8390_v60 = vld [vmem:[%s11930_s10 + $0x70] sm:$0xff]   ;;  %v8397_v4 = vld [vmem:[%s11930_s10 + $0xb8] sm:$0xff]  }
0x1046   : > { %v8679_v22 = vpop.eup %8678  ;;  %2985 = vmatprep.mubr.bf16.mxu1 %v12036_v18  ;;  %3058 = vmatprep.mubr.bf16.mxu0 %v12036_v18  ;;  %v8392_v6 = vld [vmem:[%s11930_s10 + $0x30] sm:$0xff]  }
0x1047   : > { %v2720_v28 = vadd.f32 %v10539_v39, %v2706_v30  ;;  %7327 = vmatpush3.bf16.msra.mxu1 %v8368_v25  ;;  %7367 = vmatpush3.bf16.msra.mxu0 %v8369_v59  ;;  %v2693_v37 = vmul.f32 %v8679_v22, %v10437_v32  ;;  %v8378_v32 = vld [vmem:[%s11930_s10 + $0x58] sm:$0xff]   ;;  %v8393_v25 = vld [vmem:[%s11930_s10 + $0xb0] sm:$0xff]  }
0x1048   : > { %v8681_v45 = vpop.eup %8680  ;;  %7328 = vmatprep.subr.bf16.mxu1 %v8370_v13  ;;  %7368 = vmatprep.subr.bf16.mxu0 %v8371_v61  ;;  %v8394_v59 = vld [vmem:[%s11930_s10 + $0x78] sm:$0xff]  }
0x1049   : > { %v2694_v23 = vmul.f32 %v8681_v45, %v10440_v43  ;;  %v2758_v62 = vpack.c.bf16 %v2720_v28, %v2719_v44  ;;  %v8379_v43 = vld [vmem:[%s11930_s10 + $0xd8] sm:$0xff]   ;;  %v2707_v10 = vmul.f32 %v10534_v33, %v2693_v37 }
0x104a   : > { %v8395_v13 = vld [vmem:[%s11930_s10 + $0xf8] sm:$0xff]  }
0x104b   : > { %v2708_v49 = vmul.f32 %v10534_v33, %v2694_v23  ;;  %7329 = vmatpush3.bf16.msra.mxu1 %v8372_v19  ;;  %7369 = vmatpush3.bf16.msra.mxu0 %v8373_v48  ;;  %v2721_v26 = vadd.f32 %v10539_v39, %v2707_v10  ;;  %v8396_v61 = vld [vmem:[%s11930_s10 + $0x38] sm:$0xff]   ;;  %v2761_v19 = vld [vmem:[#allocation13] sm:$0xf] }
0x104c   : > { %v8683_v58 = vpop.eup %8682  ;;  %7330 = vmatprep.subr.bf16.mxu1 %v8374_v2  ;;  %7370 = vmatprep.subr.bf16.mxu0 %v8375_v55  ;;  %v12049_v30 = vld [vmem:[#allocation40_spill] sm:$0xff] }
0x104d   : > { %2986 = vmatmul.mubr.bf16.gmra.mrb[44].mxu1 %v2758_v62  ;;  %3059 = vmatmul.mubr.bf16.gmra.mrb[60].mxu0 %v2758_v62  ;;  %v8685_v0 = vpop.eup %8684  ;;  %v2722_v47 = vadd.f32 %v10539_v39, %v2708_v49  ;;  %v2696_v7 = vmul.f32 %v8683_v58, %v10450_v53  ;;  %v8383_v53 = vld [vmem:[%s11930_s10 + $0xe0] sm:$0xff]   ;;  %v11969_v22 = vsub.s32 0, %v12049_v30  ;;  %v11968_v28 = vsub.s32 2, %v12049_v30 }
0x104e   : > { %2995 = vmatprep.mubr.bf16.mxu1 %v12036_v18  ;;  %3068 = vmatprep.mubr.bf16.mxu0 %v12036_v18  ;;  %v2695_v57 = vmul.f32 %v8685_v0, %v10445_v56  ;;  %v8387_v56 = vld [vmem:[%s11930_s10 + $0xe8] sm:$0xff]   ;;  %v11967_v48 = vsub.s32 1, %v12049_v30  ;;  %v11966_v45 = vsub.s32 3, %v12049_v30 }
0x104f   : > { %7331 = vmatpush3.bf16.msra.mxu1 %v8376_v36  ;;  %7371 = vmatpush3.bf16.msra.mxu0 %v8377_v3  ;;  %v2759_v51 = vpack.c.bf16 %v2722_v47, %v2721_v26  ;;  %v2710_v52 = vmul.f32 %v10534_v33, %v2696_v7  ;;  %v10664_v2 = vrot.slane %v2761_v19, %v11969_v22 }
0x1050   : > { %7332 = vmatprep.subr.bf16.mxu1 %v8378_v32  ;;  %7372 = vmatprep.subr.bf16.mxu0 %v8379_v43  ;;  %v2709_v24 = vmul.f32 %v10534_v33, %v2695_v57  ;;  %v8389_v33 = vld [vmem:[%s11930_s10 + $0xa8] sm:$0xff]   ;;  %v10668_v55 = vrot.slane %v2761_v19, %v11968_v28  ;;  %v10672_v44 = vrot.slane %v2761_v19, %v11967_v48 }
0x1051   : > { %v2724_v8 = vadd.f32 %v10539_v39, %v2710_v52  ;;  %v10676_v37 = vrot.slane %v2761_v19, %v11966_v45 }
0x1052   : > { %v2723_v14 = vadd.f32 %v10539_v39, %v2709_v24  ;;  %v8391_v39 = vld [vmem:[%s11930_s10 + $0xf0] sm:$0xff]  }
0x1053   : > { %7333 = vmatpush3.bf16.msra.mxu1 %v8380_v11  ;;  %7373 = vmatpush3.bf16.msra.mxu0 %v8381_v40 }
0x1054   : > { %7334 = vmatprep.subr.bf16.mxu1 %v8382_v17  ;;  %7374 = vmatprep.subr.bf16.mxu0 %v8383_v53  ;;  %v2760_v29 = vpack.c.bf16 %v2724_v8, %v2723_v14 }
0x1055   : > { %2996 = vmatmul.mubr.bf16.gmra.mrb[48].mxu1 %v2759_v51  ;;  %3069 = vmatmul.mubr.bf16.gmra.mrb[64].mxu0 %v2759_v51 }
0x1056   : > { %3005 = vmatprep.mubr.bf16.mxu1 %v12036_v18  ;;  %3078 = vmatprep.mubr.bf16.mxu0 %v12036_v18 }
0x1057   : > { %7335 = vmatpush3.bf16.msra.mxu1 %v8384_v15  ;;  %7375 = vmatpush3.bf16.msra.mxu0 %v8385_v46 }
0x1058   : > { %7336 = vmatprep.subr.bf16.mxu1 %v8386_v21  ;;  %7376 = vmatprep.subr.bf16.mxu0 %v8387_v56 }
0x105b   : > { %7337 = vmatpush3.bf16.msra.mxu1 %v8388_v54  ;;  %7377 = vmatpush3.bf16.msra.mxu0 %v8389_v33 }
0x105c   : > { %7338 = vmatprep.subr.bf16.mxu1 %v8390_v60  ;;  %7378 = vmatprep.subr.bf16.mxu0 %v8391_v39 }
0x105d   : > { %3006 = vmatmul.mubr.bf16.gmra.mrb[52].mxu1 %v2760_v29  ;;  %3079 = vmatmul.mubr.bf16.gmra.mrb[68].mxu0 %v2760_v29 }
0x105f   : > { %7339 = vmatpush3.bf16.msra.mxu1 %v8392_v6  ;;  %7379 = vmatpush3.bf16.msra.mxu0 %v8393_v25 }
0x1060   : > { %7340 = vmatprep.subr.bf16.mxu1 %v8394_v59  ;;  %7380 = vmatprep.subr.bf16.mxu0 %v8395_v13 }
0x1063   : > { %7341 = vmatpush3.bf16.msra.mxu1 %v8396_v61  ;;  %7381 = vmatpush3.bf16.msra.mxu0 %v8397_v4 }
0x1118   : > { %v2977_v23 = vpop.f32.mrb[40].mxu1  ;;  %v3050_v62 = vpop.f32.mrb[56].mxu0 }
0x1119   : > { %v2978_v49 = vadd.f32 %v2977_v23, %v10664_v2  ;;  %v3051_v36 = vadd.f32 %v3050_v62, %v10668_v55  ;;  %v2979_v3 = vpop.f32.mrb[41].mxu1  ;;  %v3052_v58 = vpop.f32.mrb[57].mxu0 }
0x111a   : > { %v2980_v32 = vadd.f32 %v2979_v3, %v10672_v44  ;;  %v3053_v43 = vadd.f32 %v3052_v58, %v10676_v37  ;;  %v2981_v10 = vpop.f32.mrb[42].mxu1  ;;  %v3054_v0 = vpop.f32.mrb[58].mxu0 }
0x111b   : > { %v2982_v47 = vadd.f32 %v2981_v10, %v10664_v2  ;;  %v3055_v7 = vadd.f32 %v3054_v0, %v10668_v55  ;;  %v2983_v11 = vpop.f32.mrb[43].mxu1  ;;  %v3056_v40 = vpop.f32.mrb[59].mxu0  ;;  %v3089_v26 = vmax.f32 %v2978_v49, 0.0  ;;  %v3091_v57 = vmax.f32 %v3051_v36, 0.0 }
0x111c   : > { %v2984_v17 = vadd.f32 %v2983_v11, %v10672_v44  ;;  %v3057_v53 = vadd.f32 %v3056_v40, %v10676_v37  ;;  %v3090_v15 = vmax.f32 %v2980_v32, 0.0  ;;  %v3092_v46 = vmax.f32 %v3053_v43, 0.0 }
0x111d   : > { %v3093_v51 = vmax.f32 %v2982_v47, 0.0  ;;  %v3095_v52 = vmax.f32 %v3055_v7, 0.0 }
0x111e   : > { %v3094_v21 = vmax.f32 %v2984_v17, 0.0  ;;  %v3096_v56 = vmax.f32 %v3057_v53, 0.0 }
0x111f   : > { %v3185_v24 = vpack.c.bf16 %v3093_v51, %v3089_v26  ;;  %v3187_v8 = vpack.c.bf16 %v3095_v52, %v3091_v57 }
0x1120   : > { %v3186_v14 = vpack.c.bf16 %v3094_v21, %v3090_v15  ;;  %v3188_v29 = vpack.c.bf16 %v3096_v56, %v3092_v46  ;;  %v2987_v54 = vpop.f32.mrb[44].mxu1  ;;  %v3060_v33 = vpop.f32.mrb[60].mxu0 }
0x1121   : > { %v2988_v60 = vadd.f32 %v2987_v54, %v10664_v2  ;;  %v3061_v39 = vadd.f32 %v3060_v33, %v10668_v55  ;;  %v2989_v6 = vpop.f32.mrb[45].mxu1  ;;  %v3062_v25 = vpop.f32.mrb[61].mxu0 }
0x1122   : > { %v2990_v59 = vadd.f32 %v2989_v6, %v10672_v44  ;;  %v3063_v13 = vadd.f32 %v3062_v25, %v10676_v37  ;;  %v2991_v61 = vpop.f32.mrb[46].mxu1  ;;  %v3064_v4 = vpop.f32.mrb[62].mxu0  ;;  %3432 = vmatprep.mubr.bf16.mxu1 %v3186_v14  ;;  %3497 = vmatprep.mubr.bf16.mxu0 %v3188_v29 }
0x1123   : > { %v2992_v19 = vadd.f32 %v2991_v61, %v10664_v2  ;;  %v3065_v23 = vadd.f32 %v3064_v4, %v10668_v55  ;;  %v2993_v62 = vpop.f32.mrb[47].mxu1  ;;  %v3066_v49 = vpop.f32.mrb[63].mxu0  ;;  %3433 = vmatmul.mubr.bf16.vlgmr.msra.gmra.mrb[56].mxu1 %v3185_v24  ;;  %3498 = vmatmul.mubr.bf16.vlgmr.msra.gmra.mrb[72].mxu0 %v3187_v8  ;;  %v3097_v58 = vmax.f32 %v2988_v60, 0.0  ;;  %v3099_v32 = vmax.f32 %v3061_v39, 0.0 }
0x1124   : > { %v2994_v36 = vadd.f32 %v2993_v62, %v10672_v44  ;;  %v3067_v3 = vadd.f32 %v3066_v49, %v10676_v37  ;;  %v3098_v0 = vmax.f32 %v2990_v59, 0.0  ;;  %v3100_v47 = vmax.f32 %v3063_v13, 0.0 }
0x1125   : > { %v3101_v43 = vmax.f32 %v2992_v19, 0.0  ;;  %v3103_v10 = vmax.f32 %v3065_v23, 0.0 }
0x1126   : > { %v3102_v7 = vmax.f32 %v2994_v36, 0.0  ;;  %v3104_v11 = vmax.f32 %v3067_v3, 0.0 }
0x1127   : > { %v3189_v40 = vpack.c.bf16 %v3101_v43, %v3097_v58  ;;  %v3191_v17 = vpack.c.bf16 %v3103_v10, %v3099_v32 }
0x1128   : > { %v3190_v53 = vpack.c.bf16 %v3102_v7, %v3098_v0  ;;  %v3192_v26 = vpack.c.bf16 %v3104_v11, %v3100_v47  ;;  %v2997_v57 = vpop.f32.mrb[48].mxu1  ;;  %v3070_v51 = vpop.f32.mrb[64].mxu0 }
0x1129   : > { %v2998_v52 = vadd.f32 %v2997_v57, %v10664_v2  ;;  %v3071_v15 = vadd.f32 %v3070_v51, %v10668_v55  ;;  %v2999_v46 = vpop.f32.mrb[49].mxu1  ;;  %v3072_v21 = vpop.f32.mrb[65].mxu0 }
0x112a   : > { %v3000_v56 = vadd.f32 %v2999_v46, %v10672_v44  ;;  %v3073_v24 = vadd.f32 %v3072_v21, %v10676_v37  ;;  %v3001_v8 = vpop.f32.mrb[50].mxu1  ;;  %v3074_v14 = vpop.f32.mrb[66].mxu0  ;;  %3440 = vmatprep.mubr.bf16.mxu1 %v3190_v53  ;;  %3505 = vmatprep.mubr.bf16.mxu0 %v3192_v26 }
0x112b   : > { %v3002_v29 = vadd.f32 %v3001_v8, %v10664_v2  ;;  %v3075_v54 = vadd.f32 %v3074_v14, %v10668_v55  ;;  %v3003_v33 = vpop.f32.mrb[51].mxu1  ;;  %v3076_v60 = vpop.f32.mrb[67].mxu0  ;;  %3441 = vmatmul.mubr.bf16.gmra.mrb[60].mxu1 %v3189_v40  ;;  %3506 = vmatmul.mubr.bf16.gmra.mrb[76].mxu0 %v3191_v17  ;;  %v3105_v25 = vmax.f32 %v2998_v52, 0.0  ;;  %v3107_v59 = vmax.f32 %v3071_v15, 0.0 }
0x112c   : > { %v3004_v39 = vadd.f32 %v3003_v33, %v10672_v44  ;;  %v3077_v6 = vadd.f32 %v3076_v60, %v10676_v37  ;;  %v3106_v4 = vmax.f32 %v3000_v56, 0.0  ;;  %v3108_v19 = vmax.f32 %v3073_v24, 0.0 }
0x112d   : > { %v3109_v13 = vmax.f32 %v3002_v29, 0.0  ;;  %v3111_v61 = vmax.f32 %v3075_v54, 0.0 }
0x112e   : > { %v3110_v23 = vmax.f32 %v3004_v39, 0.0  ;;  %v3112_v62 = vmax.f32 %v3077_v6, 0.0  ;;  %v10711_v6 = vld [vmem:[#allocation14] ss:$0 sm:$0xff] }
0x112f   : > { %v3193_v49 = vpack.c.bf16 %v3109_v13, %v3105_v25  ;;  %v3195_v36 = vpack.c.bf16 %v3111_v61, %v3107_v59 }
0x1130   : > { %v3194_v3 = vpack.c.bf16 %v3110_v23, %v3106_v4  ;;  %v3196_v58 = vpack.c.bf16 %v3112_v62, %v3108_v19  ;;  %v3007_v32 = vpop.f32.mrb[52].mxu1  ;;  %v3080_v43 = vpop.f32.mrb[68].mxu0 }
0x1131   : > { %v3008_v10 = vadd.f32 %v3007_v32, %v10664_v2  ;;  %v3081_v0 = vadd.f32 %v3080_v43, %v10668_v55  ;;  %v3009_v47 = vpop.f32.mrb[53].mxu1  ;;  %v3082_v7 = vpop.f32.mrb[69].mxu0 }
0x1132   : > { %v3010_v11 = vadd.f32 %v3009_v47, %v10672_v44  ;;  %v3083_v40 = vadd.f32 %v3082_v7, %v10676_v37  ;;  %v3011_v17 = vpop.f32.mrb[54].mxu1  ;;  %v3084_v53 = vpop.f32.mrb[70].mxu0  ;;  %3448 = vmatprep.mubr.bf16.mxu1 %v3194_v3  ;;  %3513 = vmatprep.mubr.bf16.mxu0 %v3196_v58 }
0x1133   : > { %v3012_v26 = vadd.f32 %v3011_v17, %v10664_v2  ;;  %v3085_v57 = vadd.f32 %v3084_v53, %v10668_v55  ;;  %v3013_v51 = vpop.f32.mrb[55].mxu1  ;;  %v3086_v52 = vpop.f32.mrb[71].mxu0  ;;  %3449 = vmatmul.mubr.bf16.gmra.mrb[64].mxu1 %v3193_v49  ;;  %3514 = vmatmul.mubr.bf16.gmra.mrb[80].mxu0 %v3195_v36  ;;  %v3113_v21 = vmax.f32 %v3008_v10, 0.0  ;;  %v3115_v56 = vmax.f32 %v3081_v0, 0.0 }
0x1134   : > { %v3014_v15 = vadd.f32 %v3013_v51, %v10672_v44  ;;  %v3087_v46 = vadd.f32 %v3086_v52, %v10676_v37  ;;  %v3114_v14 = vmax.f32 %v3010_v11, 0.0  ;;  %v3116_v29 = vmax.f32 %v3083_v40, 0.0 }
0x1135   : > { %v3117_v24 = vmax.f32 %v3012_v26, 0.0  ;;  %v3119_v8 = vmax.f32 %v3085_v57, 0.0 }
0x1136   : > { %v3118_v54 = vmax.f32 %v3014_v15, 0.0  ;;  %v3120_v33 = vmax.f32 %v3087_v46, 0.0 }
0x1137   : > { %v3197_v60 = vpack.c.bf16 %v3117_v24, %v3113_v21  ;;  %v3199_v2 = vpack.c.bf16 %v3119_v8, %v3115_v56 }
0x1138   : > { %v3198_v39 = vpack.c.bf16 %v3118_v54, %v3114_v14  ;;  %v3200_v55 = vpack.c.bf16 %v3120_v33, %v3116_v29 }
0x113a   : > { %3456 = vmatprep.mubr.bf16.mxu1 %v3198_v39  ;;  %3521 = vmatprep.mubr.bf16.mxu0 %v3200_v55 }
0x113b   : > { %3457 = vmatmul.mubr.bf16.gmra.mrb[68].mxu1 %v3197_v60  ;;  %3522 = vmatmul.mubr.bf16.gmra.mrb[84].mxu0 %v3199_v2 }
0x113c   : > { %3855 = vmatprep.mubr.bf16.mxu1 %v12036_v18 }
0x11f6   : > { %v7342_v44 = vpop.f32.mrb[56].mxu1  ;;  %v7382_v37 = vpop.f32.mrb[72].mxu0 }
0x11f7   : > { %v7343_v25 = vpop.f32.mrb[57].mxu1  ;;  %v7383_v59 = vpop.f32.mrb[73].mxu0 }
0x11f8   : > { %v7344_v13 = vadd.f32 %v7343_v25, %v7342_v44  ;;  %v7384_v61 = vadd.f32 %v7383_v59, %v7382_v37  ;;  %v7345_v4 = vpop.f32.mrb[58].mxu1  ;;  %v7385_v19 = vpop.f32.mrb[74].mxu0 }
0x11f9   : > { %v7346_v23 = vpop.f32.mrb[59].mxu1  ;;  %v7386_v62 = vpop.f32.mrb[75].mxu0 }
0x11fa   : > { %v3435_v49 = vadd.f32 %v7344_v13, %v10711_v6  ;;  %v7347_v36 = vadd.f32 %v7346_v23, %v7345_v4  ;;  %v7387_v3 = vadd.f32 %v7386_v62, %v7385_v19 }
0x11fc   : > { %v3500_v58 = vadd.f32 %v7384_v61, %v3435_v49  ;;  %v3438_v32 = vadd.f32 %v7347_v36, %v10711_v6 }
0x11fe   : > { %v3503_v43 = vadd.f32 %v7387_v3, %v3438_v32  ;;  %v7348_v10 = vpop.f32.mrb[60].mxu1  ;;  %v7388_v0 = vpop.f32.mrb[76].mxu0  ;;  %v10716_v47 = vadd.f32 %v3500_v58, %v10361_v42 }
0x11ff   : > { %v7349_v7 = vpop.f32.mrb[61].mxu1  ;;  %v7389_v11 = vpop.f32.mrb[77].mxu0 }
0x1200   : > { %v7350_v40 = vadd.f32 %v7349_v7, %v7348_v10  ;;  %v7390_v17 = vadd.f32 %v7389_v11, %v7388_v0  ;;  %v7351_v53 = vpop.f32.mrb[62].mxu1  ;;  %v7391_v26 = vpop.f32.mrb[78].mxu0  ;;  %3542 = vadd.xlane.f32.xlu0 %v10716_v47  ;;  %v10720_v57 = vadd.f32 %v3503_v43, %v10364_v1 }
0x1201   : > { %v7352_v51 = vpop.f32.mrb[63].mxu1  ;;  %v7392_v52 = vpop.f32.mrb[79].mxu0 }
0x1202   : > { %v3443_v15 = vadd.f32 %v7350_v40, %v10711_v6  ;;  %v7353_v46 = vadd.f32 %v7352_v51, %v7351_v53  ;;  %v7393_v21 = vadd.f32 %v7392_v52, %v7391_v26  ;;  %3544 = vadd.xlane.f32.xlu1 %v10720_v57  ;;  %v8398_v51 = vld [vmem:[#allocation8 + $0xc0] ss:$12 sps:$4 sm:$0xff]   ;;  %v8400_v52 = vld [vmem:[#allocation8 + $0xc4] ss:$12 sps:$4 sm:$0xff]  }
0x1203   : > { %3823 = vmatprep.subr.bf16.mxu1 %v8400_v52 }
0x1204   : > { %v3508_v42 = vadd.f32 %v7390_v17, %v3443_v15  ;;  %v3446_v56 = vadd.f32 %v7353_v46, %v10711_v6  ;;  %v8403_v15 = vld [vmem:[#allocation8 + $0xdc] ss:$12 sps:$4 sm:$0xff]   ;;  %3824 = vmatpush1.bf16.msra.mxu1 %v8398_v51  ;;  %v8401_v46 = vld [vmem:[#allocation8 + $0xd8] ss:$12 sps:$4 sm:$0xff]   ;;  %v8412_v51 = vld [vmem:[#allocation8 + $0x120] ss:$12 sps:$4 sm:$0xff]  }
0x1205   : > { %3825 = vmatprep.subr.bf16.mxu1 %v8403_v15  ;;  %v8418_v15 = vld [vmem:[#allocation8 + $0x13c] ss:$12 sps:$4 sm:$0xff]  }
0x1206   : > { %v3511_v24 = vadd.f32 %v7393_v21, %v3446_v56  ;;  %v7354_v8 = vpop.f32.mrb[64].mxu1  ;;  %v7394_v14 = vpop.f32.mrb[80].mxu0  ;;  %v10726_v29 = vadd.f32 %v3508_v42, %v10368_v63 }
0x1207   : > { %v7355_v54 = vpop.f32.mrb[65].mxu1  ;;  %v7395_v1 = vpop.f32.mrb[81].mxu0 }
0x1208   : > { %v7356_v33 = vadd.f32 %v7355_v54, %v7354_v8  ;;  %v7396_v60 = vadd.f32 %v7395_v1, %v7394_v14  ;;  %v7357_v2 = vpop.f32.mrb[66].mxu1  ;;  %v7397_v39 = vpop.f32.mrb[82].mxu0  ;;  %3546 = vadd.xlane.f32.xlu0 %v10726_v29  ;;  %v10730_v55 = vadd.f32 %v3511_v24, %v10373_v5  ;;  %3826 = vmatpush1.bf16.msra.mxu1 %v8401_v46  ;;  %v8419_v46 = vld [vmem:[#allocation8 + $0x110] ss:$12 sps:$4 sm:$0xff]  }
0x1209   : > { %v7358_v44 = vpop.f32.mrb[67].mxu1  ;;  %v7398_v37 = vpop.f32.mrb[83].mxu0 }
0x120a   : > { %12050 = vst [vmem:[#allocation36_spill] sm:$0xff] %v10730_v55  ;;  %v3451_v25 = vadd.f32 %v7356_v33, %v10711_v6  ;;  %v7359_v59 = vadd.f32 %v7358_v44, %v7357_v2  ;;  %v7399_v13 = vadd.f32 %v7398_v37, %v7397_v39  ;;  %3548 = vadd.xlane.f32.xlu1 %v10730_v55 }
0x120c   : > { %v3516_v63 = vadd.f32 %v7396_v60, %v3451_v25  ;;  %v3454_v61 = vadd.f32 %v7359_v59, %v10711_v6 }
0x120e   : > { %v3519_v4 = vadd.f32 %v7399_v13, %v3454_v61  ;;  %v7360_v19 = vpop.f32.mrb[68].mxu1  ;;  %v7400_v23 = vpop.f32.mrb[84].mxu0  ;;  %v10736_v62 = vadd.f32 %v3516_v63, %v10377_v31 }
0x120f   : > { %v7361_v49 = vpop.f32.mrb[69].mxu1  ;;  %v7401_v5 = vpop.f32.mrb[85].mxu0 }
0x1210   : > { %12051 = vst [vmem:[#allocation37_spill] sm:$0xff] %v10736_v62  ;;  %v7362_v36 = vadd.f32 %v7361_v49, %v7360_v19  ;;  %v7402_v3 = vadd.f32 %v7401_v5, %v7400_v23  ;;  %v7403_v58 = vpop.f32.mrb[86].mxu0  ;;  %3550 = vadd.xlane.f32.xlu0 %v10736_v62  ;;  %v7363_v32 = vpop.f32.mrb[70].mxu1  ;;  %v10740_v43 = vadd.f32 %v3519_v4, %v10380_v16  ;;  %v8406_v19 = vld [vmem:[#allocation8 + $0xf4] ss:$12 sps:$4 sm:$0xff]  }
0x1211   : > { %v7364_v10 = vpop.f32.mrb[71].mxu1  ;;  %v7404_v0 = vpop.f32.mrb[87].mxu0  ;;  %v8407_v23 = vld [vmem:[#allocation8 + $0xc8] ss:$12 sps:$4 sm:$0xff]   ;;  %v8404_v49 = vld [vmem:[#allocation8 + $0xf0] ss:$12 sps:$4 sm:$0xff]   ;;  %3827 = vmatprep.subr.bf16.mxu1 %v8406_v19 }
0x1212   : > { %12052 = vst [vmem:[#allocation38_spill] sm:$0xff] %v10740_v43  ;;  %v3459_v7 = vadd.f32 %v7362_v36, %v10711_v6  ;;  %v7365_v11 = vadd.f32 %v7364_v10, %v7363_v32  ;;  %v7405_v40 = vadd.f32 %v7404_v0, %v7403_v58  ;;  %3552 = vadd.xlane.f32.xlu1 %v10740_v43  ;;  %v8410_v58 = vld [vmem:[#allocation8 + $0x10c] ss:$12 sps:$4 sm:$0xff]   ;;  %v8408_v0 = vld [vmem:[#allocation8 + $0x108] ss:$12 sps:$4 sm:$0xff]  }
0x1213   : > { %7762 = vmatprep.subr.bf16.mxu0 %v8407_v23  ;;  %3828 = vmatpush1.bf16.msra.mxu1 %v8404_v49  ;;  %v8411_v32 = vld [vmem:[#allocation8 + $0xe0] ss:$12 sps:$4 sm:$0xff]  }
0x1214   : > { %v3524_v31 = vadd.f32 %v7402_v3, %v3459_v7  ;;  %v3462_v17 = vadd.f32 %v7365_v11, %v10711_v6  ;;  %7763 = vmatpush3.bf16.msra.mxu0 %v8407_v23  ;;  %3829 = vmatprep.subr.bf16.mxu1 %v8410_v58 }
0x1215   : > { %7764 = vmatprep.subr.bf16.mxu0 %v8411_v32 }
0x1216   : > { %v3527_v53 = vadd.f32 %v7405_v40, %v3462_v17  ;;  %v10746_v26 = vadd.f32 %v3524_v31, %v10384_v20  ;;  %v8414_v17 = vld [vmem:[#allocation8 + $0x124] ss:$12 sps:$4 sm:$0xff]  }
0x1217   : > { %3830 = vmatpush1.bf16.msra.mxu1 %v8408_v0 }
0x1218   : > { %12053 = vst [vmem:[#allocation39_spill] sm:$0xff] %v10746_v26  ;;  %3554 = vadd.xlane.f32.xlu0 %v10746_v26  ;;  %v10750_v16 = vadd.f32 %v3527_v53, %v10388_v38  ;;  %7765 = vmatpush3.bf16.msra.mxu0 %v8411_v32  ;;  %v8415_v53 = vld [vmem:[#allocation8 + $0xf8] ss:$12 sps:$4 sm:$0xff]  }
0x1219   : > { %3831 = vmatprep.subr.bf16.mxu1 %v8414_v17  ;;  %7766 = vmatprep.subr.bf16.mxu0 %v8415_v53 }
0x121a   : > { %12054 = vst [vmem:[#allocation42_spill] sm:$0xff] %v10750_v16  ;;  %3556 = vadd.xlane.f32.xlu1 %v10750_v16 }
0x121b   : > { %3832 = vmatpush1.bf16.msra.mxu1 %v8412_v51 }
0x121c   : > { %7767 = vmatpush3.bf16.msra.mxu0 %v8415_v53  ;;  %3833 = vmatprep.subr.bf16.mxu1 %v8418_v15 }
0x121d   : > { %7768 = vmatprep.subr.bf16.mxu0 %v8419_v46 }
0x1220   : > { %7769 = vmatpush3.bf16.msra.mxu0 %v8419_v46 }
0x128d   : > { %v3543_v6 = vpop.xlane.xlu0 %3542 }
0x128e   : > { %v3558_v21 = vmul.f32 0.0078125, %v3543_v6  ;;  %v8416_v6 = vld [vmem:[#allocation8 + $0x138] ss:$12 sps:$4 sm:$0xff]  }
0x128f   : > { %v3545_v42 = vpop.xlane.xlu1 %3544  ;;  %3834 = vmatpush1.bf16.msra.mxu1 %v8416_v6 }
0x1290   : > { %v10754_v20 = vsub.f32 %v10716_v47, %v3558_v21  ;;  %v3559_v56 = vmul.f32 0.0078125, %v3545_v42  ;;  %v8422_v21 = vld [vmem:[#allocation8 + $0x154] ss:$12 sps:$4 sm:$0xff]  }
0x1291   : > { %v8423_v42 = vld [vmem:[#allocation8 + $0x128] ss:$12 sps:$4 sm:$0xff]   ;;  %3835 = vmatprep.subr.bf16.mxu1 %v8422_v21 }
0x1292   : > { %v10757_v38 = vsub.f32 %v10720_v57, %v3559_v56  ;;  %v3574_v24 = vmul.f32 %v10754_v20, %v10754_v20  ;;  %v8420_v56 = vld [vmem:[#allocation8 + $0x150] ss:$12 sps:$4 sm:$0xff]   ;;  %7770 = vmatprep.subr.bf16.mxu0 %v8423_v42 }
0x1293   : > { %3836 = vmatpush1.bf16.msra.mxu1 %v8420_v56  ;;  %7771 = vmatpush3.bf16.msra.mxu0 %v8423_v42 }
0x1294   : > { %3582 = vadd.xlane.f32.xlu0 %v3574_v24  ;;  %v3575_v8 = vmul.f32 %v10757_v38, %v10757_v38  ;;  %v8426_v24 = vld [vmem:[#allocation8 + $0x16c] ss:$12 sps:$4 sm:$0xff]  }
0x1295   : > { %v3547_v14 = vpop.xlane.xlu0 %3546  ;;  %3837 = vmatprep.subr.bf16.mxu1 %v8426_v24 }
0x1296   : > { %v3560_v54 = vmul.f32 0.0078125, %v3547_v14  ;;  %3584 = vadd.xlane.f32.xlu1 %v3575_v8  ;;  %v8427_v8 = vld [vmem:[#allocation8 + $0x140] ss:$12 sps:$4 sm:$0xff]   ;;  %v8424_v14 = vld [vmem:[#allocation8 + $0x168] ss:$12 sps:$4 sm:$0xff]  }
0x1297   : > { %v3549_v1 = vpop.xlane.xlu1 %3548  ;;  %7772 = vmatprep.subr.bf16.mxu0 %v8427_v8  ;;  %3838 = vmatpush1.bf16.msra.mxu1 %v8424_v14 }
0x1298   : > { %v10764_v33 = vsub.f32 %v10726_v29, %v3560_v54  ;;  %v3561_v60 = vmul.f32 0.0078125, %v3549_v1  ;;  %7773 = vmatpush3.bf16.msra.mxu0 %v8427_v8  ;;  %v8428_v54 = vld [vmem:[#allocation8 + $0x158] ss:$12 sps:$4 sm:$0xff]   ;;  %v8429_v1 = vld [vmem:[#allocation8 + $0x170] ss:$12 sps:$4 sm:$0xff]  }
0x1299   : > { %7774 = vmatprep.subr.bf16.mxu0 %v8428_v54 }
0x129a   : > { %v10767_v2 = vsub.f32 %v10730_v55, %v3561_v60  ;;  %v3576_v39 = vmul.f32 %v10764_v33, %v10764_v33 }
0x129c   : > { %3586 = vadd.xlane.f32.xlu0 %v3576_v39  ;;  %v3577_v44 = vmul.f32 %v10767_v2, %v10767_v2  ;;  %7775 = vmatpush3.bf16.msra.mxu0 %v8428_v54 }
0x129d   : > { %v3551_v37 = vpop.xlane.xlu0 %3550  ;;  %7776 = vmatprep.subr.bf16.mxu0 %v8429_v1 }
0x129e   : > { %v3562_v25 = vmul.f32 0.0078125, %v3551_v37  ;;  %3588 = vadd.xlane.f32.xlu1 %v3577_v44 }
0x129f   : > { %v3553_v59 = vpop.xlane.xlu1 %3552 }
0x12a0   : > { %v10774_v13 = vsub.f32 %v10736_v62, %v3562_v25  ;;  %v3563_v63 = vmul.f32 0.0078125, %v3553_v59  ;;  %7777 = vmatpush3.bf16.msra.mxu0 %v8429_v1 }
0x12a2   : > { %v10777_v61 = vsub.f32 %v10740_v43, %v3563_v63  ;;  %v3578_v4 = vmul.f32 %v10774_v13, %v10774_v13 }
0x12a4   : > { %3590 = vadd.xlane.f32.xlu0 %v3578_v4  ;;  %v3579_v5 = vmul.f32 %v10777_v61, %v10777_v61 }
0x12a5   : > { %v3555_v36 = vpop.xlane.xlu0 %3554 }
0x12a6   : > { %v3564_v3 = vmul.f32 0.0078125, %v3555_v36  ;;  %3592 = vadd.xlane.f32.xlu1 %v3579_v5 }
0x12a7   : > { %v3557_v10 = vpop.xlane.xlu1 %3556 }
0x12a8   : > { %v10784_v7 = vsub.f32 %v10746_v26, %v3564_v3  ;;  %v3565_v11 = vmul.f32 0.0078125, %v3557_v10  ;;  %v6975_v3 = vld [vmem:[#allocation5 + $0x1] ss:$0 sm:$0xff] }
0x12aa   : > { %v10787_v40 = vsub.f32 %v10750_v16, %v3565_v11  ;;  %v3580_v31 = vmul.f32 %v10784_v7, %v10784_v7 }
0x12ac   : > { %3594 = vadd.xlane.f32.xlu0 %v3580_v31  ;;  %v3581_v52 = vmul.f32 %v10787_v40, %v10787_v40 }
0x12ae   : > { %3596 = vadd.xlane.f32.xlu1 %v3581_v52  ;;  %v6976_v52 = vld [vmem:[#allocation7 + $0x1] ss:$0 sm:$0xff] }
0x1321   : > { %v3583_v60 = vpop.xlane.xlu0 %3582 }
0x1322   : > { %v3598_v39 = vmul.f32 0.0078125, %v3583_v60 }
0x1323   : > { %v3585_v44 = vpop.xlane.xlu1 %3584 }
0x1324   : > { %v3606_v37 = vadd.f32 1e-05, %v3598_v39  ;;  %v3599_v25 = vmul.f32 0.0078125, %v3585_v44 }
0x1326   : > { %8686 = vrsqrt.f32 %v3606_v37  ;;  %v3607_v59 = vadd.f32 1e-05, %v3599_v25 }
0x1328   : > { %8688 = vrsqrt.f32 %v3607_v59 }
0x1329   : > { %v3587_v63 = vpop.xlane.xlu0 %3586 }
0x132a   : > { %v3600_v4 = vmul.f32 0.0078125, %v3587_v63 }
0x132b   : > { %v3589_v19 = vpop.xlane.xlu1 %3588 }
0x132c   : > { %v3608_v23 = vadd.f32 1e-05, %v3600_v4  ;;  %v3601_v49 = vmul.f32 0.0078125, %v3589_v19 }
0x132e   : > { %8690 = vrsqrt.f32 %v3608_v23  ;;  %v3609_v5 = vadd.f32 1e-05, %v3601_v49 }
0x1330   : > { %v8687_v36 = vpop.eup %8686  ;;  %8692 = vrsqrt.f32 %v3609_v5 }
0x1331   : > { %v3622_v58 = vmul.f32 %v8687_v36, %v10754_v20  ;;  %v3591_v32 = vpop.xlane.xlu0 %3590 }
0x1332   : > { %v8689_v10 = vpop.eup %8688  ;;  %v3602_v0 = vmul.f32 0.0078125, %v3591_v32 }
0x1333   : > { %v3636_v11 = vmul.f32 %v6975_v3, %v3622_v58  ;;  %v3623_v31 = vmul.f32 %v8689_v10, %v10757_v38  ;;  %v3593_v17 = vpop.xlane.xlu1 %3592 }
0x1334   : > { %v3610_v53 = vadd.f32 1e-05, %v3602_v0  ;;  %v3603_v51 = vmul.f32 0.0078125, %v3593_v17 }
0x1335   : > { %v3637_v15 = vmul.f32 %v6975_v3, %v3623_v31  ;;  %v3650_v6 = vadd.f32 %v6976_v52, %v3636_v11 }
0x1336   : > { %8694 = vrsqrt.f32 %v3610_v53  ;;  %v3611_v46 = vadd.f32 1e-05, %v3603_v51 }
0x1337   : > { %v3651_v21 = vadd.f32 %v6976_v52, %v3637_v15 }
0x1338   : > { %v8691_v42 = vpop.eup %8690  ;;  %8696 = vrsqrt.f32 %v3611_v46 }
0x1339   : > { %v3595_v56 = vpop.xlane.xlu0 %3594  ;;  %v3691_v24 = vpack.c.bf16 %v3651_v21, %v3650_v6  ;;  %v3624_v20 = vmul.f32 %v8691_v42, %v10764_v33 }
0x133a   : > { %v8693_v8 = vpop.eup %8692  ;;  %v3604_v14 = vmul.f32 0.0078125, %v3595_v56 }
0x133b   : > { %v3597_v54 = vpop.xlane.xlu1 %3596  ;;  %3856 = vmatmul.mubr.bf16.vlgmr.msra.gmra.mrb[72].mxu1 %v3691_v24  ;;  %7778 = vmatprep.mubr.bf16.mxu0 %v3691_v24  ;;  %v3625_v38 = vmul.f32 %v8693_v8, %v10767_v2  ;;  %v3638_v1 = vmul.f32 %v6975_v3, %v3624_v20 }
0x133c   : > { %v3612_v60 = vadd.f32 1e-05, %v3604_v14  ;;  %v3605_v39 = vmul.f32 0.0078125, %v3597_v54  ;;  %3865 = vmatprep.mubr.bf16.mxu1 %v12036_v18 }
0x133d   : > { %v3639_v44 = vmul.f32 %v6975_v3, %v3625_v38  ;;  %v3652_v25 = vadd.f32 %v6976_v52, %v3638_v1 }
0x133e   : > { %8698 = vrsqrt.f32 %v3612_v60  ;;  %v3613_v37 = vadd.f32 1e-05, %v3605_v39 }
0x133f   : > { %v3653_v59 = vadd.f32 %v6976_v52, %v3639_v44 }
0x1340   : > { %v8695_v63 = vpop.eup %8694  ;;  %8700 = vrsqrt.f32 %v3613_v37 }
0x1341   : > { %v3692_v33 = vpack.c.bf16 %v3653_v59, %v3652_v25  ;;  %v3626_v4 = vmul.f32 %v8695_v63, %v10774_v13 }
0x1342   : > { %v8697_v19 = vpop.eup %8696 }
0x1343   : > { %3866 = vmatmul.mubr.bf16.gmra.mrb[76].mxu1 %v3692_v33  ;;  %7779 = vmatmul.mubr.bf16.vlgmr.msra.gmra.mrb[88].mxu0 %v3692_v33  ;;  %v3627_v2 = vmul.f32 %v8697_v19, %v10777_v61  ;;  %v3640_v23 = vmul.f32 %v6975_v3, %v3626_v4 }
0x1344   : > { %3875 = vmatprep.mubr.bf16.mxu1 %v12036_v18 }
0x1345   : > { %v3641_v49 = vmul.f32 %v6975_v3, %v3627_v2  ;;  %v3654_v5 = vadd.f32 %v6976_v52, %v3640_v23 }
0x1347   : > { %v3655_v36 = vadd.f32 %v6976_v52, %v3641_v49 }
0x1348   : > { %v8699_v58 = vpop.eup %8698 }
0x1349   : > { %v3693_v32 = vpack.c.bf16 %v3655_v36, %v3654_v5  ;;  %v3628_v10 = vmul.f32 %v8699_v58, %v10784_v7 }
0x134a   : > { %v8701_v0 = vpop.eup %8700 }
0x134b   : > { %3876 = vmatmul.mubr.bf16.gmra.mrb[80].mxu1 %v3693_v32  ;;  %7782 = vmatprep.mubr.bf16.mxu0 %v3693_v32  ;;  %v3629_v13 = vmul.f32 %v8701_v0, %v10787_v40  ;;  %v3642_v11 = vmul.f32 %v6975_v3, %v3628_v10 }
0x134c   : > { %3885 = vmatprep.mubr.bf16.mxu1 %v12036_v18 }
0x134d   : > { %v3643_v31 = vmul.f32 %v6975_v3, %v3629_v13  ;;  %v3656_v61 = vadd.f32 %v6976_v52, %v3642_v11 }
0x134f   : > { %v3657_v17 = vadd.f32 %v6976_v52, %v3643_v31 }
0x1351   : > { %v3694_v53 = vpack.c.bf16 %v3657_v17, %v3656_v61 }
0x1353   : > { %3886 = vmatmul.mubr.bf16.gmra.mrb[84].mxu1 %v3694_v53  ;;  %7783 = vmatmul.mubr.bf16.gmra.mrb[92].mxu0 %v3694_v53 }
0x140e   : > { %v3857_v51 = vpop.f32.mrb[72].mxu1 }
0x140f   : > { %v3859_v15 = vpop.f32.mrb[73].mxu1 }
0x1410   : > { %v3861_v46 = vpop.f32.mrb[74].mxu1 }
0x1411   : > { %v10804_v6 = vpack.c.bf16 %v3861_v46, %v3857_v51  ;;  %v3863_v7 = vpop.f32.mrb[75].mxu1 }
0x1412   : > { %v10806_v21 = vpack.c.bf16 %v3863_v7, %v3859_v15 }
0x1413   : > { %7794 = vmatprep.mubr.msk.bf16.mxu1 %vm1151_vm0, %v10804_v6 }
0x1414   : > { %4263 = vrot.lane.b32.xlu0 %v10806_v21, %s9278_s0  ;;  %7978 = vmatprep.subr.msk.bf16.mxu1 %vm1151_vm0, %v10806_v21  ;;  %v3986_v40 = vsel %vm1151_vm0, %v10806_v21, 0 }
0x1415   : > { %7787 = vmatpush3.bf16.xpose.msra.mxu1 %v3986_v40 }
0x1416   : > { %v3867_v3 = vpop.f32.mrb[76].mxu1  ;;  %v7780_v52 = vpop.f32.mrb[88].mxu0 }
0x1417   : > { %v3869_v42 = vpop.f32.mrb[77].mxu1  ;;  %v3930_v56 = vpop.f32.mrb[89].mxu0 }
0x1418   : > { %4251 = vrot.lane.b32.xlu0 %v10804_v6, %s9278_s0  ;;  %v3871_v24 = vpop.f32.mrb[78].mxu1  ;;  %v7781_v20 = vpop.f32.mrb[90].mxu0 }
0x1419   : > { %v10818_v8 = vpack.c.bf16 %v3871_v24, %v3867_v3  ;;  %v10820_v14 = vpack.c.bf16 %v7781_v20, %v7780_v52  ;;  %v3873_v54 = vpop.f32.mrb[79].mxu1  ;;  %v3933_v38 = vpop.f32.mrb[91].mxu0 }
0x141a   : > { %v10822_v1 = vpack.c.bf16 %v3873_v54, %v3869_v42  ;;  %v10824_v60 = vpack.c.bf16 %v3933_v38, %v3930_v56 }
0x141c   : > { %7802 = vmatprep.subr.bf16.mxu0 %v10824_v60  ;;  %4265 = vrot.lane.b32.xlu1 %v10822_v1, %s9278_s0  ;;  %v3989_v39 = vsel %vm1151_vm0, %v10822_v1, 0 }
0x141d   : > { %7979 = vmatprep.subr.msk.bf16.mxu1 %vm1151_vm0, %v10822_v1  ;;  %7803 = vmatpush3.bf16.msra.mxu0 %v10824_v60 }
0x141e   : > { %7789 = vmatpush3.bf16.xpose.msra.mxu1 %v3989_v39  ;;  %v3877_v44 = vpop.f32.mrb[80].mxu1  ;;  %7804 = vmatprep.subr.bf16.mxu0 %v10820_v14 }
0x141f   : > { %v3879_v37 = vpop.f32.mrb[81].mxu1 }
0x1420   : > { %v3881_v25 = vpop.f32.mrb[82].mxu1 }
0x1421   : > { %v10835_v59 = vpack.c.bf16 %v3881_v25, %v3877_v44  ;;  %v3883_v63 = vpop.f32.mrb[83].mxu1  ;;  %7805 = vmatpush3.bf16.msra.mxu0 %v10820_v14 }
0x1422   : > { %v10838_v33 = vpack.c.bf16 %v3883_v63, %v3879_v37 }
0x1423   : > { %4255 = vrot.lane.b32.xlu0 %v10835_v59, %s9278_s0 }
0x1424   : > { %4267 = vrot.lane.b32.xlu1 %v10838_v33, %s9278_s0  ;;  %7980 = vmatprep.subr.msk.bf16.mxu1 %vm1151_vm0, %v10838_v33  ;;  %v3992_v4 = vsel %vm1151_vm0, %v10838_v33, 0 }
0x1426   : > { %7791 = vmatpush3.bf16.xpose.msra.mxu1 %v3992_v4  ;;  %v3887_v19 = vpop.f32.mrb[84].mxu1  ;;  %v7784_v2 = vpop.f32.mrb[92].mxu0 }
0x1427   : > { %v3889_v23 = vpop.f32.mrb[85].mxu1  ;;  %v3946_v49 = vpop.f32.mrb[93].mxu0 }
0x1428   : > { %v3891_v5 = vpop.f32.mrb[86].mxu1  ;;  %v7785_v36 = vpop.f32.mrb[94].mxu0 }
0x1429   : > { %v10848_v58 = vpack.c.bf16 %v3891_v5, %v3887_v19  ;;  %v10850_v32 = vpack.c.bf16 %v7785_v36, %v7784_v2  ;;  %v3893_v10 = vpop.f32.mrb[87].mxu1  ;;  %v3949_v0 = vpop.f32.mrb[95].mxu0 }
0x142a   : > { %v10852_v13 = vpack.c.bf16 %v3893_v10, %v3889_v23  ;;  %v10854_v11 = vpack.c.bf16 %v3949_v0, %v3946_v49 }
0x142c   : > { %7806 = vmatprep.subr.bf16.mxu0 %v10854_v11  ;;  %4269 = vrot.lane.b32.xlu1 %v10852_v13, %s9278_s0  ;;  %v3995_v31 = vsel %vm1151_vm0, %v10852_v13, 0 }
0x142d   : > { %7981 = vmatprep.subr.msk.bf16.mxu1 %vm1151_vm0, %v10852_v13  ;;  %7807 = vmatpush3.bf16.msra.mxu0 %v10854_v11 }
0x142e   : > { %7793 = vmatpush3.bf16.xpose.msra.mxu1 %v3995_v31  ;;  %7808 = vmatprep.subr.bf16.mxu0 %v10850_v32 }
0x1430   : > { %4253 = vrot.lane.b32.xlu1 %v10818_v8, %s9278_s0 }
0x1431   : > { %7809 = vmatpush3.bf16.msra.mxu0 %v10850_v32 }
0x1434   : > { %4257 = vrot.lane.b32.xlu1 %v10848_v58, %s9278_s0 }
0x1435   : > { %7795 = vmatmul.mubr.msk.bf16.vlgmr.msra.gmra.mrb[88].mxu1 %vm1151_vm0, %v10818_v8 }
0x1436   : > { %7798 = vmatprep.mubr.msk.bf16.mxu1 %vm1151_vm0, %v10835_v59 }
0x143d   : > { %7799 = vmatmul.mubr.msk.bf16.gmra.mrb[92].mxu1 %vm1151_vm0, %v10848_v58 }
0x1486   : > { %v4264_v61 = vpop.permute.xlu0 %4263 }
0x1487   : > { %7982 = vmatprep.subr.msk.bf16.mxu1 %vm1151_vm0, %v4264_v61  ;;  %v4284_v17 = vsel %vm1151_vm0, %v4264_v61, 0 }
0x1488   : > { %7819 = vmatpush3.bf16.xpose.msra.mxu1 %v4284_v17 }
0x148a   : > { %v4252_v53 = vpop.permute.xlu0 %4251 }
0x148b   : > { %7826 = vmatprep.mubr.msk.bf16.mxu1 %vm1151_vm0, %v4252_v53 }
0x148e   : > { %v4266_v51 = vpop.permute.xlu1 %4265 }
0x148f   : > { %7983 = vmatprep.subr.msk.bf16.mxu1 %vm1151_vm0, %v4266_v51  ;;  %v4287_v15 = vsel %vm1151_vm0, %v4266_v51, 0 }
0x1490   : > { %7821 = vmatpush3.bf16.xpose.msra.mxu1 %v4287_v15 }
0x1495   : > { %v4256_v42 = vpop.permute.xlu0 %4255 }
0x1496   : > { %v4268_v46 = vpop.permute.xlu1 %4267 }
0x1497   : > { %7984 = vmatprep.subr.msk.bf16.mxu1 %vm1151_vm0, %v4268_v46  ;;  %v4290_v7 = vsel %vm1151_vm0, %v4268_v46, 0 }
0x1498   : > { %7823 = vmatpush3.bf16.xpose.msra.mxu1 %v4290_v7 }
0x149e   : > { %v4270_v40 = vpop.permute.xlu1 %4269 }
0x149f   : > { %7985 = vmatprep.subr.msk.bf16.mxu1 %vm1151_vm0, %v4270_v40  ;;  %v4293_v3 = vsel %vm1151_vm0, %v4270_v40, 0 }
0x14a0   : > { %7825 = vmatpush3.bf16.xpose.msra.mxu1 %v4293_v3 }
0x14a2   : > { %v4254_v52 = vpop.permute.xlu1 %4253 }
0x14a6   : > { %v4258_v56 = vpop.permute.xlu1 %4257 }
0x14a7   : > { %7827 = vmatmul.mubr.msk.bf16.vlgmr.msra.gmra.mrb[96].mxu1 %vm1151_vm0, %v4254_v52 }
0x14a8   : > { %7830 = vmatprep.mubr.msk.bf16.mxu1 %vm1151_vm0, %v4256_v42 }
0x14af   : > { %7831 = vmatmul.mubr.msk.bf16.gmra.mrb[100].mxu1 %vm1151_vm0, %v4258_v56 }
0x1508   : > { %v7796_v24 = vpop.f32.mrb[88].mxu1 }
0x1509   : > { %v4064_v20 = vmul.f32 0.17677669, %v7796_v24  ;;  %v4031_v54 = vpop.f32.mrb[89].mxu1 }
0x150a   : > { %v4062_v38 = vmul.f32 0.17677669, %v4031_v54  ;;  %v7797_v39 = vpop.f32.mrb[90].mxu1 }
0x150b   : > { %v10890_v44 = vsel %vm9854_vm4, %v4064_v20, -1e+30  ;;  %v4034_v37 = vpop.f32.mrb[91].mxu1  ;;  %v4065_v19 = vmul.f32 0.17677669, %v7797_v39 }
0x150c   : > { %v4063_v25 = vmul.f32 0.17677669, %v4034_v37  ;;  %v4084_v63 = vsel %vm1257_vm2, %v10890_v44, -inf  ;;  %v10896_v4 = vsel %vm9845_vm1, %v4062_v38, -1e+30 }
0x150d   : > { %4085 = vmax.xlane.f32.xlu0 %v4084_v63  ;;  %v4078_v5 = vsel %vm1257_vm2, %v10896_v4, -inf  ;;  %v10908_v36 = vsel %vm9861_vm5, %v4065_v19, -1e+30 }
0x150e   : > { %v10900_v2 = vsel %vm9850_vm3, %v4063_v25, -1e+30  ;;  %v4087_v51 = vsel %vm1257_vm2, %v10908_v36, -inf }
0x150f   : > { %v4081_v23 = vsel %vm1257_vm2, %v10900_v2, -inf }
0x1510   : > { %4082 = vmax.xlane.f32.xlu1 %v4081_v23  ;;  %v7800_v49 = vpop.f32.mrb[92].mxu1 }
0x1511   : > { %v4068_v10 = vmul.f32 0.17677669, %v7800_v49  ;;  %4079 = vmax.xlane.f32.xlu0 %v4078_v5  ;;  %v4047_v0 = vpop.f32.mrb[93].mxu1 }
0x1512   : > { %v7801_v31 = vpop.f32.mrb[94].mxu1  ;;  %v4066_v46 = vmul.f32 0.17677669, %v4047_v0 }
0x1513   : > { %v4069_v61 = vmul.f32 0.17677669, %v7801_v31  ;;  %v4050_v17 = vpop.f32.mrb[95].mxu1  ;;  %v4076_v15 = vsel %vm9886_vm8, %v4068_v10, -1e+30 }
0x1514   : > { %v4067_v53 = vmul.f32 0.17677669, %v4050_v17  ;;  %v4096_v52 = vsel %vm1257_vm2, %v4076_v15, -inf  ;;  %v4074_v56 = vsel %vm9876_vm6, %v4066_v46, -1e+30 }
0x1515   : > { %v10916_v7 = vsel %vm9893_vm9, %v4069_v61, -1e+30  ;;  %4088 = vmax.xlane.f32.xlu0 %v4087_v51  ;;  %v4090_v20 = vsel %vm1257_vm2, %v4074_v56, -inf }
0x1516   : > { %v4099_v40 = vsel %vm1257_vm2, %v10916_v7, -inf  ;;  %v10922_v3 = vsel %vm9882_vm7, %v4067_v53, -1e+30 }
0x1517   : > { %4100 = vmax.xlane.f32.xlu1 %v4099_v40  ;;  %v4093_v24 = vsel %vm1257_vm2, %v10922_v3, -inf }
0x1519   : > { %4097 = vmax.xlane.f32.xlu0 %v4096_v52 }
0x151b   : > { %4094 = vmax.xlane.f32.xlu1 %v4093_v24 }
0x151d   : > { %4091 = vmax.xlane.f32.xlu0 %v4090_v20 }
0x157a   : > { %v7828_v54 = vpop.f32.mrb[96].mxu1 }
0x157b   : > { %v4362_v38 = vmul.f32 0.17677669, %v7828_v54  ;;  %v4329_v39 = vpop.f32.mrb[97].mxu1 }
0x157c   : > { %v4360_v37 = vmul.f32 0.17677669, %v4329_v39  ;;  %v7829_v25 = vpop.f32.mrb[98].mxu1 }
0x157d   : > { %v10932_v63 = vsel %vm9854_vm4, %v4362_v38, -1e+30  ;;  %v4363_v19 = vmul.f32 0.17677669, %v7829_v25  ;;  %v4332_v23 = vpop.f32.mrb[99].mxu1 }
0x157e   : > { %v4361_v49 = vmul.f32 0.17677669, %v4332_v23  ;;  %v4382_v5 = vsel %vm1257_vm2, %v10932_v63, -inf  ;;  %v10938_v10 = vsel %vm9845_vm1, %v4360_v37, -1e+30 }
0x157f   : > { %v10942_v0 = vsel %vm9861_vm5, %v4363_v19, -1e+30  ;;  %4383 = vmax.xlane.f32.xlu0 %v4382_v5  ;;  %v4376_v53 = vsel %vm1257_vm2, %v10938_v10, -inf }
0x1580   : > { %v4385_v31 = vsel %vm1257_vm2, %v10942_v0, -inf  ;;  %v10948_v61 = vsel %vm9850_vm3, %v4361_v49, -1e+30 }
0x1581   : > { %4386 = vmax.xlane.f32.xlu1 %v4385_v31  ;;  %v4379_v24 = vsel %vm1257_vm2, %v10948_v61, -inf }
0x1582   : > { %v7832_v17 = vpop.f32.mrb[100].mxu1 }
0x1583   : > { %v4366_v51 = vmul.f32 0.17677669, %v7832_v17  ;;  %4377 = vmax.xlane.f32.xlu0 %v4376_v53  ;;  %v4345_v46 = vpop.f32.mrb[101].mxu1 }
0x1584   : > { %v4364_v40 = vmul.f32 0.17677669, %v4345_v46  ;;  %v7833_v52 = vpop.f32.mrb[102].mxu1 }
0x1585   : > { %v10956_v20 = vsel %vm9886_vm8, %v4366_v51, -1e+30  ;;  %4380 = vmax.xlane.f32.xlu1 %v4379_v24  ;;  %v4348_v54 = vpop.f32.mrb[103].mxu1 }
0x1586   : > { %v4394_v38 = vsel %vm1257_vm2, %v10956_v20, -inf  ;;  %v10962_v39 = vsel %vm9876_vm6, %v4364_v40, -1e+30  ;;  %v4367_v40 = vmul.f32 0.17677669, %v7833_v52 }
0x1587   : > { %4395 = vmax.xlane.f32.xlu0 %v4394_v38  ;;  %v4388_v37 = vsel %vm1257_vm2, %v10962_v39, -inf  ;;  %v4365_v45 = vmul.f32 0.17677669, %v4348_v54 }
0x158b   : > { %4389 = vmax.xlane.f32.xlu0 %v4388_v37  ;;  %v10976_v37 = vsel %vm9893_vm9, %v4367_v40, -1e+30 }
0x1596   : > { %4474 = vrot.lane.b32.xlu1 %v10820_v14, %s9278_s0 }
0x159a   : > { %4476 = vrot.lane.b32.xlu1 %v10854_v11, %s9278_s0  ;;  %v4086_v25 = vpop.xlane.xlu0 %4085 }
0x159b   : > { %v4104_v49 = vsub.f32 %v10890_v44, %v4086_v25 }
0x159d   : > { %v4114_v31 = vmul.f32 1.442695, %v4104_v49 }
0x159e   : > { %v4080_v19 = vpop.xlane.xlu0 %4079 }
0x159f   : > { %v4102_v17 = vsub.f32 %v10896_v4, %v4080_v19  ;;  %8702 = vpow2.f32 %v4114_v31  ;;  %v4397_v4 = vsel %vm1257_vm2, %v10976_v37, -inf }
0x15a1   : > { %4472 = vrot.lane.b32.xlu0 %v10824_v60, %s9278_s0  ;;  %v4110_v53 = vmul.f32 1.442695, %v4102_v17 }
0x15a2   : > { %v4089_v23 = vpop.xlane.xlu0 %4088 }
0x15a3   : > { %8704 = vpow2.f32 %v4110_v53  ;;  %v4105_v31 = vsub.f32 %v10908_v36, %v4089_v23 }
0x15a6   : > { %v4098_v5 = vpop.xlane.xlu0 %4097 }
0x15a7   : > { %v4108_v51 = vsub.f32 %v4076_v15, %v4098_v5  ;;  %v10984_v15 = vsel %vm9882_vm7, %v4365_v45, -1e+30  ;;  %v4083_v5 = vpop.xlane.xlu1 %4082 }
0x15a8   : > { %v4391_v54 = vsel %vm1257_vm2, %v10984_v15, -inf  ;;  %v4103_v53 = vsub.f32 %v10900_v2, %v4083_v5 }
0x15a9   : > { %v4122_v24 = vmul.f32 1.442695, %v4108_v51  ;;  %v10978_v44 = vpop.eup %8702  ;;  %v4116_v51 = vmul.f32 1.442695, %v4105_v31 }
0x15aa   : > { %v4092_v46 = vpop.xlane.xlu0 %4091 }
0x15ab   : > { %v4106_v38 = vsub.f32 %v4074_v56, %v4092_v46  ;;  %8706 = vpow2.f32 %v4122_v24  ;;  %v4132_v56 = vsel %vm1257_vm2, %v10978_v44, 0.0  ;;  %v4101_v17 = vpop.xlane.xlu1 %4100  ;;  %v4112_v46 = vmul.f32 1.442695, %v4103_v53 }
0x15ac   : > { %v4109_v40 = vsub.f32 %v10916_v7, %v4101_v17 }
0x15ad   : > { %v4118_v48 = vmul.f32 1.442695, %v4106_v38  ;;  %v10988_v52 = vpop.eup %8704 }
0x15ae   : > { %v4126_v25 = vsel %vm1257_vm2, %v10988_v52, 0.0  ;;  %v4124_v38 = vmul.f32 1.442695, %v4109_v40 }
0x15af   : > { %8708 = vpow2.f32 %v4118_v48  ;;  %v4095_v24 = vpop.xlane.xlu1 %4094 }
0x15b0   : > { %8710 = vpow2.f32 %v4116_v51 }
0x15b1   : > { %8712 = vpow2.f32 %v4112_v46 }
0x15b2   : > { %8714 = vpow2.f32 %v4124_v38 }
0x15b5   : > { %v10994_v19 = vpop.eup %8706 }
0x15b6   : > { %v4144_v48 = vsel %vm1257_vm2, %v10994_v19, 0.0 }
0x15b9   : > { %v10998_v45 = vpop.eup %8708 }
0x15ba   : > { %v4138_v49 = vsel %vm1257_vm2, %v10998_v45, 0.0 }
0x15be   : > { %4398 = vmax.xlane.f32.xlu1 %v4397_v4  ;;  %v4107_v4 = vsub.f32 %v10922_v3, %v4095_v24 }
0x15c0   : > { %4133 = vadd.xlane.f32.xlu0 %v4132_v56  ;;  %v4120_v56 = vmul.f32 1.442695, %v4107_v4 }
0x15c2   : > { %4392 = vmax.xlane.f32.xlu1 %v4391_v54  ;;  %v11008_v54 = vpop.eup %8710  ;;  %8716 = vpow2.f32 %v4120_v56 }
0x15c3   : > { %v4135_v36 = vsel %vm1257_vm2, %v11008_v54, 0.0  ;;  %v11012_v23 = vpop.eup %8712 }
0x15c4   : > { %4127 = vadd.xlane.f32.xlu0 %v4126_v25  ;;  %v4129_v2 = vsel %vm1257_vm2, %v11012_v23, 0.0  ;;  %v11016_v7 = vpop.eup %8714 }
0x15c5   : > { %v4147_v3 = vsel %vm1257_vm2, %v11016_v7, 0.0 }
0x15c8   : > { %4145 = vadd.xlane.f32.xlu0 %v4144_v48 }
0x15cc   : > { %4139 = vadd.xlane.f32.xlu0 %v4138_v49  ;;  %v11020_v25 = vpop.eup %8716 }
0x15cd   : > { %v4141_v48 = vsel %vm1257_vm2, %v11020_v25, 0.0 }
0x15d3   : > { %4478 = vrot.lane.b32.xlu1 %v10850_v32, %s9278_s0 }
0x15f7   : > { %4136 = vadd.xlane.f32.xlu1 %v4135_v36 }
0x15fb   : > { %4130 = vadd.xlane.f32.xlu1 %v4129_v2 }
0x15ff   : > { %4148 = vadd.xlane.f32.xlu1 %v4147_v3 }
0x1603   : > { %4142 = vadd.xlane.f32.xlu1 %v4141_v48 }
0x160c   : > { %v4384_v49 = vpop.xlane.xlu0 %4383 }
0x160d   : > { %v4402_v5 = vsub.f32 %v10932_v63, %v4384_v49 }
0x160e   : > { %v4387_v31 = vpop.xlane.xlu1 %4386 }
0x160f   : > { %v4412_v17 = vmul.f32 1.442695, %v4402_v5  ;;  %v4403_v53 = vsub.f32 %v10942_v0, %v4387_v31 }
0x1610   : > { %v4378_v51 = vpop.xlane.xlu0 %4377 }
0x1611   : > { %8718 = vpow2.f32 %v4412_v17  ;;  %v4414_v46 = vmul.f32 1.442695, %v4403_v53  ;;  %v4400_v40 = vsub.f32 %v10938_v10, %v4378_v51 }
0x1612   : > { %v4381_v24 = vpop.xlane.xlu1 %4380 }
0x1613   : > { %8720 = vpow2.f32 %v4414_v46  ;;  %v4408_v38 = vmul.f32 1.442695, %v4400_v40  ;;  %v4401_v4 = vsub.f32 %v10948_v61, %v4381_v24 }
0x1614   : > { %v4396_v56 = vpop.xlane.xlu0 %4395 }
0x1615   : > { %8722 = vpow2.f32 %v4408_v38  ;;  %v4410_v36 = vmul.f32 1.442695, %v4401_v4  ;;  %v4406_v2 = vsub.f32 %v10956_v20, %v4396_v56 }
0x1616   : > { %v4475_v38 = vpop.permute.xlu1 %4474 }
0x1617   : > { %8724 = vpow2.f32 %v4410_v36  ;;  %v4420_v63 = vmul.f32 1.442695, %v4406_v2 }
0x1618   : > { %v4390_v3 = vpop.xlane.xlu0 %4389 }
0x1619   : > { %8726 = vpow2.f32 %v4420_v63  ;;  %v4404_v0 = vsub.f32 %v10962_v39, %v4390_v3 }
0x161a   : > { %v11061_v4 = vpop.permute.xlu1 %4476 }
0x161b   : > { %v11030_v48 = vpop.eup %8718  ;;  %v4416_v49 = vmul.f32 1.442695, %v4404_v0 }
0x161c   : > { %v11032_v10 = vpop.permute.xlu0 %4472  ;;  %v4430_v5 = vsel %vm1257_vm2, %v11030_v48, 0.0 }
0x161d   : > { %v11036_v61 = vpop.eup %8720  ;;  %8728 = vpow2.f32 %v4416_v49  ;;  %4431 = vadd.xlane.f32.xlu0 %v4430_v5  ;;  %7834 = vmatprep.subr.bf16.mxu0 %v11032_v10 }
0x161e   : > { %v4433_v20 = vsel %vm1257_vm2, %v11036_v61, 0.0 }
0x161f   : > { %v11041_v31 = vpop.eup %8722  ;;  %4434 = vadd.xlane.f32.xlu1 %v4433_v20 }
0x1620   : > { %v4424_v39 = vsel %vm1257_vm2, %v11041_v31, 0.0 }
0x1621   : > { %v11045_v17 = vpop.eup %8724  ;;  %4425 = vadd.xlane.f32.xlu0 %v4424_v39 }
0x1622   : > { %v4427_v53 = vsel %vm1257_vm2, %v11045_v17, 0.0 }
0x1623   : > { %v11049_v51 = vpop.eup %8726  ;;  %4428 = vadd.xlane.f32.xlu1 %v4427_v53 }
0x1624   : > { %v4442_v46 = vsel %vm1257_vm2, %v11049_v51, 0.0 }
0x1625   : > { %4443 = vadd.xlane.f32.xlu0 %v4442_v46 }
0x1627   : > { %v11053_v40 = vpop.eup %8728 }
0x1628   : > { %v4436_v24 = vsel %vm1257_vm2, %v11053_v40, 0.0 }
0x1629   : > { %4437 = vadd.xlane.f32.xlu0 %v4436_v24 }
0x1634   : > { %4571 = vrot.lane.b32.xlu1 %v10822_v1, %s9279_s22 }
0x1638   : > { %4573 = vrot.lane.b32.xlu1 %v10838_v33, %s9279_s22 }
0x164b   : > { %v4399_v56 = vpop.xlane.xlu1 %4398 }
0x164c   : > { %v4407_v36 = vsub.f32 %v10976_v37, %v4399_v56 }
0x164d   : > { %v4134_v37 = vpop.xlane.xlu0 %4133 }
0x164e   : > { %v4422_v2 = vmul.f32 1.442695, %v4407_v36 }
0x164f   : > { %v4393_v63 = vpop.xlane.xlu1 %4392 }
0x1650   : > { %8730 = vpow2.f32 %v4422_v2  ;;  %v4405_v3 = vsub.f32 %v10984_v15, %v4393_v63 }
0x1651   : > { %v4128_v15 = vpop.xlane.xlu0 %4127 }
0x1652   : > { %v4418_v0 = vmul.f32 1.442695, %v4405_v3 }
0x1653   : > { %v4479_v53 = vpop.permute.xlu1 %4478 }
0x1654   : > { %8732 = vpow2.f32 %v4418_v0 }
0x1655   : > { %v4146_v24 = vpop.xlane.xlu0 %4145 }
0x1659   : > { %v4140_v36 = vpop.xlane.xlu0 %4139 }
0x165a   : > { %v11065_v49 = vpop.eup %8730 }
0x165b   : > { %v4445_v5 = vsel %vm1257_vm2, %v11065_v49, 0.0 }
0x165c   : > { %4446 = vadd.xlane.f32.xlu0 %v4445_v5 }
0x165e   : > { %v11069_v20 = vpop.eup %8732 }
0x165f   : > { %v4439_v39 = vsel %vm1257_vm2, %v11069_v20, 0.0 }
0x1660   : > { %4440 = vadd.xlane.f32.xlu1 %v4439_v39 }
0x1671   : > { %4575 = vrot.lane.b32.xlu1 %v10852_v13, %s9279_s22 }
0x1672   : > { %4569 = vrot.lane.b32.xlu0 %v10806_v21, %s9279_s22 }
0x1675   : > { %4563 = vrot.lane.b32.xlu1 %v10818_v8, %s9279_s22 }
0x1676   : > { %4561 = vrot.lane.b32.xlu0 %v10804_v6, %s9279_s22 }
0x1679   : > { %4567 = vrot.lane.b32.xlu1 %v10848_v58, %s9279_s22 }
0x167a   : > { %4565 = vrot.lane.b32.xlu0 %v10835_v59, %s9279_s22 }
0x1684   : > { %v4137_v46 = vpop.xlane.xlu1 %4136 }
0x1685   : > { %8734 = vrcp.f32 %v4137_v46 }
0x1686   : > { %8736 = vrcp.f32 %v4128_v15 }
0x1687   : > { %8738 = vrcp.f32 %v4134_v37 }
0x1688   : > { %v4131_v56 = vpop.xlane.xlu1 %4130 }
0x1689   : > { %8740 = vrcp.f32 %v4131_v56 }
0x168c   : > { %v4149_v2 = vpop.xlane.xlu1 %4148 }
0x168d   : > { %8742 = vrcp.f32 %v4149_v2 }
0x168e   : > { %8744 = vrcp.f32 %v4140_v36 }
0x168f   : > { %v8735_v63 = vpop.eup %8734  ;;  %8746 = vrcp.f32 %v4146_v24 }
0x1690   : > { %v4143_v3 = vpop.xlane.xlu1 %4142  ;;  %v8737_v0 = vpop.eup %8736  ;;  %v4161_v28 = vmul.f32 %v8735_v63, %v11008_v54 }
0x1691   : > { %8748 = vrcp.f32 %v4143_v3  ;;  %v8739_v5 = vpop.eup %8738  ;;  %v4158_v22 = vmul.f32 %v8737_v0, %v10988_v52 }
0x1692   : > { %v4160_v37 = vmul.f32 %v8739_v5, %v10978_v44 }
0x1693   : > { %v8741_v39 = vpop.eup %8740 }
0x1694   : > { %v4159_v15 = vmul.f32 %v8741_v39, %v11012_v23  ;;  %v4167_v56 = vpack.c.bf16 %v4161_v28, %v4160_v37 }
0x1696   : > { %v4166_v46 = vpack.c.bf16 %v4159_v15, %v4158_v22 }
0x1697   : > { %v8743_v30 = vpop.eup %8742 }
0x1698   : > { %7810 = vmatprep.mubr.msk.bf16.mxu0 %vm1257_vm2, %v4166_v46  ;;  %v8745_v36 = vpop.eup %8744  ;;  %v4165_v54 = vmul.f32 %v8743_v30, %v11016_v7 }
0x1699   : > { %7811 = vmatmul.mubr.msk.bf16.vlgmr.msra.gmra.mrb[96].mxu0 %vm1257_vm2, %v4167_v56  ;;  %v8747_v24 = vpop.eup %8746  ;;  %v4162_v52 = vmul.f32 %v8745_v36, %v10998_v45 }
0x169a   : > { %7835 = vmatpush3.bf16.msra.mxu0 %v11032_v10  ;;  %v4164_v22 = vmul.f32 %v8747_v24, %v10994_v19 }
0x169b   : > { %v8749_v2 = vpop.eup %8748  ;;  %7836 = vmatprep.subr.bf16.mxu0 %v4475_v38 }
0x169c   : > { %v4163_v23 = vmul.f32 %v8749_v2, %v11020_v25  ;;  %v4169_v44 = vpack.c.bf16 %v4165_v54, %v4164_v22 }
0x169e   : > { %7837 = vmatpush3.bf16.msra.mxu0 %v4475_v38  ;;  %v4168_v28 = vpack.c.bf16 %v4163_v23, %v4162_v52 }
0x169f   : > { %7838 = vmatprep.subr.bf16.mxu0 %v11061_v4 }
0x16a0   : > { %7814 = vmatprep.mubr.msk.bf16.mxu0 %vm1257_vm2, %v4168_v28 }
0x16a1   : > { %7815 = vmatmul.mubr.msk.bf16.gmra.mrb[100].mxu0 %vm1257_vm2, %v4169_v44 }
0x16a2   : > { %7839 = vmatpush3.bf16.msra.mxu0 %v11061_v4 }
0x16a3   : > { %7840 = vmatprep.subr.bf16.mxu0 %v4479_v53 }
0x16a6   : > { %7841 = vmatpush3.bf16.msra.mxu0 %v4479_v53 }
0x16aa   : > { %v4432_v30 = vpop.xlane.xlu0 %4431 }
0x16ac   : > { %v4435_v7 = vpop.xlane.xlu1 %4434 }
0x16ad   : > { %8750 = vrcp.f32 %v4435_v7 }
0x16ae   : > { %v4426_v45 = vpop.xlane.xlu0 %4425 }
0x16af   : > { %8752 = vrcp.f32 %v4426_v45 }
0x16b0   : > { %8754 = vrcp.f32 %v4432_v30  ;;  %v4429_v19 = vpop.xlane.xlu1 %4428 }
0x16b1   : > { %8756 = vrcp.f32 %v4429_v19 }
0x16b2   : > { %v4444_v15 = vpop.xlane.xlu0 %4443 }
0x16b4   : > { %v4572_v37 = vpop.permute.xlu1 %4571 }
0x16b5   : > { %v4593_v2 = vsel %vm1151_vm0, %v4572_v37, 0 }
0x16b6   : > { %v4438_v46 = vpop.xlane.xlu0 %4437 }
0x16b7   : > { %v8751_v25 = vpop.eup %8750 }
0x16b8   : > { %v4459_v3 = vmul.f32 %v8751_v25, %v11036_v61  ;;  %v4574_v56 = vpop.permute.xlu1 %4573 }
0x16b9   : > { %v8753_v10 = vpop.eup %8752  ;;  %v4596_v19 = vsel %vm1151_vm0, %v4574_v56, 0 }
0x16ba   : > { %v8755_v38 = vpop.eup %8754  ;;  %v4456_v0 = vmul.f32 %v8753_v10, %v11041_v31 }
0x16bb   : > { %v8757_v63 = vpop.eup %8756  ;;  %v4458_v53 = vmul.f32 %v8755_v38, %v11030_v48 }
0x16bc   : > { %v4457_v4 = vmul.f32 %v8757_v63, %v11045_v17 }
0x16bd   : > { %v4465_v39 = vpack.c.bf16 %v4459_v3, %v4458_v53 }
0x16be   : > { %v4464_v5 = vpack.c.bf16 %v4457_v4, %v4456_v0 }
0x16c0   : > { %7842 = vmatprep.mubr.msk.bf16.mxu0 %vm1257_vm2, %v4464_v5 }
0x16c1   : > { %7843 = vmatmul.mubr.msk.bf16.vlgmr.msra.gmra.mrb[104].mxu0 %vm1257_vm2, %v4465_v39 }
0x16e9   : > { %v4447_v36 = vpop.xlane.xlu0 %4446 }
0x16ea   : > { %8758 = vrcp.f32 %v4447_v36 }
0x16eb   : > { %8760 = vrcp.f32 %v4438_v46 }
0x16ec   : > { %8762 = vrcp.f32 %v4444_v15 }
0x16ed   : > { %v4441_v61 = vpop.xlane.xlu1 %4440  ;;  %v4570_v31 = vpop.permute.xlu0 %4569 }
0x16ee   : > { %8764 = vrcp.f32 %v4441_v61  ;;  %7986 = vmatprep.subr.msk.bf16.mxu0 %vm1151_vm0, %v4570_v31  ;;  %v4590_v48 = vsel %vm1151_vm0, %v4570_v31, 0 }
0x16ef   : > { %7851 = vmatpush3.bf16.xpose.msra.mxu0 %v4590_v48 }
0x16f0   : > { %7987 = vmatprep.subr.msk.bf16.mxu0 %vm1151_vm0, %v4572_v37 }
0x16f1   : > { %v4562_v45 = vpop.permute.xlu0 %4561  ;;  %v4576_v25 = vpop.permute.xlu1 %4575 }
0x16f4   : > { %v8759_v17 = vpop.eup %8758 }
0x16f5   : > { %v8761_v24 = vpop.eup %8760  ;;  %v4463_v23 = vmul.f32 %v8759_v17, %v11065_v49  ;;  %v4564_v49 = vpop.permute.xlu1 %4563 }
0x16f6   : > { %v8763_v54 = vpop.eup %8762  ;;  %v4460_v22 = vmul.f32 %v8761_v24, %v11053_v40  ;;  %v4599_v40 = vsel %vm1151_vm0, %v4576_v25, 0 }
0x16f7   : > { %7853 = vmatpush3.bf16.xpose.msra.mxu0 %v4593_v2  ;;  %v4462_v44 = vmul.f32 %v8763_v54, %v11049_v51  ;;  %v4566_v51 = vpop.permute.xlu0 %4565 }
0x16f8   : > { %v8765_v52 = vpop.eup %8764  ;;  %7988 = vmatprep.subr.msk.bf16.mxu0 %vm1151_vm0, %v4574_v56 }
0x16f9   : > { %v4461_v28 = vmul.f32 %v8765_v52, %v11069_v20  ;;  %v4467_v7 = vpack.c.bf16 %v4463_v23, %v4462_v44  ;;  %v4568_v20 = vpop.permute.xlu1 %4567 }
0x16fb   : > { %v4466_v30 = vpack.c.bf16 %v4461_v28, %v4460_v22 }
0x16fd   : > { %7846 = vmatprep.mubr.msk.bf16.mxu0 %vm1257_vm2, %v4466_v30 }
0x16fe   : > { %7847 = vmatmul.mubr.msk.bf16.gmra.mrb[108].mxu0 %vm1257_vm2, %v4467_v7 }
0x16ff   : > { %7855 = vmatpush3.bf16.xpose.msra.mxu0 %v4596_v19  ;;  %7858 = vmatprep.mubr.msk.bf16.mxu0 %vm1151_vm0, %v4562_v45 }
0x1700   : > { %7989 = vmatprep.subr.msk.bf16.mxu0 %vm1151_vm0, %v4576_v25 }
0x1707   : > { %7857 = vmatpush3.bf16.xpose.msra.mxu0 %v4599_v40 }
0x170e   : > { %7859 = vmatmul.mubr.msk.bf16.vlgmr.msra.gmra.mrb[112].mxu0 %vm1151_vm0, %v4564_v49 }
0x170f   : > { %7862 = vmatprep.mubr.msk.bf16.mxu0 %vm1151_vm0, %v4566_v51 }
0x1716   : > { %7863 = vmatmul.mubr.msk.bf16.gmra.mrb[116].mxu0 %vm1151_vm0, %v4568_v20 }
0x176c   : > { %v11124_v10 = vpop.f32.mrb[96].mxu0 }
0x176d   : > { %v11126_v38 = vpop.f32.mrb[97].mxu0 }
0x176e   : > { %v11128_v63 = vpop.f32.mrb[98].mxu0 }
0x176f   : > { %v11130_v3 = vpop.f32.mrb[99].mxu0 }
0x1774   : > { %v11132_v0 = vpop.f32.mrb[100].mxu0 }
0x1775   : > { %v11134_v4 = vpop.f32.mrb[101].mxu0 }
0x1776   : > { %v11136_v53 = vpop.f32.mrb[102].mxu0 }
0x1777   : > { %v11138_v5 = vpop.f32.mrb[103].mxu0 }
0x1794   : > { %v11140_v39 = vpop.f32.mrb[104].mxu0 }
0x1795   : > { %v11142_v15 = vpop.f32.mrb[105].mxu0 }
0x1796   : > { %v11144_v37 = vpop.f32.mrb[106].mxu0 }
0x1797   : > { %v11148_v56 = vpop.f32.mrb[107].mxu0 }
0x17d1   : > { %v11152_v61 = vpop.f32.mrb[108].mxu0 }
0x17d2   : > { %v11154_v31 = vpop.f32.mrb[109].mxu0 }
0x17d3   : > { %v11156_v48 = vpop.f32.mrb[110].mxu0 }
0x17d4   : > { %v11160_v24 = vpop.f32.mrb[111].mxu0 }
0x17e1   : > { %v7860_v54 = vpop.f32.mrb[112].mxu0 }
0x17e2   : > { %v4668_v52 = vmul.f32 0.17677669, %v7860_v54  ;;  %v4635_v23 = vpop.f32.mrb[113].mxu0 }
0x17e3   : > { %v4666_v22 = vmul.f32 0.17677669, %v4635_v23  ;;  %v7861_v28 = vpop.f32.mrb[114].mxu0 }
0x17e4   : > { %v4676_v44 = vsel %vm9854_vm4, %v4668_v52, -1e+30  ;;  %v4638_v30 = vpop.f32.mrb[115].mxu0  ;;  %v4669_v25 = vmul.f32 0.17677669, %v7861_v28 }
0x17e5   : > { %v4667_v7 = vmul.f32 0.17677669, %v4638_v30  ;;  %v4688_v45 = vsel %vm1257_vm2, %v4676_v44, -inf  ;;  %v4674_v19 = vsel %vm9845_vm1, %v4666_v22, -1e+30 }
0x17e6   : > { %4689 = vmax.xlane.f32.xlu0 %v4688_v45  ;;  %v4682_v20 = vsel %vm1257_vm2, %v4674_v19, -inf  ;;  %v4677_v54 = vsel %vm9861_vm5, %v4669_v25, -1e+30 }
0x17e7   : > { %v4675_v40 = vsel %vm9850_vm3, %v4667_v7, -1e+30  ;;  %v4691_v22 = vsel %vm1257_vm2, %v4677_v54, -inf }
0x17e8   : > { %v4685_v49 = vsel %vm1257_vm2, %v4675_v40, -inf }
0x17e9   : > { %4686 = vmax.xlane.f32.xlu1 %v4685_v49  ;;  %v7864_v51 = vpop.f32.mrb[116].mxu0 }
0x17ea   : > { %v4672_v52 = vmul.f32 0.17677669, %v7864_v51  ;;  %4683 = vmax.xlane.f32.xlu0 %v4682_v20  ;;  %v4651_v23 = vpop.f32.mrb[117].mxu0 }
0x17eb   : > { %v7865_v30 = vpop.f32.mrb[118].mxu0  ;;  %v4670_v7 = vmul.f32 0.17677669, %v4651_v23 }
0x17ec   : > { %v4654_v2 = vpop.f32.mrb[119].mxu0  ;;  %v4680_v28 = vsel %vm9886_vm8, %v4672_v52, -1e+30  ;;  %v4673_v51 = vmul.f32 0.17677669, %v7865_v30 }
0x17ed   : > { %v4700_v45 = vsel %vm1257_vm2, %v4680_v28, -inf  ;;  %v4678_v49 = vsel %vm9876_vm6, %v4670_v7, -1e+30  ;;  %v4671_v52 = vmul.f32 0.17677669, %v4654_v2 }
0x17ee   : > { %4692 = vmax.xlane.f32.xlu0 %v4691_v22  ;;  %v4694_v25 = vsel %vm1257_vm2, %v4678_v49, -inf  ;;  %v11190_v20 = vsel %vm9893_vm9, %v4673_v51, -1e+30 }
0x17ef   : > { %v4703_v23 = vsel %vm1257_vm2, %v11190_v20, -inf  ;;  %v11196_v22 = vsel %vm9882_vm7, %v4671_v52, -1e+30 }
0x17f0   : > { %v4697_v7 = vsel %vm1257_vm2, %v11196_v22, -inf }
0x17f2   : > { %4701 = vmax.xlane.f32.xlu0 %v4700_v45 }
0x17f6   : > { %4695 = vmax.xlane.f32.xlu0 %v4694_v25 }
0x17fa   : > { %4776 = vrot.lane.b32.xlu1 %v10820_v14, %s9279_s22 }
0x17fe   : > { %4778 = vrot.lane.b32.xlu1 %v10854_v11, %s9279_s22 }
0x180c   : > { %4774 = vrot.lane.b32.xlu0 %v10824_v60, %s9279_s22 }
0x1822   : > { %4704 = vmax.xlane.f32.xlu1 %v4703_v23 }
0x1826   : > { %4698 = vmax.xlane.f32.xlu1 %v4697_v7 }
0x1837   : > { %4780 = vrot.lane.b32.xlu1 %v10850_v32, %s9279_s22 }
0x1873   : > { %v4690_v30 = vpop.xlane.xlu0 %4689 }
0x1874   : > { %v4708_v45 = vsub.f32 %v4676_v44, %v4690_v30 }
0x1876   : > { %v4718_v25 = vmul.f32 1.442695, %v4708_v45  ;;  %v4687_v51 = vpop.xlane.xlu1 %4686 }
0x1877   : > { %v4684_v2 = vpop.xlane.xlu0 %4683  ;;  %v4707_v46 = vsub.f32 %v4675_v40, %v4687_v51 }
0x1878   : > { %8766 = vpow2.f32 %v4718_v25  ;;  %v4706_v17 = vsub.f32 %v4674_v19, %v4684_v2 }
0x1879   : > { %v4716_v23 = vmul.f32 1.442695, %v4707_v46 }
0x187a   : > { %v4714_v36 = vmul.f32 1.442695, %v4706_v17 }
0x187b   : > { %v4693_v16 = vpop.xlane.xlu0 %4692 }
0x187c   : > { %8768 = vpow2.f32 %v4714_v36  ;;  %v4709_v52 = vsub.f32 %v4677_v54, %v4693_v16  ;;  %v4777_v16 = vpop.permute.xlu1 %4776 }
0x187e   : > { %v4720_v26 = vmul.f32 1.442695, %v4709_v52 }
0x187f   : > { %v4702_v43 = vpop.xlane.xlu0 %4701 }
0x1880   : > { %8770 = vpow2.f32 %v4720_v26  ;;  %v4712_v7 = vsub.f32 %v4680_v28, %v4702_v43 }
0x1881   : > { %8772 = vpow2.f32 %v4716_v23 }
0x1882   : > { %v11202_v62 = vpop.eup %8766  ;;  %v4726_v55 = vmul.f32 1.442695, %v4712_v7 }
0x1883   : > { %v4696_v44 = vpop.xlane.xlu0 %4695  ;;  %v4736_v30 = vsel %vm1257_vm2, %v11202_v62, 0.0 }
0x1884   : > { %8774 = vpow2.f32 %v4726_v55  ;;  %v4710_v19 = vsub.f32 %v4678_v49, %v4696_v44  ;;  %4737 = vadd.xlane.f32.xlu0 %v4736_v30  ;;  %v4779_v55 = vpop.permute.xlu1 %4778 }
0x1886   : > { %v11206_v17 = vpop.eup %8768  ;;  %v4722_v36 = vmul.f32 1.442695, %v4710_v19 }
0x1887   : > { %v4775_v46 = vpop.permute.xlu0 %4774  ;;  %v4730_v26 = vsel %vm1257_vm2, %v11206_v17, 0.0 }
0x1888   : > { %8776 = vpow2.f32 %v4722_v36  ;;  %4731 = vadd.xlane.f32.xlu0 %v4730_v26  ;;  %7866 = vmatprep.subr.bf16.mxu1 %v4775_v46 }
0x1889   : > { %7867 = vmatpush3.bf16.msra.mxu1 %v4775_v46 }
0x188a   : > { %v8771_v43 = vpop.eup %8770  ;;  %7868 = vmatprep.subr.bf16.mxu1 %v4777_v16 }
0x188b   : > { %v4739_v40 = vsel %vm1257_vm2, %v8771_v43, 0.0  ;;  %v8773_v54 = vpop.eup %8772 }
0x188c   : > { %4740 = vadd.xlane.f32.xlu1 %v4739_v40  ;;  %v4733_v49 = vsel %vm1257_vm2, %v8773_v54, 0.0 }
0x188d   : > { %7869 = vmatpush3.bf16.msra.mxu1 %v4777_v16 }
0x188e   : > { %v11211_v28 = vpop.eup %8774  ;;  %7870 = vmatprep.subr.bf16.mxu1 %v4779_v55 }
0x188f   : > { %v4748_v45 = vsel %vm1257_vm2, %v11211_v28, 0.0 }
0x1890   : > { %4734 = vadd.xlane.f32.xlu1 %v4733_v49  ;;  %4749 = vadd.xlane.f32.xlu0 %v4748_v45 }
0x1891   : > { %7871 = vmatpush3.bf16.msra.mxu1 %v4779_v55 }
0x1892   : > { %v11216_v25 = vpop.eup %8776 }
0x1893   : > { %v4742_v51 = vsel %vm1257_vm2, %v11216_v25, 0.0 }
0x1894   : > { %4743 = vadd.xlane.f32.xlu0 %v4742_v51 }
0x18a1   : > { %4873 = vrot.lane.b32.xlu1 %v10822_v1, %s9280_s29 }
0x18a5   : > { %4875 = vrot.lane.b32.xlu1 %v10838_v33, %s9280_s29 }
0x18af   : > { %v4705_v2 = vpop.xlane.xlu1 %4704 }
0x18b0   : > { %v4713_v52 = vsub.f32 %v11190_v20, %v4705_v2 }
0x18b2   : > { %v4728_v23 = vmul.f32 1.442695, %v4713_v52 }
0x18b3   : > { %v4699_v7 = vpop.xlane.xlu1 %4698 }
0x18b4   : > { %8778 = vpow2.f32 %v4728_v23  ;;  %v4711_v44 = vsub.f32 %v11196_v22, %v4699_v7 }
0x18b6   : > { %v4724_v30 = vmul.f32 1.442695, %v4711_v44 }
0x18b7   : > { %v4781_v19 = vpop.permute.xlu1 %4780 }
0x18b8   : > { %7872 = vmatprep.subr.bf16.mxu1 %v4781_v19  ;;  %8780 = vpow2.f32 %v4724_v30 }
0x18b9   : > { %7873 = vmatpush3.bf16.msra.mxu1 %v4781_v19 }
0x18be   : > { %v8779_v36 = vpop.eup %8778 }
0x18bf   : > { %v4751_v16 = vsel %vm1257_vm2, %v8779_v36, 0.0 }
0x18c0   : > { %4752 = vadd.xlane.f32.xlu0 %v4751_v16 }
0x18c2   : > { %v8781_v1 = vpop.eup %8780 }
0x18c3   : > { %v4745_v33 = vsel %vm1257_vm2, %v8781_v1, 0.0 }
0x18c9   : > { %4746 = vadd.xlane.f32.xlu1 %v4745_v33 }
0x18d6   : > { %4871 = vrot.lane.b32.xlu0 %v10806_v21, %s9280_s29 }
0x18da   : > { %4877 = vrot.lane.b32.xlu1 %v10852_v13, %s9280_s29  ;;  %4863 = vrot.lane.b32.xlu0 %v10804_v6, %s9280_s29 }
0x18de   : > { %4865 = vrot.lane.b32.xlu1 %v10818_v8, %s9280_s29  ;;  %4867 = vrot.lane.b32.xlu0 %v10835_v59, %s9280_s29 }
0x18e2   : > { %4869 = vrot.lane.b32.xlu1 %v10848_v58, %s9280_s29 }
0x1911   : > { %v4738_v20 = vpop.xlane.xlu0 %4737 }
0x1915   : > { %v4732_v22 = vpop.xlane.xlu0 %4731 }
0x1919   : > { %v4741_v46 = vpop.xlane.xlu1 %4740 }
0x191a   : > { %8782 = vrcp.f32 %v4741_v46 }
0x191b   : > { %8784 = vrcp.f32 %v4732_v22 }
0x191c   : > { %8786 = vrcp.f32 %v4738_v20 }
0x191d   : > { %v4735_v21 = vpop.xlane.xlu1 %4734  ;;  %v4750_v51 = vpop.xlane.xlu0 %4749 }
0x191e   : > { %8788 = vrcp.f32 %v4735_v21 }
0x1921   : > { %v4744_v2 = vpop.xlane.xlu0 %4743  ;;  %v4874_v52 = vpop.permute.xlu1 %4873 }
0x1924   : > { %v8783_v13 = vpop.eup %8782 }
0x1925   : > { %v8785_v26 = vpop.eup %8784  ;;  %v4765_v55 = vmul.f32 %v8783_v13, %v8771_v43  ;;  %v4876_v44 = vpop.permute.xlu1 %4875 }
0x1926   : > { %v8787_v6 = vpop.eup %8786  ;;  %v4762_v8 = vmul.f32 %v8785_v26, %v11206_v17  ;;  %v4895_v17 = vsel %vm1151_vm0, %v4874_v52, 0  ;;  %v4898_v20 = vsel %vm1151_vm0, %v4876_v44, 0 }
0x1927   : > { %v4764_v59 = vmul.f32 %v8787_v6, %v11202_v62 }
0x1928   : > { %v8789_v40 = vpop.eup %8788 }
0x1929   : > { %v4763_v49 = vmul.f32 %v8789_v40, %v8773_v54  ;;  %v4771_v58 = vpack.c.bf16 %v4765_v55, %v4764_v59 }
0x192b   : > { %v4770_v45 = vpack.c.bf16 %v4763_v49, %v4762_v8 }
0x192d   : > { %7874 = vmatprep.mubr.msk.bf16.mxu1 %vm1257_vm2, %v4770_v45 }
0x192e   : > { %7875 = vmatmul.mubr.msk.bf16.vlgmr.msra.gmra.mrb[104].mxu1 %vm1257_vm2, %v4771_v58 }
0x194d   : > { %v4753_v23 = vpop.xlane.xlu0 %4752 }
0x194e   : > { %8790 = vrcp.f32 %v4753_v23 }
0x194f   : > { %8792 = vrcp.f32 %v4744_v2 }
0x1950   : > { %8794 = vrcp.f32 %v4750_v51 }
0x1951   : > { %v4872_v7 = vpop.permute.xlu0 %4871 }
0x1952   : > { %v4892_v30 = vsel %vm1151_vm0, %v4872_v7, 0  ;;  %7990 = vmatprep.subr.msk.bf16.mxu1 %vm1151_vm0, %v4872_v7 }
0x1953   : > { %7883 = vmatpush3.bf16.xpose.msra.mxu1 %v4892_v30 }
0x1954   : > { %7991 = vmatprep.subr.msk.bf16.mxu1 %vm1151_vm0, %v4874_v52 }
0x1955   : > { %v4864_v40 = vpop.permute.xlu0 %4863 }
0x1956   : > { %v4747_v62 = vpop.xlane.xlu1 %4746 }
0x1957   : > { %8796 = vrcp.f32 %v4747_v62 }
0x1958   : > { %v8791_v43 = vpop.eup %8790 }
0x1959   : > { %v8793_v54 = vpop.eup %8792  ;;  %v4769_v33 = vmul.f32 %v8791_v43, %v8779_v36 }
0x195a   : > { %v8795_v19 = vpop.eup %8794  ;;  %v4766_v22 = vmul.f32 %v8793_v54, %v11216_v25  ;;  %v4878_v21 = vpop.permute.xlu1 %4877 }
0x195b   : > { %7885 = vmatpush3.bf16.xpose.msra.mxu1 %v4895_v17  ;;  %v4768_v13 = vmul.f32 %v8795_v19, %v11211_v28  ;;  %v4901_v36 = vsel %vm1151_vm0, %v4878_v21, 0 }
0x195c   : > { %7992 = vmatprep.subr.msk.bf16.mxu1 %vm1151_vm0, %v4876_v44 }
0x195d   : > { %v4773_v6 = vpack.c.bf16 %v4769_v33, %v4768_v13 }
0x195e   : > { %v4866_v25 = vpop.permute.xlu1 %4865 }
0x1961   : > { %v8797_v16 = vpop.eup %8796 }
0x1962   : > { %v4767_v46 = vmul.f32 %v8797_v16, %v8781_v1  ;;  %v4868_v1 = vpop.permute.xlu0 %4867  ;;  %v4870_v28 = vpop.permute.xlu1 %4869 }
0x1963   : > { %7887 = vmatpush3.bf16.xpose.msra.mxu1 %v4898_v20 }
0x1964   : > { %7993 = vmatprep.subr.msk.bf16.mxu1 %vm1151_vm0, %v4878_v21  ;;  %v4772_v26 = vpack.c.bf16 %v4767_v46, %v4766_v22 }
0x1966   : > { %7878 = vmatprep.mubr.msk.bf16.mxu1 %vm1257_vm2, %v4772_v26 }
0x1967   : > { %7879 = vmatmul.mubr.msk.bf16.gmra.mrb[108].mxu1 %vm1257_vm2, %v4773_v6 }
0x1968   : > { %7890 = vmatprep.mubr.msk.bf16.mxu1 %vm1151_vm0, %v4864_v40 }
0x196b   : > { %7889 = vmatpush3.bf16.xpose.msra.mxu1 %v4901_v36 }
0x1972   : > { %7891 = vmatmul.mubr.msk.bf16.vlgmr.msra.gmra.mrb[112].mxu1 %vm1151_vm0, %v4866_v25 }
0x1973   : > { %7894 = vmatprep.mubr.msk.bf16.mxu1 %vm1151_vm0, %v4868_v1 }
0x197a   : > { %7895 = vmatmul.mubr.msk.bf16.gmra.mrb[116].mxu1 %vm1151_vm0, %v4870_v28 }
0x197b   : > { %5799 = vmatprep.mubr.bf16.mxu1 %v12036_v18 }
0x1a01   : > { %v11261_v55 = vpop.f32.mrb[104].mxu1 }
0x1a02   : > { %v11263_v8 = vpop.f32.mrb[105].mxu1 }
0x1a03   : > { %v11265_v49 = vpop.f32.mrb[106].mxu1 }
0x1a04   : > { %v8233_v59 = vpack.i.bf16 %v11265_v49, %v11261_v55  ;;  %v11269_v45 = vpop.f32.mrb[107].mxu1 }
0x1a05   : > { %v8228_v58 = vpack.i.bf16 %v11269_v45, %v11263_v8 }
0x1a3a   : > { %v11273_v51 = vpop.f32.mrb[108].mxu1 }
0x1a3b   : > { %v11275_v2 = vpop.f32.mrb[109].mxu1 }
0x1a3c   : > { %v11277_v52 = vpop.f32.mrb[110].mxu1 }
0x1a3d   : > { %v8263_v23 = vpack.i.bf16 %v11277_v52, %v11273_v51  ;;  %v11281_v7 = vpop.f32.mrb[111].mxu1 }
0x1a3e   : > { %v8258_v44 = vpack.i.bf16 %v11281_v7, %v11275_v2 }
0x1a45   : > { %v7892_v30 = vpop.f32.mrb[112].mxu1 }
0x1a46   : > { %v4937_v62 = vpop.f32.mrb[113].mxu1  ;;  %v4970_v17 = vmul.f32 0.17677669, %v7892_v30 }
0x1a47   : > { %v4968_v43 = vmul.f32 0.17677669, %v4937_v62  ;;  %v7893_v54 = vpop.f32.mrb[114].mxu1 }
0x1a48   : > { %v4940_v19 = vpop.f32.mrb[115].mxu1  ;;  %v4978_v22 = vsel %vm9854_vm4, %v4970_v17, -1e+30  ;;  %v4971_v46 = vmul.f32 0.17677669, %v7893_v54 }
0x1a49   : > { %v4976_v16 = vsel %vm9845_vm1, %v4968_v43, -1e+30  ;;  %v4969_v33 = vmul.f32 0.17677669, %v4940_v19  ;;  %v4990_v40 = vsel %vm1257_vm2, %v4978_v22, -inf }
0x1a4a   : > { %v4984_v20 = vsel %vm1257_vm2, %v4976_v16, -inf  ;;  %v4979_v27 = vsel %vm9861_vm5, %v4971_v46, -1e+30 }
0x1a4b   : > { %v4977_v21 = vsel %vm9850_vm3, %v4969_v33, -1e+30  ;;  %4985 = vmax.xlane.f32.xlu0 %v4984_v20  ;;  %v4993_v50 = vsel %vm1257_vm2, %v4979_v27, -inf }
0x1a4c   : > { %v4987_v13 = vsel %vm1257_vm2, %v4977_v21, -inf }
0x1a4d   : > { %4988 = vmax.xlane.f32.xlu1 %v4987_v13  ;;  %v7896_v26 = vpop.f32.mrb[116].mxu1 }
0x1a4e   : > { %v4953_v6 = vpop.f32.mrb[117].mxu1  ;;  %v4974_v30 = vmul.f32 0.17677669, %v7896_v26 }
0x1a4f   : > { %v4972_v36 = vmul.f32 0.17677669, %v4953_v6  ;;  %4991 = vmax.xlane.f32.xlu0 %v4990_v40  ;;  %v7897_v25 = vpop.f32.mrb[118].mxu1 }
0x1a50   : > { %v4956_v35 = vpop.f32.mrb[119].mxu1  ;;  %v4975_v1 = vmul.f32 0.17677669, %v7897_v25  ;;  %v4982_v19 = vsel %vm9886_vm8, %v4974_v30, -1e+30 }
0x1a51   : > { %v4973_v28 = vmul.f32 0.17677669, %v4956_v35  ;;  %v4980_v62 = vsel %vm9876_vm6, %v4972_v36, -1e+30  ;;  %v5002_v42 = vsel %vm1257_vm2, %v4982_v19, -inf }
0x1a52   : > { %v4983_v41 = vsel %vm9893_vm9, %v4975_v1, -1e+30  ;;  %v4996_v54 = vsel %vm1257_vm2, %v4980_v62, -inf }
0x1a53   : > { %v4981_v17 = vsel %vm9882_vm7, %v4973_v28, -1e+30  ;;  %4994 = vmax.xlane.f32.xlu0 %v4993_v50  ;;  %v5005_v33 = vsel %vm1257_vm2, %v4983_v41, -inf }
0x1a54   : > { %v4999_v43 = vsel %vm1257_vm2, %v4981_v17, -inf }
0x1a55   : > { %5000 = vmax.xlane.f32.xlu1 %v4999_v43 }
0x1a57   : > { %4997 = vmax.xlane.f32.xlu0 %v4996_v54 }
0x1a59   : > { %5006 = vmax.xlane.f32.xlu1 %v5005_v33 }
0x1a5b   : > { %5003 = vmax.xlane.f32.xlu0 %v5002_v42 }
0x1a71   : > { %5076 = vrot.lane.b32.xlu0 %v10824_v60, %s9280_s29 }
0x1ad8   : > { %v4986_v9 = vpop.xlane.xlu0 %4985 }
0x1ad9   : > { %v5008_v20 = vsub.f32 %v4976_v16, %v4986_v9 }
0x1ada   : > { %v4989_v34 = vpop.xlane.xlu1 %4988 }
0x1adb   : > { %v5016_v26 = vmul.f32 1.442695, %v5008_v20  ;;  %v5009_v6 = vsub.f32 %v4977_v21, %v4989_v34 }
0x1adc   : > { %v4992_v46 = vpop.xlane.xlu0 %4991 }
0x1add   : > { %v5010_v13 = vsub.f32 %v4978_v22, %v4992_v46  ;;  %v5018_v35 = vmul.f32 1.442695, %v5009_v6 }
0x1adf   : > { %v5020_v40 = vmul.f32 1.442695, %v5010_v13 }
0x1ae0   : > { %v4995_v12 = vpop.xlane.xlu0 %4994 }
0x1ae1   : > { %8798 = vpow2.f32 %v5020_v40  ;;  %v5011_v36 = vsub.f32 %v4979_v27, %v4995_v12 }
0x1ae2   : > { %v5001_v25 = vpop.xlane.xlu1 %5000  ;;  %8800 = vpow2.f32 %v5016_v26 }
0x1ae3   : > { %v5022_v1 = vmul.f32 1.442695, %v5011_v36 }
0x1ae4   : > { %v4998_v28 = vpop.xlane.xlu0 %4997 }
0x1ae5   : > { %8802 = vpow2.f32 %v5022_v1  ;;  %v5012_v50 = vsub.f32 %v4980_v62, %v4998_v28  ;;  %v5013_v62 = vsub.f32 %v4981_v17, %v5001_v25  ;;  %v12056_v1 = vpack.i.bf16 %v11148_v56, %v11142_v15 }
0x1ae6   : > { %8804 = vpow2.f32 %v5018_v35  ;;  %v5007_v60 = vpop.xlane.xlu1 %5006 }
0x1ae7   : > { %v5024_v22 = vmul.f32 1.442695, %v5012_v50  ;;  %v5015_v54 = vsub.f32 %v4983_v41, %v5007_v60  ;;  %v5026_v46 = vmul.f32 1.442695, %v5013_v62 }
0x1ae8   : > { %v5004_v30 = vpop.xlane.xlu0 %5003 }
0x1ae9   : > { %v5014_v16 = vsub.f32 %v4982_v19, %v5004_v30  ;;  %v5030_v20 = vmul.f32 1.442695, %v5015_v54 }
0x1aeb   : > { %v11311_v43 = vpop.eup %8798  ;;  %v5028_v21 = vmul.f32 1.442695, %v5014_v16 }
0x1aec   : > { %v5077_v33 = vpop.permute.xlu0 %5076  ;;  %v5038_v27 = vsel %vm1257_vm2, %v11311_v43, 0.0  ;;  %v8801_v42 = vpop.eup %8800 }
0x1aed   : > { %8806 = vpow2.f32 %v5028_v21  ;;  %5039 = vadd.xlane.f32.xlu0 %v5038_v27  ;;  %7898 = vmatprep.subr.bf16.mxu0 %v5077_v33  ;;  %v5032_v19 = vsel %vm1257_vm2, %v8801_v42, 0.0 }
0x1aee   : > { %7899 = vmatpush3.bf16.msra.mxu0 %v5077_v33  ;;  %8808 = vpow2.f32 %v5024_v22 }
0x1aef   : > { %v11315_v9 = vpop.eup %8802  ;;  %8810 = vpow2.f32 %v5030_v20 }
0x1af0   : > { %v5041_v41 = vsel %vm1257_vm2, %v11315_v9, 0.0  ;;  %v8805_v34 = vpop.eup %8804  ;;  %8812 = vpow2.f32 %v5026_v46 }
0x1af1   : > { %5033 = vadd.xlane.f32.xlu0 %v5032_v19  ;;  %5042 = vadd.xlane.f32.xlu1 %v5041_v41  ;;  %v5035_v13 = vsel %vm1257_vm2, %v8805_v34, 0.0 }
0x1af5   : > { %5036 = vadd.xlane.f32.xlu1 %v5035_v13 }
0x1af7   : > { %v11321_v26 = vpop.eup %8806 }
0x1af8   : > { %v5050_v17 = vsel %vm1257_vm2, %v11321_v26, 0.0  ;;  %v8809_v6 = vpop.eup %8808 }
0x1af9   : > { %5051 = vadd.xlane.f32.xlu1 %v5050_v17  ;;  %v5044_v40 = vsel %vm1257_vm2, %v8809_v6, 0.0  ;;  %v8811_v12 = vpop.eup %8810 }
0x1afa   : > { %v5053_v36 = vsel %vm1257_vm2, %v8811_v12, 0.0  ;;  %v8813_v25 = vpop.eup %8812 }
0x1afb   : > { %v5047_v35 = vsel %vm1257_vm2, %v8813_v25, 0.0 }
0x1afd   : > { %5045 = vadd.xlane.f32.xlu1 %v5044_v40  ;;  %v8434_v40 = vld [vmem:[%s11925_s5 + $0x60] sm:$0xff]  }
0x1b01   : > { %5054 = vadd.xlane.f32.xlu1 %v5053_v36  ;;  %v8436_v36 = vld [vmem:[%s11925_s5 + $0x70] sm:$0xff]  }
0x1b05   : > { %5048 = vadd.xlane.f32.xlu1 %v5047_v35 }
0x1b07   : > { %5080 = vrot.lane.b32.xlu0 %v10854_v11, %s9280_s29  ;;  %v12057_v11 = vpack.i.bf16 %v11144_v37, %v11140_v39 }
0x1b0b   : > { %5082 = vrot.lane.b32.xlu0 %v10850_v32, %s9280_s29 }
0x1b0f   : > { %8219 = vrot.lane.b32.xlu0 %v12056_v1, %s9280_s29 }
0x1b13   : > { %8229 = vrot.lane.b32.xlu0 %v8228_v58, %s9279_s22 }
0x1b16   : > { %5078 = vrot.lane.b32.xlu1 %v10820_v14, %s9280_s29 }
0x1b1a   : > { %8224 = vrot.lane.b32.xlu1 %v12057_v11, %s9280_s29 }
0x1b1e   : > { %8234 = vrot.lane.b32.xlu1 %v8233_v59, %s9279_s22 }
0x1b7a   : > { %v5040_v32 = vpop.xlane.xlu0 %5039 }
0x1b7e   : > { %v5043_v15 = vpop.xlane.xlu1 %5042  ;;  %v5034_v56 = vpop.xlane.xlu0 %5033 }
0x1b7f   : > { %8814 = vrcp.f32 %v5034_v56 }
0x1b82   : > { %v5037_v28 = vpop.xlane.xlu1 %5036  ;;  %v5081_v55 = vpop.permute.xlu0 %5080 }
0x1b83   : > { %8816 = vrcp.f32 %v5037_v28 }
0x1b84   : > { %8818 = vrcp.f32 %v5043_v15 }
0x1b85   : > { %8820 = vrcp.f32 %v5040_v32 }
0x1b86   : > { %v5052_v8 = vpop.xlane.xlu1 %5051  ;;  %v5083_v54 = vpop.permute.xlu0 %5082 }
0x1b89   : > { %v8815_v58 = vpop.eup %8814 }
0x1b8a   : > { %v5046_v45 = vpop.xlane.xlu1 %5045  ;;  %v5064_v60 = vmul.f32 %v8815_v58, %v8801_v42  ;;  %v12059_v58 = vpack.i.bf16 %v11160_v24, %v11154_v31  ;;  %v8220_v31 = vpop.permute.xlu0 %8219 }
0x1b8b   : > { %8822 = vrcp.f32 %v5046_v45  ;;  %v8222_v24 = vunpack.i.h.bf16 %v8220_v31 }
0x1b8d   : > { %v8817_v14 = vpop.eup %8816  ;;  %v5262_v2 = vsel %vm1151_vm0, %v11130_v3, %v8222_v24 }
0x1b8e   : > { %v5055_v50 = vpop.xlane.xlu1 %5054  ;;  %v5065_v30 = vmul.f32 %v8817_v14, %v8805_v34  ;;  %v8819_v59 = vpop.eup %8818 }
0x1b8f   : > { %v8821_v16 = vpop.eup %8820  ;;  %v5067_v33 = vmul.f32 %v8819_v59, %v11315_v9  ;;  %v8431_v9 = vld [vmem:[%s11925_s5 + $0x48] sm:$0xff]  }
0x1b90   : > { %v5072_v39 = vpack.c.bf16 %v5065_v30, %v5064_v60  ;;  %v5066_v42 = vmul.f32 %v8821_v16, %v11311_v43  ;;  %v8430_v43 = vld [vmem:[%s11925_s5 + $0x40] sm:$0xff]  }
0x1b92   : > { %v5049_v37 = vpop.xlane.xlu1 %5048  ;;  %7906 = vmatprep.mubr.msk.bf16.mxu0 %vm1257_vm2, %v5072_v39  ;;  %v5073_v20 = vpack.c.bf16 %v5067_v33, %v5066_v42  ;;  %v8221_v39 = vunpack.i.l.bf16 %v8220_v31 }
0x1b93   : > { %8824 = vrcp.f32 %v5049_v37  ;;  %v8230_v37 = vpop.permute.xlu0 %8229 }
0x1b94   : > { %8826 = vrcp.f32 %v5055_v50  ;;  %v8232_v52 = vunpack.i.h.bf16 %v8230_v37  ;;  %v5261_v7 = vsel %vm1151_vm0, %v11126_v38, %v8221_v39 }
0x1b95   : > { %8828 = vrcp.f32 %v5052_v8  ;;  %v8823_v22 = vpop.eup %8822  ;;  %v12058_v8 = vpack.i.bf16 %v11156_v48, %v11152_v61 }
0x1b96   : > { %v5079_v49 = vpop.permute.xlu1 %5078  ;;  %v5068_v62 = vmul.f32 %v8823_v22, %v8809_v6  ;;  %v8432_v6 = vld [vmem:[%s11925_s5 + $0x50] sm:$0xff]   ;;  %v5270_v38 = vsel %vm1257_vm2, %v5262_v2, %v8232_v52 }
0x1b97   : > { %7900 = vmatprep.subr.bf16.mxu0 %v5079_v49 }
0x1b98   : > { %7901 = vmatpush3.bf16.msra.mxu0 %v5079_v49 }
0x1b99   : > { %7902 = vmatprep.subr.bf16.mxu0 %v5081_v55 }
0x1b9a   : > { %v8225_v61 = vpop.permute.xlu1 %8224 }
0x1b9b   : > { %v8226_v49 = vunpack.i.l.bf16 %v8225_v61 }
0x1b9c   : > { %7903 = vmatpush3.bf16.msra.mxu0 %v5081_v55  ;;  %v8227_v55 = vunpack.i.h.bf16 %v8225_v61 }
0x1b9d   : > { %v8825_v21 = vpop.eup %8824  ;;  %7904 = vmatprep.subr.bf16.mxu0 %v5083_v54  ;;  %v5263_v22 = vsel %vm1151_vm0, %v11124_v10, %v8226_v49 }
0x1b9e   : > { %v5069_v27 = vmul.f32 %v8825_v21, %v8813_v25  ;;  %v8827_v19 = vpop.eup %8826  ;;  %v8437_v25 = vld [vmem:[%s11925_s5 + $0x78] sm:$0xff]   ;;  %v8235_v48 = vpop.permute.xlu1 %8234  ;;  %v5264_v16 = vsel %vm1151_vm0, %v11128_v63, %v8227_v55 }
0x1b9f   : > { %v8829_v34 = vpop.eup %8828  ;;  %v5071_v46 = vmul.f32 %v8827_v19, %v8811_v12  ;;  %v8435_v12 = vld [vmem:[%s11925_s5 + $0x68] sm:$0xff]   ;;  %v8237_v59 = vunpack.i.h.bf16 %v8235_v48  ;;  %v8236_v51 = vunpack.i.l.bf16 %v8235_v48 }
0x1ba0   : > { %7905 = vmatpush3.bf16.msra.mxu0 %v5083_v54  ;;  %v5074_v41 = vpack.c.bf16 %v5069_v27, %v5068_v62  ;;  %v5070_v13 = vmul.f32 %v8829_v34, %v11321_v26  ;;  %v8433_v26 = vld [vmem:[%s11925_s5 + $0x58] sm:$0xff]  }
0x1ba1   : > { %7914 = vmatprep.subr.bf16.mxu0 %v8430_v43  ;;  %v5271_v27 = vsel %vm1257_vm2, %v5263_v22, %v8236_v51  ;;  %v5272_v42 = vsel %vm1257_vm2, %v5264_v16, %v8237_v59 }
0x1ba2   : > { %v5075_v17 = vpack.c.bf16 %v5071_v46, %v5070_v13 }
0x1ba3   : > { %7907 = vmatmul.mubr.msk.bf16.vlgmr.msra.gmra.mrb[120].mxu0 %vm1257_vm2, %v5073_v20 }
0x1ba4   : > { %7910 = vmatprep.mubr.msk.bf16.mxu0 %vm1257_vm2, %v5074_v41  ;;  %7915 = vmatpush3.bf16.msra.mxu0 %v8430_v43 }
0x1ba5   : > { %7916 = vmatprep.subr.bf16.mxu0 %v8431_v9 }
0x1ba8   : > { %7917 = vmatpush3.bf16.msra.mxu0 %v8431_v9 }
0x1ba9   : > { %7918 = vmatprep.subr.bf16.mxu0 %v8432_v6 }
0x1bab   : > { %7911 = vmatmul.mubr.msk.bf16.gmra.mrb[124].mxu0 %vm1257_vm2, %v5075_v17 }
0x1bac   : > { %7919 = vmatpush3.bf16.msra.mxu0 %v8432_v6 }
0x1bad   : > { %7920 = vmatprep.subr.bf16.mxu0 %v8433_v26 }
0x1bb0   : > { %7921 = vmatpush3.bf16.msra.mxu0 %v8433_v26 }
0x1bb1   : > { %7922 = vmatprep.subr.bf16.mxu0 %v8434_v40 }
0x1bb4   : > { %7923 = vmatpush3.bf16.msra.mxu0 %v8434_v40 }
0x1bb5   : > { %7924 = vmatprep.subr.bf16.mxu0 %v8435_v12 }
0x1bb8   : > { %7925 = vmatpush3.bf16.msra.mxu0 %v8435_v12 }
0x1bb9   : > { %7926 = vmatprep.subr.bf16.mxu0 %v8436_v36 }
0x1bbc   : > { %7927 = vmatpush3.bf16.msra.mxu0 %v8436_v36 }
0x1bbd   : > { %7928 = vmatprep.subr.bf16.mxu0 %v8437_v25 }
0x1bc0   : > { %7929 = vmatpush3.bf16.msra.mxu0 %v8437_v25 }
0x1c76   : > { %v7908_v35 = vpop.f32.mrb[120].mxu0 }
0x1c77   : > { %v5134_v1 = vpop.f32.mrb[121].mxu0 }
0x1c78   : > { %v7909_v11 = vpop.f32.mrb[122].mxu0 }
0x1c79   : > { %v8243_v32 = vpack.i.bf16 %v7909_v11, %v7908_v35  ;;  %v5137_v15 = vpop.f32.mrb[123].mxu0 }
0x1c7a   : > { %v8238_v56 = vpack.i.bf16 %v5137_v15, %v5134_v1 }
0x1c7b   : > { %8244 = vrot.lane.b32.xlu1 %v8243_v32, %s9278_s0 }
0x1c7c   : > { %8239 = vrot.lane.b32.xlu0 %v8238_v56, %s9278_s0 }
0x1c7e   : > { %v7912_v28 = vpop.f32.mrb[124].mxu0 }
0x1c7f   : > { %8254 = vrot.lane.b32.xlu1 %v12058_v8, %s9280_s29  ;;  %v5150_v45 = vpop.f32.mrb[125].mxu0 }
0x1c80   : > { %8249 = vrot.lane.b32.xlu0 %v12059_v58, %s9280_s29  ;;  %v7913_v14 = vpop.f32.mrb[126].mxu0 }
0x1c81   : > { %v8273_v50 = vpack.i.bf16 %v7913_v14, %v7912_v28  ;;  %v5153_v60 = vpop.f32.mrb[127].mxu0 }
0x1c82   : > { %v8268_v30 = vpack.i.bf16 %v5153_v60, %v5150_v45 }
0x1c83   : > { %8264 = vrot.lane.b32.xlu1 %v8263_v23, %s9279_s22  ;;  %v8231_v23 = vunpack.i.l.bf16 %v8230_v37 }
0x1c84   : > { %8259 = vrot.lane.b32.xlu0 %v8258_v44, %s9279_s22 }
0x1c85   : > { %v5269_v3 = vsel %vm1257_vm2, %v5261_v7, %v8231_v23  ;;  %v12060_v23 = vld [vmem:[#allocation36_spill] sm:$0xff] }
0x1c87   : > { %8274 = vrot.lane.b32.xlu1 %v8273_v50, %s9278_s0 }
0x1c88   : > { %8269 = vrot.lane.b32.xlu0 %v8268_v30, %s9278_s0  ;;  %s7237_s0 = sshll.u32 %s9390_s25, 10  ;;  %s11879_s25 = scalar_lea.sflag [#allocation4], %s666_s18 }
0x1c89   : > { %s11875_s21 = scalar_lea.hbm %s12073_s23, %s7237_s0 }
0x1ced   : > { %v8245_v44 = vpop.permute.xlu1 %8244 }
0x1cee   : > { %v8247_v54 = vunpack.i.h.bf16 %v8245_v44  ;;  %v8246_v21 = vunpack.i.l.bf16 %v8245_v44  ;;  %v8240_v33 = vpop.permute.xlu0 %8239  ;;  %v12061_v44 = vld [vmem:[#allocation37_spill] sm:$0xff] }
0x1cef   : > { %v8242_v62 = vunpack.i.h.bf16 %v8240_v33  ;;  %v8241_v20 = vunpack.i.l.bf16 %v8240_v33 }
0x1cf0   : > { %v5280_v19 = vsel %vm2457_vm10, %v5272_v42, %v8247_v54  ;;  %v5279_v63 = vsel %vm2457_vm10, %v5271_v27, %v8246_v21  ;;  %v12062_v54 = vld [vmem:[#allocation38_spill] sm:$0xff] }
0x1cf1   : > { %v5303_v41 = vpack.c.bf16 %v5280_v19, %v5279_v63  ;;  %v8255_v34 = vpop.permute.xlu1 %8254  ;;  %v5277_v10 = vsel %vm2457_vm10, %v5269_v3, %v8241_v20  ;;  %v5278_v46 = vsel %vm2457_vm10, %v5270_v38, %v8242_v62  ;;  %v12064_v27 = vld [vmem:[#allocation42_spill] sm:$0xff]  ;;  %v8438_v62 = vld [vmem:[%s11928_s8 + $0x100] ss:$16 sps:$4 sm:$0xff]   ;;  %v8440_v20 = vld [vmem:[%s11928_s8 + $0x104] ss:$16 sps:$4 sm:$0xff]  }
0x1cf2   : > { %v8250_v13 = vpop.permute.xlu0 %8249  ;;  %v5302_v17 = vpack.c.bf16 %v5278_v46, %v5277_v10  ;;  %v8257_v43 = vunpack.i.h.bf16 %v8255_v34  ;;  %v8256_v9 = vunpack.i.l.bf16 %v8255_v34  ;;  %v8441_v3 = vld [vmem:[%s11928_s8 + $0x108] ss:$16 sps:$4 sm:$0xff]   ;;  %v8443_v38 = vld [vmem:[%s11928_s8 + $0x10c] ss:$16 sps:$4 sm:$0xff]   ;;  %v8446_v19 = vld [vmem:[%s11928_s8 + $0x124] ss:$16 sps:$4 sm:$0xff]   ;;  %5767 = vmatprep.subr.bf16.mxu1 %v8440_v20 }
0x1cf3   : > { %v8252_v26 = vunpack.i.h.bf16 %v8250_v13  ;;  %v8251_v40 = vunpack.i.l.bf16 %v8250_v13  ;;  %v8449_v63 = vld [vmem:[%s11928_s8 + $0x12c] ss:$16 sps:$4 sm:$0xff]   ;;  %5840 = vmatprep.subr.bf16.mxu0 %v8443_v38  ;;  %5768 = vmatpush1.bf16.msra.mxu1 %v8438_v62  ;;  %v8447_v34 = vld [vmem:[%s11928_s8 + $0x128] ss:$16 sps:$4 sm:$0xff]   ;;  %v8476_v20 = vld [vmem:[%s11928_s8 + $0x1c4] ss:$16 sps:$4 sm:$0xff]  }
0x1cf4   : > { %7930 = vmatprep.mubr.bf16.mxu0 %v5302_v17  ;;  %v5268_v11 = vsel %vm1151_vm0, %v11136_v53, %v8257_v43  ;;  %v5267_v32 = vsel %vm1151_vm0, %v11132_v0, %v8256_v9  ;;  %5769 = vmatprep.subr.bf16.mxu1 %v8446_v19  ;;  %v8471_v62 = vld [vmem:[%s11928_s8 + $0x1a8] ss:$16 sps:$4 sm:$0xff]   ;;  %v8474_v38 = vld [vmem:[%s11928_s8 + $0x1c0] ss:$16 sps:$4 sm:$0xff]  }
0x1cf5   : > { %v8265_v6 = vpop.permute.xlu1 %8264  ;;  %7931 = vmatmul.mubr.bf16.vlgmr.msra.gmra.mrb[128].mxu0 %v5303_v41  ;;  %v5266_v56 = vsel %vm1151_vm0, %v11138_v5, %v8252_v26  ;;  %v5265_v28 = vsel %vm1151_vm0, %v11134_v4, %v8251_v40  ;;  %v8444_v41 = vld [vmem:[%s11928_s8 + $0x120] ss:$16 sps:$4 sm:$0xff]   ;;  %v8477_v19 = vld [vmem:[%s11928_s8 + $0x1c8] ss:$16 sps:$4 sm:$0xff]  }
0x1cf6   : > { %v8260_v12 = vpop.permute.xlu0 %8259  ;;  %v8267_v36 = vunpack.i.h.bf16 %v8265_v6  ;;  %v8266_v25 = vunpack.i.l.bf16 %v8265_v6  ;;  %5841 = vmatpush1.bf16.msra.mxu0 %v8441_v3  ;;  %v8479_v3 = vld [vmem:[%s11928_s8 + $0x1cc] ss:$16 sps:$4 sm:$0xff]  }
0x1cf7   : > { %v8262_v35 = vunpack.i.h.bf16 %v8260_v12  ;;  %v8261_v1 = vunpack.i.l.bf16 %v8260_v12  ;;  %5842 = vmatprep.subr.bf16.mxu0 %v8449_v63  ;;  %5770 = vmatpush1.bf16.msra.mxu1 %v8444_v41  ;;  %v8482_v63 = vld [vmem:[%s11928_s8 + $0x1e4] ss:$16 sps:$4 sm:$0xff]   ;;  %v8485_v41 = vld [vmem:[%s11928_s8 + $0x1ec] ss:$16 sps:$4 sm:$0xff]  }
0x1cf8   : > { %v5275_v14 = vsel %vm1257_vm2, %v5267_v32, %v8266_v25  ;;  %v5276_v50 = vsel %vm1257_vm2, %v5268_v11, %v8267_v36 }
0x1cf9   : > { %v8275_v15 = vpop.permute.xlu1 %8274  ;;  %v5273_v53 = vsel %vm1257_vm2, %v5265_v28, %v8261_v1  ;;  %v5274_v0 = vsel %vm1257_vm2, %v5266_v56, %v8262_v35 }
0x1cfa   : > { %v8277_v8 = vunpack.i.h.bf16 %v8275_v15  ;;  %v8276_v45 = vunpack.i.l.bf16 %v8275_v15  ;;  %v8270_v58 = vpop.permute.xlu0 %8269  ;;  %5843 = vmatpush1.bf16.msra.mxu0 %v8447_v34  ;;  %v8480_v34 = vld [vmem:[%s11928_s8 + $0x1e0] ss:$16 sps:$4 sm:$0xff]  }
0x1cfb   : > { %v8272_v60 = vunpack.i.h.bf16 %v8270_v58  ;;  %v8271_v30 = vunpack.i.l.bf16 %v8270_v58 }
0x1cfc   : > { %v5283_v61 = vsel %vm2457_vm10, %v5275_v14, %v8276_v45  ;;  %v5284_v5 = vsel %vm2457_vm10, %v5276_v50, %v8277_v8 }
0x1cfd   : > { %v5281_v31 = vsel %vm2457_vm10, %v5273_v53, %v8271_v30  ;;  %v5282_v4 = vsel %vm2457_vm10, %v5274_v0, %v8272_v60  ;;  %v5305_v48 = vpack.c.bf16 %v5284_v5, %v5283_v61 }
0x1cfe   : > { %v5304_v24 = vpack.c.bf16 %v5282_v4, %v5281_v31  ;;  %v8452_v4 = vld [vmem:[%s11928_s8 + $0x144] ss:$16 sps:$4 sm:$0xff]  }
0x1cff   : > { %5771 = vmatprep.subr.bf16.mxu1 %v8452_v4 }
0x1d00   : > { %7934 = vmatprep.mubr.bf16.mxu0 %v5304_v24  ;;  %v8450_v24 = vld [vmem:[%s11928_s8 + $0x140] ss:$16 sps:$4 sm:$0xff]  }
0x1d01   : > { %7935 = vmatmul.mubr.bf16.gmra.mrb[132].mxu0 %v5305_v48  ;;  %v8455_v48 = vld [vmem:[%s11928_s8 + $0x14c] ss:$16 sps:$4 sm:$0xff]   ;;  %5772 = vmatpush1.bf16.msra.mxu1 %v8450_v24 }
0x1d02   : > { %5872 = vmatprep.mubr.bf16.mxu0 %v12036_v18  ;;  %5844 = vmatprep.subr.bf16.mxu0 %v8455_v48 }
0x1dc8   : > { %v7932_v39 = vpop.f32.mrb[128].mxu0 }
0x1dc9   : > { %v5388_v37 = vpop.f32.mrb[129].mxu0  ;;  %v11442_v52 = vadd.f32 %v7932_v39, %v10726_v29  ;;  %v12063_v29 = vld [vmem:[#allocation39_spill] sm:$0xff]  ;;  %v8453_v39 = vld [vmem:[%s11928_s8 + $0x148] ss:$16 sps:$4 sm:$0xff]  }
0x1dca   : > { %v11435_v55 = vadd.f32 %v5388_v37, %v10716_v47  ;;  %v7933_v49 = vpop.f32.mrb[130].mxu0  ;;  %5845 = vmatpush1.bf16.msra.mxu0 %v8453_v39 }
0x1dcb   : > { %v5391_v59 = vpop.f32.mrb[131].mxu0  ;;  %v11447_v2 = vadd.f32 %v7933_v49, %v12060_v23  ;;  %v8458_v49 = vld [vmem:[%s11928_s8 + $0x164] ss:$16 sps:$4 sm:$0xff]   ;;  %v8456_v23 = vld [vmem:[%s11928_s8 + $0x160] ss:$16 sps:$4 sm:$0xff]  }
0x1dcc   : > { %v11438_v51 = vadd.f32 %v5391_v59, %v10720_v57  ;;  %5431 = vadd.xlane.f32.xlu0 %v11435_v55  ;;  %v8461_v59 = vld [vmem:[%s11928_s8 + $0x16c] ss:$16 sps:$4 sm:$0xff]   ;;  %5773 = vmatprep.subr.bf16.mxu1 %v8458_v49 }
0x1dcd   : > { %5846 = vmatprep.subr.bf16.mxu0 %v8461_v59  ;;  %5774 = vmatpush1.bf16.msra.mxu1 %v8456_v23 }
0x1dce   : > { %5433 = vadd.xlane.f32.xlu1 %v11438_v51 }
0x1dd0   : > { %5435 = vadd.xlane.f32.xlu0 %v11442_v52 }
0x1dd4   : > { %5437 = vadd.xlane.f32.xlu0 %v11447_v2  ;;  %v7936_v47 = vpop.f32.mrb[132].mxu0 }
0x1dd5   : > { %v5404_v7 = vpop.f32.mrb[133].mxu0  ;;  %v11458_v33 = vadd.f32 %v7936_v47, %v12063_v29  ;;  %v8459_v47 = vld [vmem:[%s11928_s8 + $0x168] ss:$16 sps:$4 sm:$0xff]   ;;  %v8473_v29 = vld [vmem:[%s11928_s8 + $0x1ac] ss:$16 sps:$4 sm:$0xff]  }
0x1dd6   : > { %v11451_v16 = vadd.f32 %v5404_v7, %v12061_v44  ;;  %v7937_v57 = vpop.f32.mrb[134].mxu0  ;;  %5847 = vmatpush1.bf16.msra.mxu0 %v8459_v47  ;;  %v8464_v7 = vld [vmem:[%s11928_s8 + $0x184] ss:$16 sps:$4 sm:$0xff]   ;;  %v8467_v44 = vld [vmem:[%s11928_s8 + $0x18c] ss:$16 sps:$4 sm:$0xff]  }
0x1dd7   : > { %v5407_v22 = vpop.f32.mrb[135].mxu0  ;;  %v11462_v42 = vadd.f32 %v7937_v57, %v12064_v27  ;;  %v8462_v57 = vld [vmem:[%s11928_s8 + $0x180] ss:$16 sps:$4 sm:$0xff]   ;;  %5775 = vmatprep.subr.bf16.mxu1 %v8464_v7  ;;  %5848 = vmatprep.subr.bf16.mxu0 %v8467_v44  ;;  %v11613_v7 = vld [vmem:[#allocation11 + $0x1] ss:$0 sm:$0xff] }
0x1dd8   : > { %v11454_v21 = vadd.f32 %v5407_v22, %v12062_v54  ;;  %5439 = vadd.xlane.f32.xlu0 %v11451_v16  ;;  %v8465_v22 = vld [vmem:[%s11928_s8 + $0x188] ss:$16 sps:$4 sm:$0xff]   ;;  %5776 = vmatpush1.bf16.msra.mxu1 %v8462_v57  ;;  %v8470_v54 = vld [vmem:[%s11928_s8 + $0x1a4] ss:$16 sps:$4 sm:$0xff]   ;;  %v8468_v27 = vld [vmem:[%s11928_s8 + $0x1a0] ss:$16 sps:$4 sm:$0xff]  }
0x1dd9   : > { %5777 = vmatprep.subr.bf16.mxu1 %v8470_v54 }
0x1dda   : > { %5441 = vadd.xlane.f32.xlu1 %v11454_v21  ;;  %5849 = vmatpush1.bf16.msra.mxu0 %v8465_v22 }
0x1ddb   : > { %5850 = vmatprep.subr.bf16.mxu0 %v8473_v29 }
0x1ddc   : > { %5443 = vadd.xlane.f32.xlu0 %v11458_v33  ;;  %5778 = vmatpush1.bf16.msra.mxu1 %v8468_v27 }
0x1ddd   : > { %5779 = vmatprep.subr.bf16.mxu1 %v8476_v20  ;;  %v8488_v20 = vld [vmem:[%s11930_s10 + $0x100] sm:$0xff]  }
0x1dde   : > { %5445 = vadd.xlane.f32.xlu1 %v11462_v42  ;;  %5851 = vmatpush1.bf16.msra.mxu0 %v8471_v62 }
0x1ddf   : > { %5852 = vmatprep.subr.bf16.mxu0 %v8479_v3  ;;  %v8489_v3 = vld [vmem:[%s11930_s10 + $0x180] sm:$0xff]  }
0x1de0   : > { %5780 = vmatpush1.bf16.msra.mxu1 %v8474_v38  ;;  %v8490_v38 = vld [vmem:[%s11930_s10 + $0x148] sm:$0xff]  }
0x1de1   : > { %5781 = vmatprep.subr.bf16.mxu1 %v8482_v63 }
0x1de2   : > { %5853 = vmatpush1.bf16.msra.mxu0 %v8477_v19 }
0x1de3   : > { %5854 = vmatprep.subr.bf16.mxu0 %v8485_v41 }
0x1de4   : > { %5782 = vmatpush1.bf16.msra.mxu1 %v8480_v34  ;;  %v8492_v34 = vld [vmem:[%s11930_s10 + $0x108] sm:$0xff]  }
0x1e59   : > { %v5432_v10 = vpop.xlane.xlu0 %5431 }
0x1e5a   : > { %v5447_v46 = vmul.f32 0.0078125, %v5432_v10  ;;  %v8483_v10 = vld [vmem:[%s11928_s8 + $0x1e8] ss:$16 sps:$4 sm:$0xff]  }
0x1e5b   : > { %v5434_v13 = vpop.xlane.xlu1 %5433  ;;  %5855 = vmatpush1.bf16.msra.mxu0 %v8483_v10  ;;  %v8493_v10 = vld [vmem:[%s11930_s10 + $0x188] sm:$0xff]  }
0x1e5c   : > { %v11491_v17 = vsub.f32 %v11435_v55, %v5447_v46  ;;  %v5448_v43 = vmul.f32 0.0078125, %v5434_v13  ;;  %v8486_v46 = vld [vmem:[%s11930_s10 + $0x140] sm:$0xff]  }
0x1e5d   : > { %v5436_v9 = vpop.xlane.xlu0 %5435  ;;  %v8487_v13 = vld [vmem:[%s11930_s10 + $0x1c0] sm:$0xff]   ;;  %7494 = vmatprep.subr.bf16.mxu1 %v8486_v46 }
0x1e5e   : > { %v11494_v6 = vsub.f32 %v11438_v51, %v5448_v43  ;;  %v5449_v26 = vmul.f32 0.0078125, %v5436_v9  ;;  %v5463_v40 = vmul.f32 %v11491_v17, %v11491_v17  ;;  %7534 = vmatprep.subr.bf16.mxu0 %v8487_v13  ;;  %v8494_v13 = vld [vmem:[%s11930_s10 + $0x150] sm:$0xff]  }
0x1e60   : > { %v11499_v12 = vsub.f32 %v11442_v52, %v5449_v26  ;;  %5471 = vadd.xlane.f32.xlu0 %v5463_v40  ;;  %v5464_v36 = vmul.f32 %v11494_v6, %v11494_v6 }
0x1e61   : > { %v5438_v25 = vpop.xlane.xlu0 %5437 }
0x1e62   : > { %v5450_v35 = vmul.f32 0.0078125, %v5438_v25  ;;  %5473 = vadd.xlane.f32.xlu1 %v5464_v36  ;;  %v5465_v1 = vmul.f32 %v11499_v12, %v11499_v12 }
0x1e64   : > { %v11506_v11 = vsub.f32 %v11447_v2, %v5450_v35  ;;  %5475 = vadd.xlane.f32.xlu0 %v5465_v1 }
0x1e65   : > { %v5440_v32 = vpop.xlane.xlu0 %5439 }
0x1e66   : > { %v5451_v15 = vmul.f32 0.0078125, %v5440_v32  ;;  %v5466_v56 = vmul.f32 %v11506_v11, %v11506_v11 }
0x1e67   : > { %v5442_v28 = vpop.xlane.xlu1 %5441 }
0x1e68   : > { %v11511_v8 = vsub.f32 %v11451_v16, %v5451_v15  ;;  %v5452_v45 = vmul.f32 0.0078125, %v5442_v28  ;;  %5477 = vadd.xlane.f32.xlu1 %v5466_v56 }
0x1e69   : > { %v5444_v58 = vpop.xlane.xlu0 %5443 }
0x1e6a   : > { %v11514_v14 = vsub.f32 %v11454_v21, %v5452_v45  ;;  %v5453_v50 = vmul.f32 0.0078125, %v5444_v58  ;;  %v5467_v60 = vmul.f32 %v11511_v8, %v11511_v8 }
0x1e6b   : > { %v5446_v30 = vpop.xlane.xlu1 %5445 }
0x1e6c   : > { %v11519_v53 = vsub.f32 %v11458_v33, %v5453_v50  ;;  %v5454_v0 = vmul.f32 0.0078125, %v5446_v30  ;;  %5479 = vadd.xlane.f32.xlu0 %v5467_v60  ;;  %v5468_v61 = vmul.f32 %v11514_v14, %v11514_v14  ;;  %v11608_v30 = vld [vmem:[#allocation10 + $0x1] ss:$0 sm:$0xff] }
0x1e6e   : > { %v11524_v5 = vsub.f32 %v11462_v42, %v5454_v0  ;;  %5481 = vadd.xlane.f32.xlu1 %v5468_v61  ;;  %v5469_v31 = vmul.f32 %v11519_v53, %v11519_v53 }
0x1e70   : > { %5483 = vadd.xlane.f32.xlu0 %v5469_v31  ;;  %v5470_v37 = vmul.f32 %v11524_v5, %v11524_v5 }
0x1e72   : > { %5485 = vadd.xlane.f32.xlu1 %v5470_v37 }
0x1eed   : > { %v5472_v43 = vpop.xlane.xlu0 %5471 }
0x1eee   : > { %v5487_v9 = vmul.f32 0.0078125, %v5472_v43  ;;  %v8495_v43 = vld [vmem:[%s11930_s10 + $0x1d0] sm:$0xff]  }
0x1eef   : > { %v5474_v26 = vpop.xlane.xlu1 %5473 }
0x1ef0   : > { %v5495_v40 = vadd.f32 1e-05, %v5487_v9  ;;  %v5488_v36 = vmul.f32 0.0078125, %v5474_v26 }
0x1ef1   : > { %v5476_v25 = vpop.xlane.xlu0 %5475 }
0x1ef2   : > { %8830 = vrsqrt.f32 %v5495_v40  ;;  %v5496_v35 = vadd.f32 1e-05, %v5488_v36  ;;  %v5489_v1 = vmul.f32 0.0078125, %v5476_v25 }
0x1ef4   : > { %8832 = vrsqrt.f32 %v5496_v35  ;;  %v5497_v32 = vadd.f32 1e-05, %v5489_v1  ;;  %v8496_v35 = vld [vmem:[%s11930_s10 + $0x110] sm:$0xff]  }
0x1ef5   : > { %v5478_v15 = vpop.xlane.xlu1 %5477  ;;  %v8497_v1 = vld [vmem:[%s11930_s10 + $0x190] sm:$0xff]  }
0x1ef6   : > { %8834 = vrsqrt.f32 %v5497_v32  ;;  %v5490_v56 = vmul.f32 0.0078125, %v5478_v15 }
0x1ef8   : > { %v5498_v28 = vadd.f32 1e-05, %v5490_v56 }
0x1ef9   : > { %v5480_v45 = vpop.xlane.xlu0 %5479 }
0x1efa   : > { %8836 = vrsqrt.f32 %v5498_v28  ;;  %v5491_v58 = vmul.f32 0.0078125, %v5480_v45 }
0x1efb   : > { %v5482_v50 = vpop.xlane.xlu1 %5481 }
0x1efc   : > { %v8831_v60 = vpop.eup %8830  ;;  %v5499_v0 = vadd.f32 1e-05, %v5491_v58  ;;  %v5492_v61 = vmul.f32 0.0078125, %v5482_v50  ;;  %v8500_v58 = vld [vmem:[%s11930_s10 + $0x118] sm:$0xff]  }
0x1efd   : > { %v5511_v31 = vmul.f32 %v8831_v60, %v11491_v17  ;;  %v5484_v4 = vpop.xlane.xlu0 %5483  ;;  %v8501_v50 = vld [vmem:[%s11930_s10 + $0x198] sm:$0xff]   ;;  %v8502_v60 = vld [vmem:[%s11930_s10 + $0x160] sm:$0xff]  }
0x1efe   : > { %v8833_v48 = vpop.eup %8832  ;;  %8838 = vrsqrt.f32 %v5499_v0  ;;  %v5500_v24 = vadd.f32 1e-05, %v5492_v61  ;;  %v5493_v39 = vmul.f32 0.0078125, %v5484_v4 }
0x1eff   : > { %v5525_v37 = vmul.f32 %v11608_v30, %v5511_v31  ;;  %v5512_v49 = vmul.f32 %v8833_v48, %v11494_v6  ;;  %v5486_v59 = vpop.xlane.xlu1 %5485  ;;  %v8504_v48 = vld [vmem:[%s11930_s10 + $0x120] sm:$0xff]  }
0x1f00   : > { %v8835_v23 = vpop.eup %8834  ;;  %8840 = vrsqrt.f32 %v5500_v24  ;;  %v5494_v47 = vmul.f32 0.0078125, %v5486_v59  ;;  %v5501_v57 = vadd.f32 1e-05, %v5493_v39  ;;  %v8505_v24 = vld [vmem:[%s11930_s10 + $0x1a0] sm:$0xff]   ;;  %v8506_v39 = vld [vmem:[%s11930_s10 + $0x168] sm:$0xff]  }
0x1f01   : > { %v5526_v44 = vmul.f32 %v11608_v30, %v5512_v49  ;;  %v5539_v17 = vadd.f32 %v11613_v7, %v5525_v37  ;;  %v5513_v29 = vmul.f32 %v8835_v23, %v11499_v12  ;;  %v8491_v12 = vld [vmem:[%s11930_s10 + $0x1c8] sm:$0xff]  }
0x1f02   : > { %v5502_v22 = vadd.f32 1e-05, %v5494_v47  ;;  %v8508_v47 = vld [vmem:[%s11930_s10 + $0x128] sm:$0xff]  }
0x1f03   : > { %v5540_v54 = vadd.f32 %v11613_v7, %v5526_v44  ;;  %v8512_v44 = vld [vmem:[%s11930_s10 + $0x130] sm:$0xff]  }
0x1f04   : > { %v8837_v27 = vpop.eup %8836  ;;  %8842 = vrsqrt.f32 %v5502_v22  ;;  %v8514_v22 = vld [vmem:[%s11930_s10 + $0x178] sm:$0xff]  }
0x1f05   : > { %v5580_v62 = vpack.c.bf16 %v5540_v54, %v5539_v17  ;;  %v5514_v6 = vmul.f32 %v8837_v27, %v11506_v11  ;;  %8844 = vrsqrt.f32 %v5501_v57  ;;  %v5527_v11 = vmul.f32 %v11608_v30, %v5513_v29  ;;  %v8513_v57 = vld [vmem:[%s11930_s10 + $0x1b0] sm:$0xff]   ;;  %v8515_v17 = vld [vmem:[%s11930_s10 + $0x1f8] sm:$0xff]   ;;  %v5585_v27 = vld [vmem:[#allocation13 + $0x4] sm:$0xf] }
0x1f06   : > { %v8516_v54 = vld [vmem:[%s11930_s10 + $0x138] sm:$0xff]  }
0x1f07   : > { %5800 = vmatmul.mubr.bf16.vlgmr.msra.gmra.mrb[120].mxu1 %v5580_v62  ;;  %5873 = vmatmul.mubr.bf16.vlgmr.msra.gmra.mrb[136].mxu0 %v5580_v62  ;;  %v5528_v19 = vmul.f32 %v11608_v30, %v5514_v6  ;;  %v5541_v9 = vadd.f32 %v11613_v7, %v5527_v11  ;;  %v8517_v29 = vld [vmem:[%s11930_s10 + $0x1b8] sm:$0xff]  }
0x1f08   : > { %v8839_v63 = vpop.eup %8838  ;;  %5809 = vmatprep.mubr.bf16.mxu1 %v12036_v18  ;;  %5882 = vmatprep.mubr.bf16.mxu0 %v12036_v18  ;;  %v12065_v62 = vld [vmem:[#allocation40_spill] sm:$0xff] }
0x1f09   : > { %v5542_v41 = vadd.f32 %v11613_v7, %v5528_v19  ;;  %7495 = vmatpush3.bf16.msra.mxu1 %v8488_v20  ;;  %7535 = vmatpush3.bf16.msra.mxu0 %v8489_v3  ;;  %v5515_v26 = vmul.f32 %v8839_v63, %v11511_v8  ;;  %v8498_v8 = vld [vmem:[%s11930_s10 + $0x158] sm:$0xff]   ;;  %v12066_v6 = vsub.s32 0, %v12065_v62  ;;  %v12067_v3 = vsub.s32 2, %v12065_v62 }
0x1f0a   : > { %v8841_v46 = vpop.eup %8840  ;;  %7496 = vmatprep.subr.bf16.mxu1 %v8490_v38  ;;  %7536 = vmatprep.subr.bf16.mxu0 %v8491_v12  ;;  %v12068_v12 = vsub.s32 1, %v12065_v62  ;;  %v12069_v19 = vsub.s32 3, %v12065_v62 }
0x1f0b   : > { %v5516_v40 = vmul.f32 %v8841_v46, %v11514_v14  ;;  %v5581_v36 = vpack.c.bf16 %v5542_v41, %v5541_v9  ;;  %v8499_v14 = vld [vmem:[%s11930_s10 + $0x1d8] sm:$0xff]   ;;  %v5529_v15 = vmul.f32 %v11608_v30, %v5515_v26  ;;  %v11734_v20 = vrot.slane %v5585_v27, %v12066_v6 }
0x1f0c   : > { %v11738_v38 = vrot.slane %v5585_v27, %v12067_v3  ;;  %v11742_v11 = vrot.slane %v5585_v27, %v12068_v12  ;;  %v11746_v63 = vrot.slane %v5585_v27, %v12069_v19 }
0x1f0d   : > { %v5530_v25 = vmul.f32 %v11608_v30, %v5516_v40  ;;  %7497 = vmatpush3.bf16.msra.mxu1 %v8492_v34  ;;  %7537 = vmatpush3.bf16.msra.mxu0 %v8493_v10  ;;  %v5543_v0 = vadd.f32 %v11613_v7, %v5529_v15 }
0x1f0e   : > { %v8843_v32 = vpop.eup %8842  ;;  %7498 = vmatprep.subr.bf16.mxu1 %v8494_v13  ;;  %7538 = vmatprep.subr.bf16.mxu0 %v8495_v43 }
0x1f0f   : > { %5810 = vmatmul.mubr.bf16.gmra.mrb[124].mxu1 %v5581_v36  ;;  %5883 = vmatmul.mubr.bf16.gmra.mrb[140].mxu0 %v5581_v36  ;;  %v8845_v56 = vpop.eup %8844  ;;  %v5544_v28 = vadd.f32 %v11613_v7, %v5530_v25  ;;  %v5518_v45 = vmul.f32 %v8843_v32, %v11524_v5  ;;  %v8503_v5 = vld [vmem:[%s11930_s10 + $0x1e0] sm:$0xff]  }
0x1f10   : > { %5819 = vmatprep.mubr.bf16.mxu1 %v12036_v18  ;;  %5892 = vmatprep.mubr.bf16.mxu0 %v12036_v18  ;;  %v5517_v61 = vmul.f32 %v8845_v56, %v11519_v53  ;;  %v8507_v53 = vld [vmem:[%s11930_s10 + $0x1e8] sm:$0xff]  }
0x1f11   : > { %7499 = vmatpush3.bf16.msra.mxu1 %v8496_v35  ;;  %7539 = vmatpush3.bf16.msra.mxu0 %v8497_v1  ;;  %v5582_v31 = vpack.c.bf16 %v5544_v28, %v5543_v0  ;;  %v5532_v4 = vmul.f32 %v11608_v30, %v5518_v45 }
0x1f12   : > { %7500 = vmatprep.subr.bf16.mxu1 %v8498_v8  ;;  %7540 = vmatprep.subr.bf16.mxu0 %v8499_v14  ;;  %v5531_v37 = vmul.f32 %v11608_v30, %v5517_v61  ;;  %v8509_v30 = vld [vmem:[%s11930_s10 + $0x1a8] sm:$0xff]  }
0x1f13   : > { %v5546_v49 = vadd.f32 %v11613_v7, %v5532_v4 }
0x1f14   : > { %v5545_v59 = vadd.f32 %v11613_v7, %v5531_v37  ;;  %v8511_v7 = vld [vmem:[%s11930_s10 + $0x1f0] sm:$0xff]  }
0x1f15   : > { %7501 = vmatpush3.bf16.msra.mxu1 %v8500_v58  ;;  %7541 = vmatpush3.bf16.msra.mxu0 %v8501_v50 }
0x1f16   : > { %7502 = vmatprep.subr.bf16.mxu1 %v8502_v60  ;;  %7542 = vmatprep.subr.bf16.mxu0 %v8503_v5  ;;  %v5583_v23 = vpack.c.bf16 %v5546_v49, %v5545_v59 }
0x1f17   : > { %5820 = vmatmul.mubr.bf16.gmra.mrb[128].mxu1 %v5582_v31  ;;  %5893 = vmatmul.mubr.bf16.gmra.mrb[144].mxu0 %v5582_v31 }
0x1f18   : > { %5829 = vmatprep.mubr.bf16.mxu1 %v12036_v18  ;;  %5902 = vmatprep.mubr.bf16.mxu0 %v12036_v18  ;;  %v8510_v18 = vld [vmem:[%s11930_s10 + $0x170] sm:$0xff]  }
0x1f19   : > { %7503 = vmatpush3.bf16.msra.mxu1 %v8504_v48  ;;  %7543 = vmatpush3.bf16.msra.mxu0 %v8505_v24 }
0x1f1a   : > { %7504 = vmatprep.subr.bf16.mxu1 %v8506_v39  ;;  %7544 = vmatprep.subr.bf16.mxu0 %v8507_v53 }
0x1f1d   : > { %7505 = vmatpush3.bf16.msra.mxu1 %v8508_v47  ;;  %7545 = vmatpush3.bf16.msra.mxu0 %v8509_v30 }
0x1f1e   : > { %7506 = vmatprep.subr.bf16.mxu1 %v8510_v18  ;;  %7546 = vmatprep.subr.bf16.mxu0 %v8511_v7 }
0x1f1f   : > { %5830 = vmatmul.mubr.bf16.gmra.mrb[132].mxu1 %v5583_v23  ;;  %5903 = vmatmul.mubr.bf16.gmra.mrb[148].mxu0 %v5583_v23 }
0x1f21   : > { %7507 = vmatpush3.bf16.msra.mxu1 %v8512_v44  ;;  %7547 = vmatpush3.bf16.msra.mxu0 %v8513_v57 }
0x1f22   : > { %7508 = vmatprep.subr.bf16.mxu1 %v8514_v22  ;;  %7548 = vmatprep.subr.bf16.mxu0 %v8515_v17 }
0x1f25   : > { %7509 = vmatpush3.bf16.msra.mxu1 %v8516_v54  ;;  %7549 = vmatpush3.bf16.msra.mxu0 %v8517_v29 }
0x1fda   : > { %v5801_v41 = vpop.f32.mrb[120].mxu1  ;;  %v5874_v34 = vpop.f32.mrb[136].mxu0 }
0x1fdb   : > { %v5802_v10 = vadd.f32 %v5801_v41, %v11734_v20  ;;  %v5875_v46 = vadd.f32 %v5874_v34, %v11738_v38  ;;  %v5803_v13 = vpop.f32.mrb[121].mxu1  ;;  %v5876_v43 = vpop.f32.mrb[137].mxu0 }
0x1fdc   : > { %v5804_v9 = vadd.f32 %v5803_v13, %v11742_v11  ;;  %v5877_v26 = vadd.f32 %v5876_v43, %v11746_v63  ;;  %v5805_v40 = vpop.f32.mrb[122].mxu1  ;;  %v5878_v36 = vpop.f32.mrb[138].mxu0 }
0x1fdd   : > { %v5806_v25 = vadd.f32 %v5805_v40, %v11734_v20  ;;  %v5879_v35 = vadd.f32 %v5878_v36, %v11738_v38  ;;  %v5807_v1 = vpop.f32.mrb[123].mxu1  ;;  %v5880_v32 = vpop.f32.mrb[139].mxu0  ;;  %v5913_v15 = vmax.f32 %v5802_v10, 0.0  ;;  %v5915_v56 = vmax.f32 %v5875_v46, 0.0 }
0x1fde   : > { %v5808_v8 = vadd.f32 %v5807_v1, %v11742_v11  ;;  %v5881_v14 = vadd.f32 %v5880_v32, %v11746_v63  ;;  %v5914_v58 = vmax.f32 %v5804_v9, 0.0  ;;  %v5916_v50 = vmax.f32 %v5877_v26, 0.0 }
0x1fdf   : > { %v5917_v28 = vmax.f32 %v5806_v25, 0.0  ;;  %v5919_v45 = vmax.f32 %v5879_v35, 0.0 }
0x1fe0   : > { %v5918_v60 = vmax.f32 %v5808_v8, 0.0  ;;  %v5920_v5 = vmax.f32 %v5881_v14, 0.0 }
0x1fe1   : > { %v6010_v0 = vpack.c.bf16 %v5917_v28, %v5913_v15  ;;  %v6012_v61 = vpack.c.bf16 %v5919_v45, %v5915_v56 }
0x1fe2   : > { %v6011_v31 = vpack.c.bf16 %v5918_v60, %v5914_v58  ;;  %v6013_v4 = vpack.c.bf16 %v5920_v5, %v5916_v50  ;;  %v5811_v48 = vpop.f32.mrb[124].mxu1  ;;  %v5884_v24 = vpop.f32.mrb[140].mxu0 }
0x1fe3   : > { %v5812_v39 = vadd.f32 %v5811_v48, %v11734_v20  ;;  %v5885_v53 = vadd.f32 %v5884_v24, %v11738_v38  ;;  %v5813_v37 = vpop.f32.mrb[125].mxu1  ;;  %v5886_v49 = vpop.f32.mrb[141].mxu0 }
0x1fe4   : > { %v5814_v59 = vadd.f32 %v5813_v37, %v11742_v11  ;;  %v5887_v23 = vadd.f32 %v5886_v49, %v11746_v63  ;;  %v5815_v47 = vpop.f32.mrb[126].mxu1  ;;  %v5888_v30 = vpop.f32.mrb[142].mxu0  ;;  %6258 = vmatprep.mubr.bf16.mxu1 %v6011_v31  ;;  %6323 = vmatprep.mubr.bf16.mxu0 %v6013_v4 }
0x1fe5   : > { %v5816_v18 = vadd.f32 %v5815_v47, %v11734_v20  ;;  %v5889_v7 = vadd.f32 %v5888_v30, %v11738_v38  ;;  %v5817_v44 = vpop.f32.mrb[127].mxu1  ;;  %v5890_v57 = vpop.f32.mrb[143].mxu0  ;;  %6259 = vmatmul.mubr.bf16.vlgmr.msra.gmra.mrb[136].mxu1 %v6010_v0  ;;  %6324 = vmatmul.mubr.bf16.vlgmr.msra.gmra.mrb[152].mxu0 %v6012_v61  ;;  %v5921_v54 = vmax.f32 %v5812_v39, 0.0  ;;  %v5923_v29 = vmax.f32 %v5885_v53, 0.0 }
0x1fe6   : > { %v5818_v22 = vadd.f32 %v5817_v44, %v11742_v11  ;;  %v5891_v17 = vadd.f32 %v5890_v57, %v11746_v63  ;;  %v5922_v6 = vmax.f32 %v5814_v59, 0.0  ;;  %v5924_v3 = vmax.f32 %v5887_v23, 0.0 }
0x1fe7   : > { %v5925_v27 = vmax.f32 %v5816_v18, 0.0  ;;  %v5927_v62 = vmax.f32 %v5889_v7, 0.0 }
0x1fe8   : > { %v5926_v12 = vmax.f32 %v5818_v22, 0.0  ;;  %v5928_v19 = vmax.f32 %v5891_v17, 0.0 }
0x1fe9   : > { %v6014_v41 = vpack.c.bf16 %v5925_v27, %v5921_v54  ;;  %v6016_v34 = vpack.c.bf16 %v5927_v62, %v5923_v29 }
0x1fea   : > { %v6015_v10 = vpack.c.bf16 %v5926_v12, %v5922_v6  ;;  %v6017_v46 = vpack.c.bf16 %v5928_v19, %v5924_v3  ;;  %v5821_v13 = vpop.f32.mrb[128].mxu1  ;;  %v5894_v43 = vpop.f32.mrb[144].mxu0 }
0x1feb   : > { %v5822_v9 = vadd.f32 %v5821_v13, %v11734_v20  ;;  %v5895_v26 = vadd.f32 %v5894_v43, %v11738_v38  ;;  %v5823_v40 = vpop.f32.mrb[129].mxu1  ;;  %v5896_v36 = vpop.f32.mrb[145].mxu0 }
0x1fec   : > { %v5824_v25 = vadd.f32 %v5823_v40, %v11742_v11  ;;  %v5897_v35 = vadd.f32 %v5896_v36, %v11746_v63  ;;  %v5825_v1 = vpop.f32.mrb[130].mxu1  ;;  %v5898_v32 = vpop.f32.mrb[146].mxu0  ;;  %6266 = vmatprep.mubr.bf16.mxu1 %v6015_v10  ;;  %6331 = vmatprep.mubr.bf16.mxu0 %v6017_v46 }
0x1fed   : > { %v5826_v8 = vadd.f32 %v5825_v1, %v11734_v20  ;;  %v5899_v14 = vadd.f32 %v5898_v32, %v11738_v38  ;;  %v5827_v15 = vpop.f32.mrb[131].mxu1  ;;  %v5900_v56 = vpop.f32.mrb[147].mxu0  ;;  %6267 = vmatmul.mubr.bf16.gmra.mrb[140].mxu1 %v6014_v41  ;;  %6332 = vmatmul.mubr.bf16.gmra.mrb[156].mxu0 %v6016_v34  ;;  %v5929_v58 = vmax.f32 %v5822_v9, 0.0  ;;  %v5931_v50 = vmax.f32 %v5895_v26, 0.0  ;;  %v11780_v26 = vld [vmem:[#allocation14 + $0x1] ss:$0 sm:$0xff] }
0x1fee   : > { %v5828_v28 = vadd.f32 %v5827_v15, %v11742_v11  ;;  %v5901_v45 = vadd.f32 %v5900_v56, %v11746_v63  ;;  %v5930_v0 = vmax.f32 %v5824_v25, 0.0  ;;  %v5932_v61 = vmax.f32 %v5897_v35, 0.0 }
0x1fef   : > { %v5933_v60 = vmax.f32 %v5826_v8, 0.0  ;;  %v5935_v5 = vmax.f32 %v5899_v14, 0.0 }
0x1ff0   : > { %v5934_v31 = vmax.f32 %v5828_v28, 0.0  ;;  %v5936_v4 = vmax.f32 %v5901_v45, 0.0 }
0x1ff1   : > { %v6018_v48 = vpack.c.bf16 %v5933_v60, %v5929_v58  ;;  %v6020_v24 = vpack.c.bf16 %v5935_v5, %v5931_v50 }
0x1ff2   : > { %v6019_v39 = vpack.c.bf16 %v5934_v31, %v5930_v0  ;;  %v6021_v53 = vpack.c.bf16 %v5936_v4, %v5932_v61  ;;  %v5831_v37 = vpop.f32.mrb[132].mxu1  ;;  %v5904_v49 = vpop.f32.mrb[148].mxu0 }
0x1ff3   : > { %v5832_v59 = vadd.f32 %v5831_v37, %v11734_v20  ;;  %v5905_v23 = vadd.f32 %v5904_v49, %v11738_v38  ;;  %v5833_v47 = vpop.f32.mrb[133].mxu1  ;;  %v5906_v30 = vpop.f32.mrb[149].mxu0 }
0x1ff4   : > { %v5834_v18 = vadd.f32 %v5833_v47, %v11742_v11  ;;  %v5907_v7 = vadd.f32 %v5906_v30, %v11746_v63  ;;  %v5835_v44 = vpop.f32.mrb[134].mxu1  ;;  %v5908_v57 = vpop.f32.mrb[150].mxu0  ;;  %6274 = vmatprep.mubr.bf16.mxu1 %v6019_v39  ;;  %6339 = vmatprep.mubr.bf16.mxu0 %v6021_v53 }
0x1ff5   : > { %v5836_v22 = vadd.f32 %v5835_v44, %v11734_v20  ;;  %v5909_v17 = vadd.f32 %v5908_v57, %v11738_v38  ;;  %v5837_v54 = vpop.f32.mrb[135].mxu1  ;;  %v5910_v29 = vpop.f32.mrb[151].mxu0  ;;  %6275 = vmatmul.mubr.bf16.gmra.mrb[144].mxu1 %v6018_v48  ;;  %6340 = vmatmul.mubr.bf16.gmra.mrb[160].mxu0 %v6020_v24  ;;  %v5937_v6 = vmax.f32 %v5832_v59, 0.0  ;;  %v5939_v3 = vmax.f32 %v5905_v23, 0.0 }
0x1ff6   : > { %v5838_v27 = vadd.f32 %v5837_v54, %v11742_v11  ;;  %v5911_v62 = vadd.f32 %v5910_v29, %v11746_v63  ;;  %v5938_v41 = vmax.f32 %v5834_v18, 0.0  ;;  %v5940_v34 = vmax.f32 %v5907_v7, 0.0 }
0x1ff7   : > { %v5941_v12 = vmax.f32 %v5836_v22, 0.0  ;;  %v5943_v19 = vmax.f32 %v5909_v17, 0.0 }
0x1ff8   : > { %v5942_v10 = vmax.f32 %v5838_v27, 0.0  ;;  %v5944_v46 = vmax.f32 %v5911_v62, 0.0 }
0x1ff9   : > { %v6022_v13 = vpack.c.bf16 %v5941_v12, %v5937_v6  ;;  %v6024_v20 = vpack.c.bf16 %v5943_v19, %v5939_v3 }
0x1ffa   : > { %v6023_v43 = vpack.c.bf16 %v5942_v10, %v5938_v41  ;;  %v6025_v38 = vpack.c.bf16 %v5944_v46, %v5940_v34 }
0x1ffc   : > { %6282 = vmatprep.mubr.bf16.mxu1 %v6023_v43  ;;  %6347 = vmatprep.mubr.bf16.mxu0 %v6025_v38 }
0x1ffd   : > { %6283 = vmatmul.mubr.bf16.gmra.mrb[148].mxu1 %v6022_v13  ;;  %6348 = vmatmul.mubr.bf16.gmra.mrb[164].mxu0 %v6024_v20 }
0x20b8   : > { %v7510_v9 = vpop.f32.mrb[136].mxu1  ;;  %v7550_v11 = vpop.f32.mrb[152].mxu0 }
0x20b9   : > { %v7511_v63 = vpop.f32.mrb[137].mxu1  ;;  %v7551_v40 = vpop.f32.mrb[153].mxu0 }
0x20ba   : > { %v7512_v36 = vadd.f32 %v7511_v63, %v7510_v9  ;;  %v7552_v25 = vadd.f32 %v7551_v40, %v7550_v11  ;;  %v7513_v35 = vpop.f32.mrb[138].mxu1  ;;  %v7553_v1 = vpop.f32.mrb[154].mxu0 }
0x20bb   : > { %v7514_v32 = vpop.f32.mrb[139].mxu1  ;;  %v7554_v8 = vpop.f32.mrb[155].mxu0 }
0x20bc   : > { %v6261_v14 = vadd.f32 %v7512_v36, %v11780_v26  ;;  %v7515_v15 = vadd.f32 %v7514_v32, %v7513_v35  ;;  %v7555_v56 = vadd.f32 %v7554_v8, %v7553_v1 }
0x20be   : > { %v6326_v28 = vadd.f32 %v7552_v25, %v6261_v14  ;;  %v6264_v45 = vadd.f32 %v7515_v15, %v11780_v26 }
0x20c0   : > { %v6329_v58 = vadd.f32 %v7555_v56, %v6264_v45  ;;  %v7516_v50 = vpop.f32.mrb[140].mxu1  ;;  %v7556_v60 = vpop.f32.mrb[156].mxu0  ;;  %v11785_v5 = vadd.f32 %v6326_v28, %v11435_v55 }
0x20c1   : > { %v7517_v0 = vpop.f32.mrb[141].mxu1  ;;  %v7557_v61 = vpop.f32.mrb[157].mxu0 }
0x20c2   : > { %v7518_v31 = vadd.f32 %v7517_v0, %v7516_v50  ;;  %v7558_v4 = vadd.f32 %v7557_v61, %v7556_v60  ;;  %v7519_v48 = vpop.f32.mrb[142].mxu1  ;;  %v7559_v24 = vpop.f32.mrb[158].mxu0  ;;  %6366 = vadd.xlane.f32.xlu0 %v11785_v5  ;;  %v6357_v39 = vadd.f32 %v6329_v58, %v11438_v51 }
0x20c3   : > { %v7520_v53 = vpop.f32.mrb[143].mxu1  ;;  %v7560_v37 = vpop.f32.mrb[159].mxu0 }
0x20c4   : > { %v6269_v49 = vadd.f32 %v7518_v31, %v11780_v26  ;;  %v7521_v59 = vadd.f32 %v7520_v53, %v7519_v48  ;;  %v7561_v23 = vadd.f32 %v7560_v37, %v7559_v24  ;;  %6368 = vadd.xlane.f32.xlu1 %v6357_v39 }
0x20c6   : > { %v6334_v47 = vadd.f32 %v7558_v4, %v6269_v49  ;;  %v6272_v55 = vadd.f32 %v7521_v59, %v11780_v26 }
0x20c8   : > { %v6337_v30 = vadd.f32 %v7561_v23, %v6272_v55  ;;  %v7522_v18 = vpop.f32.mrb[144].mxu1  ;;  %v7562_v7 = vpop.f32.mrb[160].mxu0  ;;  %v6358_v44 = vadd.f32 %v6334_v47, %v11442_v52  ;;  %v8518_v47 = vld [vmem:[%s12070_s7] sm:$0xff]  }
0x20c9   : > { %v7523_v57 = vpop.f32.mrb[145].mxu1  ;;  %v7563_v22 = vpop.f32.mrb[161].mxu0  ;;  %7938 = vmatprep.subr.bf16.mxu1 %v8518_v47 }
0x20ca   : > { %v7524_v17 = vadd.f32 %v7523_v57, %v7522_v18  ;;  %v7564_v54 = vadd.f32 %v7563_v22, %v7562_v7  ;;  %v7525_v51 = vpop.f32.mrb[146].mxu1  ;;  %v7565_v29 = vpop.f32.mrb[162].mxu0  ;;  %6370 = vadd.xlane.f32.xlu0 %v6358_v44  ;;  %v6359_v27 = vadd.f32 %v6337_v30, %v11447_v2  ;;  %7939 = vmatpush3.bf16.msra.mxu1 %v8518_v47  ;;  %v8519_v7 = vld [vmem:[%s12070_s7 + $0x8] sm:$0xff]  }
0x20cb   : > { %v7526_v62 = vpop.f32.mrb[147].mxu1  ;;  %v7566_v6 = vpop.f32.mrb[163].mxu0  ;;  %7940 = vmatprep.subr.bf16.mxu1 %v8519_v7 }
0x20cc   : > { %v6277_v3 = vadd.f32 %v7524_v17, %v11780_v26  ;;  %v7527_v12 = vadd.f32 %v7526_v62, %v7525_v51  ;;  %v7567_v19 = vadd.f32 %v7566_v6, %v7565_v29  ;;  %6372 = vadd.xlane.f32.xlu1 %v6359_v27  ;;  %v8520_v51 = vld [vmem:[%s12070_s7 + $0x10] sm:$0xff]   ;;  %v8522_v62 = vld [vmem:[%s12070_s7 + $0x20] sm:$0xff]   ;;  %v8523_v6 = vld [vmem:[%s12070_s7 + $0x28] sm:$0xff]  }
0x20ce   : > { %v6342_v41 = vadd.f32 %v7564_v54, %v6277_v3  ;;  %v6280_v34 = vadd.f32 %v7527_v12, %v11780_v26  ;;  %7941 = vmatpush3.bf16.msra.mxu1 %v8519_v7  ;;  %v8524_v3 = vld [vmem:[%s12070_s7 + $0x30] sm:$0xff]   ;;  %v8525_v12 = vld [vmem:[%s12070_s7 + $0x38] sm:$0xff]  }
0x20cf   : > { %7942 = vmatprep.subr.bf16.mxu1 %v8520_v51 }
0x20d0   : > { %v6345_v52 = vadd.f32 %v7567_v19, %v6280_v34  ;;  %v7528_v10 = vpop.f32.mrb[148].mxu1  ;;  %v7568_v46 = vpop.f32.mrb[164].mxu0  ;;  %v6360_v13 = vadd.f32 %v6342_v41, %v11451_v16 }
0x20d1   : > { %v7529_v20 = vpop.f32.mrb[149].mxu1  ;;  %v7569_v43 = vpop.f32.mrb[165].mxu0 }
0x20d2   : > { %v7530_v38 = vadd.f32 %v7529_v20, %v7528_v10  ;;  %v7570_v9 = vadd.f32 %v7569_v43, %v7568_v46  ;;  %v7571_v2 = vpop.f32.mrb[166].mxu0  ;;  %6374 = vadd.xlane.f32.xlu0 %v6360_v13  ;;  %v7531_v11 = vpop.f32.mrb[150].mxu1  ;;  %v6361_v63 = vadd.f32 %v6345_v52, %v11454_v21  ;;  %7943 = vmatpush3.bf16.msra.mxu1 %v8520_v51 }
0x20d3   : > { %v7532_v40 = vpop.f32.mrb[151].mxu1  ;;  %v7572_v36 = vpop.f32.mrb[167].mxu0 }
0x20d4   : > { %v6285_v25 = vadd.f32 %v7530_v38, %v11780_v26  ;;  %v7533_v35 = vadd.f32 %v7532_v40, %v7531_v11  ;;  %v7573_v1 = vadd.f32 %v7572_v36, %v7571_v2  ;;  %6376 = vadd.xlane.f32.xlu1 %v6361_v63 }
0x20d6   : > { %v6350_v32 = vadd.f32 %v7570_v9, %v6285_v25  ;;  %v6288_v8 = vadd.f32 %v7533_v35, %v11780_v26 }
0x20d8   : > { %v6353_v16 = vadd.f32 %v7573_v1, %v6288_v8  ;;  %v6362_v14 = vadd.f32 %v6350_v32, %v11458_v33 }
0x20da   : > { %6378 = vadd.xlane.f32.xlu0 %v6362_v14  ;;  %v6363_v15 = vadd.f32 %v6353_v16, %v11462_v42 }
0x20dc   : > { %6380 = vadd.xlane.f32.xlu1 %v6363_v15 }
0x214f   : > { %v6367_v56 = vpop.xlane.xlu0 %6366 }
0x2150   : > { %v6382_v28 = vmul.f32 0.0078125, %v6367_v56 }
0x2151   : > { %v6369_v21 = vpop.xlane.xlu1 %6368 }
0x2152   : > { %v11802_v45 = vsub.f32 %v11785_v5, %v6382_v28  ;;  %v6383_v58 = vmul.f32 0.0078125, %v6369_v21 }
0x2154   : > { %v11804_v50 = vsub.f32 %v6357_v39, %v6383_v58  ;;  %v6398_v60 = vmul.f32 %v11802_v45, %v11802_v45 }
0x2156   : > { %6406 = vadd.xlane.f32.xlu0 %v6398_v60  ;;  %v6399_v33 = vmul.f32 %v11804_v50, %v11804_v50 }
0x2157   : > { %v6371_v26 = vpop.xlane.xlu0 %6370 }
0x2158   : > { %v6384_v0 = vmul.f32 0.0078125, %v6371_v26  ;;  %6408 = vadd.xlane.f32.xlu1 %v6399_v33 }
0x2159   : > { %v6373_v42 = vpop.xlane.xlu1 %6372 }
0x215a   : > { %v11810_v61 = vsub.f32 %v6358_v44, %v6384_v0  ;;  %v6385_v31 = vmul.f32 0.0078125, %v6373_v42 }
0x215c   : > { %v11812_v4 = vsub.f32 %v6359_v27, %v6385_v31  ;;  %v6400_v5 = vmul.f32 %v11810_v61, %v11810_v61  ;;  %v8521_v27 = vld [vmem:[%s12070_s7 + $0x18] sm:$0xff]  }
0x215d   : > { %7944 = vmatprep.subr.bf16.mxu1 %v8521_v27 }
0x215e   : > { %6410 = vadd.xlane.f32.xlu0 %v6400_v5  ;;  %v6401_v48 = vmul.f32 %v11812_v4, %v11812_v4  ;;  %7945 = vmatpush3.bf16.msra.mxu1 %v8521_v27 }
0x215f   : > { %v6375_v24 = vpop.xlane.xlu0 %6374  ;;  %7946 = vmatprep.subr.bf16.mxu1 %v8522_v62 }
0x2160   : > { %v6386_v39 = vmul.f32 0.0078125, %v6375_v24  ;;  %6412 = vadd.xlane.f32.xlu1 %v6401_v48 }
0x2161   : > { %v6377_v53 = vpop.xlane.xlu1 %6376 }
0x2162   : > { %v11818_v37 = vsub.f32 %v6360_v13, %v6386_v39  ;;  %v6387_v49 = vmul.f32 0.0078125, %v6377_v53  ;;  %7947 = vmatpush3.bf16.msra.mxu1 %v8522_v62 }
0x2163   : > { %7948 = vmatprep.subr.bf16.mxu1 %v8523_v6 }
0x2164   : > { %v11820_v59 = vsub.f32 %v6361_v63, %v6387_v49  ;;  %v6402_v23 = vmul.f32 %v11818_v37, %v11818_v37  ;;  %v7220_v63 = vld [vmem:[#allocation16] ss:$0 sm:$0xff] }
0x2166   : > { %6414 = vadd.xlane.f32.xlu0 %v6402_v23  ;;  %v6403_v55 = vmul.f32 %v11820_v59, %v11820_v59  ;;  %7949 = vmatpush3.bf16.msra.mxu1 %v8523_v6 }
0x2167   : > { %v6379_v30 = vpop.xlane.xlu0 %6378  ;;  %7950 = vmatprep.subr.bf16.mxu1 %v8524_v3 }
0x2168   : > { %v6388_v18 = vmul.f32 0.0078125, %v6379_v30  ;;  %6416 = vadd.xlane.f32.xlu1 %v6403_v55 }
0x2169   : > { %v6381_v44 = vpop.xlane.xlu1 %6380 }
0x216a   : > { %v11832_v57 = vsub.f32 %v6362_v14, %v6388_v18  ;;  %v6389_v22 = vmul.f32 0.0078125, %v6381_v44  ;;  %7951 = vmatpush3.bf16.msra.mxu1 %v8524_v3 }
0x216b   : > { %7952 = vmatprep.subr.bf16.mxu1 %v8525_v12 }
0x216c   : > { %v11834_v17 = vsub.f32 %v6363_v15, %v6389_v22  ;;  %v6404_v54 = vmul.f32 %v11832_v57, %v11832_v57  ;;  %v7221_v15 = vld [vmem:[#allocation17] ss:$0 sm:$0xff] }
0x216e   : > { %6418 = vadd.xlane.f32.xlu0 %v6404_v54  ;;  %v6405_v29 = vmul.f32 %v11834_v17, %v11834_v17  ;;  %7953 = vmatpush3.bf16.msra.mxu1 %v8525_v12 }
0x2170   : > { %6420 = vadd.xlane.f32.xlu1 %v6405_v29 }
0x21e3   : > { %v6407_v19 = vpop.xlane.xlu0 %6406 }
0x21e4   : > { %v6422_v41 = vmul.f32 0.0078125, %v6407_v19 }
0x21e5   : > { %v6409_v34 = vpop.xlane.xlu1 %6408 }
0x21e6   : > { %v6430_v52 = vadd.f32 1e-05, %v6422_v41  ;;  %v6423_v10 = vmul.f32 0.0078125, %v6409_v34 }
0x21e8   : > { %8846 = vrsqrt.f32 %v6430_v52  ;;  %v6431_v46 = vadd.f32 1e-05, %v6423_v10 }
0x21ea   : > { %8848 = vrsqrt.f32 %v6431_v46 }
0x21eb   : > { %v6411_v13 = vpop.xlane.xlu0 %6410 }
0x21ec   : > { %v6424_v20 = vmul.f32 0.0078125, %v6411_v13 }
0x21ed   : > { %v6413_v43 = vpop.xlane.xlu1 %6412 }
0x21ee   : > { %v6432_v38 = vadd.f32 1e-05, %v6424_v20  ;;  %v6425_v9 = vmul.f32 0.0078125, %v6413_v43 }
0x21f0   : > { %8850 = vrsqrt.f32 %v6432_v38  ;;  %v6433_v2 = vadd.f32 1e-05, %v6425_v9 }
0x21f2   : > { %v8847_v11 = vpop.eup %8846  ;;  %8852 = vrsqrt.f32 %v6433_v2 }
0x21f3   : > { %v6415_v40 = vpop.xlane.xlu0 %6414  ;;  %v6446_v36 = vmul.f32 %v8847_v11, %v11802_v45 }
0x21f4   : > { %v8849_v25 = vpop.eup %8848  ;;  %v6426_v35 = vmul.f32 0.0078125, %v6415_v40 }
0x21f5   : > { %v6417_v1 = vpop.xlane.xlu1 %6416  ;;  %v6447_v32 = vmul.f32 %v8849_v25, %v11804_v50  ;;  %v6460_v8 = vmul.f32 %v7220_v63, %v6446_v36 }
0x21f6   : > { %v6434_v16 = vadd.f32 1e-05, %v6426_v35  ;;  %v6427_v14 = vmul.f32 0.0078125, %v6417_v1 }
0x21f7   : > { %v6461_v56 = vmul.f32 %v7220_v63, %v6447_v32  ;;  %v6474_v21 = vadd.f32 %v7221_v15, %v6460_v8 }
0x21f8   : > { %8854 = vrsqrt.f32 %v6434_v16  ;;  %v6435_v28 = vadd.f32 1e-05, %v6427_v14 }
0x21f9   : > { %v6475_v58 = vadd.f32 %v7221_v15, %v6461_v56 }
0x21fa   : > { %v8851_v60 = vpop.eup %8850  ;;  %8856 = vrsqrt.f32 %v6435_v28 }
0x21fb   : > { %v6448_v33 = vmul.f32 %v8851_v60, %v11810_v61  ;;  %v6419_v26 = vpop.xlane.xlu0 %6418  ;;  %v6498_v45 = vpack.c.bf16 %v6475_v58, %v6474_v21 }
0x21fc   : > { %v8853_v0 = vpop.eup %8852  ;;  %v6428_v42 = vmul.f32 0.0078125, %v6419_v26 }
0x21fd   : > { %v6462_v31 = vmul.f32 %v7220_v63, %v6448_v33  ;;  %v6449_v50 = vmul.f32 %v8853_v0, %v11812_v4  ;;  %v6421_v5 = vpop.xlane.xlu1 %6420  ;;  %7954 = vmatprep.mubr.bf16.mxu1 %v6498_v45 }
0x21fe   : > { %v6436_v48 = vadd.f32 1e-05, %v6428_v42  ;;  %v6429_v24 = vmul.f32 0.0078125, %v6421_v5 }
0x21ff   : > { %v6463_v39 = vmul.f32 %v7220_v63, %v6449_v50  ;;  %v6476_v49 = vadd.f32 %v7221_v15, %v6462_v31 }
0x2200   : > { %8858 = vrsqrt.f32 %v6436_v48  ;;  %v6437_v53 = vadd.f32 1e-05, %v6429_v24 }
0x2201   : > { %v6477_v23 = vadd.f32 %v7221_v15, %v6463_v39 }
0x2202   : > { %v8855_v47 = vpop.eup %8854  ;;  %8860 = vrsqrt.f32 %v6437_v53 }
0x2203   : > { %v6499_v55 = vpack.c.bf16 %v6477_v23, %v6476_v49  ;;  %v6450_v61 = vmul.f32 %v8855_v47, %v11818_v37 }
0x2204   : > { %v8857_v30 = vpop.eup %8856 }
0x2205   : > { %7955 = vmatmul.mubr.bf16.vlgmr.msra.gmra.mrb[152].mxu1 %v6499_v55  ;;  %v6451_v18 = vmul.f32 %v8857_v30, %v11820_v59  ;;  %v6464_v7 = vmul.f32 %v7220_v63, %v6450_v61  ;;  %v7222_v59 = vld [vmem:[#allocation19] ss:$0 sm:$0xff] }
0x2207   : > { %v6465_v4 = vmul.f32 %v7220_v63, %v6451_v18  ;;  %v6478_v44 = vadd.f32 %v7221_v15, %v6464_v7 }
0x2209   : > { %v6479_v22 = vadd.f32 %v7221_v15, %v6465_v4 }
0x220a   : > { %v8859_v54 = vpop.eup %8858 }
0x220b   : > { %v6500_v51 = vpack.c.bf16 %v6479_v22, %v6478_v44  ;;  %v6452_v29 = vmul.f32 %v8859_v54, %v11832_v57 }
0x220c   : > { %v8861_v27 = vpop.eup %8860 }
0x220d   : > { %7958 = vmatprep.mubr.bf16.mxu1 %v6500_v51  ;;  %v6453_v62 = vmul.f32 %v8861_v27, %v11834_v17  ;;  %v6466_v6 = vmul.f32 %v7220_v63, %v6452_v29 }
0x220f   : > { %v6467_v37 = vmul.f32 %v7220_v63, %v6453_v62  ;;  %v6480_v3 = vadd.f32 %v7221_v15, %v6466_v6 }
0x2211   : > { %v6481_v12 = vadd.f32 %v7221_v15, %v6467_v37 }
0x2213   : > { %v6501_v19 = vpack.c.bf16 %v6481_v12, %v6480_v3 }
0x2215   : > { %7959 = vmatmul.mubr.bf16.gmra.mrb[156].mxu1 %v6501_v19 }
0x22d8   : > { %v7956_v41 = vpop.f32.mrb[152].mxu1 }
0x22d9   : > { %v6600_v34 = vadd.f32 %v7956_v41, %v7222_v59  ;;  %v6591_v52 = vpop.f32.mrb[153].mxu1 }
0x22da   : > { %v6592_v10 = vadd.f32 %v7222_v59, %v6591_v52  ;;  %v7957_v57 = vpop.f32.mrb[154].mxu1 }
0x22db   : > { %6624 = vst [vmem:[%s668_s19 + $0x10] sm:$0xff] %v6600_v34  ;;  %v6603_v46 = vadd.f32 %v7957_v57, %v7222_v59  ;;  %v6594_v17 = vpop.f32.mrb[155].mxu1 }
0x22dc   : > { %6622 = vst [vmem:[%s668_s19] sm:$0xff] %v6592_v10  ;;  %v6595_v13 = vadd.f32 %v7222_v59, %v6594_v17 }
0x22dd   : > { %6625 = vst [vmem:[%s668_s19 + $0x18] sm:$0xff] %v6603_v46 }
0x22de   : > { %6623 = vst [vmem:[%s668_s19 + $0x8] sm:$0xff] %v6595_v13 }
0x22e8   : > { %v7960_v20 = vpop.f32.mrb[156].mxu1 }
0x22e9   : > { %v6616_v43 = vadd.f32 %v7960_v20, %v7222_v59  ;;  %v6607_v38 = vpop.f32.mrb[157].mxu1 }
0x22ea   : > { %v6608_v9 = vadd.f32 %v7222_v59, %v6607_v38  ;;  %v7961_v2 = vpop.f32.mrb[158].mxu1 }
0x22eb   : > { %6628 = vst [vmem:[%s668_s19 + $0x30] sm:$0xff] %v6616_v43  ;;  %v6619_v11 = vadd.f32 %v7961_v2, %v7222_v59  ;;  %v6610_v63 = vpop.f32.mrb[159].mxu1 }
0x22ec   : > { %6626 = vst [vmem:[%s668_s19 + $0x20] sm:$0xff] %v6608_v9  ;;  %v6611_v40 = vadd.f32 %v7222_v59, %v6610_v63 }
0x22ed   : > { %6629 = vst [vmem:[%s668_s19 + $0x38] sm:$0xff] %v6619_v11 }
0x22ee   : > { %6627 = vst [vmem:[%s668_s19 + $0x28] sm:$0xff] %v6611_v40 }
0x22ef   : > { %9183 = shalt.err (!%p9180_p1)
}
0x22f0   : > { %s9184_s17 = scalar_lea.hbm %s11875_s21, 1024  ;;  %s9188_s18 = scalar_lea.hbm %s12074_s20, 2048 }
0x22f1   : > { %p9185_p2 = scmp.ne.s32.totalorder %s11875_s21, %s9184_s17  ;;  %p9189_p7 = scmp.lt.u32.totalorder %s11875_s21, %s12074_s20 }
0x22f2   : > { %p9190_p8 = scmp.lt.u32.totalorder %s9188_s18, %s9184_s17  ;;  %p9192_p5 = scmp.lt.u32.totalorder %s9184_s17, %s11875_s21 }
0x22f3   : > { %p9186_p3 = pnand %p9185_p2, %p12075_p6 }
0x22f4   : > { %p9191_p11 = por %p9190_p8, %p9189_p7 }
0x22f5   : > { %p9187_p4 = pneg %p9186_p3 }
0x22f6   : > { %p9193_p0 = por %p9192_p5, %p9191_p11 }
0x22f8   : > { %p9194_p9 = pnand %p9193_p0, %p9187_p4 }
0x22fa   : > { %9197 = shalt.err (!%p9194_p9)
}
0x22fb   : > { %s9282_s0 = smov 128   ;;  %s9283_s22 = smov 8  }
0x22fc   : > { %8038 = dma.vmem_to_hbm [thread:$0]  (%p12075_p6), %s11870_s4, 1024, %s11875_s21, %s11879_s25, %s9282_s0, %s9282_s0, %s9283_s22  }
0x22fd PF: > { %s12076_s29 = sld [smem:[#allocation31_spill]]  ;;  %s12077_s23 = sld [smem:[#allocation28_spill]] }
0x22fe   : > { %s12078_s24 = sld [smem:[#allocation35_spill]] }
0x2303   : > { %p8100_p10 = scmp.ge.s32.totalorder %s12076_s29, 2  ;;  %s6659_s16 = sand.u32 1, %s12077_s23  }
0x2304   : > { %p12079_p13 = scmp.ne.s32.totalorder %s12078_s24, 0  ;;  %s6660_s27 = scalar_lea.sflag [#allocation4], %s6659_s16 }
0x2306   : > { %p8075_p12 = pnand %p8100_p10, %p12079_p13 }
0x2308   : > { %9239 = dma.done.wait (!%p8075_p12), %s6660_s27, 1024  }
0x2309   : > { %9241 = vsyncadd (!%p8075_p12), %s6660_s27, 4294966272  ;;  %s12080_s24 = sld [smem:[#allocation32_spill]]  ;;  %s12081_s21 = sld [smem:[#allocation29_spill]] }
0x230a   : > { %s12082_s22 = sld [smem:[#allocation30_spill]]  ;;  %s12083_s23 = sld [smem:[#allocation33_spill]] }
0x230f   : > { %p32_p1 = scmp.ge.s32.totalorder %s12080_s24, 4  }
0x2311   :  { %34 = sbr.rel (!%p32_p1) target bundleno = 16 (0x10), region = 174 }
0x2318   :  { %6665 = vsyncpa [#allocation3], 1 }
0x2319   :  { %6667 = vsyncpa [#allocation3 + $0x1], 1 }
0x231a   :  { %6668 = vsyncpa [#allocation6], 1 }
0x231b   :  { %6669 = vsyncpa [#allocation9], 1 }
0x231c   :  { %6670 = vsyncpa [#allocation12], 1 }
0x231d   :  { %6671 = vsyncpa [#allocation15], 1 }
0x231e   :  { %6672 = vsyncpa [#allocation18], 1 }
0x231f   :  { %6673 = vsyncpa [#allocation4], 1 }
0x2320   :  { %6675 = vsyncpa [#allocation4 + $0x1], 1 }

</bundles_post_ra>
